<compile_context>
chip_gen: v6e
topology: v6e:2x2x1
jax: 0.10.0
libtpu: 0.0.40
codegen_flags: <defaults>
</compile_context>

<pallas_src>
import numpy as np
import jax
import jax.numpy as jnp
from jax.experimental import pallas as pl
from jax.experimental.pallas import tpu as pltpu


# ---------------------------------------------------------------------------
# Model dimensions (synthetic PCRL encoder / decoder)
# ---------------------------------------------------------------------------
IN_CH, C64, C128, C256, C512 = 4, 8, 16, 32, 64
FEAT_DIM, AUG_CH, OUT_CH = 32, 8, 4
S = 16  # spatial size D = H = W

N_ENC = 13   # packed params per encoder
N_DEC = 15   # packed decoder params


# ---------------------------------------------------------------------------
# In-kernel math helpers
# ---------------------------------------------------------------------------
def _dot(a, b):
    """bf16 MXU matmul, f32 accumulation (cast is a no-op for bf16 weights)."""
    return jnp.dot(a.astype(jnp.bfloat16), b.astype(jnp.bfloat16),
                   preferred_element_type=jnp.float32)


def _encode(x, p):
    """Encoder on one sample in packed/folded layout.

    x: (128, 256-wide-input? no) -> x is (128, 128): rows=(d, h//2), lanes=(h%2, w, cin).
    Returns feat (1,32) and skips (out512, skip256, skip128, skip64_folded).
    """
    W1, b1, P1r, M2, b2, P2r, M3, b3, P3r, M4, b4, Wg, bfc = [r[...] for r in p]
    h1 = jnp.maximum(_dot(x, W1) + b1, 0.0)                 # (128,256) skip64 (folded)
    h2 = jnp.maximum(_dot(_dot(P1r, h1), M2) + b2, 0.0)     # (64,128)  skip128
    h3 = jnp.maximum(_dot(_dot(P2r, h2), M3) + b3, 0.0)     # (16,128)  skip256
    h4 = jnp.maximum(_dot(_dot(P3r, h3), M4) + b4, 0.0)     # (4,128)   out512
    feat = _dot(jnp.mean(h4, axis=0, keepdims=True), Wg) + bfc   # (1,32)
    return feat, (h4, h3, h2, h1)


def _decode(skips, aug, dp):
    """Decoder on one sample; upsample + skip-concat folded into split-weight matmuls."""
    o512, s256, s128, s64f = skips
    (W0t, W0b, b0, U1, W1t, W1b, b1, U2, W2t, W2b, b2, U3, W3t, W3b, b3) = dp
    h = jnp.maximum(_dot(o512, W0t) + _dot(aug, W0b) + b0, 0.0)   # (4,64)
    h = _dot(U1, h)                                               # (16,64)
    h = jnp.maximum(_dot(h, W1t) + _dot(s256, W1b) + b1, 0.0)     # (16,64)
    h = _dot(U2, h)                                               # (64,64)
    h = jnp.maximum(_dot(h, W2t) + _dot(s128, W2b) + b2, 0.0)     # (64,64)
    h = _dot(U3, h)                                               # (128,64)
    return jax.nn.sigmoid(_dot(h, W3t) + _dot(s64f, W3b) + b3)    # (128,128) lane-dense


# ---------------------------------------------------------------------------
# The single fused kernel (per-sample grid step)
# ---------------------------------------------------------------------------
def _pcrl_kernel(alpha_ref, x1_ref, x2_ref, a1_ref, a2_ref, ah_ref, *refs):
    enc_q = refs[:N_ENC]
    enc_k = refs[N_ENC:2 * N_ENC]
    dec_refs = refs[2 * N_ENC:2 * N_ENC + N_DEC]
    (featq_ref, featk_ref, featm_ref,
     pre1_ref, pre2_ref, pre3_ref) = refs[2 * N_ENC + N_DEC:]

    dp = tuple(r[...] for r in dec_refs)

    feat_q, sq = _encode(x1_ref[0], enc_q)   # query encoder on x1
    feat_k, sk = _encode(x2_ref[0], enc_k)   # EMA encoder on x2 (ShuffleBN is a no-op here)
    featq_ref[0] = feat_q
    featk_ref[0] = feat_k

    a = alpha_ref[0]                          # runtime mixup scalar (SMEM)
    mixed = tuple(a * q + (1.0 - a) * k for q, k in zip(sq, sk))

    # mixup fc branch: self.encoder(out512_alpha, mixup=True) with the QUERY encoder's fc
    Wg_q, bfc_q = enc_q[11][...], enc_q[12][...]
    featm_ref[0] = _dot(jnp.mean(mixed[0], axis=0, keepdims=True), Wg_q) + bfc_q

    pre1_ref[0] = _decode(sq, a1_ref[0], dp)
    pre2_ref[0] = _decode(sk, a2_ref[0], dp)
    pre3_ref[0] = _decode(mixed, ah_ref[0], dp)


# ---------------------------------------------------------------------------
# pallas_call wrapper
# ---------------------------------------------------------------------------
def _blk(rows, lanes):
    """Per-sample block of a [B, rows, lanes] array."""
    return pl.BlockSpec((1, rows, lanes), lambda b: (b, 0, 0))


def _rep(arr):
    """Full 2-D parameter block, resident across the batch grid."""
    m, n = arr.shape
    return pl.BlockSpec((m, n), lambda b: (0, 0))


_ENC_ORDER = ("W1", "b1", "P1r", "M2", "b2", "P2r", "M3", "b3",
              "P3r", "M4", "b4", "Wg", "bfc")


def pcrl_forward(x1, x2, aug1, aug2, augh, enc_pk, ema_pk, dec_pk, shuffle_key, alpha):
    """Whole PCRLModel3d forward as a single fused Pallas launch."""
    # ShuffleBN permute + un-permute cancel exactly for this per-sample encoder
    # (no BatchNorm / cross-sample statistics), so the gathers are folded out.
    del shuffle_key
    B = x1.shape[0]
    RQ, LQ = S * (S // 2), 2 * S * IN_CH      # 128, 128  input (h-parity folded)
    RA, LA = 4, 2 * AUG_CH                    # 4, 16     aug tensors
    RO, LO = S * (S // 2), 2 * S * OUT_CH     # 128, 128  recon (h-parity folded)

    # Pure reshapes (no transpose): [b,d,h,w,c] -> [b, d*8 + h//2, (h%2)*64 + w*C + c]
    x1f = x1.reshape(B, RQ, LQ)
    x2f = x2.reshape(B, RQ, LQ)
    a1p = aug1.reshape(B, RA, LA)
    a2p = aug2.reshape(B, RA, LA)
    ahp = augh.reshape(B, RA, LA)

    enc_q = [enc_pk[k] for k in _ENC_ORDER]
    enc_k = [ema_pk[k] for k in _ENC_ORDER]
    params = enc_q + enc_k + list(dec_pk)

    in_specs = ([pl.BlockSpec(memory_space=pltpu.MemorySpace.SMEM)]       # alpha
                + [_blk(RQ, LQ), _blk(RQ, LQ),
                   _blk(RA, LA), _blk(RA, LA), _blk(RA, LA)]
                + [_rep(p) for p in params])

    out_shape = (
        jax.ShapeDtypeStruct((B, 1, FEAT_DIM), jnp.float32),   # feat_q
        jax.ShapeDtypeStruct((B, 1, FEAT_DIM), jnp.float32),   # feat_k
        jax.ShapeDtypeStruct((B, 1, FEAT_DIM), jnp.float32),   # feat_mixed
        jax.ShapeDtypeStruct((B, RO, LO), jnp.float32),        # pre1
        jax.ShapeDtypeStruct((B, RO, LO), jnp.float32),        # pre2
        jax.ShapeDtypeStruct((B, RO, LO), jnp.float32),        # pre3
    )
    out_specs = (_blk(1, FEAT_DIM),) * 3 + (_blk(RO, LO),) * 3

    # Advisory cost estimate (2 encoders + 3 decoders of tiny matmuls per sample).
    macs_per_sample = 2 * 9_000_000 + 3 * 7_000_000
    in_bytes = sum(int(np.prod(a.shape)) * a.dtype.itemsize
                   for a in [x1f, x2f, a1p, a2p, ahp] + params)
    out_bytes = B * (3 * FEAT_DIM + 3 * RO * LO) * 4
    cost = pl.CostEstimate(flops=2 * macs_per_sample * B,
                           transcendentals=B * 3 * RO * LO,
                           bytes_accessed=in_bytes + out_bytes)

    feat_q, feat_k, feat_m, pre1, pre2, pre3 = pl.pallas_call(
        _pcrl_kernel,
        out_shape=out_shape,
        grid=(B,),
        in_specs=in_specs,
        out_specs=out_specs,
        compiler_params=pltpu.CompilerParams(dimension_semantics=("parallel",)),
        cost_estimate=cost,
    )(alpha, x1f, x2f, a1p, a2p, ahp, *params)

    to_ndhwc = lambda t: t.reshape(B, S, S, S, OUT_CH)
    return (feat_k.reshape(B, FEAT_DIM), feat_q.reshape(B, FEAT_DIM),
            feat_m.reshape(B, FEAT_DIM),
            to_ndhwc(pre1), to_ndhwc(pre2), to_ndhwc(pre3))


# ---------------------------------------------------------------------------
# Parameter initialisation (same synthetic encoder/decoder as the reference)
# ---------------------------------------------------------------------------
def _init_linear(key, cin, cout, scale=0.05):
    kw, kb = jax.random.split(key)
    w = scale * jax.random.normal(kw, (cin, cout), jnp.float32)
    b = scale * jax.random.normal(kb, (cout,), jnp.float32)
    return w, b


def init_encoder_params(key):
    ks = jax.random.split(key, 5)
    return {
        "c1": _init_linear(ks[0], IN_CH, C64),
        "c2": _init_linear(ks[1], C64, C128),
        "c3": _init_linear(ks[2], C128, C256),
        "c4": _init_linear(ks[3], C256, C512),
        "fc": _init_linear(ks[4], C512, FEAT_DIM),
    }


def init_decoder_params(key):
    ks = jax.random.split(key, 4)
    return {
        "d0": _init_linear(ks[0], C512 + AUG_CH, C256),
        "d1": _init_linear(ks[1], C256 + C256, C128),
        "d2": _init_linear(ks[2], C128 + C128, C64),
        "d3": _init_linear(ks[3], C64 + C64, OUT_CH),
    }


# ---------------------------------------------------------------------------
# Packing: block-diagonal / pooling / upsampling matrices (setup only, bf16)
# ---------------------------------------------------------------------------
def _pool_pair_matrix(n):
    """(n//2, n): 0.5 at (i, 2i) and (i, 2i+1)  -> averages adjacent pairs."""
    m = np.zeros((n // 2, n), np.float32)
    idx = np.arange(n)
    m[idx // 2, idx] = 0.5
    return jnp.asarray(m)


def _up_pair_matrix(n):
    """(2n, n): 1 at (i, i//2)  -> nearest-neighbour upsample by 2."""
    m = np.zeros((2 * n, n), np.float32)
    idx = np.arange(2 * n)
    m[idx, idx // 2] = 1.0
    return jnp.asarray(m)


def pack_encoder_params(raw):
    (W1, b1), (W2, b2) = raw["c1"], raw["c2"]
    (W3, b3), (W4, b4) = raw["c3"], raw["c4"]
    Wfc, bfc = raw["fc"]
    P16, P8, P4 = _pool_pair_matrix(16), _pool_pair_matrix(8), _pool_pair_matrix(4)
    eye = lambda n: jnp.eye(n, dtype=jnp.float32)
    bf = lambda a: a.astype(jnp.bfloat16)

    # Stage-1 lane-side pool (averages h-parity and w pairs), folded into conv2.
    L1 = jnp.kron(jnp.full((2, 1), 0.5, jnp.float32), jnp.kron(P16.T, eye(C64)))  # (256,64)
    M2 = L1 @ jnp.kron(eye(S // 2), W2)                                           # (256,128)
    M3 = jnp.kron(P8.T, eye(C128)) @ jnp.kron(eye(4), W3)                         # (128,128)
    M4 = jnp.kron(P4.T, eye(C256)) @ jnp.kron(eye(2), W4)                         # (128,128)
    Pg = jnp.kron(jnp.full((2, 1), 0.5, jnp.float32), eye(C512))                  # (128,64)
    return {
        "W1": bf(jnp.kron(eye(2 * S), W1)),        # (128,256) conv1 on folded input
        "b1": jnp.tile(b1, 2 * S)[None, :],        # (1,256)  f32
        "P1r": bf(jnp.kron(P16, eye(S // 2))),     # (64,128) row pool over d
        "M2": bf(M2), "b2": jnp.tile(b2, S // 2)[None, :],
        "P2r": bf(jnp.kron(P8, P8)),               # (16,64)
        "M3": bf(M3), "b3": jnp.tile(b3, 4)[None, :],
        "P3r": bf(jnp.kron(P4, P4)),               # (4,16)
        "M4": bf(M4), "b4": jnp.tile(b4, 2)[None, :],
        "Wg": bf(Pg @ Wfc),                        # (128,32) global-pool folded into fc
        "bfc": bfc[None, :],                       # (1,32)   f32
    }


def pack_decoder_params(raw):
    W0, b0 = raw["d0"]
    W1, b1 = raw["d1"]
    W2, b2 = raw["d2"]
    W3, b3 = raw["d3"]
    U2_, U4_, U8_ = _up_pair_matrix(2), _up_pair_matrix(4), _up_pair_matrix(8)
    eye = lambda n: jnp.eye(n, dtype=jnp.float32)
    bf = lambda a: a.astype(jnp.bfloat16)
    W3t = jnp.kron(U8_.T, W3[:C64])                 # (64,64): w-upsample + top conv
    return [
        bf(jnp.kron(eye(2), W0[:C512])),            # W0t (128,64)
        bf(jnp.kron(eye(2), W0[C512:])),            # W0b (16,64)
        jnp.tile(b0, 2)[None, :],                   # b0  (1,64)  f32
        bf(jnp.kron(U2_, U2_)),                     # U1  (16,4)
        bf(jnp.kron(U2_.T, W1[:C256])),             # W1t (64,64)
        bf(jnp.kron(eye(4), W1[C256:])),            # W1b (128,64)
        jnp.tile(b1, 4)[None, :],                   # b1  (1,64)
        bf(jnp.kron(U4_, U4_)),                     # U2  (64,16)
        bf(jnp.kron(U4_.T, W2[:C128])),             # W2t (64,64)
        bf(jnp.kron(eye(8), W2[C128:])),            # W2b (128,64)
        jnp.tile(b2, 8)[None, :],                   # b2  (1,64)
        bf(jnp.kron(U8_, eye(S // 2))),             # U3  (128,64) d-upsample, h//2 identity
        bf(jnp.tile(W3t, (1, 2))),                  # W3t (64,128) duplicated over h-parity lanes
        bf(jnp.kron(eye(2 * S), W3[C64:])),         # W3b (256,128) skip64 bottom conv
        jnp.tile(b3, 2 * S)[None, :],               # b3  (1,128)
    ]


# ---------------------------------------------------------------------------
# Pure-JAX reference (NDHWC, straightforward) for numerical sanity check
# ---------------------------------------------------------------------------
def _ref_conv(x, w, b, act):
    y = jnp.einsum("bdhwc,co->bdhwo", x, w) + b
    if act == "relu":
        return jnp.maximum(y, 0.0)
    if act == "sigmoid":
        return jax.nn.sigmoid(y)
    return y


def _ref_pool(x):
    B, D, H, W, C = x.shape
    return x.reshape(B, D // 2, 2, H // 2, 2, W // 2, 2, C).mean(axis=(2, 4, 6))


def _ref_up(x):
    x = jnp.repeat(x, 2, axis=1)
    x = jnp.repeat(x, 2, axis=2)
    return jnp.repeat(x, 2, axis=3)


def _ref_encoder(x, p, mixup=False):
    if mixup:
        return x.mean(axis=(1, 2, 3)) @ p["fc"][0] + p["fc"][1]
    s64 = _ref_conv(x, *p["c1"], "relu")
    h = _ref_pool(s64)
    s128 = _ref_conv(h, *p["c2"], "relu")
    h = _ref_pool(s128)
    s256 = _ref_conv(h, *p["c3"], "relu")
    h = _ref_pool(s256)
    o512 = _ref_conv(h, *p["c4"], "relu")
    feat = o512.mean(axis=(1, 2, 3)) @ p["fc"][0] + p["fc"][1]
    return feat, [o512, s64, s128, s256]


def _ref_decoder(feats, aug, p):
    o512, s64, s128, s256 = feats
    h = _ref_conv(jnp.concatenate([o512, aug], -1), *p["d0"], "relu")
    h = _ref_up(h)
    h = _ref_conv(jnp.concatenate([h, s256], -1), *p["d1"], "relu")
    h = _ref_up(h)
    h = _ref_conv(jnp.concatenate([h, s128], -1), *p["d2"], "relu")
    h = _ref_up(h)
    return _ref_conv(jnp.concatenate([h, s64], -1), *p["d3"], "sigmoid")


def _ref_forward(x1, x2, aug1, aug2, augh, enc_raw, ema_raw, dec_raw, key, alpha):
    B = x1.shape[0]
    feat_q, feats_q = _ref_encoder(x1, enc_raw)
    ids = jax.random.permutation(key, B)
    rev = jnp.argsort(ids)
    feat_k, feats_k = _ref_encoder(x2[ids], ema_raw)
    feat_k = feat_k[rev]
    feats_k = [t[rev] for t in feats_k]
    o_o, s64_o, s128_o, s256_o = feats_q
    o_e, s64_e, s128_e, s256_e = feats_k
    mix = lambda a, b: alpha * a + (1.0 - alpha) * b
    o_a, s64_a, s128_a, s256_a = mix(o_o, o_e), mix(s64_o, s64_e), mix(s128_o, s128_e), mix(s256_o, s256_e)
    feat_m = _ref_encoder(o_a, enc_raw, mixup=True)
    p1 = _ref_decoder(feats_q, aug1, dec_raw)
    p2 = _ref_decoder(feats_k, aug2, dec_raw)
    p3 = _ref_decoder([o_a, s64_a, s128_a, s256_a], augh, dec_raw)
    return feat_k, feat_q, feat_m, p1, p2, p3


# ---------------------------------------------------------------------------
if __name__ == "__main__":
    B = 2

    key = jax.random.PRNGKey(0)
    k_x1, k_x2, k_a1, k_a2, k_ah, k_enc, k_ema, k_dec, k_shuf = jax.random.split(key, 9)

    x1 = jax.random.normal(k_x1, (B, S, S, S, IN_CH), jnp.float32)
    x2 = jax.random.normal(k_x2, (B, S, S, S, IN_CH), jnp.float32)
    aug1 = jax.random.normal(k_a1, (B, 2, 2, 2, AUG_CH), jnp.float32)
    aug2 = jax.random.normal(k_a2, (B, 2, 2, 2, AUG_CH), jnp.float32)
    augh = jax.random.normal(k_ah, (B, 2, 2, 2, AUG_CH), jnp.float32)

    enc_raw = init_encoder_params(k_enc)
    ema_raw = init_encoder_params(k_ema)
    dec_raw = init_decoder_params(k_dec)
    enc_pk = pack_encoder_params(enc_raw)
    ema_pk = pack_encoder_params(ema_raw)
    dec_pk = pack_decoder_params(dec_raw)

    # alpha ~ Beta(1,1), then max(alpha, 1-alpha); passed as runtime SMEM scalar.
    rng = np.random.default_rng(0)
    alpha = float(rng.beta(1.0, 1.0))
    alpha = max(alpha, 1.0 - alpha)
    alpha_arr = jnp.asarray([alpha], jnp.float32)

    fwd = jax.jit(pcrl_forward)
    outs = fwd(x1, x2, aug1, aug2, augh, enc_pk, ema_pk, dec_pk, k_shuf, alpha_arr)
    outs = jax.block_until_ready(outs)

    feat_k, feat_q, feat_mixed, p1, p2, p3 = outs
    assert feat_k.shape == (B, FEAT_DIM)
    assert feat_q.shape == (B, FEAT_DIM)
    assert feat_mixed.shape == (B, FEAT_DIM)
    assert p1.shape == (B, S, S, S, OUT_CH)
    assert p2.shape == (B, S, S, S, OUT_CH)
    assert p3.shape == (B, S, S, S, OUT_CH)
    assert all(bool(jnp.isfinite(o).all()) for o in outs)

    # Numerical check against the straightforward NDHWC JAX reference
    # (bf16 MXU operands in the kernel -> loose tolerance).
    ref = _ref_forward(x1, x2, aug1, aug2, augh, enc_raw, ema_raw, dec_raw, k_shuf, alpha)
    for got, want in zip(outs, ref):
        err = float(jnp.max(jnp.abs(got - want)))
        assert err < 3e-2, f"mismatch vs reference: max abs err = {err}"

    print("KERNEL_OK")
</pallas_src>

<mosaic_0001>
module attributes {stable_mosaic.version = 11 : i64} {
  func.func @_pcrl_kernel(%arg0: i32, %arg1: memref<1xf32, #tpu.memory_space<smem>>, %arg2: memref<1x128x128xf32, #tpu.memory_space<vmem>>, %arg3: memref<1x128x128xf32, #tpu.memory_space<vmem>>, %arg4: memref<1x4x16xf32, #tpu.memory_space<vmem>>, %arg5: memref<1x4x16xf32, #tpu.memory_space<vmem>>, %arg6: memref<1x4x16xf32, #tpu.memory_space<vmem>>, %arg7: memref<128x256xbf16, #tpu.memory_space<vmem>>, %arg8: memref<1x256xf32, #tpu.memory_space<vmem>>, %arg9: memref<64x128xbf16, #tpu.memory_space<vmem>>, %arg10: memref<256x128xbf16, #tpu.memory_space<vmem>>, %arg11: memref<1x128xf32, #tpu.memory_space<vmem>>, %arg12: memref<16x64xbf16, #tpu.memory_space<vmem>>, %arg13: memref<128x128xbf16, #tpu.memory_space<vmem>>, %arg14: memref<1x128xf32, #tpu.memory_space<vmem>>, %arg15: memref<4x16xbf16, #tpu.memory_space<vmem>>, %arg16: memref<128x128xbf16, #tpu.memory_space<vmem>>, %arg17: memref<1x128xf32, #tpu.memory_space<vmem>>, %arg18: memref<128x32xbf16, #tpu.memory_space<vmem>>, %arg19: memref<1x32xf32, #tpu.memory_space<vmem>>, %arg20: memref<128x256xbf16, #tpu.memory_space<vmem>>, %arg21: memref<1x256xf32, #tpu.memory_space<vmem>>, %arg22: memref<64x128xbf16, #tpu.memory_space<vmem>>, %arg23: memref<256x128xbf16, #tpu.memory_space<vmem>>, %arg24: memref<1x128xf32, #tpu.memory_space<vmem>>, %arg25: memref<16x64xbf16, #tpu.memory_space<vmem>>, %arg26: memref<128x128xbf16, #tpu.memory_space<vmem>>, %arg27: memref<1x128xf32, #tpu.memory_space<vmem>>, %arg28: memref<4x16xbf16, #tpu.memory_space<vmem>>, %arg29: memref<128x128xbf16, #tpu.memory_space<vmem>>, %arg30: memref<1x128xf32, #tpu.memory_space<vmem>>, %arg31: memref<128x32xbf16, #tpu.memory_space<vmem>>, %arg32: memref<1x32xf32, #tpu.memory_space<vmem>>, %arg33: memref<128x64xbf16, #tpu.memory_space<vmem>>, %arg34: memref<16x64xbf16, #tpu.memory_space<vmem>>, %arg35: memref<1x64xf32, #tpu.memory_space<vmem>>, %arg36: memref<16x4xbf16, #tpu.memory_space<vmem>>, %arg37: memref<64x64xbf16, #tpu.memory_space<vmem>>, %arg38: memref<128x64xbf16, #tpu.memory_space<vmem>>, %arg39: memref<1x64xf32, #tpu.memory_space<vmem>>, %arg40: memref<64x16xbf16, #tpu.memory_space<vmem>>, %arg41: memref<64x64xbf16, #tpu.memory_space<vmem>>, %arg42: memref<128x64xbf16, #tpu.memory_space<vmem>>, %arg43: memref<1x64xf32, #tpu.memory_space<vmem>>, %arg44: memref<128x64xbf16, #tpu.memory_space<vmem>>, %arg45: memref<64x128xbf16, #tpu.memory_space<vmem>>, %arg46: memref<256x128xbf16, #tpu.memory_space<vmem>>, %arg47: memref<1x128xf32, #tpu.memory_space<vmem>>, %arg48: memref<1x1x32xf32, #tpu.memory_space<vmem>>, %arg49: memref<1x1x32xf32, #tpu.memory_space<vmem>>, %arg50: memref<1x1x32xf32, #tpu.memory_space<vmem>>, %arg51: memref<1x128x128xf32, #tpu.memory_space<vmem>>, %arg52: memref<1x128x128xf32, #tpu.memory_space<vmem>>, %arg53: memref<1x128x128xf32, #tpu.memory_space<vmem>>) attributes {dimension_semantics = [#tpu.dimension_semantics<parallel>], iteration_bounds = array<i64: 2>, scalar_prefetch = 0 : i64, scratch_operands = 0 : i64, tpu.core_type = #tpu.core_type<tc>, window_params = [{transform_indices = @transform_0, window_bounds = array<i64: 1>}, {transform_indices = @transform_1, window_bounds = array<i64: 1, 128, 128>}, {transform_indices = @transform_2, window_bounds = array<i64: 1, 128, 128>}, {transform_indices = @transform_3, window_bounds = array<i64: 1, 4, 16>}, {transform_indices = @transform_4, window_bounds = array<i64: 1, 4, 16>}, {transform_indices = @transform_5, window_bounds = array<i64: 1, 4, 16>}, {pipeline_mode = #tpu.pipeline_mode<synchronous>, transform_indices = @transform_6, window_bounds = array<i64: 128, 256>}, {pipeline_mode = #tpu.pipeline_mode<synchronous>, transform_indices = @transform_7, window_bounds = array<i64: 1, 256>}, {pipeline_mode = #tpu.pipeline_mode<synchronous>, transform_indices = @transform_8, window_bounds = array<i64: 64, 128>}, {pipeline_mode = #tpu.pipeline_mode<synchronous>, transform_indices = @transform_9, window_bounds = array<i64: 256, 128>}, {pipeline_mode = #tpu.pipeline_mode<synchronous>, transform_indices = @transform_10, window_bounds = array<i64: 1, 128>}, {pipeline_mode = #tpu.pipeline_mode<synchronous>, transform_indices = @transform_11, window_bounds = array<i64: 16, 64>}, {pipeline_mode = #tpu.pipeline_mode<synchronous>, transform_indices = @transform_12, window_bounds = array<i64: 128, 128>}, {pipeline_mode = #tpu.pipeline_mode<synchronous>, transform_indices = @transform_13, window_bounds = array<i64: 1, 128>}, {pipeline_mode = #tpu.pipeline_mode<synchronous>, transform_indices = @transform_14, window_bounds = array<i64: 4, 16>}, {pipeline_mode = #tpu.pipeline_mode<synchronous>, transform_indices = @transform_15, window_bounds = array<i64: 128, 128>}, {pipeline_mode = #tpu.pipeline_mode<synchronous>, transform_indices = @transform_16, window_bounds = array<i64: 1, 128>}, {pipeline_mode = #tpu.pipeline_mode<synchronous>, transform_indices = @transform_17, window_bounds = array<i64: 128, 32>}, {pipeline_mode = #tpu.pipeline_mode<synchronous>, transform_indices = @transform_18, window_bounds = array<i64: 1, 32>}, {pipeline_mode = #tpu.pipeline_mode<synchronous>, transform_indices = @transform_19, window_bounds = array<i64: 128, 256>}, {pipeline_mode = #tpu.pipeline_mode<synchronous>, transform_indices = @transform_20, window_bounds = array<i64: 1, 256>}, {pipeline_mode = #tpu.pipeline_mode<synchronous>, transform_indices = @transform_21, window_bounds = array<i64: 64, 128>}, {pipeline_mode = #tpu.pipeline_mode<synchronous>, transform_indices = @transform_22, window_bounds = array<i64: 256, 128>}, {pipeline_mode = #tpu.pipeline_mode<synchronous>, transform_indices = @transform_23, window_bounds = array<i64: 1, 128>}, {pipeline_mode = #tpu.pipeline_mode<synchronous>, transform_indices = @transform_24, window_bounds = array<i64: 16, 64>}, {pipeline_mode = #tpu.pipeline_mode<synchronous>, transform_indices = @transform_25, window_bounds = array<i64: 128, 128>}, {pipeline_mode = #tpu.pipeline_mode<synchronous>, transform_indices = @transform_26, window_bounds = array<i64: 1, 128>}, {pipeline_mode = #tpu.pipeline_mode<synchronous>, transform_indices = @transform_27, window_bounds = array<i64: 4, 16>}, {pipeline_mode = #tpu.pipeline_mode<synchronous>, transform_indices = @transform_28, window_bounds = array<i64: 128, 128>}, {pipeline_mode = #tpu.pipeline_mode<synchronous>, transform_indices = @transform_29, window_bounds = array<i64: 1, 128>}, {pipeline_mode = #tpu.pipeline_mode<synchronous>, transform_indices = @transform_30, window_bounds = array<i64: 128, 32>}, {pipeline_mode = #tpu.pipeline_mode<synchronous>, transform_indices = @transform_31, window_bounds = array<i64: 1, 32>}, {pipeline_mode = #tpu.pipeline_mode<synchronous>, transform_indices = @transform_32, window_bounds = array<i64: 128, 64>}, {pipeline_mode = #tpu.pipeline_mode<synchronous>, transform_indices = @transform_33, window_bounds = array<i64: 16, 64>}, {pipeline_mode = #tpu.pipeline_mode<synchronous>, transform_indices = @transform_34, window_bounds = array<i64: 1, 64>}, {pipeline_mode = #tpu.pipeline_mode<synchronous>, transform_indices = @transform_35, window_bounds = array<i64: 16, 4>}, {pipeline_mode = #tpu.pipeline_mode<synchronous>, transform_indices = @transform_36, window_bounds = array<i64: 64, 64>}, {pipeline_mode = #tpu.pipeline_mode<synchronous>, transform_indices = @transform_37, window_bounds = array<i64: 128, 64>}, {pipeline_mode = #tpu.pipeline_mode<synchronous>, transform_indices = @transform_38, window_bounds = array<i64: 1, 64>}, {pipeline_mode = #tpu.pipeline_mode<synchronous>, transform_indices = @transform_39, window_bounds = array<i64: 64, 16>}, {pipeline_mode = #tpu.pipeline_mode<synchronous>, transform_indices = @transform_40, window_bounds = array<i64: 64, 64>}, {pipeline_mode = #tpu.pipeline_mode<synchronous>, transform_indices = @transform_41, window_bounds = array<i64: 128, 64>}, {pipeline_mode = #tpu.pipeline_mode<synchronous>, transform_indices = @transform_42, window_bounds = array<i64: 1, 64>}, {pipeline_mode = #tpu.pipeline_mode<synchronous>, transform_indices = @transform_43, window_bounds = array<i64: 128, 64>}, {pipeline_mode = #tpu.pipeline_mode<synchronous>, transform_indices = @transform_44, window_bounds = array<i64: 64, 128>}, {pipeline_mode = #tpu.pipeline_mode<synchronous>, transform_indices = @transform_45, window_bounds = array<i64: 256, 128>}, {pipeline_mode = #tpu.pipeline_mode<synchronous>, transform_indices = @transform_46, window_bounds = array<i64: 1, 128>}, {transform_indices = @transform_47, window_bounds = array<i64: 1, 1, 32>}, {transform_indices = @transform_48, window_bounds = array<i64: 1, 1, 32>}, {transform_indices = @transform_49, window_bounds = array<i64: 1, 1, 32>}, {transform_indices = @transform_50, window_bounds = array<i64: 1, 128, 128>}, {transform_indices = @transform_51, window_bounds = array<i64: 1, 128, 128>}, {transform_indices = @transform_52, window_bounds = array<i64: 1, 128, 128>}]} {
    %c0 = arith.constant 0 : index
    %c0_0 = arith.constant 0 : index
    %0 = vector.load %arg33[%c0, %c0_0] : memref<128x64xbf16, #tpu.memory_space<vmem>>, vector<128x64xbf16>
    %c0_1 = arith.constant 0 : index
    %c0_2 = arith.constant 0 : index
    %1 = vector.load %arg34[%c0_1, %c0_2] : memref<16x64xbf16, #tpu.memory_space<vmem>>, vector<16x64xbf16>
    %c0_3 = arith.constant 0 : index
    %c0_4 = arith.constant 0 : index
    %2 = vector.load %arg35[%c0_3, %c0_4] : memref<1x64xf32, #tpu.memory_space<vmem>>, vector<1x64xf32>
    %c0_5 = arith.constant 0 : index
    %c0_6 = arith.constant 0 : index
    %3 = vector.load %arg36[%c0_5, %c0_6] : memref<16x4xbf16, #tpu.memory_space<vmem>>, vector<16x4xbf16>
    %c0_7 = arith.constant 0 : index
    %c0_8 = arith.constant 0 : index
    %4 = vector.load %arg37[%c0_7, %c0_8] : memref<64x64xbf16, #tpu.memory_space<vmem>>, vector<64x64xbf16>
    %c0_9 = arith.constant 0 : index
    %c0_10 = arith.constant 0 : index
    %5 = vector.load %arg38[%c0_9, %c0_10] : memref<128x64xbf16, #tpu.memory_space<vmem>>, vector<128x64xbf16>
    %c0_11 = arith.constant 0 : index
    %c0_12 = arith.constant 0 : index
    %6 = vector.load %arg39[%c0_11, %c0_12] : memref<1x64xf32, #tpu.memory_space<vmem>>, vector<1x64xf32>
    %c0_13 = arith.constant 0 : index
    %c0_14 = arith.constant 0 : index
    %7 = vector.load %arg40[%c0_13, %c0_14] : memref<64x16xbf16, #tpu.memory_space<vmem>>, vector<64x16xbf16>
    %c0_15 = arith.constant 0 : index
    %c0_16 = arith.constant 0 : index
    %8 = vector.load %arg41[%c0_15, %c0_16] : memref<64x64xbf16, #tpu.memory_space<vmem>>, vector<64x64xbf16>
    %c0_17 = arith.constant 0 : index
    %c0_18 = arith.constant 0 : index
    %9 = vector.load %arg42[%c0_17, %c0_18] : memref<128x64xbf16, #tpu.memory_space<vmem>>, vector<128x64xbf16>
    %c0_19 = arith.constant 0 : index
    %c0_20 = arith.constant 0 : index
    %10 = vector.load %arg43[%c0_19, %c0_20] : memref<1x64xf32, #tpu.memory_space<vmem>>, vector<1x64xf32>
    %c0_21 = arith.constant 0 : index
    %c0_22 = arith.constant 0 : index
    %11 = vector.load %arg44[%c0_21, %c0_22] : memref<128x64xbf16, #tpu.memory_space<vmem>>, vector<128x64xbf16>
    %c0_23 = arith.constant 0 : index
    %c0_24 = arith.constant 0 : index
    %12 = vector.load %arg45[%c0_23, %c0_24] : memref<64x128xbf16, #tpu.memory_space<vmem>>, vector<64x128xbf16>
    %c0_25 = arith.constant 0 : index
    %c0_26 = arith.constant 0 : index
    %13 = vector.load %arg46[%c0_25, %c0_26] : memref<256x128xbf16, #tpu.memory_space<vmem>>, vector<256x128xbf16>
    %c0_27 = arith.constant 0 : index
    %c0_28 = arith.constant 0 : index
    %14 = vector.load %arg47[%c0_27, %c0_28] : memref<1x128xf32, #tpu.memory_space<vmem>>, vector<1x128xf32>
    %c0_29 = arith.constant 0 : index
    %c0_30 = arith.constant 0 : index
    %c0_31 = arith.constant 0 : index
    %15 = vector.load %arg2[%c0_29, %c0_30, %c0_31] : memref<1x128x128xf32, #tpu.memory_space<vmem>>, vector<1x128x128xf32>
    %16 = vector.shape_cast %15 : vector<1x128x128xf32> to vector<128x128xf32>
    %c0_32 = arith.constant 0 : index
    %c0_33 = arith.constant 0 : index
    %17 = vector.load %arg7[%c0_32, %c0_33] : memref<128x256xbf16, #tpu.memory_space<vmem>>, vector<128x256xbf16>
    %c0_34 = arith.constant 0 : index
    %c0_35 = arith.constant 0 : index
    %18 = vector.load %arg8[%c0_34, %c0_35] : memref<1x256xf32, #tpu.memory_space<vmem>>, vector<1x256xf32>
    %c0_36 = arith.constant 0 : index
    %c0_37 = arith.constant 0 : index
    %19 = vector.load %arg9[%c0_36, %c0_37] : memref<64x128xbf16, #tpu.memory_space<vmem>>, vector<64x128xbf16>
    %c0_38 = arith.constant 0 : index
    %c0_39 = arith.constant 0 : index
    %20 = vector.load %arg10[%c0_38, %c0_39] : memref<256x128xbf16, #tpu.memory_space<vmem>>, vector<256x128xbf16>
    %c0_40 = arith.constant 0 : index
    %c0_41 = arith.constant 0 : index
    %21 = vector.load %arg11[%c0_40, %c0_41] : memref<1x128xf32, #tpu.memory_space<vmem>>, vector<1x128xf32>
    %c0_42 = arith.constant 0 : index
    %c0_43 = arith.constant 0 : index
    %22 = vector.load %arg12[%c0_42, %c0_43] : memref<16x64xbf16, #tpu.memory_space<vmem>>, vector<16x64xbf16>
    %c0_44 = arith.constant 0 : index
    %c0_45 = arith.constant 0 : index
    %23 = vector.load %arg13[%c0_44, %c0_45] : memref<128x128xbf16, #tpu.memory_space<vmem>>, vector<128x128xbf16>
    %c0_46 = arith.constant 0 : index
    %c0_47 = arith.constant 0 : index
    %24 = vector.load %arg14[%c0_46, %c0_47] : memref<1x128xf32, #tpu.memory_space<vmem>>, vector<1x128xf32>
    %c0_48 = arith.constant 0 : index
    %c0_49 = arith.constant 0 : index
    %25 = vector.load %arg15[%c0_48, %c0_49] : memref<4x16xbf16, #tpu.memory_space<vmem>>, vector<4x16xbf16>
    %c0_50 = arith.constant 0 : index
    %c0_51 = arith.constant 0 : index
    %26 = vector.load %arg16[%c0_50, %c0_51] : memref<128x128xbf16, #tpu.memory_space<vmem>>, vector<128x128xbf16>
    %c0_52 = arith.constant 0 : index
    %c0_53 = arith.constant 0 : index
    %27 = vector.load %arg17[%c0_52, %c0_53] : memref<1x128xf32, #tpu.memory_space<vmem>>, vector<1x128xf32>
    %c0_54 = arith.constant 0 : index
    %c0_55 = arith.constant 0 : index
    %28 = vector.load %arg18[%c0_54, %c0_55] : memref<128x32xbf16, #tpu.memory_space<vmem>>, vector<128x32xbf16>
    %c0_56 = arith.constant 0 : index
    %c0_57 = arith.constant 0 : index
    %29 = vector.load %arg19[%c0_56, %c0_57] : memref<1x32xf32, #tpu.memory_space<vmem>>, vector<1x32xf32>
    %30 = arith.truncf %16 : vector<128x128xf32> to vector<128x128xbf16>
    %cst = arith.constant dense<0.000000e+00> : vector<128x256xf32>
    %31 = tpu.matmul %30, %17, %cst {dimension_numbers = #tpu.dot_dimension_numbers<[1], [0], [0], [1], [0, 0, 1, 1], [], []>} : vector<128x128xbf16>, vector<128x256xbf16>, vector<128x256xf32> -> vector<128x256xf32>
    %32 = vector.broadcast %18 : vector<1x256xf32> to vector<128x256xf32>
    %33 = arith.addf %31, %32 : vector<128x256xf32>
    %cst_58 = arith.constant 0.000000e+00 : f32
    %34 = vector.broadcast %cst_58 : f32 to vector<128x256xf32>
    %35 = arith.maximumf %33, %34 : vector<128x256xf32>
    %36 = arith.truncf %35 : vector<128x256xf32> to vector<128x256xbf16>
    %cst_59 = arith.constant dense<0.000000e+00> : vector<64x256xf32>
    %37 = tpu.matmul %19, %36, %cst_59 {dimension_numbers = #tpu.dot_dimension_numbers<[1], [0], [0], [1], [0, 0, 1, 1], [], []>} : vector<64x128xbf16>, vector<128x256xbf16>, vector<64x256xf32> -> vector<64x256xf32>
    %38 = arith.truncf %37 : vector<64x256xf32> to vector<64x256xbf16>
    %cst_60 = arith.constant dense<0.000000e+00> : vector<64x128xf32>
    %39 = tpu.matmul %38, %20, %cst_60 {dimension_numbers = #tpu.dot_dimension_numbers<[1], [0], [0], [1], [0, 0, 1, 1], [], []>} : vector<64x256xbf16>, vector<256x128xbf16>, vector<64x128xf32> -> vector<64x128xf32>
    %40 = vector.broadcast %21 : vector<1x128xf32> to vector<64x128xf32>
    %41 = arith.addf %39, %40 : vector<64x128xf32>
    %cst_61 = arith.constant 0.000000e+00 : f32
    %42 = vector.broadcast %cst_61 : f32 to vector<64x128xf32>
    %43 = arith.maximumf %41, %42 : vector<64x128xf32>
    %44 = arith.truncf %43 : vector<64x128xf32> to vector<64x128xbf16>
    %cst_62 = arith.constant dense<0.000000e+00> : vector<16x128xf32>
    %45 = tpu.matmul %22, %44, %cst_62 {dimension_numbers = #tpu.dot_dimension_numbers<[1], [0], [0], [1], [0, 0, 1, 1], [], []>} : vector<16x64xbf16>, vector<64x128xbf16>, vector<16x128xf32> -> vector<16x128xf32>
    %46 = arith.truncf %45 : vector<16x128xf32> to vector<16x128xbf16>
    %cst_63 = arith.constant dense<0.000000e+00> : vector<16x128xf32>
    %47 = tpu.matmul %46, %23, %cst_63 {dimension_numbers = #tpu.dot_dimension_numbers<[1], [0], [0], [1], [0, 0, 1, 1], [], []>} : vector<16x128xbf16>, vector<128x128xbf16>, vector<16x128xf32> -> vector<16x128xf32>
    %48 = vector.broadcast %24 : vector<1x128xf32> to vector<16x128xf32>
    %49 = arith.addf %47, %48 : vector<16x128xf32>
    %cst_64 = arith.constant 0.000000e+00 : f32
    %50 = vector.broadcast %cst_64 : f32 to vector<16x128xf32>
    %51 = arith.maximumf %49, %50 : vector<16x128xf32>
    %52 = arith.truncf %51 : vector<16x128xf32> to vector<16x128xbf16>
    %cst_65 = arith.constant dense<0.000000e+00> : vector<4x128xf32>
    %53 = tpu.matmul %25, %52, %cst_65 {dimension_numbers = #tpu.dot_dimension_numbers<[1], [0], [0], [1], [0, 0, 1, 1], [], []>} : vector<4x16xbf16>, vector<16x128xbf16>, vector<4x128xf32> -> vector<4x128xf32>
    %54 = arith.truncf %53 : vector<4x128xf32> to vector<4x128xbf16>
    %cst_66 = arith.constant dense<0.000000e+00> : vector<4x128xf32>
    %55 = tpu.matmul %54, %26, %cst_66 {dimension_numbers = #tpu.dot_dimension_numbers<[1], [0], [0], [1], [0, 0, 1, 1], [], []>} : vector<4x128xbf16>, vector<128x128xbf16>, vector<4x128xf32> -> vector<4x128xf32>
    %56 = vector.broadcast %27 : vector<1x128xf32> to vector<4x128xf32>
    %57 = arith.addf %55, %56 : vector<4x128xf32>
    %cst_67 = arith.constant 0.000000e+00 : f32
    %58 = vector.broadcast %cst_67 : f32 to vector<4x128xf32>
    %59 = arith.maximumf %57, %58 : vector<4x128xf32>
    %cst_68 = arith.constant dense<0.000000e+00> : vector<128xf32>
    %60 = vector.multi_reduction <add>, %59, %cst_68 [0] : vector<4x128xf32> to vector<128xf32>
    %61 = vector.shape_cast %60 : vector<128xf32> to vector<1x128xf32>
    %cst_69 = arith.constant 4.000000e+00 : f32
    %62 = vector.broadcast %cst_69 : f32 to vector<1x128xf32>
    %63 = arith.divf %61, %62 : vector<1x128xf32>
    %64 = arith.truncf %63 : vector<1x128xf32> to vector<1x128xbf16>
    %cst_70 = arith.constant dense<0.000000e+00> : vector<1x32xf32>
    %65 = tpu.matmul %64, %28, %cst_70 {dimension_numbers = #tpu.dot_dimension_numbers<[1], [0], [0], [1], [0, 0, 1, 1], [], []>} : vector<1x128xbf16>, vector<128x32xbf16>, vector<1x32xf32> -> vector<1x32xf32>
    %66 = arith.addf %65, %29 : vector<1x32xf32>
    %c0_71 = arith.constant 0 : index
    %c0_72 = arith.constant 0 : index
    %c0_73 = arith.constant 0 : index
    %67 = vector.load %arg3[%c0_71, %c0_72, %c0_73] : memref<1x128x128xf32, #tpu.memory_space<vmem>>, vector<1x128x128xf32>
    %68 = vector.shape_cast %67 : vector<1x128x128xf32> to vector<128x128xf32>
    %c0_74 = arith.constant 0 : index
    %c0_75 = arith.constant 0 : index
    %69 = vector.load %arg20[%c0_74, %c0_75] : memref<128x256xbf16, #tpu.memory_space<vmem>>, vector<128x256xbf16>
    %c0_76 = arith.constant 0 : index
    %c0_77 = arith.constant 0 : index
    %70 = vector.load %arg21[%c0_76, %c0_77] : memref<1x256xf32, #tpu.memory_space<vmem>>, vector<1x256xf32>
    %c0_78 = arith.constant 0 : index
    %c0_79 = arith.constant 0 : index
    %71 = vector.load %arg22[%c0_78, %c0_79] : memref<64x128xbf16, #tpu.memory_space<vmem>>, vector<64x128xbf16>
    %c0_80 = arith.constant 0 : index
    %c0_81 = arith.constant 0 : index
    %72 = vector.load %arg23[%c0_80, %c0_81] : memref<256x128xbf16, #tpu.memory_space<vmem>>, vector<256x128xbf16>
    %c0_82 = arith.constant 0 : index
    %c0_83 = arith.constant 0 : index
    %73 = vector.load %arg24[%c0_82, %c0_83] : memref<1x128xf32, #tpu.memory_space<vmem>>, vector<1x128xf32>
    %c0_84 = arith.constant 0 : index
    %c0_85 = arith.constant 0 : index
    %74 = vector.load %arg25[%c0_84, %c0_85] : memref<16x64xbf16, #tpu.memory_space<vmem>>, vector<16x64xbf16>
    %c0_86 = arith.constant 0 : index
    %c0_87 = arith.constant 0 : index
    %75 = vector.load %arg26[%c0_86, %c0_87] : memref<128x128xbf16, #tpu.memory_space<vmem>>, vector<128x128xbf16>
    %c0_88 = arith.constant 0 : index
    %c0_89 = arith.constant 0 : index
    %76 = vector.load %arg27[%c0_88, %c0_89] : memref<1x128xf32, #tpu.memory_space<vmem>>, vector<1x128xf32>
    %c0_90 = arith.constant 0 : index
    %c0_91 = arith.constant 0 : index
    %77 = vector.load %arg28[%c0_90, %c0_91] : memref<4x16xbf16, #tpu.memory_space<vmem>>, vector<4x16xbf16>
    %c0_92 = arith.constant 0 : index
    %c0_93 = arith.constant 0 : index
    %78 = vector.load %arg29[%c0_92, %c0_93] : memref<128x128xbf16, #tpu.memory_space<vmem>>, vector<128x128xbf16>
    %c0_94 = arith.constant 0 : index
    %c0_95 = arith.constant 0 : index
    %79 = vector.load %arg30[%c0_94, %c0_95] : memref<1x128xf32, #tpu.memory_space<vmem>>, vector<1x128xf32>
    %c0_96 = arith.constant 0 : index
    %c0_97 = arith.constant 0 : index
    %80 = vector.load %arg31[%c0_96, %c0_97] : memref<128x32xbf16, #tpu.memory_space<vmem>>, vector<128x32xbf16>
    %c0_98 = arith.constant 0 : index
    %c0_99 = arith.constant 0 : index
    %81 = vector.load %arg32[%c0_98, %c0_99] : memref<1x32xf32, #tpu.memory_space<vmem>>, vector<1x32xf32>
    %82 = arith.truncf %68 : vector<128x128xf32> to vector<128x128xbf16>
    %cst_100 = arith.constant dense<0.000000e+00> : vector<128x256xf32>
    %83 = tpu.matmul %82, %69, %cst_100 {dimension_numbers = #tpu.dot_dimension_numbers<[1], [0], [0], [1], [0, 0, 1, 1], [], []>} : vector<128x128xbf16>, vector<128x256xbf16>, vector<128x256xf32> -> vector<128x256xf32>
    %84 = vector.broadcast %70 : vector<1x256xf32> to vector<128x256xf32>
    %85 = arith.addf %83, %84 : vector<128x256xf32>
    %cst_101 = arith.constant 0.000000e+00 : f32
    %86 = vector.broadcast %cst_101 : f32 to vector<128x256xf32>
    %87 = arith.maximumf %85, %86 : vector<128x256xf32>
    %88 = arith.truncf %87 : vector<128x256xf32> to vector<128x256xbf16>
    %cst_102 = arith.constant dense<0.000000e+00> : vector<64x256xf32>
    %89 = tpu.matmul %71, %88, %cst_102 {dimension_numbers = #tpu.dot_dimension_numbers<[1], [0], [0], [1], [0, 0, 1, 1], [], []>} : vector<64x128xbf16>, vector<128x256xbf16>, vector<64x256xf32> -> vector<64x256xf32>
    %90 = arith.truncf %89 : vector<64x256xf32> to vector<64x256xbf16>
    %cst_103 = arith.constant dense<0.000000e+00> : vector<64x128xf32>
    %91 = tpu.matmul %90, %72, %cst_103 {dimension_numbers = #tpu.dot_dimension_numbers<[1], [0], [0], [1], [0, 0, 1, 1], [], []>} : vector<64x256xbf16>, vector<256x128xbf16>, vector<64x128xf32> -> vector<64x128xf32>
    %92 = vector.broadcast %73 : vector<1x128xf32> to vector<64x128xf32>
    %93 = arith.addf %91, %92 : vector<64x128xf32>
    %cst_104 = arith.constant 0.000000e+00 : f32
    %94 = vector.broadcast %cst_104 : f32 to vector<64x128xf32>
    %95 = arith.maximumf %93, %94 : vector<64x128xf32>
    %96 = arith.truncf %95 : vector<64x128xf32> to vector<64x128xbf16>
    %cst_105 = arith.constant dense<0.000000e+00> : vector<16x128xf32>
    %97 = tpu.matmul %74, %96, %cst_105 {dimension_numbers = #tpu.dot_dimension_numbers<[1], [0], [0], [1], [0, 0, 1, 1], [], []>} : vector<16x64xbf16>, vector<64x128xbf16>, vector<16x128xf32> -> vector<16x128xf32>
    %98 = arith.truncf %97 : vector<16x128xf32> to vector<16x128xbf16>
    %cst_106 = arith.constant dense<0.000000e+00> : vector<16x128xf32>
    %99 = tpu.matmul %98, %75, %cst_106 {dimension_numbers = #tpu.dot_dimension_numbers<[1], [0], [0], [1], [0, 0, 1, 1], [], []>} : vector<16x128xbf16>, vector<128x128xbf16>, vector<16x128xf32> -> vector<16x128xf32>
    %100 = vector.broadcast %76 : vector<1x128xf32> to vector<16x128xf32>
    %101 = arith.addf %99, %100 : vector<16x128xf32>
    %cst_107 = arith.constant 0.000000e+00 : f32
    %102 = vector.broadcast %cst_107 : f32 to vector<16x128xf32>
    %103 = arith.maximumf %101, %102 : vector<16x128xf32>
    %104 = arith.truncf %103 : vector<16x128xf32> to vector<16x128xbf16>
    %cst_108 = arith.constant dense<0.000000e+00> : vector<4x128xf32>
    %105 = tpu.matmul %77, %104, %cst_108 {dimension_numbers = #tpu.dot_dimension_numbers<[1], [0], [0], [1], [0, 0, 1, 1], [], []>} : vector<4x16xbf16>, vector<16x128xbf16>, vector<4x128xf32> -> vector<4x128xf32>
    %106 = arith.truncf %105 : vector<4x128xf32> to vector<4x128xbf16>
    %cst_109 = arith.constant dense<0.000000e+00> : vector<4x128xf32>
    %107 = tpu.matmul %106, %78, %cst_109 {dimension_numbers = #tpu.dot_dimension_numbers<[1], [0], [0], [1], [0, 0, 1, 1], [], []>} : vector<4x128xbf16>, vector<128x128xbf16>, vector<4x128xf32> -> vector<4x128xf32>
    %108 = vector.broadcast %79 : vector<1x128xf32> to vector<4x128xf32>
    %109 = arith.addf %107, %108 : vector<4x128xf32>
    %cst_110 = arith.constant 0.000000e+00 : f32
    %110 = vector.broadcast %cst_110 : f32 to vector<4x128xf32>
    %111 = arith.maximumf %109, %110 : vector<4x128xf32>
    %cst_111 = arith.constant dense<0.000000e+00> : vector<128xf32>
    %112 = vector.multi_reduction <add>, %111, %cst_111 [0] : vector<4x128xf32> to vector<128xf32>
    %113 = vector.shape_cast %112 : vector<128xf32> to vector<1x128xf32>
    %cst_112 = arith.constant 4.000000e+00 : f32
    %114 = vector.broadcast %cst_112 : f32 to vector<1x128xf32>
    %115 = arith.divf %113, %114 : vector<1x128xf32>
    %116 = arith.truncf %115 : vector<1x128xf32> to vector<1x128xbf16>
    %cst_113 = arith.constant dense<0.000000e+00> : vector<1x32xf32>
    %117 = tpu.matmul %116, %80, %cst_113 {dimension_numbers = #tpu.dot_dimension_numbers<[1], [0], [0], [1], [0, 0, 1, 1], [], []>} : vector<1x128xbf16>, vector<128x32xbf16>, vector<1x32xf32> -> vector<1x32xf32>
    %118 = arith.addf %117, %81 : vector<1x32xf32>
    %c0_114 = arith.constant 0 : index
    %c0_115 = arith.constant 0 : index
    %c0_116 = arith.constant 0 : index
    %119 = vector.load %arg48[%c0_114, %c0_115, %c0_116] : memref<1x1x32xf32, #tpu.memory_space<vmem>>, vector<1x1x32xf32>
    %120 = vector.shape_cast %119 : vector<1x1x32xf32> to vector<1x32xf32>
    %121 = vector.shape_cast %66 : vector<1x32xf32> to vector<1x1x32xf32>
    tpu.vector_store %arg48[%c0_114, %c0_115, %c0_116], %121 {strides = array<i32>} : memref<1x1x32xf32, #tpu.memory_space<vmem>>, vector<1x1x32xf32>,
    %c0_117 = arith.constant 0 : index
    %c0_118 = arith.constant 0 : index
    %c0_119 = arith.constant 0 : index
    %122 = vector.load %arg49[%c0_117, %c0_118, %c0_119] : memref<1x1x32xf32, #tpu.memory_space<vmem>>, vector<1x1x32xf32>
    %123 = vector.shape_cast %122 : vector<1x1x32xf32> to vector<1x32xf32>
    %124 = vector.shape_cast %118 : vector<1x32xf32> to vector<1x1x32xf32>
    tpu.vector_store %arg49[%c0_117, %c0_118, %c0_119], %124 {strides = array<i32>} : memref<1x1x32xf32, #tpu.memory_space<vmem>>, vector<1x1x32xf32>,
    %c0_120 = arith.constant 0 : index
    %125 = memref.load %arg1[%c0_120] : memref<1xf32, #tpu.memory_space<smem>>
    %126 = vector.broadcast %125 : f32 to vector<4x128xf32>
    %127 = arith.mulf %126, %59 : vector<4x128xf32>
    %cst_121 = arith.constant 1.000000e+00 : f32
    %128 = arith.subf %cst_121, %125 : f32
    %129 = vector.broadcast %128 : f32 to vector<4x128xf32>
    %130 = arith.mulf %129, %111 : vector<4x128xf32>
    %131 = arith.addf %127, %130 : vector<4x128xf32>
    %132 = vector.broadcast %125 : f32 to vector<16x128xf32>
    %133 = arith.mulf %132, %51 : vector<16x128xf32>
    %cst_122 = arith.constant 1.000000e+00 : f32
    %134 = arith.subf %cst_122, %125 : f32
    %135 = vector.broadcast %134 : f32 to vector<16x128xf32>
    %136 = arith.mulf %135, %103 : vector<16x128xf32>
    %137 = arith.addf %133, %136 : vector<16x128xf32>
    %138 = vector.broadcast %125 : f32 to vector<64x128xf32>
    %139 = arith.mulf %138, %43 : vector<64x128xf32>
    %cst_123 = arith.constant 1.000000e+00 : f32
    %140 = arith.subf %cst_123, %125 : f32
    %141 = vector.broadcast %140 : f32 to vector<64x128xf32>
    %142 = arith.mulf %141, %95 : vector<64x128xf32>
    %143 = arith.addf %139, %142 : vector<64x128xf32>
    %144 = vector.broadcast %125 : f32 to vector<128x256xf32>
    %145 = arith.mulf %144, %35 : vector<128x256xf32>
    %cst_124 = arith.constant 1.000000e+00 : f32
    %146 = arith.subf %cst_124, %125 : f32
    %147 = vector.broadcast %146 : f32 to vector<128x256xf32>
    %148 = arith.mulf %147, %87 : vector<128x256xf32>
    %149 = arith.addf %145, %148 : vector<128x256xf32>
    %c0_125 = arith.constant 0 : index
    %c0_126 = arith.constant 0 : index
    %150 = vector.load %arg18[%c0_125, %c0_126] : memref<128x32xbf16, #tpu.memory_space<vmem>>, vector<128x32xbf16>
    %c0_127 = arith.constant 0 : index
    %c0_128 = arith.constant 0 : index
    %151 = vector.load %arg19[%c0_127, %c0_128] : memref<1x32xf32, #tpu.memory_space<vmem>>, vector<1x32xf32>
    %cst_129 = arith.constant dense<0.000000e+00> : vector<128xf32>
    %152 = vector.multi_reduction <add>, %131, %cst_129 [0] : vector<4x128xf32> to vector<128xf32>
    %153 = vector.shape_cast %152 : vector<128xf32> to vector<1x128xf32>
    %cst_130 = arith.constant 4.000000e+00 : f32
    %154 = vector.broadcast %cst_130 : f32 to vector<1x128xf32>
    %155 = arith.divf %153, %154 : vector<1x128xf32>
    %156 = arith.truncf %155 : vector<1x128xf32> to vector<1x128xbf16>
    %cst_131 = arith.constant dense<0.000000e+00> : vector<1x32xf32>
    %157 = tpu.matmul %156, %150, %cst_131 {dimension_numbers = #tpu.dot_dimension_numbers<[1], [0], [0], [1], [0, 0, 1, 1], [], []>} : vector<1x128xbf16>, vector<128x32xbf16>, vector<1x32xf32> -> vector<1x32xf32>
    %158 = arith.addf %157, %151 : vector<1x32xf32>
    %c0_132 = arith.constant 0 : index
    %c0_133 = arith.constant 0 : index
    %c0_134 = arith.constant 0 : index
    %159 = vector.load %arg50[%c0_132, %c0_133, %c0_134] : memref<1x1x32xf32, #tpu.memory_space<vmem>>, vector<1x1x32xf32>
    %160 = vector.shape_cast %159 : vector<1x1x32xf32> to vector<1x32xf32>
    %161 = vector.shape_cast %158 : vector<1x32xf32> to vector<1x1x32xf32>
    tpu.vector_store %arg50[%c0_132, %c0_133, %c0_134], %161 {strides = array<i32>} : memref<1x1x32xf32, #tpu.memory_space<vmem>>, vector<1x1x32xf32>,
    %c0_135 = arith.constant 0 : index
    %c0_136 = arith.constant 0 : index
    %c0_137 = arith.constant 0 : index
    %162 = vector.load %arg4[%c0_135, %c0_136, %c0_137] : memref<1x4x16xf32, #tpu.memory_space<vmem>>, vector<1x4x16xf32>
    %163 = vector.shape_cast %162 : vector<1x4x16xf32> to vector<4x16xf32>
    %164 = arith.truncf %59 : vector<4x128xf32> to vector<4x128xbf16>
    %cst_138 = arith.constant dense<0.000000e+00> : vector<4x64xf32>
    %165 = tpu.matmul %164, %0, %cst_138 {dimension_numbers = #tpu.dot_dimension_numbers<[1], [0], [0], [1], [0, 0, 1, 1], [], []>} : vector<4x128xbf16>, vector<128x64xbf16>, vector<4x64xf32> -> vector<4x64xf32>
    %166 = arith.truncf %163 : vector<4x16xf32> to vector<4x16xbf16>
    %cst_139 = arith.constant dense<0.000000e+00> : vector<4x64xf32>
    %167 = tpu.matmul %166, %1, %cst_139 {dimension_numbers = #tpu.dot_dimension_numbers<[1], [0], [0], [1], [0, 0, 1, 1], [], []>} : vector<4x16xbf16>, vector<16x64xbf16>, vector<4x64xf32> -> vector<4x64xf32>
    %168 = arith.addf %165, %167 : vector<4x64xf32>
    %169 = vector.broadcast %2 : vector<1x64xf32> to vector<4x64xf32>
    %170 = arith.addf %168, %169 : vector<4x64xf32>
    %cst_140 = arith.constant 0.000000e+00 : f32
    %171 = vector.broadcast %cst_140 : f32 to vector<4x64xf32>
    %172 = arith.maximumf %170, %171 : vector<4x64xf32>
    %173 = arith.truncf %172 : vector<4x64xf32> to vector<4x64xbf16>
    %cst_141 = arith.constant dense<0.000000e+00> : vector<16x64xf32>
    %174 = tpu.matmul %3, %173, %cst_141 {dimension_numbers = #tpu.dot_dimension_numbers<[1], [0], [0], [1], [0, 0, 1, 1], [], []>} : vector<16x4xbf16>, vector<4x64xbf16>, vector<16x64xf32> -> vector<16x64xf32>
    %175 = arith.truncf %174 : vector<16x64xf32> to vector<16x64xbf16>
    %cst_142 = arith.constant dense<0.000000e+00> : vector<16x64xf32>
    %176 = tpu.matmul %175, %4, %cst_142 {dimension_numbers = #tpu.dot_dimension_numbers<[1], [0], [0], [1], [0, 0, 1, 1], [], []>} : vector<16x64xbf16>, vector<64x64xbf16>, vector<16x64xf32> -> vector<16x64xf32>
    %177 = arith.truncf %51 : vector<16x128xf32> to vector<16x128xbf16>
    %cst_143 = arith.constant dense<0.000000e+00> : vector<16x64xf32>
    %178 = tpu.matmul %177, %5, %cst_143 {dimension_numbers = #tpu.dot_dimension_numbers<[1], [0], [0], [1], [0, 0, 1, 1], [], []>} : vector<16x128xbf16>, vector<128x64xbf16>, vector<16x64xf32> -> vector<16x64xf32>
    %179 = arith.addf %176, %178 : vector<16x64xf32>
    %180 = vector.broadcast %6 : vector<1x64xf32> to vector<16x64xf32>
    %181 = arith.addf %179, %180 : vector<16x64xf32>
    %cst_144 = arith.constant 0.000000e+00 : f32
    %182 = vector.broadcast %cst_144 : f32 to vector<16x64xf32>
    %183 = arith.maximumf %181, %182 : vector<16x64xf32>
    %184 = arith.truncf %183 : vector<16x64xf32> to vector<16x64xbf16>
    %cst_145 = arith.constant dense<0.000000e+00> : vector<64x64xf32>
    %185 = tpu.matmul %7, %184, %cst_145 {dimension_numbers = #tpu.dot_dimension_numbers<[1], [0], [0], [1], [0, 0, 1, 1], [], []>} : vector<64x16xbf16>, vector<16x64xbf16>, vector<64x64xf32> -> vector<64x64xf32>
    %186 = arith.truncf %185 : vector<64x64xf32> to vector<64x64xbf16>
    %cst_146 = arith.constant dense<0.000000e+00> : vector<64x64xf32>
    %187 = tpu.matmul %186, %8, %cst_146 {dimension_numbers = #tpu.dot_dimension_numbers<[1], [0], [0], [1], [0, 0, 1, 1], [], []>} : vector<64x64xbf16>, vector<64x64xbf16>, vector<64x64xf32> -> vector<64x64xf32>
    %188 = arith.truncf %43 : vector<64x128xf32> to vector<64x128xbf16>
    %cst_147 = arith.constant dense<0.000000e+00> : vector<64x64xf32>
    %189 = tpu.matmul %188, %9, %cst_147 {dimension_numbers = #tpu.dot_dimension_numbers<[1], [0], [0], [1], [0, 0, 1, 1], [], []>} : vector<64x128xbf16>, vector<128x64xbf16>, vector<64x64xf32> -> vector<64x64xf32>
    %190 = arith.addf %187, %189 : vector<64x64xf32>
    %191 = vector.broadcast %10 : vector<1x64xf32> to vector<64x64xf32>
    %192 = arith.addf %190, %191 : vector<64x64xf32>
    %cst_148 = arith.constant 0.000000e+00 : f32
    %193 = vector.broadcast %cst_148 : f32 to vector<64x64xf32>
    %194 = arith.maximumf %192, %193 : vector<64x64xf32>
    %195 = arith.truncf %194 : vector<64x64xf32> to vector<64x64xbf16>
    %cst_149 = arith.constant dense<0.000000e+00> : vector<128x64xf32>
    %196 = tpu.matmul %11, %195, %cst_149 {dimension_numbers = #tpu.dot_dimension_numbers<[1], [0], [0], [1], [0, 0, 1, 1], [], []>} : vector<128x64xbf16>, vector<64x64xbf16>, vector<128x64xf32> -> vector<128x64xf32>
    %197 = arith.truncf %196 : vector<128x64xf32> to vector<128x64xbf16>
    %cst_150 = arith.constant dense<0.000000e+00> : vector<128x128xf32>
    %198 = tpu.matmul %197, %12, %cst_150 {dimension_numbers = #tpu.dot_dimension_numbers<[1], [0], [0], [1], [0, 0, 1, 1], [], []>} : vector<128x64xbf16>, vector<64x128xbf16>, vector<128x128xf32> -> vector<128x128xf32>
    %199 = arith.truncf %35 : vector<128x256xf32> to vector<128x256xbf16>
    %cst_151 = arith.constant dense<0.000000e+00> : vector<128x128xf32>
    %200 = tpu.matmul %199, %13, %cst_151 {dimension_numbers = #tpu.dot_dimension_numbers<[1], [0], [0], [1], [0, 0, 1, 1], [], []>} : vector<128x256xbf16>, vector<256x128xbf16>, vector<128x128xf32> -> vector<128x128xf32>
    %201 = arith.addf %198, %200 : vector<128x128xf32>
    %202 = vector.broadcast %14 : vector<1x128xf32> to vector<128x128xf32>
    %203 = arith.addf %201, %202 : vector<128x128xf32>
    %204 = arith.negf %203 : vector<128x128xf32>
    %205 = math.exp %204 : vector<128x128xf32>
    %cst_152 = arith.constant 1.000000e+00 : f32
    %206 = vector.broadcast %cst_152 : f32 to vector<128x128xf32>
    %207 = arith.addf %206, %205 : vector<128x128xf32>
    %208 = arith.divf %206, %207 : vector<128x128xf32>
    %c0_153 = arith.constant 0 : index
    %c0_154 = arith.constant 0 : index
    %c0_155 = arith.constant 0 : index
    %209 = vector.load %arg51[%c0_153, %c0_154, %c0_155] : memref<1x128x128xf32, #tpu.memory_space<vmem>>, vector<1x128x128xf32>
    %210 = vector.shape_cast %209 : vector<1x128x128xf32> to vector<128x128xf32>
    %211 = vector.shape_cast %208 : vector<128x128xf32> to vector<1x128x128xf32>
    tpu.vector_store %arg51[%c0_153, %c0_154, %c0_155], %211 {strides = array<i32>} : memref<1x128x128xf32, #tpu.memory_space<vmem>>, vector<1x128x128xf32>,
    %c0_156 = arith.constant 0 : index
    %c0_157 = arith.constant 0 : index
    %c0_158 = arith.constant 0 : index
    %212 = vector.load %arg5[%c0_156, %c0_157, %c0_158] : memref<1x4x16xf32, #tpu.memory_space<vmem>>, vector<1x4x16xf32>
    %213 = vector.shape_cast %212 : vector<1x4x16xf32> to vector<4x16xf32>
    %214 = arith.truncf %111 : vector<4x128xf32> to vector<4x128xbf16>
    %cst_159 = arith.constant dense<0.000000e+00> : vector<4x64xf32>
    %215 = tpu.matmul %214, %0, %cst_159 {dimension_numbers = #tpu.dot_dimension_numbers<[1], [0], [0], [1], [0, 0, 1, 1], [], []>} : vector<4x128xbf16>, vector<128x64xbf16>, vector<4x64xf32> -> vector<4x64xf32>
    %216 = arith.truncf %213 : vector<4x16xf32> to vector<4x16xbf16>
    %cst_160 = arith.constant dense<0.000000e+00> : vector<4x64xf32>
    %217 = tpu.matmul %216, %1, %cst_160 {dimension_numbers = #tpu.dot_dimension_numbers<[1], [0], [0], [1], [0, 0, 1, 1], [], []>} : vector<4x16xbf16>, vector<16x64xbf16>, vector<4x64xf32> -> vector<4x64xf32>
    %218 = arith.addf %215, %217 : vector<4x64xf32>
    %219 = vector.broadcast %2 : vector<1x64xf32> to vector<4x64xf32>
    %220 = arith.addf %218, %219 : vector<4x64xf32>
    %cst_161 = arith.constant 0.000000e+00 : f32
    %221 = vector.broadcast %cst_161 : f32 to vector<4x64xf32>
    %222 = arith.maximumf %220, %221 : vector<4x64xf32>
    %223 = arith.truncf %222 : vector<4x64xf32> to vector<4x64xbf16>
    %cst_162 = arith.constant dense<0.000000e+00> : vector<16x64xf32>
    %224 = tpu.matmul %3, %223, %cst_162 {dimension_numbers = #tpu.dot_dimension_numbers<[1], [0], [0], [1], [0, 0, 1, 1], [], []>} : vector<16x4xbf16>, vector<4x64xbf16>, vector<16x64xf32> -> vector<16x64xf32>
    %225 = arith.truncf %224 : vector<16x64xf32> to vector<16x64xbf16>
    %cst_163 = arith.constant dense<0.000000e+00> : vector<16x64xf32>
    %226 = tpu.matmul %225, %4, %cst_163 {dimension_numbers = #tpu.dot_dimension_numbers<[1], [0], [0], [1], [0, 0, 1, 1], [], []>} : vector<16x64xbf16>, vector<64x64xbf16>, vector<16x64xf32> -> vector<16x64xf32>
    %227 = arith.truncf %103 : vector<16x128xf32> to vector<16x128xbf16>
    %cst_164 = arith.constant dense<0.000000e+00> : vector<16x64xf32>
    %228 = tpu.matmul %227, %5, %cst_164 {dimension_numbers = #tpu.dot_dimension_numbers<[1], [0], [0], [1], [0, 0, 1, 1], [], []>} : vector<16x128xbf16>, vector<128x64xbf16>, vector<16x64xf32> -> vector<16x64xf32>
    %229 = arith.addf %226, %228 : vector<16x64xf32>
    %230 = vector.broadcast %6 : vector<1x64xf32> to vector<16x64xf32>
    %231 = arith.addf %229, %230 : vector<16x64xf32>
    %cst_165 = arith.constant 0.000000e+00 : f32
    %232 = vector.broadcast %cst_165 : f32 to vector<16x64xf32>
    %233 = arith.maximumf %231, %232 : vector<16x64xf32>
    %234 = arith.truncf %233 : vector<16x64xf32> to vector<16x64xbf16>
    %cst_166 = arith.constant dense<0.000000e+00> : vector<64x64xf32>
    %235 = tpu.matmul %7, %234, %cst_166 {dimension_numbers = #tpu.dot_dimension_numbers<[1], [0], [0], [1], [0, 0, 1, 1], [], []>} : vector<64x16xbf16>, vector<16x64xbf16>, vector<64x64xf32> -> vector<64x64xf32>
    %236 = arith.truncf %235 : vector<64x64xf32> to vector<64x64xbf16>
    %cst_167 = arith.constant dense<0.000000e+00> : vector<64x64xf32>
    %237 = tpu.matmul %236, %8, %cst_167 {dimension_numbers = #tpu.dot_dimension_numbers<[1], [0], [0], [1], [0, 0, 1, 1], [], []>} : vector<64x64xbf16>, vector<64x64xbf16>, vector<64x64xf32> -> vector<64x64xf32>
    %238 = arith.truncf %95 : vector<64x128xf32> to vector<64x128xbf16>
    %cst_168 = arith.constant dense<0.000000e+00> : vector<64x64xf32>
    %239 = tpu.matmul %238, %9, %cst_168 {dimension_numbers = #tpu.dot_dimension_numbers<[1], [0], [0], [1], [0, 0, 1, 1], [], []>} : vector<64x128xbf16>, vector<128x64xbf16>, vector<64x64xf32> -> vector<64x64xf32>
    %240 = arith.addf %237, %239 : vector<64x64xf32>
    %241 = vector.broadcast %10 : vector<1x64xf32> to vector<64x64xf32>
    %242 = arith.addf %240, %241 : vector<64x64xf32>
    %cst_169 = arith.constant 0.000000e+00 : f32
    %243 = vector.broadcast %cst_169 : f32 to vector<64x64xf32>
    %244 = arith.maximumf %242, %243 : vector<64x64xf32>
    %245 = arith.truncf %244 : vector<64x64xf32> to vector<64x64xbf16>
    %cst_170 = arith.constant dense<0.000000e+00> : vector<128x64xf32>
    %246 = tpu.matmul %11, %245, %cst_170 {dimension_numbers = #tpu.dot_dimension_numbers<[1], [0], [0], [1], [0, 0, 1, 1], [], []>} : vector<128x64xbf16>, vector<64x64xbf16>, vector<128x64xf32> -> vector<128x64xf32>
    %247 = arith.truncf %246 : vector<128x64xf32> to vector<128x64xbf16>
    %cst_171 = arith.constant dense<0.000000e+00> : vector<128x128xf32>
    %248 = tpu.matmul %247, %12, %cst_171 {dimension_numbers = #tpu.dot_dimension_numbers<[1], [0], [0], [1], [0, 0, 1, 1], [], []>} : vector<128x64xbf16>, vector<64x128xbf16>, vector<128x128xf32> -> vector<128x128xf32>
    %249 = arith.truncf %87 : vector<128x256xf32> to vector<128x256xbf16>
    %cst_172 = arith.constant dense<0.000000e+00> : vector<128x128xf32>
    %250 = tpu.matmul %249, %13, %cst_172 {dimension_numbers = #tpu.dot_dimension_numbers<[1], [0], [0], [1], [0, 0, 1, 1], [], []>} : vector<128x256xbf16>, vector<256x128xbf16>, vector<128x128xf32> -> vector<128x128xf32>
    %251 = arith.addf %248, %250 : vector<128x128xf32>
    %252 = vector.broadcast %14 : vector<1x128xf32> to vector<128x128xf32>
    %253 = arith.addf %251, %252 : vector<128x128xf32>
    %254 = arith.negf %253 : vector<128x128xf32>
    %255 = math.exp %254 : vector<128x128xf32>
    %cst_173 = arith.constant 1.000000e+00 : f32
    %256 = vector.broadcast %cst_173 : f32 to vector<128x128xf32>
    %257 = arith.addf %256, %255 : vector<128x128xf32>
    %258 = arith.divf %256, %257 : vector<128x128xf32>
    %c0_174 = arith.constant 0 : index
    %c0_175 = arith.constant 0 : index
    %c0_176 = arith.constant 0 : index
    %259 = vector.load %arg52[%c0_174, %c0_175, %c0_176] : memref<1x128x128xf32, #tpu.memory_space<vmem>>, vector<1x128x128xf32>
    %260 = vector.shape_cast %259 : vector<1x128x128xf32> to vector<128x128xf32>
    %261 = vector.shape_cast %258 : vector<128x128xf32> to vector<1x128x128xf32>
    tpu.vector_store %arg52[%c0_174, %c0_175, %c0_176], %261 {strides = array<i32>} : memref<1x128x128xf32, #tpu.memory_space<vmem>>, vector<1x128x128xf32>,
    %c0_177 = arith.constant 0 : index
    %c0_178 = arith.constant 0 : index
    %c0_179 = arith.constant 0 : index
    %262 = vector.load %arg6[%c0_177, %c0_178, %c0_179] : memref<1x4x16xf32, #tpu.memory_space<vmem>>, vector<1x4x16xf32>
    %263 = vector.shape_cast %262 : vector<1x4x16xf32> to vector<4x16xf32>
    %264 = arith.truncf %131 : vector<4x128xf32> to vector<4x128xbf16>
    %cst_180 = arith.constant dense<0.000000e+00> : vector<4x64xf32>
    %265 = tpu.matmul %264, %0, %cst_180 {dimension_numbers = #tpu.dot_dimension_numbers<[1], [0], [0], [1], [0, 0, 1, 1], [], []>} : vector<4x128xbf16>, vector<128x64xbf16>, vector<4x64xf32> -> vector<4x64xf32>
    %266 = arith.truncf %263 : vector<4x16xf32> to vector<4x16xbf16>
    %cst_181 = arith.constant dense<0.000000e+00> : vector<4x64xf32>
    %267 = tpu.matmul %266, %1, %cst_181 {dimension_numbers = #tpu.dot_dimension_numbers<[1], [0], [0], [1], [0, 0, 1, 1], [], []>} : vector<4x16xbf16>, vector<16x64xbf16>, vector<4x64xf32> -> vector<4x64xf32>
    %268 = arith.addf %265, %267 : vector<4x64xf32>
    %269 = vector.broadcast %2 : vector<1x64xf32> to vector<4x64xf32>
    %270 = arith.addf %268, %269 : vector<4x64xf32>
    %cst_182 = arith.constant 0.000000e+00 : f32
    %271 = vector.broadcast %cst_182 : f32 to vector<4x64xf32>
    %272 = arith.maximumf %270, %271 : vector<4x64xf32>
    %273 = arith.truncf %272 : vector<4x64xf32> to vector<4x64xbf16>
    %cst_183 = arith.constant dense<0.000000e+00> : vector<16x64xf32>
    %274 = tpu.matmul %3, %273, %cst_183 {dimension_numbers = #tpu.dot_dimension_numbers<[1], [0], [0], [1], [0, 0, 1, 1], [], []>} : vector<16x4xbf16>, vector<4x64xbf16>, vector<16x64xf32> -> vector<16x64xf32>
    %275 = arith.truncf %274 : vector<16x64xf32> to vector<16x64xbf16>
    %cst_184 = arith.constant dense<0.000000e+00> : vector<16x64xf32>
    %276 = tpu.matmul %275, %4, %cst_184 {dimension_numbers = #tpu.dot_dimension_numbers<[1], [0], [0], [1], [0, 0, 1, 1], [], []>} : vector<16x64xbf16>, vector<64x64xbf16>, vector<16x64xf32> -> vector<16x64xf32>
    %277 = arith.truncf %137 : vector<16x128xf32> to vector<16x128xbf16>
    %cst_185 = arith.constant dense<0.000000e+00> : vector<16x64xf32>
    %278 = tpu.matmul %277, %5, %cst_185 {dimension_numbers = #tpu.dot_dimension_numbers<[1], [0], [0], [1], [0, 0, 1, 1], [], []>} : vector<16x128xbf16>, vector<128x64xbf16>, vector<16x64xf32> -> vector<16x64xf32>
    %279 = arith.addf %276, %278 : vector<16x64xf32>
    %280 = vector.broadcast %6 : vector<1x64xf32> to vector<16x64xf32>
    %281 = arith.addf %279, %280 : vector<16x64xf32>
    %cst_186 = arith.constant 0.000000e+00 : f32
    %282 = vector.broadcast %cst_186 : f32 to vector<16x64xf32>
    %283 = arith.maximumf %281, %282 : vector<16x64xf32>
    %284 = arith.truncf %283 : vector<16x64xf32> to vector<16x64xbf16>
    %cst_187 = arith.constant dense<0.000000e+00> : vector<64x64xf32>
    %285 = tpu.matmul %7, %284, %cst_187 {dimension_numbers = #tpu.dot_dimension_numbers<[1], [0], [0], [1], [0, 0, 1, 1], [], []>} : vector<64x16xbf16>, vector<16x64xbf16>, vector<64x64xf32> -> vector<64x64xf32>
    %286 = arith.truncf %285 : vector<64x64xf32> to vector<64x64xbf16>
    %cst_188 = arith.constant dense<0.000000e+00> : vector<64x64xf32>
    %287 = tpu.matmul %286, %8, %cst_188 {dimension_numbers = #tpu.dot_dimension_numbers<[1], [0], [0], [1], [0, 0, 1, 1], [], []>} : vector<64x64xbf16>, vector<64x64xbf16>, vector<64x64xf32> -> vector<64x64xf32>
    %288 = arith.truncf %143 : vector<64x128xf32> to vector<64x128xbf16>
    %cst_189 = arith.constant dense<0.000000e+00> : vector<64x64xf32>
    %289 = tpu.matmul %288, %9, %cst_189 {dimension_numbers = #tpu.dot_dimension_numbers<[1], [0], [0], [1], [0, 0, 1, 1], [], []>} : vector<64x128xbf16>, vector<128x64xbf16>, vector<64x64xf32> -> vector<64x64xf32>
    %290 = arith.addf %287, %289 : vector<64x64xf32>
    %291 = vector.broadcast %10 : vector<1x64xf32> to vector<64x64xf32>
    %292 = arith.addf %290, %291 : vector<64x64xf32>
    %cst_190 = arith.constant 0.000000e+00 : f32
    %293 = vector.broadcast %cst_190 : f32 to vector<64x64xf32>
    %294 = arith.maximumf %292, %293 : vector<64x64xf32>
    %295 = arith.truncf %294 : vector<64x64xf32> to vector<64x64xbf16>
    %cst_191 = arith.constant dense<0.000000e+00> : vector<128x64xf32>
    %296 = tpu.matmul %11, %295, %cst_191 {dimension_numbers = #tpu.dot_dimension_numbers<[1], [0], [0], [1], [0, 0, 1, 1], [], []>} : vector<128x64xbf16>, vector<64x64xbf16>, vector<128x64xf32> -> vector<128x64xf32>
    %297 = arith.truncf %296 : vector<128x64xf32> to vector<128x64xbf16>
    %cst_192 = arith.constant dense<0.000000e+00> : vector<128x128xf32>
    %298 = tpu.matmul %297, %12, %cst_192 {dimension_numbers = #tpu.dot_dimension_numbers<[1], [0], [0], [1], [0, 0, 1, 1], [], []>} : vector<128x64xbf16>, vector<64x128xbf16>, vector<128x128xf32> -> vector<128x128xf32>
    %299 = arith.truncf %149 : vector<128x256xf32> to vector<128x256xbf16>
    %cst_193 = arith.constant dense<0.000000e+00> : vector<128x128xf32>
    %300 = tpu.matmul %299, %13, %cst_193 {dimension_numbers = #tpu.dot_dimension_numbers<[1], [0], [0], [1], [0, 0, 1, 1], [], []>} : vector<128x256xbf16>, vector<256x128xbf16>, vector<128x128xf32> -> vector<128x128xf32>
    %301 = arith.addf %298, %300 : vector<128x128xf32>
    %302 = vector.broadcast %14 : vector<1x128xf32> to vector<128x128xf32>
    %303 = arith.addf %301, %302 : vector<128x128xf32>
    %304 = arith.negf %303 : vector<128x128xf32>
    %305 = math.exp %304 : vector<128x128xf32>
    %cst_194 = arith.constant 1.000000e+00 : f32
    %306 = vector.broadcast %cst_194 : f32 to vector<128x128xf32>
    %307 = arith.addf %306, %305 : vector<128x128xf32>
    %308 = arith.divf %306, %307 : vector<128x128xf32>
    %c0_195 = arith.constant 0 : index
    %c0_196 = arith.constant 0 : index
    %c0_197 = arith.constant 0 : index
    %309 = vector.load %arg53[%c0_195, %c0_196, %c0_197] : memref<1x128x128xf32, #tpu.memory_space<vmem>>, vector<1x128x128xf32>
    %310 = vector.shape_cast %309 : vector<1x128x128xf32> to vector<128x128xf32>
    %311 = vector.shape_cast %308 : vector<128x128xf32> to vector<1x128x128xf32>
    tpu.vector_store %arg53[%c0_195, %c0_196, %c0_197], %311 {strides = array<i32>} : memref<1x128x128xf32, #tpu.memory_space<vmem>>, vector<1x128x128xf32>,
    return
  }
  func.func @transform_0(%arg0: i32) -> i32 {
    %c0_i32 = arith.constant 0 : i32
    %c0_i32_0 = arith.constant 0 : i32
    return %c0_i32 : i32
  }
  func.func @transform_1(%arg0: i32) -> (i32, i32, i32) {
    %c0_i32 = arith.constant 0 : i32
    %c0_i32_0 = arith.constant 0 : i32
    %c0_i32_1 = arith.constant 0 : i32
    return %arg0, %c0_i32, %c0_i32_0 : i32, i32, i32
  }
  func.func @transform_2(%arg0: i32) -> (i32, i32, i32) {
    %c0_i32 = arith.constant 0 : i32
    %c0_i32_0 = arith.constant 0 : i32
    %c0_i32_1 = arith.constant 0 : i32
    return %arg0, %c0_i32, %c0_i32_0 : i32, i32, i32
  }
  func.func @transform_3(%arg0: i32) -> (i32, i32, i32) {
    %c0_i32 = arith.constant 0 : i32
    %c0_i32_0 = arith.constant 0 : i32
    %c0_i32_1 = arith.constant 0 : i32
    return %arg0, %c0_i32, %c0_i32_0 : i32, i32, i32
  }
  func.func @transform_4(%arg0: i32) -> (i32, i32, i32) {
    %c0_i32 = arith.constant 0 : i32
    %c0_i32_0 = arith.constant 0 : i32
    %c0_i32_1 = arith.constant 0 : i32
    return %arg0, %c0_i32, %c0_i32_0 : i32, i32, i32
  }
  func.func @transform_5(%arg0: i32) -> (i32, i32, i32) {
    %c0_i32 = arith.constant 0 : i32
    %c0_i32_0 = arith.constant 0 : i32
    %c0_i32_1 = arith.constant 0 : i32
    return %arg0, %c0_i32, %c0_i32_0 : i32, i32, i32
  }
  func.func @transform_6(%arg0: i32) -> (i32, i32) {
    %c0_i32 = arith.constant 0 : i32
    %c0_i32_0 = arith.constant 0 : i32
    %c0_i32_1 = arith.constant 0 : i32
    return %c0_i32, %c0_i32_0 : i32, i32
  }
  func.func @transform_7(%arg0: i32) -> (i32, i32) {
    %c0_i32 = arith.constant 0 : i32
    %c0_i32_0 = arith.constant 0 : i32
    %c0_i32_1 = arith.constant 0 : i32
    return %c0_i32, %c0_i32_0 : i32, i32
  }
  func.func @transform_8(%arg0: i32) -> (i32, i32) {
    %c0_i32 = arith.constant 0 : i32
    %c0_i32_0 = arith.constant 0 : i32
    %c0_i32_1 = arith.constant 0 : i32
    return %c0_i32, %c0_i32_0 : i32, i32
  }
  func.func @transform_9(%arg0: i32) -> (i32, i32) {
    %c0_i32 = arith.constant 0 : i32
    %c0_i32_0 = arith.constant 0 : i32
    %c0_i32_1 = arith.constant 0 : i32
    return %c0_i32, %c0_i32_0 : i32, i32
  }
  func.func @transform_10(%arg0: i32) -> (i32, i32) {
    %c0_i32 = arith.constant 0 : i32
    %c0_i32_0 = arith.constant 0 : i32
    %c0_i32_1 = arith.constant 0 : i32
    return %c0_i32, %c0_i32_0 : i32, i32
  }
  func.func @transform_11(%arg0: i32) -> (i32, i32) {
    %c0_i32 = arith.constant 0 : i32
    %c0_i32_0 = arith.constant 0 : i32
    %c0_i32_1 = arith.constant 0 : i32
    return %c0_i32, %c0_i32_0 : i32, i32
  }
  func.func @transform_12(%arg0: i32) -> (i32, i32) {
    %c0_i32 = arith.constant 0 : i32
    %c0_i32_0 = arith.constant 0 : i32
    %c0_i32_1 = arith.constant 0 : i32
    return %c0_i32, %c0_i32_0 : i32, i32
  }
  func.func @transform_13(%arg0: i32) -> (i32, i32) {
    %c0_i32 = arith.constant 0 : i32
    %c0_i32_0 = arith.constant 0 : i32
    %c0_i32_1 = arith.constant 0 : i32
    return %c0_i32, %c0_i32_0 : i32, i32
  }
  func.func @transform_14(%arg0: i32) -> (i32, i32) {
    %c0_i32 = arith.constant 0 : i32
    %c0_i32_0 = arith.constant 0 : i32
    %c0_i32_1 = arith.constant 0 : i32
    return %c0_i32, %c0_i32_0 : i32, i32
  }
  func.func @transform_15(%arg0: i32) -> (i32, i32) {
    %c0_i32 = arith.constant 0 : i32
    %c0_i32_0 = arith.constant 0 : i32
    %c0_i32_1 = arith.constant 0 : i32
    return %c0_i32, %c0_i32_0 : i32, i32
  }
  func.func @transform_16(%arg0: i32) -> (i32, i32) {
    %c0_i32 = arith.constant 0 : i32
    %c0_i32_0 = arith.constant 0 : i32
    %c0_i32_1 = arith.constant 0 : i32
    return %c0_i32, %c0_i32_0 : i32, i32
  }
  func.func @transform_17(%arg0: i32) -> (i32, i32) {
    %c0_i32 = arith.constant 0 : i32
    %c0_i32_0 = arith.constant 0 : i32
    %c0_i32_1 = arith.constant 0 : i32
    return %c0_i32, %c0_i32_0 : i32, i32
  }
  func.func @transform_18(%arg0: i32) -> (i32, i32) {
    %c0_i32 = arith.constant 0 : i32
    %c0_i32_0 = arith.constant 0 : i32
    %c0_i32_1 = arith.constant 0 : i32
    return %c0_i32, %c0_i32_0 : i32, i32
  }
  func.func @transform_19(%arg0: i32) -> (i32, i32) {
    %c0_i32 = arith.constant 0 : i32
    %c0_i32_0 = arith.constant 0 : i32
    %c0_i32_1 = arith.constant 0 : i32
    return %c0_i32, %c0_i32_0 : i32, i32
  }
  func.func @transform_20(%arg0: i32) -> (i32, i32) {
    %c0_i32 = arith.constant 0 : i32
    %c0_i32_0 = arith.constant 0 : i32
    %c0_i32_1 = arith.constant 0 : i32
    return %c0_i32, %c0_i32_0 : i32, i32
  }
  func.func @transform_21(%arg0: i32) -> (i32, i32) {
    %c0_i32 = arith.constant 0 : i32
    %c0_i32_0 = arith.constant 0 : i32
    %c0_i32_1 = arith.constant 0 : i32
    return %c0_i32, %c0_i32_0 : i32, i32
  }
  func.func @transform_22(%arg0: i32) -> (i32, i32) {
    %c0_i32 = arith.constant 0 : i32
    %c0_i32_0 = arith.constant 0 : i32
    %c0_i32_1 = arith.constant 0 : i32
    return %c0_i32, %c0_i32_0 : i32, i32
  }
  func.func @transform_23(%arg0: i32) -> (i32, i32) {
    %c0_i32 = arith.constant 0 : i32
    %c0_i32_0 = arith.constant 0 : i32
    %c0_i32_1 = arith.constant 0 : i32
    return %c0_i32, %c0_i32_0 : i32, i32
  }
  func.func @transform_24(%arg0: i32) -> (i32, i32) {
    %c0_i32 = arith.constant 0 : i32
    %c0_i32_0 = arith.constant 0 : i32
    %c0_i32_1 = arith.constant 0 : i32
    return %c0_i32, %c0_i32_0 : i32, i32
  }
  func.func @transform_25(%arg0: i32) -> (i32, i32) {
    %c0_i32 = arith.constant 0 : i32
    %c0_i32_0 = arith.constant 0 : i32
    %c0_i32_1 = arith.constant 0 : i32
    return %c0_i32, %c0_i32_0 : i32, i32
  }
  func.func @transform_26(%arg0: i32) -> (i32, i32) {
    %c0_i32 = arith.constant 0 : i32
    %c0_i32_0 = arith.constant 0 : i32
    %c0_i32_1 = arith.constant 0 : i32
    return %c0_i32, %c0_i32_0 : i32, i32
  }
  func.func @transform_27(%arg0: i32) -> (i32, i32) {
    %c0_i32 = arith.constant 0 : i32
    %c0_i32_0 = arith.constant 0 : i32
    %c0_i32_1 = arith.constant 0 : i32
    return %c0_i32, %c0_i32_0 : i32, i32
  }
  func.func @transform_28(%arg0: i32) -> (i32, i32) {
    %c0_i32 = arith.constant 0 : i32
    %c0_i32_0 = arith.constant 0 : i32
    %c0_i32_1 = arith.constant 0 : i32
    return %c0_i32, %c0_i32_0 : i32, i32
  }
  func.func @transform_29(%arg0: i32) -> (i32, i32) {
    %c0_i32 = arith.constant 0 : i32
    %c0_i32_0 = arith.constant 0 : i32
    %c0_i32_1 = arith.constant 0 : i32
    return %c0_i32, %c0_i32_0 : i32, i32
  }
  func.func @transform_30(%arg0: i32) -> (i32, i32) {
    %c0_i32 = arith.constant 0 : i32
    %c0_i32_0 = arith.constant 0 : i32
    %c0_i32_1 = arith.constant 0 : i32
    return %c0_i32, %c0_i32_0 : i32, i32
  }
  func.func @transform_31(%arg0: i32) -> (i32, i32) {
    %c0_i32 = arith.constant 0 : i32
    %c0_i32_0 = arith.constant 0 : i32
    %c0_i32_1 = arith.constant 0 : i32
    return %c0_i32, %c0_i32_0 : i32, i32
  }
  func.func @transform_32(%arg0: i32) -> (i32, i32) {
    %c0_i32 = arith.constant 0 : i32
    %c0_i32_0 = arith.constant 0 : i32
    %c0_i32_1 = arith.constant 0 : i32
    return %c0_i32, %c0_i32_0 : i32, i32
  }
  func.func @transform_33(%arg0: i32) -> (i32, i32) {
    %c0_i32 = arith.constant 0 : i32
    %c0_i32_0 = arith.constant 0 : i32
    %c0_i32_1 = arith.constant 0 : i32
    return %c0_i32, %c0_i32_0 : i32, i32
  }
  func.func @transform_34(%arg0: i32) -> (i32, i32) {
    %c0_i32 = arith.constant 0 : i32
    %c0_i32_0 = arith.constant 0 : i32
    %c0_i32_1 = arith.constant 0 : i32
    return %c0_i32, %c0_i32_0 : i32, i32
  }
  func.func @transform_35(%arg0: i32) -> (i32, i32) {
    %c0_i32 = arith.constant 0 : i32
    %c0_i32_0 = arith.constant 0 : i32
    %c0_i32_1 = arith.constant 0 : i32
    return %c0_i32, %c0_i32_0 : i32, i32
  }
  func.func @transform_36(%arg0: i32) -> (i32, i32) {
    %c0_i32 = arith.constant 0 : i32
    %c0_i32_0 = arith.constant 0 : i32
    %c0_i32_1 = arith.constant 0 : i32
    return %c0_i32, %c0_i32_0 : i32, i32
  }
  func.func @transform_37(%arg0: i32) -> (i32, i32) {
    %c0_i32 = arith.constant 0 : i32
    %c0_i32_0 = arith.constant 0 : i32
    %c0_i32_1 = arith.constant 0 : i32
    return %c0_i32, %c0_i32_0 : i32, i32
  }
  func.func @transform_38(%arg0: i32) -> (i32, i32) {
    %c0_i32 = arith.constant 0 : i32
    %c0_i32_0 = arith.constant 0 : i32
    %c0_i32_1 = arith.constant 0 : i32
    return %c0_i32, %c0_i32_0 : i32, i32
  }
  func.func @transform_39(%arg0: i32) -> (i32, i32) {
    %c0_i32 = arith.constant 0 : i32
    %c0_i32_0 = arith.constant 0 : i32
    %c0_i32_1 = arith.constant 0 : i32
    return %c0_i32, %c0_i32_0 : i32, i32
  }
  func.func @transform_40(%arg0: i32) -> (i32, i32) {
    %c0_i32 = arith.constant 0 : i32
    %c0_i32_0 = arith.constant 0 : i32
    %c0_i32_1 = arith.constant 0 : i32
    return %c0_i32, %c0_i32_0 : i32, i32
  }
  func.func @transform_41(%arg0: i32) -> (i32, i32) {
    %c0_i32 = arith.constant 0 : i32
    %c0_i32_0 = arith.constant 0 : i32
    %c0_i32_1 = arith.constant 0 : i32
    return %c0_i32, %c0_i32_0 : i32, i32
  }
  func.func @transform_42(%arg0: i32) -> (i32, i32) {
    %c0_i32 = arith.constant 0 : i32
    %c0_i32_0 = arith.constant 0 : i32
    %c0_i32_1 = arith.constant 0 : i32
    return %c0_i32, %c0_i32_0 : i32, i32
  }
  func.func @transform_43(%arg0: i32) -> (i32, i32) {
    %c0_i32 = arith.constant 0 : i32
    %c0_i32_0 = arith.constant 0 : i32
    %c0_i32_1 = arith.constant 0 : i32
    return %c0_i32, %c0_i32_0 : i32, i32
  }
  func.func @transform_44(%arg0: i32) -> (i32, i32) {
    %c0_i32 = arith.constant 0 : i32
    %c0_i32_0 = arith.constant 0 : i32
    %c0_i32_1 = arith.constant 0 : i32
    return %c0_i32, %c0_i32_0 : i32, i32
  }
  func.func @transform_45(%arg0: i32) -> (i32, i32) {
    %c0_i32 = arith.constant 0 : i32
    %c0_i32_0 = arith.constant 0 : i32
    %c0_i32_1 = arith.constant 0 : i32
    return %c0_i32, %c0_i32_0 : i32, i32
  }
  func.func @transform_46(%arg0: i32) -> (i32, i32) {
    %c0_i32 = arith.constant 0 : i32
    %c0_i32_0 = arith.constant 0 : i32
    %c0_i32_1 = arith.constant 0 : i32
    return %c0_i32, %c0_i32_0 : i32, i32
  }
  func.func @transform_47(%arg0: i32) -> (i32, i32, i32) {
    %c0_i32 = arith.constant 0 : i32
    %c0_i32_0 = arith.constant 0 : i32
    %c0_i32_1 = arith.constant 0 : i32
    return %arg0, %c0_i32, %c0_i32_0 : i32, i32, i32
  }
  func.func @transform_48(%arg0: i32) -> (i32, i32, i32) {
    %c0_i32 = arith.constant 0 : i32
    %c0_i32_0 = arith.constant 0 : i32
    %c0_i32_1 = arith.constant 0 : i32
    return %arg0, %c0_i32, %c0_i32_0 : i32, i32, i32
  }
  func.func @transform_49(%arg0: i32) -> (i32, i32, i32) {
    %c0_i32 = arith.constant 0 : i32
    %c0_i32_0 = arith.constant 0 : i32
    %c0_i32_1 = arith.constant 0 : i32
    return %arg0, %c0_i32, %c0_i32_0 : i32, i32, i32
  }
  func.func @transform_50(%arg0: i32) -> (i32, i32, i32) {
    %c0_i32 = arith.constant 0 : i32
    %c0_i32_0 = arith.constant 0 : i32
    %c0_i32_1 = arith.constant 0 : i32
    return %arg0, %c0_i32, %c0_i32_0 : i32, i32, i32
  }
  func.func @transform_51(%arg0: i32) -> (i32, i32, i32) {
    %c0_i32 = arith.constant 0 : i32
    %c0_i32_0 = arith.constant 0 : i32
    %c0_i32_1 = arith.constant 0 : i32
    return %arg0, %c0_i32, %c0_i32_0 : i32, i32, i32
  }
  func.func @transform_52(%arg0: i32) -> (i32, i32, i32) {
    %c0_i32 = arith.constant 0 : i32
    %c0_i32_0 = arith.constant 0 : i32
    %c0_i32_1 = arith.constant 0 : i32
    return %arg0, %c0_i32, %c0_i32_0 : i32, i32, i32
  }
}

</mosaic_0001>

<bundles_post_ra>
// kernel: pcrl_forward.1
= control target key start
LH: loop header
LB: loop body
LE: loop exit
PB: predicated region body
PF: predicated region fallthrough
CT: control target
= control target key end

     0   :  { %s10015_s6 = smov 1   ;;  %s10016_s10 = smov 2   ;;  %s12825_s0 = inlined_call_operand.smem [shape: u32[53], index: -1, kind: input, shape index: {}] }
   0x1   :  { %s10081_s5 = sld [smem:[%s12825_s0]]   ;;  %s10017_s14 = smov 3  }
   0x2   :  { %s10086_s9 = sld [smem:[%s12825_s0 + %s10015_s6]]   ;;  %s10018_s18 = smov 4  }
   0x3   :  { %s10091_s13 = sld [smem:[%s12825_s0 + %s10016_s10]]   ;;  %s10019_s22 = smov 5  }
   0x4   :  { %s10096_s17 = sld [smem:[%s12825_s0 + %s10017_s14]]   ;;  %s10020_s26 = smov 6  }
   0x5   :  { %s10101_s21 = sld [smem:[%s12825_s0 + %s10018_s18]]   ;;  %s10021_s30 = smov 7  }
   0x6   :  { %s10106_s25 = sld [smem:[%s12825_s0 + %s10019_s22]]   ;;  %s10022_s4 = smov 8  }
   0x7   :  { %s10111_s29 = sld [smem:[%s12825_s0 + %s10020_s26]]   ;;  %s10023_s10 = smov 9  }
   0x8   :  { %13060 = sst [smem:[#allocation10_spill]] %s10086_s9  ;;  %s10024_s15 = smov 10  }
   0x9   :  { %13061 = sst [smem:[#allocation11_spill]] %s10091_s13  ;;  %s10025_s20 = smov 11  }
   0xa   :  { %13062 = sst [smem:[#allocation12_spill]] %s10096_s17  ;;  %s10026_s26 = smov 12  }
   0xb   :  { %13063 = sst [smem:[#allocation13_spill]] %s10101_s21  ;;  %s10027_s1 = smov 13  }
   0xc   :  { %13064 = sst [smem:[#allocation14_spill]] %s10106_s25  ;;  %s10028_s7 = smov 14  }
   0xd   :  { %13065 = sst [smem:[#allocation15_spill]] %s10111_s29  ;;  %s10030_s22 = smov 16  }
   0xe   :  { %s10116_s3 = sld [smem:[%s12825_s0 + %s10021_s30]]   ;;  %s10031_s28 = smov 17  }
   0xf   :  { %s10121_s8 = sld [smem:[%s12825_s0 + %s10022_s4]]  }
  0x10   :  { %s10126_s14 = sld [smem:[%s12825_s0 + %s10023_s10]]  }
  0x11   :  { %s10131_s19 = sld [smem:[%s12825_s0 + %s10024_s15]]   ;;  %s10029_s15 = smov 15  }
  0x12   :  { %s10136_s24 = sld [smem:[%s12825_s0 + %s10025_s20]]  }
  0x13   :  { %s10141_s30 = sld [smem:[%s12825_s0 + %s10026_s26]]  }
  0x14   :  { %13066 = sst [smem:[#allocation16_spill]] %s10116_s3 }
  0x15   :  { %13067 = sst [smem:[#allocation17_spill]] %s10121_s8 }
  0x16   :  { %13068 = sst [smem:[#allocation18_spill]] %s10126_s14 }
  0x17   :  { %13069 = sst [smem:[#allocation19_spill]] %s10131_s19 }
  0x18   :  { %13070 = sst [smem:[#allocation20_spill]] %s10136_s24 }
  0x19   :  { %13071 = sst [smem:[#allocation21_spill]] %s10141_s30 }
  0x1a   :  { %s10146_s6 = sld [smem:[%s12825_s0 + %s10027_s1]]  }
  0x1b   :  { %s10151_s12 = sld [smem:[%s12825_s0 + %s10028_s7]]   ;;  %s10032_s7 = smov 18  }
  0x1c   :  { %s10156_s20 = sld [smem:[%s12825_s0 + %s10029_s15]]   ;;  %s10033_s15 = smov 19  }
  0x1d   :  { %s10161_s27 = sld [smem:[%s12825_s0 + %s10030_s22]]   ;;  %s10034_s22 = smov 20  }
  0x1e   :  { %s10166_s4 = sld [smem:[%s12825_s0 + %s10031_s28]]   ;;  %s10035_s28 = smov 21  }
  0x1f   :  { %s10171_s25 = sld [smem:[%s12825_s0 + %s10032_s7]]   ;;  %s10036_s7 = smov 22  }
  0x20   :  { %13072 = sst [smem:[#allocation22_spill]] %s10146_s6 }
  0x21   :  { %13073 = sst [smem:[#allocation23_spill]] %s10151_s12 }
  0x22   :  { %13074 = sst [smem:[#allocation24_spill]] %s10156_s20 }
  0x23   :  { %13075 = sst [smem:[#allocation25_spill]] %s10161_s27 }
  0x24   :  { %13076 = sst [smem:[#allocation26_spill]] %s10166_s4 }
  0x25   :  { %13077 = sst [smem:[#allocation27_spill]] %s10171_s25 }
  0x26   :  { %s10176_s21 = sld [smem:[%s12825_s0 + %s10033_s15]]   ;;  %s10037_s15 = smov 23  }
  0x27   :  { %s10181_s17 = sld [smem:[%s12825_s0 + %s10034_s22]]   ;;  %s10038_s22 = smov 24  }
  0x28   :  { %s10186_s27 = sld [smem:[%s12825_s0 + %s10035_s28]]   ;;  %s10039_s28 = smov 25  }
  0x29   :  { %s10191_s25 = sld [smem:[%s12825_s0 + %s10036_s7]]   ;;  %s10040_s7 = smov 26  }
  0x2a   :  { %s10196_s13 = sld [smem:[%s12825_s0 + %s10037_s15]]   ;;  %s10041_s15 = smov 27  }
  0x2b   :  { %111 = sst [smem:[#allocation2]] %s10081_s5 }
  0x2c   :  { %13078 = sst [smem:[#allocation28_spill]] %s10176_s21 }
  0x2d   :  { %13079 = sst [smem:[#allocation29_spill]] %s10181_s17 }
  0x2e   :  { %13080 = sst [smem:[#allocation30_spill]] %s10186_s27 }
  0x2f   :  { %13081 = sst [smem:[#allocation31_spill]] %s10191_s25 }
  0x30   :  { %13082 = sst [smem:[#allocation32_spill]] %s10196_s13 }
  0x31   :  { %s10201_s17 = sld [smem:[%s12825_s0 + %s10038_s22]]   ;;  %s10042_s22 = smov 28  }
  0x32   :  { %s10206_s27 = sld [smem:[%s12825_s0 + %s10039_s28]]   ;;  %s10043_s28 = smov 29  }
  0x33   :  { %s10211_s25 = sld [smem:[%s12825_s0 + %s10040_s7]]   ;;  %s10044_s7 = smov 30  }
  0x34   :  { %s10216_s13 = sld [smem:[%s12825_s0 + %s10041_s15]]   ;;  %s10045_s15 = smov 31  }
  0x37   :  { %13083 = sst [smem:[#allocation33_spill]] %s10201_s17 }
  0x38   :  { %13084 = sst [smem:[#allocation34_spill]] %s10206_s27 }
  0x39   :  { %13085 = sst [smem:[#allocation35_spill]] %s10211_s25 }
  0x3a   :  { %13086 = sst [smem:[#allocation36_spill]] %s10216_s13 }
  0x3b   :  { %s10221_s17 = sld [smem:[%s12825_s0 + %s10042_s22]]   ;;  %s10046_s22 = smov 32  }
  0x3c   :  { %s10226_s27 = sld [smem:[%s12825_s0 + %s10043_s28]]   ;;  %s10047_s28 = smov 33  }
  0x3d   :  { %s10231_s25 = sld [smem:[%s12825_s0 + %s10044_s7]]   ;;  %s10048_s7 = smov 34  }
  0x3e   :  { %s10236_s13 = sld [smem:[%s12825_s0 + %s10045_s15]]   ;;  %s10049_s15 = smov 35  }
  0x41   :  { %13087 = sst [smem:[#allocation37_spill]] %s10221_s17 }
  0x42   :  { %13088 = sst [smem:[#allocation38_spill]] %s10226_s27 }
  0x43   :  { %13089 = sst [smem:[#allocation39_spill]] %s10231_s25 }
  0x44   :  { %13090 = sst [smem:[#allocation40_spill]] %s10236_s13 }
  0x45   :  { %s10241_s17 = sld [smem:[%s12825_s0 + %s10046_s22]]   ;;  %s10050_s22 = smov 36  }
  0x46   :  { %s10246_s27 = sld [smem:[%s12825_s0 + %s10047_s28]]   ;;  %s10051_s28 = smov 37  }
  0x47   :  { %s10251_s25 = sld [smem:[%s12825_s0 + %s10048_s7]]   ;;  %s10052_s7 = smov 38  }
  0x48   :  { %s10256_s13 = sld [smem:[%s12825_s0 + %s10049_s15]]   ;;  %s10053_s15 = smov 39  }
  0x4b   :  { %13091 = sst [smem:[#allocation41_spill]] %s10241_s17 }
  0x4c   :  { %13092 = sst [smem:[#allocation42_spill]] %s10246_s27 }
  0x4d   :  { %13093 = sst [smem:[#allocation43_spill]] %s10251_s25 }
  0x4e   :  { %13094 = sst [smem:[#allocation44_spill]] %s10256_s13 }
  0x4f   :  { %s10261_s17 = sld [smem:[%s12825_s0 + %s10050_s22]]   ;;  %s10054_s22 = smov 40  }
  0x50   :  { %s10266_s27 = sld [smem:[%s12825_s0 + %s10051_s28]]   ;;  %s10055_s28 = smov 41  }
  0x51   :  { %s10271_s25 = sld [smem:[%s12825_s0 + %s10052_s7]]   ;;  %s10056_s7 = smov 42  }
  0x52   :  { %s10276_s13 = sld [smem:[%s12825_s0 + %s10053_s15]]   ;;  %s10057_s15 = smov 43  }
  0x55   :  { %13095 = sst [smem:[#allocation45_spill]] %s10261_s17 }
  0x56   :  { %13096 = sst [smem:[#allocation46_spill]] %s10266_s27 }
  0x57   :  { %13097 = sst [smem:[#allocation47_spill]] %s10271_s25 }
  0x58   :  { %13098 = sst [smem:[#allocation48_spill]] %s10276_s13 }
  0x59   :  { %s10281_s17 = sld [smem:[%s12825_s0 + %s10054_s22]]   ;;  %s10058_s22 = smov 44  }
  0x5a   :  { %s10286_s27 = sld [smem:[%s12825_s0 + %s10055_s28]]   ;;  %s10059_s28 = smov 45  }
  0x5b   :  { %s10291_s25 = sld [smem:[%s12825_s0 + %s10056_s7]]   ;;  %s10060_s7 = smov 46  }
  0x5c   :  { %s10296_s13 = sld [smem:[%s12825_s0 + %s10057_s15]]   ;;  %s10061_s15 = smov 47  }
  0x5d   :  { %s10306_s10 = sld [smem:[%s12825_s0 + %s10059_s28]]   ;;  %s10063_s28 = smov 49  }
  0x5e   :  { %s10311_s16 = sld [smem:[%s12825_s0 + %s10060_s7]]  }
  0x5f   :  { %13099 = sst [smem:[#allocation49_spill]] %s10281_s17 }
  0x60   :  { %13100 = sst [smem:[#allocation50_spill]] %s10286_s27 }
  0x61   :  { %13101 = sst [smem:[#allocation51_spill]] %s10291_s25  ;;  %s10064_s25 = smov 50  }
  0x62   :  { %13102 = sst [smem:[#allocation52_spill]] %s10296_s13  ;;  %s10065_s13 = smov 51  }
  0x63   :  { %s10301_s17 = sld [smem:[%s12825_s0 + %s10058_s22]]   ;;  %s10062_s22 = smov 48  }
  0x64   :  { %13104 = sst [smem:[#allocation54_spill]] %s10306_s10 }
  0x65   :  { %13105 = sst [smem:[#allocation55_spill]] %s10311_s16 }
  0x66   :  { %s10316_s23 = sld [smem:[%s12825_s0 + %s10061_s15]]  }
  0x67   :  { %s10321_s1 = sld [smem:[%s12825_s0 + %s10062_s22]]  }
  0x68   :  { %s10326_s27 = sld [smem:[%s12825_s0 + %s10063_s28]]  }
  0x69   :  { %13103 = sst [smem:[#allocation53_spill]] %s10301_s17  ;;  %s10066_s17 = smov 52  }
  0x6a   :  { %s10331_s16 = sld [smem:[%s12825_s0 + %s10064_s25]]  }
  0x6c   :  { %13106 = sst [smem:[#allocation56_spill]] %s10316_s23 }
  0x6d   :  { %13107 = sst [smem:[#allocation57_spill]] %s10321_s1 }
  0x6e   :  { %s10336_s23 = sld [smem:[%s12825_s0 + %s10065_s13]]  }
  0x6f   :  { %s10341_s1 = sld [smem:[%s12825_s0 + %s10066_s17]]  }
  0x70   :  { %13108 = sst [smem:[#allocation58_spill]] %s10331_s16 }
  0x71   :  { %112 = vsyncpa [#allocation4], 0 }
  0x72   :  { %114 = vsyncpa [#allocation4 + $0x1], 0 }
  0x73   :  { %115 = vsyncpa [#allocation6], 0 }
  0x74   :  { %117 = vsyncpa [#allocation6 + $0x1], 0  ;;  %s10344_s10 = smov 0   ;;  %s10346_s28 = smov 0  }
  0x75   :  { %s10348_s2 = smov 0   ;;  %s10350_s25 = smov 0  }
  0x76 LB: > { %s13109_s30 = sld [smem:[#allocation21_spill]]  ;;  %s10365_s0 = sadd.s32 4294967295, %s10013_s25   ;;  %s10009_s2 = sphi %s10348_s2, %s13472_s2   ;;  %s10005_s28 = sphi %s10346_s28, %s13471_s28   ;;  %s10001_s10 = sphi %s10344_s10, %s13470_s10   ;;  %s10013_s25 = sphi %s10350_s25, %s13473_s25  }
  0x77   : > { %s13110_s29 = sld [smem:[#allocation15_spill]]  ;;  %s12909_s5 = sadd.s32 4294967294, %s10013_s25  }
  0x78   : > { %s13111_s21 = sld [smem:[#allocation28_spill]]  ;;  %s10369_s7 = sadd.s32 1, %s10013_s25  }
  0x79   : > { %s13112_s20 = sld [smem:[#allocation24_spill]]  ;;  %s1142_s11 = sadd.s32 1, %s10009_s2 }
  0x7a   : > { %s13113_s14 = sld [smem:[#allocation18_spill]]  ;;  %s1139_s13 = ssub.s32 %s10013_s25, %s10369_s7 }
  0x7b   : > { %s13114_s4 = sld [smem:[#allocation26_spill]]  ;;  %p1152_p0 = scmp.ne.s32.totalorder %s10009_s2, %s10005_s28 }
  0x7c   : > { %s13115_s8 = sld [smem:[#allocation17_spill]]  ;;  %p1140_p1 = scmp.eq.s32.totalorder %s1139_s13, 0 }
  0x7d   : > { %13116 = sst [smem:[#allocation59_spill]] %s10009_s2  ;;  %p1153_p2 = scmp.eq.s32.totalorder %s10365_s0, 1 }
  0x7e   : > { %p1158_p3 = scmp.ne.s32.totalorder %s10005_s28, %s10001_s10  ;;  %p1159_p4 = scmp.eq.s32.totalorder %s12909_s5, 1 }
  0x7f   : > { %s10382_s15 = scalar_select %p1140_p1, %s10009_s2, %s1142_s11  }
  0x80   : > { %p10384_p5 = por %p1153_p2, %p1152_p0  ;;  %p10388_p6 = por %p1159_p4, %p1158_p3 }
  0x81   : > { %13117 = sst [smem:[#allocation60_spill]] %s10382_s15  ;;  %p7716_p7 = scmp.ge.s32.totalorder %s10013_s25, 1 }
  0x82   : > { %p1470_p8 = scmp.lt.s32.totalorder %s10013_s25, 3 }
  0x84   : > { %p1471_p9 = pnand %p7716_p7, %p1470_p8 }
  0x86   : > { %1474 = sbr.rel (%p1471_p9) target bundleno = 7206 (0x1c26), region = 208 }
  0x8b   : > { %v9422_v0 = vld [vmem:[%s13110_s29 + $0x74] ss:$8 sps:$4 sm:$0xff]   ;;  %v9424_v1 = vld [vmem:[%s13110_s29 + $0x70] ss:$8 sps:$4 sm:$0xff]   ;;  %v12883_v2 = vmov 0   ;;  %p1631_p10 = scmp.lt.s32.totalorder %s10365_s0, 1  ;;  %v1942_v41 = vlaneseq }
  0x8c   : > { %2064 = vmatprep.mubr.bf16.mxu0 %v12883_v2  ;;  %2249 = vmatprep.mubr.bf16.mxu1 %v12883_v2  ;;  %v9425_v3 = vld [vmem:[%s13110_s29 + $0x64] ss:$8 sps:$4 sm:$0xff]   ;;  %v9427_v4 = vld [vmem:[%s13110_s29 + $0x60] ss:$8 sps:$4 sm:$0xff]   ;;  %v9428_v5 = vld [vmem:[%s13110_s29 + $0x54] ss:$8 sps:$4 sm:$0xff]  }
  0x8d   : > { %2032 = vmatprep.subr.bf16.mxu0 %v9422_v0  ;;  %v9430_v6 = vld [vmem:[%s13110_s29 + $0x50] ss:$8 sps:$4 sm:$0xff]   ;;  %v9431_v7 = vld [vmem:[%s13110_s29 + $0x44] ss:$8 sps:$4 sm:$0xff]   ;;  %s13120_s9 = sld [smem:[#allocation10_spill]]  ;;  %v10446_v42 = vshrl.u32 %v1942_v41, 7 }
  0x8e   : > { %2033 = vmatpush1.bf16.msra.mxu0 %v9424_v1  ;;  %v9433_v8 = vld [vmem:[%s13110_s29 + $0x40] ss:$8 sps:$4 sm:$0xff]   ;;  %s10406_s22 = scalar_select %p1631_p10, %s10365_s0, 1  ;;  %v9434_v9 = vld [vmem:[%s13110_s29 + $0x34] ss:$8 sps:$4 sm:$0xff]   ;;  %vm10069_vm0 = vmmov 0  }
  0x8f   : > { %2034 = vmatprep.subr.bf16.mxu0 %v9425_v3  ;;  %v9436_v10 = vld [vmem:[%s13110_s29 + $0x30] ss:$8 sps:$4 sm:$0xff]   ;;  %v9437_v11 = vld [vmem:[%s13110_s29 + $0x24] ss:$8 sps:$4 sm:$0xff]   ;;  %v9439_v12 = vld [vmem:[%s13110_s29 + $0x20] ss:$8 sps:$4 sm:$0xff]  }
  0x90   : > { %s10411_s26 = sshll.u32 %s10406_s22, 7  ;;  %v9440_v13 = vld [vmem:[%s13110_s29 + $0x14] ss:$8 sps:$4 sm:$0xff]   ;;  %v9442_v14 = vld [vmem:[%s13110_s29 + $0x10] ss:$8 sps:$4 sm:$0xff]   ;;  %s13121_s3 = sld [smem:[#allocation16_spill]] }
  0x91   : > { %v9443_v15 = vld [vmem:[%s13110_s29 + $0x4] ss:$8 sps:$4 sm:$0xff]   ;;  %v9445_v16 = vld [vmem:[%s13110_s29] ss:$8 sps:$4 sm:$0xff]   ;;  %v12882_v43 = vsub.s32 0, %v10446_v42  ;;  %s13138_s19 = sld [smem:[#allocation19_spill]] }
  0x92   : > { %2035 = vmatpush1.bf16.msra.mxu0 %v9427_v4  ;;  %s13140_s24 = sld [smem:[#allocation20_spill]]  ;;  %vm2482_vm1 = vcmask 523264   ;;  %vm2626_vm2 = vcmask 130048   ;;  %vm2766_vm3 = vcmask 1043456   ;;  %vm3921_vm4 = vcmask 253952  }
  0x93   : > { %2036 = vmatprep.subr.bf16.mxu0 %v9428_v5  ;;  %s10420_s11 = scalar_lea.vmem %s13120_s9, %s10411_s26  ;;  %s13145_s6 = sld [smem:[#allocation22_spill]]  ;;  %vm4330_vm5 = vcmask 1041408   ;;  %vm4326_vm6 = vcmask 31744  }
  0x94   : > { %v1805_v17 = vld [vmem:[%s10420_s11] sm:$0xff]  ;;  %v1806_v18 = vld [vmem:[%s10420_s11 + $0x8] sm:$0xff]  ;;  %v1807_v20 = vld [vmem:[%s10420_s11 + $0x10] sm:$0xff]  ;;  %s13146_s12 = sld [smem:[#allocation23_spill]] }
  0x95   : > { %v1933_v19 = vpack.c.bf16 %v1806_v18, %v1805_v17  ;;  %v1808_v21 = vld [vmem:[%s10420_s11 + $0x18] sm:$0xff]  ;;  %v1809_v23 = vld [vmem:[%s10420_s11 + $0x20] sm:$0xff]  ;;  %v1810_v24 = vld [vmem:[%s10420_s11 + $0x28] sm:$0xff]  ;;  %s13151_s13 = sld [smem:[#allocation11_spill]] }
  0x96   : > { %2037 = vmatpush1.bf16.msra.mxu0 %v9430_v6  ;;  %v1934_v22 = vpack.c.bf16 %v1808_v21, %v1807_v20  ;;  %v1935_v25 = vpack.c.bf16 %v1810_v24, %v1809_v23  ;;  %v1811_v26 = vld [vmem:[%s10420_s11 + $0x30] sm:$0xff]  ;;  %v1812_v27 = vld [vmem:[%s10420_s11 + $0x38] sm:$0xff]  ;;  %v1813_v29 = vld [vmem:[%s10420_s11 + $0x40] sm:$0xff]  ;;  %v12881_v21 = vsub.s32 1, %v10446_v42  ;;  %s13153_s5 = sld [smem:[#allocation29_spill]] }
  0x97   : > { %2038 = vmatprep.subr.bf16.mxu0 %v9431_v7  ;;  %v1936_v28 = vpack.c.bf16 %v1812_v27, %v1811_v26  ;;  %v1814_v30 = vld [vmem:[%s10420_s11 + $0x48] sm:$0xff]  ;;  %v1815_v32 = vld [vmem:[%s10420_s11 + $0x50] sm:$0xff]  ;;  %v1816_v33 = vld [vmem:[%s10420_s11 + $0x58] sm:$0xff]  ;;  %s13282_s9 = sld [smem:[#allocation37_spill]] }
  0x98   : > { %v1937_v31 = vpack.c.bf16 %v1814_v30, %v1813_v29  ;;  %v1938_v34 = vpack.c.bf16 %v1816_v33, %v1815_v32  ;;  %v1817_v35 = vld [vmem:[%s10420_s11 + $0x60] sm:$0xff]  ;;  %v1818_v36 = vld [vmem:[%s10420_s11 + $0x68] sm:$0xff]  ;;  %v1819_v38 = vld [vmem:[%s10420_s11 + $0x70] sm:$0xff]  ;;  %s13341_s29 = sld [smem:[#allocation53_spill]] }
  0x99   : > { %v1939_v37 = vpack.c.bf16 %v1818_v36, %v1817_v35  ;;  %v1820_v39 = vld [vmem:[%s10420_s11 + $0x78] sm:$0xff]  ;;  %v1837_v44 = vld [vmem:[%s13121_s3] sm:$0x3]  ;;  %s11421_s3 = sand.u32 1, %s10005_s28   ;;  %s13344_s15 = sld [smem:[#allocation55_spill]] }
  0x9a   : > { %2039 = vmatpush1.bf16.msra.mxu0 %v9433_v8  ;;  %v1940_v40 = vpack.c.bf16 %v1820_v39, %v1819_v38  ;;  %v10452_v45 = vrot.slane %v1837_v44, %v12882_v43  ;;  %v10503_v24 = vrot.slane %v1837_v44, %v12881_v21  ;;  %s13345_s16 = sld [smem:[#allocation58_spill]] }
  0x9b   : > { %2040 = vmatprep.subr.bf16.mxu0 %v9434_v9  ;;  %s10892_s11 = scalar_lea.vmem %s13151_s13, %s10411_s26  ;;  %s13152_s13 = sld [smem:[#allocation25_spill]] }
  0x9e   : > { %2041 = vmatpush1.bf16.msra.mxu0 %v9436_v10 }
  0x9f   : > { %2042 = vmatprep.subr.bf16.mxu0 %v9437_v11 }
  0xa2   : > { %2043 = vmatpush1.bf16.msra.mxu0 %v9439_v12 }
  0xa3   : > { %2044 = vmatprep.subr.bf16.mxu0 %v9440_v13 }
  0xa6   : > { %2045 = vmatpush1.bf16.msra.mxu0 %v9442_v14 }
  0xa7   : > { %2046 = vmatprep.subr.bf16.mxu0 %v9443_v15 }
  0xaa   : > { %2047 = vmatpush1.bf16.msra.mxu0 %v9445_v16 }
  0xad   : > { %2065 = vmatmul.mubr.bf16.vlgmr.msra.gmra.mxu0 %v1933_v19 }
  0xae   : > { %2074 = vmatprep.mubr.bf16.mxu0 %v12883_v2 }
  0xb5   : > { %2075 = vmatmul.mubr.bf16.gmra.mxu0 %v1934_v22 }
  0xb6   : > { %2084 = vmatprep.mubr.bf16.mxu0 %v12883_v2 }
  0xbd   : > { %2085 = vmatmul.mubr.bf16.gmra.mxu0 %v1935_v25 }
  0xbe   : > { %2094 = vmatprep.mubr.bf16.mxu0 %v12883_v2 }
  0xc5   : > { %2095 = vmatmul.mubr.bf16.gmra.mxu0 %v1936_v28 }
  0xc6   : > { %2104 = vmatprep.mubr.bf16.mxu0 %v12883_v2 }
  0xcd   : > { %2105 = vmatmul.mubr.bf16.gmra.mxu0 %v1937_v31 }
  0xce   : > { %2114 = vmatprep.mubr.bf16.mxu0 %v12883_v2 }
  0xd5   : > { %2115 = vmatmul.mubr.bf16.gmra.mxu0 %v1938_v34 }
  0xd6   : > { %2124 = vmatprep.mubr.bf16.mxu0 %v12883_v2 }
  0xdd   : > { %2125 = vmatmul.mubr.bf16.gmra.mxu0 %v1939_v37 }
  0xde   : > { %2134 = vmatprep.mubr.bf16.mxu0 %v12883_v2 }
  0xe5   : > { %2135 = vmatmul.mubr.bf16.gmra.mxu0 %v1940_v40 }
 0x16d   : > { %v2066_v46 = vpop.f32.mrf.mxu0 }
 0x16e   : > { %v10457_v48 = vadd.f32 %v2066_v46, %v10452_v45 }
 0x16f   : > { %v10454_v47 = vpop.f32.mrf.mxu0 }
 0x170   : > { %v12880_v52 = vmax.f32 %v10457_v48, 0.0 }
 0x171   : > { %v2070_v49 = vpop.f32.mrf.mxu0 }
 0x172   : > { %v10460_v50 = vadd.f32 %v2070_v49, %v10452_v45 }
 0x173   : > { %v10462_v51 = vpop.f32.mrf.mxu0 }
 0x174   : > { %v12878_v53 = vmax.f32 %v10460_v50, 0.0 }
 0x175   : > { %v2076_v54 = vpop.f32.mrf.mxu0 }
 0x176   : > { %v10470_v55 = vpack.c.bf16 %v12878_v53, %v12880_v52  ;;  %v10475_v57 = vadd.f32 %v2076_v54, %v10452_v45  ;;  %v9464_v53 = vld [vmem:[%s13113_s14 + $0x40] sm:$0xff]  }
 0x177   : > { %v10472_v56 = vpop.f32.mrf.mxu0 }
 0x178   : > { %13122 = vst [vmem:[#allocation61_spill] sm:$0xff] %v10470_v55  ;;  %v12876_v61 = vmax.f32 %v10475_v57, 0.0 }
 0x179   : > { %v2080_v58 = vpop.f32.mrf.mxu0 }
 0x17a   : > { %v10478_v59 = vadd.f32 %v2080_v58, %v10452_v45 }
 0x17b   : > { %v10480_v60 = vpop.f32.mrf.mxu0 }
 0x17c   : > { %v12874_v62 = vmax.f32 %v10478_v59, 0.0 }
 0x17d   : > { %v10484_v63 = vpop.f32.mrf.mxu0 }
 0x17e   : > { %v10490_v0 = vpack.c.bf16 %v12874_v62, %v12876_v61  ;;  %v9454_v62 = vld [vmem:[%s13113_s14 + $0x68] sm:$0xff]  }
 0x17f   : > { %v10492_v1 = vpop.f32.mrf.mxu0  ;;  %v9455_v61 = vld [vmem:[%s13113_s14 + $0x28] sm:$0xff]  }
 0x180   : > { %13123 = vst [vmem:[#allocation62_spill] sm:$0xff] %v10490_v0 }
 0x181   : > { %v10494_v3 = vpop.f32.mrf.mxu0 }
 0x183   : > { %v10496_v4 = vpop.f32.mrf.mxu0 }
 0x185   : > { %v10498_v5 = vpop.f32.mrf.mxu0 }
 0x187   : > { %v2098_v6 = vpop.f32.mrf.mxu0 }
 0x189   : > { %v2100_v7 = vpop.f32.mrf.mxu0 }
 0x18b   : > { %v2102_v8 = vpop.f32.mrf.mxu0 }
 0x18d   : > { %v2106_v9 = vpop.f32.mrf.mxu0 }
 0x18f   : > { %v2108_v10 = vpop.f32.mrf.mxu0 }
 0x191   : > { %v2110_v11 = vpop.f32.mrf.mxu0 }
 0x193   : > { %v2112_v12 = vpop.f32.mrf.mxu0 }
 0x195   : > { %v2116_v13 = vpop.f32.mrf.mxu0 }
 0x197   : > { %v2118_v14 = vpop.f32.mrf.mxu0 }
 0x198   : > { %v10538_v41 = vadd.f32 %v2118_v14, %v10503_v24  ;;  %v10558_v14 = vadd.f32 %v2112_v12, %v10503_v24  ;;  %v10574_v12 = vadd.f32 %v2108_v10, %v10503_v24 }
 0x199   : > { %v2120_v15 = vpop.f32.mrf.mxu0 }
 0x19a   : > { %v10548_v49 = vadd.f32 %v2120_v15, %v10452_v45  ;;  %v12861_v10 = vmax.f32 %v10558_v14, 0.0 }
 0x19b   : > { %v2122_v16 = vpop.f32.mrf.mxu0 }
 0x19c   : > { %v10528_v35 = vadd.f32 %v2122_v16, %v10503_v24 }
 0x19d   : > { %v2126_v17 = vpop.f32.mrf.mxu0 }
 0x19e   : > { %v10534_v39 = vadd.f32 %v2126_v17, %v10452_v45  ;;  %v12857_v16 = vmax.f32 %v10528_v35, 0.0  ;;  %v10569_v17 = vadd.f32 %v2116_v13, %v10452_v45 }
 0x19f   : > { %v2128_v18 = vpop.f32.mrf.mxu0 }
 0x1a0   : > { %v10518_v31 = vadd.f32 %v2128_v18, %v10503_v24  ;;  %v12856_v18 = vmax.f32 %v10534_v39, 0.0 }
 0x1a1   : > { %v2130_v19 = vpop.f32.mrf.mxu0 }
 0x1a2   : > { %v10524_v33 = vadd.f32 %v2130_v19, %v10452_v45  ;;  %v12855_v44 = vmax.f32 %v10518_v31, 0.0  ;;  %v12859_v19 = vmax.f32 %v10538_v41, 0.0 }
 0x1a3   : > { %v2132_v20 = vpop.f32.mrf.mxu0 }
 0x1a4   : > { %v10506_v26 = vadd.f32 %v2132_v20, %v10503_v24  ;;  %v12854_v54 = vmax.f32 %v10524_v33, 0.0  ;;  %v10579_v20 = vadd.f32 %v2110_v11, %v10452_v45  ;;  %v10599_v11 = vadd.f32 %v2106_v9, %v10452_v45 }
 0x1a5   : > { %v2136_v22 = vpop.f32.mrf.mxu0 }
 0x1a6   : > { %v10515_v29 = vadd.f32 %v2136_v22, %v10452_v45  ;;  %v12853_v36 = vmax.f32 %v10506_v26, 0.0  ;;  %v12858_v22 = vmax.f32 %v10548_v49, 0.0  ;;  %v10586_v13 = vpack.c.bf16 %v12854_v54, %v12856_v18 }
 0x1a7   : > { %v2138_v23 = vpop.f32.mrf.mxu0  ;;  %v12864_v54 = vmax.f32 %v10599_v11, 0.0  ;;  %v10643_v18 = vadd.f32 %v10494_v3, %v10452_v45 }
 0x1a8   : > { %v10509_v27 = vadd.f32 %v2138_v23, %v10503_v24  ;;  %v12852_v40 = vmax.f32 %v10515_v29, 0.0  ;;  %v10566_v15 = vpack.c.bf16 %v12853_v36, %v12855_v44  ;;  %13127 = vst [vmem:[#allocation66_spill] sm:$0xff] %v10586_v13  ;;  %v10589_v23 = vadd.f32 %v2102_v8, %v10503_v24 }
 0x1a9   : > { %v2140_v25 = vpop.f32.mrf.mxu0  ;;  %v12863_v8 = vmax.f32 %v10574_v12, 0.0  ;;  %v10631_v36 = vadd.f32 %v10498_v5, %v10452_v45 }
 0x1aa   : > { %v10512_v28 = vadd.f32 %v2140_v25, %v10452_v45  ;;  %v12851_v37 = vmax.f32 %v10509_v27, 0.0  ;;  %13126 = vst [vmem:[#allocation65_spill] sm:$0xff] %v10566_v15  ;;  %v10596_v25 = vpack.c.bf16 %v12857_v16, %v12859_v19  ;;  %v10665_v19 = vadd.f32 %v10484_v63, %v10452_v45 }
 0x1ab   : > { %v2142_v30 = vpop.f32.mrf.mxu0  ;;  %v10684_v63 = vadd.f32 %v10462_v51, %v10503_v24 }
 0x1ac   : > { %v10521_v32 = vadd.f32 %v2142_v30, %v10503_v24  ;;  %v12850_v34 = vmax.f32 %v10512_v28, 0.0  ;;  %13128 = vst [vmem:[#allocation67_spill] sm:$0xff] %v10596_v25  ;;  %v12860_v30 = vmax.f32 %v10569_v17, 0.0 }
 0x1ae   : > { %v12849_v38 = vmax.f32 %v10521_v32, 0.0  ;;  %v10555_v58 = vpack.c.bf16 %v12850_v34, %v12852_v40  ;;  %v10609_v34 = vadd.f32 %v2100_v7, %v10452_v45  ;;  %v10616_v9 = vpack.c.bf16 %v12858_v22, %v12860_v30 }
 0x1af   : > { %v10620_v40 = vadd.f32 %v10496_v4, %v10503_v24  ;;  %v10627_v7 = vpack.c.bf16 %v12861_v10, %v12863_v8  ;;  %v10637_v4 = vadd.f32 %v10492_v1, %v10503_v24  ;;  %v10654_v1 = vadd.f32 %v10480_v60, %v10503_v24 }
 0x1b0   : > { %v10545_v46 = vpack.c.bf16 %v12849_v38, %v12851_v37  ;;  %13125 = vst [vmem:[#allocation64_spill] sm:$0xff] %v10555_v58  ;;  %v10604_v38 = vadd.f32 %v2098_v6, %v10503_v24  ;;  %v12862_v37 = vmax.f32 %v10579_v20, 0.0  ;;  %13129 = vst [vmem:[#allocation68_spill] sm:$0xff] %v10616_v9  ;;  %v12865_v6 = vmax.f32 %v10589_v23, 0.0 }
 0x1b1   : > { %13130 = vst [vmem:[#allocation69_spill] sm:$0xff] %v10627_v7  ;;  %v12866_v16 = vmax.f32 %v10609_v34, 0.0  ;;  %v12869_v22 = vmax.f32 %v10620_v40, 0.0  ;;  %v12868_v30 = vmax.f32 %v10631_v36, 0.0  ;;  %v10671_v60 = vadd.f32 %v10472_v56, %v10503_v24 }
 0x1b2   : > { %13124 = vst [vmem:[#allocation63_spill] sm:$0xff] %v10545_v46  ;;  %2217 = vmatprep.subr.bf16.mxu1 %v10545_v46  ;;  %v12867_v44 = vmax.f32 %v10604_v38, 0.0  ;;  %v10650_v5 = vpack.c.bf16 %v12862_v37, %v12864_v54  ;;  %v12871_v10 = vmax.f32 %v10637_v4, 0.0  ;;  %v12870_v37 = vmax.f32 %v10643_v18, 0.0 }
 0x1b3   : > { %2218 = vmatpush1.bf16.msra.mxu1 %v10555_v58  ;;  %v10680_v45 = vpack.c.bf16 %v12866_v16, %v12868_v30  ;;  %v12873_v8 = vmax.f32 %v10654_v1, 0.0  ;;  %v12872_v54 = vmax.f32 %v10665_v19, 0.0  ;;  %v12875_v51 = vmax.f32 %v10671_v60, 0.0 }
 0x1b4   : > { %2219 = vmatprep.subr.bf16.mxu1 %v10566_v15  ;;  %13131 = vst [vmem:[#allocation70_spill] sm:$0xff] %v10650_v5  ;;  %v10661_v3 = vpack.c.bf16 %v12865_v6, %v12867_v44  ;;  %v10691_v56 = vpack.c.bf16 %v12869_v22, %v12871_v10  ;;  %v10697_v6 = vadd.f32 %v10454_v47, %v10503_v24  ;;  %v12877_v44 = vmax.f32 %v10684_v63, 0.0  ;;  %v9450_v22 = vld [vmem:[%s13113_s14 + $0x78] sm:$0xff]  }
 0x1b5   : > { %13133 = vst [vmem:[#allocation72_spill] sm:$0xff] %v10680_v45  ;;  %v10705_v16 = vpack.c.bf16 %v12870_v37, %v12872_v54  ;;  %v10712_v30 = vpack.c.bf16 %v12873_v8, %v12875_v51  ;;  %v9446_v37 = vld [vmem:[%s13115_s8] sm:$0xff]   ;;  %v9451_v10 = vld [vmem:[%s13113_s14 + $0x38] sm:$0xff]   ;;  %v9452_v54 = vld [vmem:[%s13113_s14 + $0x70] sm:$0xff]  }
 0x1b6   : > { %13132 = vst [vmem:[#allocation71_spill] sm:$0xff] %v10661_v3  ;;  %13134 = vst [vmem:[#allocation73_spill] sm:$0xff] %v10691_v56  ;;  %v12879_v47 = vmax.f32 %v10697_v6, 0.0  ;;  %v9453_v8 = vld [vmem:[%s13113_s14 + $0x30] sm:$0xff]   ;;  %v9447_v51 = vld [vmem:[%s13115_s8 + $0x8] sm:$0xff]  }
 0x1b7   : > { %2220 = vmatpush1.bf16.msra.mxu1 %v10586_v13  ;;  %13135 = vst [vmem:[#allocation74_spill] sm:$0xff] %v10705_v16  ;;  %13136 = vst [vmem:[#allocation75_spill] sm:$0xff] %v10712_v30 }
 0x1b8   : > { %2221 = vmatprep.subr.bf16.mxu1 %v10596_v25  ;;  %v10721_v24 = vpack.c.bf16 %v12877_v44, %v12879_v47  ;;  %v9456_v44 = vld [vmem:[%s13113_s14 + $0x60] sm:$0xff]  }
 0x1ba   : > { %13137 = vst [vmem:[#allocation76_spill] sm:$0xff] %v10721_v24 }
 0x1bb   : > { %2222 = vmatpush1.bf16.msra.mxu1 %v10616_v9 }
 0x1bc   : > { %2223 = vmatprep.subr.bf16.mxu1 %v10627_v7 }
 0x1bf   : > { %2224 = vmatpush1.bf16.msra.mxu1 %v10650_v5 }
 0x1c0   : > { %2225 = vmatprep.subr.bf16.mxu1 %v10661_v3 }
 0x1c3   : > { %2226 = vmatpush1.bf16.msra.mxu1 %v10680_v45 }
 0x1c4   : > { %2227 = vmatprep.subr.bf16.mxu1 %v10691_v56 }
 0x1c7   : > { %2228 = vmatpush1.bf16.msra.mxu1 %v10705_v16 }
 0x1c8   : > { %2229 = vmatprep.subr.bf16.mxu1 %v10712_v30 }
 0x1cb   : > { %2230 = vmatpush1.bf16.msra.mxu1 %v10490_v0 }
 0x1cc   : > { %2231 = vmatprep.subr.bf16.mxu1 %v10721_v24 }
 0x1cf   : > { %2232 = vmatpush1.bf16.msra.mxu1 %v10470_v55 }
 0x1d0   : > { %8079 = vmatprep.subr.bf16.mxu1 %v9450_v22  ;;  %v9458_v22 = vld [vmem:[%s13113_s14 + $0x58] sm:$0xff]  }
 0x1d2   : > { %2250 = vmatmul.mubr.bf16.vlgmr.msra.gmra.mxu1 %v9446_v37  ;;  %v9457_v37 = vld [vmem:[%s13113_s14 + $0x20] sm:$0xff]  }
 0x1d3   : > { %2259 = vmatprep.mubr.bf16.mxu1 %v12883_v2  ;;  %8080 = vmatpush3.bf16.msra.mxu1 %v9451_v10  ;;  %v9448_v10 = vld [vmem:[%s13115_s8 + $0x10] sm:$0xff]  }
 0x1d4   : > { %8081 = vmatprep.subr.bf16.mxu1 %v9452_v54  ;;  %v9459_v54 = vld [vmem:[%s13113_s14 + $0x18] sm:$0xff]  }
 0x1d7   : > { %8082 = vmatpush3.bf16.msra.mxu1 %v9453_v8  ;;  %v9460_v8 = vld [vmem:[%s13113_s14 + $0x50] sm:$0xff]  }
 0x1d8   : > { %8083 = vmatprep.subr.bf16.mxu1 %v9454_v62  ;;  %v9461_v62 = vld [vmem:[%s13113_s14 + $0x10] sm:$0xff]  }
 0x1da   : > { %2260 = vmatmul.mubr.bf16.gmra.mxu1 %v9447_v51  ;;  %v9449_v51 = vld [vmem:[%s13115_s8 + $0x18] sm:$0xff]   ;;  %s13280_s8 = sld [smem:[#allocation35_spill]] }
 0x1db   : > { %2269 = vmatprep.mubr.bf16.mxu1 %v12883_v2  ;;  %8084 = vmatpush3.bf16.msra.mxu1 %v9455_v61  ;;  %v9462_v61 = vld [vmem:[%s13113_s14 + $0x48] sm:$0xff]  }
 0x1dc   : > { %8085 = vmatprep.subr.bf16.mxu1 %v9456_v44  ;;  %v9463_v44 = vld [vmem:[%s13113_s14 + $0x8] sm:$0xff]  }
 0x1df   : > { %8086 = vmatpush3.bf16.msra.mxu1 %v9457_v37  ;;  %v9465_v37 = vld [vmem:[%s13113_s14] sm:$0xff]   ;;  %s13304_s14 = sld [smem:[#allocation50_spill]] }
 0x1e0   : > { %8087 = vmatprep.subr.bf16.mxu1 %v9458_v22 }
 0x1e2   : > { %2270 = vmatmul.mubr.bf16.gmra.mxu1 %v9448_v10 }
 0x1e3   : > { %2279 = vmatprep.mubr.bf16.mxu1 %v12883_v2  ;;  %8088 = vmatpush3.bf16.msra.mxu1 %v9459_v54 }
 0x1e4   : > { %8089 = vmatprep.subr.bf16.mxu1 %v9460_v8 }
 0x1e7   : > { %8090 = vmatpush3.bf16.msra.mxu1 %v9461_v62 }
 0x1e8   : > { %8091 = vmatprep.subr.bf16.mxu1 %v9462_v61 }
 0x1ea   : > { %2280 = vmatmul.mubr.bf16.gmra.mxu1 %v9449_v51 }
 0x1eb   : > { %8092 = vmatpush3.bf16.msra.mxu1 %v9463_v44 }
 0x1ec   : > { %8093 = vmatprep.subr.bf16.mxu1 %v9464_v53 }
 0x1ef   : > { %8094 = vmatpush3.bf16.msra.mxu1 %v9465_v37 }
 0x292   : > { %v2251_v47 = vpop.f32.mrf.mxu1 }
 0x294   : > { %v2253_v22 = vpop.f32.mrf.mxu1 }
 0x296   : > { %v2255_v52 = vpop.f32.mrf.mxu1 }
 0x297   : > { %v2290_v43 = vpack.c.bf16 %v2255_v52, %v2251_v47 }
 0x298   : > { %v2257_v10 = vpop.f32.mrf.mxu1 }
 0x299   : > { %v2291_v21 = vpack.c.bf16 %v2257_v10, %v2253_v22  ;;  %v9471_v10 = vld [vmem:[%s13109_s30 + $0x18] sm:$0xff]  }
 0x29a   : > { %v2261_v54 = vpop.f32.mrf.mxu1 }
 0x29b   : > { %2432 = vmatprep.mubr.bf16.mxu1 %v2291_v21 }
 0x29c   : > { %v2263_v8 = vpop.f32.mrf.mxu1  ;;  %2433 = vmatmul.mubr.bf16.vlgmr.msra.gmra.mxu1 %v2290_v43 }
 0x29e   : > { %v2265_v62 = vpop.f32.mrf.mxu1 }
 0x29f   : > { %v2292_v58 = vpack.c.bf16 %v2265_v62, %v2261_v54  ;;  %v9472_v54 = vld [vmem:[%s13109_s30 + $0x10] sm:$0xff]  }
 0x2a0   : > { %v2267_v51 = vpop.f32.mrf.mxu1 }
 0x2a1   : > { %v2293_v2 = vpack.c.bf16 %v2267_v51, %v2263_v8 }
 0x2a2   : > { %v2271_v61 = vpop.f32.mrf.mxu1 }
 0x2a3   : > { %2440 = vmatprep.mubr.bf16.mxu1 %v2293_v2  ;;  %v12889_v2 = vmov 0.0  }
 0x2a4   : > { %v2273_v44 = vpop.f32.mrf.mxu1  ;;  %2441 = vmatmul.mubr.bf16.gmra.mxu1 %v2292_v58  ;;  %8656 = vmatprep.subr.bf16.mxu0 %v12889_v2  ;;  %v9468_v58 = vld [vmem:[%s13109_s30 + $0x30] sm:$0xff]  }
 0x2a5   : > { %8668 = vmatprep.subr.bf16.mxu1 %v12889_v2  ;;  %8664 = vmatprep.mubr.msk.bf16.mxu0 %vm10069_vm0, %v12889_v2 }
 0x2a6   : > { %v2275_v53 = vpop.f32.mrf.mxu1 }
 0x2a7   : > { %v2294_v13 = vpack.c.bf16 %v2275_v53, %v2271_v61 }
 0x2a8   : > { %v2277_v37 = vpop.f32.mrf.mxu1 }
 0x2a9   : > { %v2295_v46 = vpack.c.bf16 %v2277_v37, %v2273_v44 }
 0x2aa   : > { %v2281_v15 = vpop.f32.mrf.mxu1 }
 0x2ab   : > { %2448 = vmatprep.mubr.bf16.mxu1 %v2295_v46  ;;  %v9467_v46 = vld [vmem:[%s13109_s30 + $0x38] sm:$0xff]  }
 0x2ac   : > { %v2283_v52 = vpop.f32.mrf.mxu1  ;;  %2449 = vmatmul.mubr.bf16.gmra.mxu1 %v2294_v13  ;;  %v9470_v13 = vld [vmem:[%s13109_s30 + $0x20] sm:$0xff]  }
 0x2ad   : > { %8669 = vmatpush3.bf16.msra.mxu1 %v9467_v46 }
 0x2ae   : > { %v2285_v21 = vpop.f32.mrf.mxu1  ;;  %8670 = vmatprep.subr.bf16.mxu1 %v12889_v2 }
 0x2af   : > { %v2296_v22 = vpack.c.bf16 %v2285_v21, %v2281_v15  ;;  %v9469_v15 = vld [vmem:[%s13109_s30 + $0x28] sm:$0xff]  }
 0x2b0   : > { %v2287_v43 = vpop.f32.mrf.mxu1 }
 0x2b1   : > { %v2297_v47 = vpack.c.bf16 %v2287_v43, %v2283_v52  ;;  %8671 = vmatpush3.bf16.msra.mxu1 %v9468_v58 }
 0x2b2   : > { %8672 = vmatprep.subr.bf16.mxu1 %v12889_v2 }
 0x2b3   : > { %2456 = vmatprep.mubr.bf16.mxu1 %v2297_v47 }
 0x2b4   : > { %2457 = vmatmul.mubr.bf16.gmra.mxu1 %v2296_v22 }
 0x2b5   : > { %8684 = vmatprep.mubr.msk.bf16.mxu1 %vm10069_vm0, %v12889_v2  ;;  %8673 = vmatpush3.bf16.msra.mxu1 %v9469_v15 }
 0x2b6   : > { %8674 = vmatprep.subr.bf16.mxu1 %v12889_v2 }
 0x2b9   : > { %8675 = vmatpush3.bf16.msra.mxu1 %v9470_v13 }
 0x2ba   : > { %8676 = vmatprep.subr.bf16.mxu1 %v12889_v2 }
 0x2bd   : > { %8677 = vmatpush3.bf16.msra.mxu1 %v9471_v10 }
 0x2be   : > { %8678 = vmatprep.subr.bf16.mxu1 %v12889_v2 }
 0x2c1   : > { %8679 = vmatpush3.bf16.msra.mxu1 %v9472_v54  ;;  %v7750_v54 = vld [vmem:[%s13138_s19] ss:$0 sm:$0xff]  ;;  %s13305_s19 = sld [smem:[#allocation49_spill]] }
 0x2c2   : > { %8680 = vmatprep.subr.bf16.mxu1 %v12889_v2 }
 0x35c   : > { %v8095_v8 = vpop.f32.mrf.mxu1 }
 0x35e   : > { %v8096_v62 = vpop.f32.mrf.mxu1 }
 0x360   : > { %v8098_v51 = vpop.f32.mrf.mxu1 }
 0x362   : > { %v8099_v61 = vpop.f32.mrf.mxu1 }
 0x364   : > { %v8101_v44 = vpop.f32.mrf.mxu1 }
 0x366   : > { %v8102_v53 = vpop.f32.mrf.mxu1 }
 0x367   : > { %v8103_v16 = vadd.f32 %v8102_v53, %v8101_v44  ;;  %v13141_v44 = vmov 0.0  }
 0x368   : > { %v8104_v37 = vpop.f32.mrf.mxu1 }
 0x36a   : > { %v8105_v52 = vpop.f32.mrf.mxu1 }
 0x36b   : > { %v8106_v7 = vadd.f32 %v8105_v52, %v8104_v37  ;;  %v10787_v37 = vadd.f32 %v8103_v16, %v7750_v54 }
 0x36c   : > { %v8107_v21 = vpop.f32.mrf.mxu1 }
 0x36d   : > { %v12907_v16 = vmax.f32 %v10787_v37, 0.0 }
 0x36e   : > { %v8108_v43 = vpop.f32.mrf.mxu1 }
 0x36f   : > { %v8109_v9 = vadd.f32 %v8108_v43, %v8107_v21 }
 0x370   : > { %v8110_v47 = vpop.f32.mrf.mxu1 }
 0x371   : > { %v10774_v56 = vadd.f32 %v8109_v9, %v7750_v54 }
 0x372   : > { %v8111_v22 = vpop.f32.mrf.mxu1 }
 0x373   : > { %v8112_v10 = vadd.f32 %v8111_v22, %v8110_v47  ;;  %v10778_v47 = vadd.f32 %v8106_v7, %v7750_v54  ;;  %v12905_v9 = vmax.f32 %v10774_v56, 0.0  ;;  %v9466_v22 = vld [vmem:[%s13140_s24] sm:$0xff]   ;;  %s13340_s24 = sld [smem:[#allocation51_spill]] }
 0x374   : > { %v8113_v46 = vpop.f32.mrf.mxu1 }
 0x375   : > { %v10770_v45 = vadd.f32 %v8112_v10, %v7750_v54 }
 0x376   : > { %v8114_v58 = vpop.f32.mrf.mxu1 }
 0x377   : > { %v8115_v15 = vadd.f32 %v8114_v58, %v8113_v46  ;;  %v8100_v58 = vadd.f32 %v8099_v61, %v8098_v51  ;;  %v12902_v21 = vmax.f32 %v10770_v45, 0.0  ;;  %v12906_v51 = vmax.f32 %v10778_v47, 0.0 }
 0x378   : > { %v8116_v13 = vpop.f32.mrf.mxu1 }
 0x379   : > { %v10768_v25 = vadd.f32 %v8115_v15, %v7750_v54  ;;  %v10792_v7 = vadd.f32 %v8100_v58, %v7750_v54  ;;  %v10799_v61 = vpack.c.bf16 %v12902_v21, %v12905_v9  ;;  %v10811_v53 = vpack.c.bf16 %v12906_v51, %v12907_v16  ;;  %v9473_v15 = vld [vmem:[%s13109_s30 + $0x8] sm:$0xff]  }
 0x37a   : > { %v8117_v2 = vpop.f32.mrf.mxu1  ;;  %8681 = vmatpush3.bf16.msra.mxu1 %v9473_v15  ;;  %v9475_v15 = vld [vmem:[%s13112_s20 + $0x38] sm:$0xff]   ;;  %v9486_v9 = vld [vmem:[%s13111_s21 + $0x60] ss:$8 sps:$4 sm:$0xff]   ;;  %v13150_v51 = vmov 0  }
 0x37b   : > { %v8118_v5 = vadd.f32 %v8117_v2, %v8116_v13  ;;  %v12901_v0 = vmax.f32 %v10768_v25, 0.0  ;;  %13142 = vst [vmem:[#allocation78_spill] sm:$0xff] %v10799_v61  ;;  %13143 = vst [vmem:[#allocation79_spill] sm:$0xff] %v10811_v53  ;;  %8682 = vmatprep.subr.bf16.mxu1 %v13141_v44  ;;  %v9474_v13 = vld [vmem:[%s13109_s30] sm:$0xff]   ;;  %s13343_s30 = sld [smem:[#allocation13_spill]] }
 0x37d   : > { %v10772_v3 = vadd.f32 %v8118_v5, %v7750_v54  ;;  %v8097_v5 = vadd.f32 %v8096_v62, %v8095_v8  ;;  %v12908_v62 = vmax.f32 %v10792_v7, 0.0 }
 0x37e   : > { %8683 = vmatpush3.bf16.msra.mxu1 %v9474_v13  ;;  %v9477_v13 = vld [vmem:[%s13112_s20 + $0x28] sm:$0xff]  }
 0x37f   : > { %v12900_v46 = vmax.f32 %v10772_v3, 0.0  ;;  %v10801_v8 = vadd.f32 %v8097_v5, %v7750_v54  ;;  %8694 = vmatprep.subr.bf16.mxu1 %v13141_v44 }
 0x381   : > { %v10785_v2 = vpack.c.bf16 %v12900_v46, %v12901_v0  ;;  %v12910_v52 = vmax.f32 %v10801_v8, 0.0  ;;  %v9476_v46 = vld [vmem:[%s13112_s20 + $0x30] sm:$0xff]  }
 0x383   : > { %13139 = vst [vmem:[#allocation77_spill] sm:$0xff] %v10785_v2  ;;  %8657 = vmatpush3.bf16.msra.mxu0 %v10785_v2  ;;  %v10820_v43 = vpack.c.bf16 %v12908_v62, %v12910_v52  ;;  %v9489_v62 = vld [vmem:[%s13111_s21 + $0x50] ss:$8 sps:$4 sm:$0xff]  }
 0x384   : > { %8658 = vmatprep.subr.bf16.mxu0 %v13141_v44 }
 0x385   : > { %13144 = vst [vmem:[#allocation80_spill] sm:$0xff] %v10820_v43 }
 0x387   : > { %8659 = vmatpush3.bf16.msra.mxu0 %v10799_v61 }
 0x388   : > { %8660 = vmatprep.subr.bf16.mxu0 %v13141_v44 }
 0x38b   : > { %8661 = vmatpush3.bf16.msra.mxu0 %v10811_v53 }
 0x38c   : > { %8662 = vmatprep.subr.bf16.mxu0 %v13141_v44 }
 0x38f   : > { %8663 = vmatpush3.bf16.msra.mxu0 %v10820_v43  ;;  %v13160_v43 = vmax.f32 %v10460_v50, 0.0 }
 0x390   : > { %8688 = vmatprep.subr.bf16.mxu0 %v13141_v44 }
 0x392   : > { %8665 = vmatmul.mubr.msk.bf16.vlgmr.msra.gmra.mxu0 %vm2482_vm1, %v9466_v22 }
 0x393   : > { %8690 = vmatprep.mubr.msk.bf16.mxu0 %vm10069_vm0, %v13141_v44 }
 0x452   : > { %v2520_v10 = vpop.f32.mrf.mxu0 }
 0x454   : > { %v8666_v54 = vpop.f32.mrf.mxu0 }
 0x455   : > { %v9479_v54 = vld [vmem:[%s13112_s20 + $0x18] sm:$0xff]  }
 0x456   : > { %v2523_v58 = vpop.f32.mrf.mxu0 }
 0x457   : > { %v2527_v5 = vpack.c.bf16 %v2523_v58, %v2520_v10  ;;  %v9478_v10 = vld [vmem:[%s13112_s20 + $0x20] sm:$0xff]   ;;  %v9480_v58 = vld [vmem:[%s13112_s20 + $0x10] sm:$0xff]  }
 0x458   : > { %v8667_v22 = vpop.f32.mrf.mxu0 }
 0x459   : > { %8685 = vmatmul.mubr.bf16.vlgmr.msra.gmra.mxu1 %v2527_v5  ;;  %v9481_v5 = vld [vmem:[%s13112_s20 + $0x8] sm:$0xff]   ;;  %v7769_v22 = vld [vmem:[%s13145_s6] ss:$0 sm:$0xff]  ;;  %s12967_s6 = scalar_lea.vmem [#allocation3], %s11421_s3 }
 0x45a   : > { %8710 = vmatprep.mubr.msk.bf16.mxu1 %vm10069_vm0, %v13141_v44  ;;  %8695 = vmatpush3.bf16.msra.mxu1 %v9475_v15 }
 0x45b   : > { %8696 = vmatprep.subr.bf16.mxu1 %v13141_v44 }
 0x45e   : > { %8697 = vmatpush3.bf16.msra.mxu1 %v9476_v46  ;;  %v9482_v46 = vld [vmem:[%s13112_s20] sm:$0xff]   ;;  %s13306_s20 = sld [smem:[#allocation54_spill]] }
 0x45f   : > { %8698 = vmatprep.subr.bf16.mxu1 %v13141_v44 }
 0x462   : > { %8699 = vmatpush3.bf16.msra.mxu1 %v9477_v13 }
 0x463   : > { %8700 = vmatprep.subr.bf16.mxu1 %v13141_v44 }
 0x466   : > { %8701 = vmatpush3.bf16.msra.mxu1 %v9478_v10 }
 0x467   : > { %8702 = vmatprep.subr.bf16.mxu1 %v13141_v44 }
 0x46a   : > { %8703 = vmatpush3.bf16.msra.mxu1 %v9479_v54 }
 0x46b   : > { %8704 = vmatprep.subr.bf16.mxu1 %v13141_v44 }
 0x46e   : > { %8705 = vmatpush3.bf16.msra.mxu1 %v9480_v58 }
 0x46f   : > { %8706 = vmatprep.subr.bf16.mxu1 %v13141_v44 }
 0x472   : > { %8707 = vmatpush3.bf16.msra.mxu1 %v9481_v5 }
 0x473   : > { %8708 = vmatprep.subr.bf16.mxu1 %v13141_v44 }
 0x476   : > { %8709 = vmatpush3.bf16.msra.mxu1 %v9482_v46 }
 0x519   : > { %v2616_v15 = vpop.f32.mrf.mxu1 }
 0x51a   : > { %v10850_v10 = vadd.f32 %v7769_v22, %v2616_v15  ;;  %v1898_v15 = vld [vmem:[%s13146_s12] sm:$0x3]  ;;  %s12980_s12 = scalar_lea.vmem [#allocation7], %s11421_s3 }
 0x51b   : > { %v8686_v13 = vpop.f32.mrf.mxu1 }
 0x51c   : > { %13147 = vst [vmem:[#allocation81_spill] sm:$0xff] %v10850_v10  ;;  %v12904_v21 = vmax.f32 %v10850_v10, 0.0  ;;  %v9507_v13 = vld [vmem:[%s13114_s4 + $0x38] sm:$0xff]  }
 0x51d   : > { %v2619_v54 = vpop.f32.mrf.mxu1 }
 0x51e   : > { %v10852_v0 = vadd.f32 %v7769_v22, %v2619_v54  ;;  %v9485_v22 = vld [vmem:[%s13111_s21 + $0x74] ss:$8 sps:$4 sm:$0xff]  }
 0x51f   : > { %v8687_v58 = vpop.f32.mrf.mxu1  ;;  %3092 = vmatprep.subr.bf16.mxu1 %v9485_v22  ;;  %v9508_v54 = vld [vmem:[%s13114_s4 + $0x30] sm:$0xff]   ;;  %v9488_v22 = vld [vmem:[%s13111_s21 + $0x64] ss:$8 sps:$4 sm:$0xff]  }
 0x520   : > { %13148 = vst [vmem:[#allocation82_spill] sm:$0xff] %v10852_v0  ;;  %v12903_v5 = vmax.f32 %v10852_v0, 0.0  ;;  %v9509_v58 = vld [vmem:[%s13114_s4 + $0x28] sm:$0xff]  }
 0x522   : > { %v10860_v46 = vpack.c.bf16 %v12903_v5, %v12904_v21  ;;  %v9483_v5 = vld [vmem:[%s13111_s21 + $0x70] ss:$8 sps:$4 sm:$0xff]  }
 0x524   : > { %13149 = vst [vmem:[#allocation83_spill] sm:$0xff] %v10860_v46  ;;  %8689 = vmatpush3.bf16.msra.mxu0 %v10860_v46 }
 0x525   : > { %8714 = vmatprep.subr.bf16.mxu0 %v13141_v44 }
 0x527   : > { %8691 = vmatmul.mubr.msk.bf16.vlgmr.msra.gmra.mxu0 %vm2626_vm2, %v1898_v15 }
 0x528   : > { %8730 = vmatprep.mubr.msk.bf16.mxu0 %vm10069_vm0, %v13141_v44  ;;  %8715 = vmatpush3.bf16.msra.mxu0 %v9507_v13 }
 0x529   : > { %8716 = vmatprep.subr.bf16.mxu0 %v13141_v44 }
 0x52c   : > { %8717 = vmatpush3.bf16.msra.mxu0 %v9508_v54 }
 0x52d   : > { %8718 = vmatprep.subr.bf16.mxu0 %v13141_v44 }
 0x530   : > { %8719 = vmatpush3.bf16.msra.mxu0 %v9509_v58  ;;  %v9491_v58 = vld [vmem:[%s13111_s21 + $0x54] ss:$8 sps:$4 sm:$0xff]  }
 0x531   : > { %8720 = vmatprep.subr.bf16.mxu0 %v13141_v44 }
 0x5e7   : > { %v2664_v15 = vpop.f32.mrf.mxu0 }
 0x5e8   : > { %v2670_v21 = vpack.c.bf16 %v2664_v15, %v2664_v15  ;;  %v9494_v15 = vld [vmem:[%s13111_s21 + $0x44] ss:$8 sps:$4 sm:$0xff]  }
 0x5e9   : > { %v8692_v13 = vpop.f32.mrf.mxu0 }
 0x5ea   : > { %8711 = vmatmul.mubr.bf16.vlgmr.msra.gmra.mxu1 %v2670_v21  ;;  %v9492_v21 = vld [vmem:[%s13111_s21 + $0x40] ss:$8 sps:$4 sm:$0xff]   ;;  %v9495_v13 = vld [vmem:[%s13111_s21 + $0x30] ss:$8 sps:$4 sm:$0xff]  }
 0x5eb   : > { %3093 = vmatpush1.bf16.msra.mxu1 %v9483_v5  ;;  %v2667_v54 = vpop.f32.mrf.mxu0  ;;  %3124 = vmatprep.mubr.bf16.mxu1 %v13150_v51  ;;  %v9497_v5 = vld [vmem:[%s13111_s21 + $0x34] ss:$8 sps:$4 sm:$0xff]  }
 0x5ec   : > { %3094 = vmatprep.subr.bf16.mxu1 %v9488_v22  ;;  %v9500_v22 = vld [vmem:[%s13111_s21 + $0x24] ss:$8 sps:$4 sm:$0xff]   ;;  %v9501_v54 = vld [vmem:[%s13111_s21 + $0x10] ss:$8 sps:$4 sm:$0xff]  }
 0x5ed   : > { %v8693_v16 = vpop.f32.mrf.mxu0 }
 0x5ee   : > { %v9498_v16 = vld [vmem:[%s13111_s21 + $0x20] ss:$8 sps:$4 sm:$0xff]  }
 0x5ef   : > { %3095 = vmatpush1.bf16.msra.mxu1 %v9486_v9  ;;  %v9503_v9 = vld [vmem:[%s13111_s21 + $0x14] ss:$8 sps:$4 sm:$0xff]  }
 0x5f0   : > { %3096 = vmatprep.subr.bf16.mxu1 %v9491_v58  ;;  %v9506_v58 = vld [vmem:[%s13111_s21 + $0x4] ss:$8 sps:$4 sm:$0xff]  }
 0x5f3   : > { %3097 = vmatpush1.bf16.msra.mxu1 %v9489_v62  ;;  %v9504_v62 = vld [vmem:[%s13111_s21] ss:$8 sps:$4 sm:$0xff]   ;;  %s13339_s21 = sld [smem:[#allocation52_spill]] }
 0x5f4   : > { %3098 = vmatprep.subr.bf16.mxu1 %v9494_v15  ;;  %v2865_v15 = vld [vmem:[%s10892_s11] sm:$0xff] }
 0x5f7   : > { %3099 = vmatpush1.bf16.msra.mxu1 %v9492_v21  ;;  %v2866_v21 = vld [vmem:[%s10892_s11 + $0x8] sm:$0xff] }
 0x5f8   : > { %3100 = vmatprep.subr.bf16.mxu1 %v9497_v5  ;;  %v2993_v5 = vpack.c.bf16 %v2866_v21, %v2865_v15  ;;  %v2872_v15 = vld [vmem:[%s10892_s11 + $0x38] sm:$0xff] }
 0x5fb   : > { %3101 = vmatpush1.bf16.msra.mxu1 %v9495_v13  ;;  %v2867_v13 = vld [vmem:[%s10892_s11 + $0x10] sm:$0xff] }
 0x5fc   : > { %3102 = vmatprep.subr.bf16.mxu1 %v9500_v22  ;;  %v2868_v22 = vld [vmem:[%s10892_s11 + $0x18] sm:$0xff] }
 0x5ff   : > { %3103 = vmatpush1.bf16.msra.mxu1 %v9498_v16  ;;  %v2994_v16 = vpack.c.bf16 %v2868_v22, %v2867_v13  ;;  %v2874_v13 = vld [vmem:[%s10892_s11 + $0x48] sm:$0xff] }
 0x600   : > { %3104 = vmatprep.subr.bf16.mxu1 %v9503_v9  ;;  %v2869_v9 = vld [vmem:[%s10892_s11 + $0x20] sm:$0xff] }
 0x603   : > { %3105 = vmatpush1.bf16.msra.mxu1 %v9501_v54  ;;  %v2870_v54 = vld [vmem:[%s10892_s11 + $0x28] sm:$0xff] }
 0x604   : > { %3106 = vmatprep.subr.bf16.mxu1 %v9506_v58  ;;  %v2995_v58 = vpack.c.bf16 %v2870_v54, %v2869_v9  ;;  %v2876_v9 = vld [vmem:[%s10892_s11 + $0x58] sm:$0xff]  ;;  %v9510_v54 = vld [vmem:[%s13114_s4 + $0x20] sm:$0xff]  }
 0x605   : > { %8721 = vmatpush3.bf16.msra.mxu0 %v9510_v54  ;;  %v2880_v54 = vld [vmem:[%s10892_s11 + $0x78] sm:$0xff] }
 0x606   : > { %8722 = vmatprep.subr.bf16.mxu0 %v13141_v44 }
 0x607   : > { %3107 = vmatpush1.bf16.msra.mxu1 %v9504_v62  ;;  %v2871_v62 = vld [vmem:[%s10892_s11 + $0x30] sm:$0xff] }
 0x608   : > { %8734 = vmatprep.subr.bf16.mxu1 %v13141_v44  ;;  %v2996_v21 = vpack.c.bf16 %v2872_v15, %v2871_v62  ;;  %v9511_v62 = vld [vmem:[%s13114_s4 + $0x18] sm:$0xff]   ;;  %v2877_v15 = vld [vmem:[%s10892_s11 + $0x60] sm:$0xff] }
 0x609   : > { %8723 = vmatpush3.bf16.msra.mxu0 %v9511_v62  ;;  %v7779_v62 = vld [vmem:[%s13152_s13] ss:$0 sm:$0xff] }
 0x60a   : > { %3125 = vmatmul.mubr.bf16.vlgmr.msra.gmra.mxu1 %v2993_v5  ;;  %v2873_v5 = vld [vmem:[%s10892_s11 + $0x40] sm:$0xff]  ;;  %8724 = vmatprep.subr.bf16.mxu0 %v13141_v44 }
 0x60b   : > { %3134 = vmatprep.mubr.bf16.mxu1 %v13150_v51  ;;  %v2997_v22 = vpack.c.bf16 %v2874_v13, %v2873_v5  ;;  %v9512_v5 = vld [vmem:[%s13114_s4 + $0x10] sm:$0xff]  }
 0x60d   : > { %8725 = vmatpush3.bf16.msra.mxu0 %v9512_v5 }
 0x60e   : > { %8726 = vmatprep.subr.bf16.mxu0 %v13141_v44 }
 0x612   : > { %3135 = vmatmul.mubr.bf16.gmra.mxu1 %v2994_v16  ;;  %v2875_v16 = vld [vmem:[%s10892_s11 + $0x50] sm:$0xff] }
 0x613   : > { %3144 = vmatprep.mubr.bf16.mxu1 %v13150_v51 }
 0x61a   : > { %3145 = vmatmul.mubr.bf16.gmra.mxu1 %v2995_v58  ;;  %v2998_v58 = vpack.c.bf16 %v2876_v9, %v2875_v16  ;;  %v9514_v16 = vld [vmem:[%s13114_s4] sm:$0xff]   ;;  %v2879_v9 = vld [vmem:[%s10892_s11 + $0x70] sm:$0xff] }
 0x61b   : > { %3154 = vmatprep.mubr.bf16.mxu1 %v13150_v51 }
 0x622   : > { %3155 = vmatmul.mubr.bf16.gmra.mxu1 %v2996_v21  ;;  %v2878_v21 = vld [vmem:[%s10892_s11 + $0x68] sm:$0xff]  ;;  %s3924_s11 = sld [smem:[#allocation2]] }
 0x623   : > { %3164 = vmatprep.mubr.bf16.mxu1 %v13150_v51  ;;  %v2999_v13 = vpack.c.bf16 %v2878_v21, %v2877_v15 }
 0x628   : > { %s3927_s13 = ssub.f32 1.0, %s3924_s11 }
 0x62a   : > { %3165 = vmatmul.mubr.bf16.gmra.mxu1 %v2997_v22  ;;  %v9513_v22 = vld [vmem:[%s13114_s4 + $0x8] sm:$0xff]  }
 0x62b   : > { %3174 = vmatprep.mubr.bf16.mxu1 %v13150_v51  ;;  %8727 = vmatpush3.bf16.msra.mxu0 %v9513_v22 }
 0x62c   : > { %8728 = vmatprep.subr.bf16.mxu0 %v13141_v44 }
 0x62f   : > { %8729 = vmatpush3.bf16.msra.mxu0 %v9514_v16 }
 0x632   : > { %3175 = vmatmul.mubr.bf16.gmra.mxu1 %v2998_v58  ;;  %v3000_v58 = vpack.c.bf16 %v2880_v54, %v2879_v9 }
 0x633   : > { %3184 = vmatprep.mubr.bf16.mxu1 %v13150_v51 }
 0x63a   : > { %3185 = vmatmul.mubr.bf16.gmra.mxu1 %v2999_v13 }
 0x63b   : > { %3194 = vmatprep.mubr.bf16.mxu1 %v13150_v51 }
 0x642   : > { %3195 = vmatmul.mubr.bf16.gmra.mxu1 %v3000_v58 }
 0x643   : > { %8742 = vmatprep.mubr.msk.bf16.mxu1 %vm10069_vm0, %v13141_v44 }
 0x6aa   : > { %v2759_v15 = vpop.f32.mrf.mxu1 }
 0x6ab   : > { %v2760_v21 = vadd.f32 %v7779_v62, %v2759_v15  ;;  %v2897_v62 = vld [vmem:[%s13153_s5] sm:$0x3]  ;;  %v13155_v15 = vsub.s32 0, %v10446_v42  ;;  %s13238_s5 = sld [smem:[#allocation31_spill]] }
 0x6ac   : > { %v8712_v5 = vpop.f32.mrf.mxu1 }
 0x6ad   : > { %v10931_v13 = vmax.f32 %v2760_v21, 0.0  ;;  %v10939_v21 = vrot.slane %v2897_v62, %v13155_v15  ;;  %v13156_v5 = vsub.s32 1, %v10446_v42 }
 0x6ae   : > { %v2762_v22 = vpop.f32.mrf.mxu1 }
 0x6af   : > { %13154 = vst [vmem:[#allocation84_spill] sm:$0xff] %v10931_v13  ;;  %v2767_v52 = vsel %vm2766_vm3, %v10931_v13, 0.0  ;;  %v10946_v22 = vstv %s3924_s11  ;;  %s13242_s11 = sld [smem:[#allocation30_spill]] }
 0x6b0   : > { %v2768_v30 = vrot.slane %v2767_v52, 4  ;;  %v8713_v55 = vpop.f32.mrf.mxu1  ;;  %v3963_v46 = vmul.f32 %v10946_v22, %v13160_v43 }
 0x6b1   : > { %v10943_v55 = vrot.slane %v2897_v62, %v13156_v5  ;;  %v13158_v5 = vmax.f32 %v10697_v6, 0.0 }
 0x6b2   : > { %v2769_v9 = vadd.f32 %v2768_v30, %v2767_v52 }
 0x6b4   : > { %v2770_v16 = vrot.slane %v2769_v9, 2 }
 0x6b6   : > { %v2771_v54 = vadd.f32 %v2770_v16, %v2769_v9 }
 0x6b8   : > { %v2772_v58 = vrot.slane %v2771_v54, 1 }
 0x6ba   : > { %v2773_v24 = vadd.f32 %v2772_v58, %v2771_v54  ;;  %v13157_v54 = vmax.f32 %v10457_v48, 0.0 }
 0x6bc   : > { %v2775_v2 = vmul.f32 0.25, %v2773_v24  ;;  %v10948_v24 = vstv %s3927_s13  ;;  %v3961_v58 = vmul.f32 %v10946_v22, %v13157_v54  ;;  %s13259_s13 = sld [smem:[#allocation27_spill]] }
 0x6be   : > { %v2776_v61 = vpack.c.bf16 %v2775_v2, %v2775_v2 }
 0x6c0   : > { %8731 = vmatmul.mubr.bf16.vlgmr.msra.gmra.mxu0 %v2776_v61 }
 0x6c1   : > { %3309 = vmatprep.mubr.bf16.mxu0 %v13150_v51 }
 0x6ca   : > { %v3126_v30 = vpop.f32.mrf.mxu1 }
 0x6cb   : > { %v3127_v52 = vadd.f32 %v3126_v30, %v10939_v21  ;;  %v3962_v30 = vmul.f32 %v10946_v22, %v13158_v5 }
 0x6cc   : > { %v3128_v2 = vpop.f32.mrf.mxu1 }
 0x6cd   : > { %v3205_v61 = vmax.f32 %v3127_v52, 0.0  ;;  %v10951_v9 = vadd.f32 %v3128_v2, %v10943_v55 }
 0x6ce   : > { %v3130_v16 = vpop.f32.mrf.mxu1 }
 0x6cf   : > { %v3993_v42 = vmul.f32 %v10948_v24, %v3205_v61  ;;  %v12921_v62 = vmax.f32 %v10951_v9, 0.0  ;;  %v3131_v15 = vadd.f32 %v3130_v16, %v10939_v21 }
 0x6d0   : > { %v3132_v53 = vpop.f32.mrf.mxu1 }
 0x6d1   : > { %v10962_v52 = vadd.f32 %v3993_v42, %v3961_v58  ;;  %v3994_v2 = vmul.f32 %v10948_v24, %v12921_v62  ;;  %v3207_v48 = vmax.f32 %v3131_v15, 0.0  ;;  %v10968_v54 = vadd.f32 %v3132_v53, %v10943_v55 }
 0x6d2   : > { %v3136_v16 = vpop.f32.mrf.mxu1  ;;  %v13163_v15 = vmax.f32 %v10684_v63, 0.0 }
 0x6d3   : > { %13159 = vst [vmem:[#allocation85_spill] sm:$0xff] %v10962_v52  ;;  %v10973_v13 = vadd.f32 %v3994_v2, %v3962_v30  ;;  %v10975_v6 = vpack.c.bf16 %v3207_v48, %v3205_v61  ;;  %v3995_v58 = vmul.f32 %v10948_v24, %v3207_v48  ;;  %v12923_v42 = vmax.f32 %v10968_v54, 0.0 }
 0x6d4   : > { %v3137_v5 = vadd.f32 %v3136_v16, %v10939_v21  ;;  %v3138_v62 = vpop.f32.mrf.mxu1  ;;  %v3964_v53 = vmul.f32 %v10946_v22, %v13163_v15  ;;  %v13167_v15 = vmax.f32 %v10671_v60, 0.0 }
 0x6d5   : > { %13161 = vst [vmem:[#allocation86_spill] sm:$0xff] %v10973_v13  ;;  %13162 = vst [vmem:[#allocation87_spill] sm:$0xff] %v10975_v6  ;;  %v10983_v0 = vadd.f32 %v3995_v58, %v3963_v46  ;;  %v3996_v50 = vmul.f32 %v10948_v24, %v12923_v42  ;;  %v10989_v43 = vadd.f32 %v3138_v62, %v10943_v55  ;;  %v13166_v46 = vmax.f32 %v10475_v57, 0.0 }
 0x6d6   : > { %v3209_v61 = vmax.f32 %v3137_v5, 0.0  ;;  %v3140_v30 = vpop.f32.mrf.mxu1  ;;  %v3966_v62 = vmul.f32 %v10946_v22, %v13167_v15  ;;  %v13172_v57 = vmax.f32 %v10654_v1, 0.0 }
 0x6d7   : > { %13164 = vst [vmem:[#allocation88_spill] sm:$0xff] %v10983_v0  ;;  %v12926_v48 = vmax.f32 %v10989_v43, 0.0  ;;  %v3141_v63 = vadd.f32 %v3140_v30, %v10939_v21  ;;  %v10995_v16 = vadd.f32 %v3996_v50, %v3964_v53  ;;  %v3965_v58 = vmul.f32 %v10946_v22, %v13166_v46 }
 0x6d8   : > { %v3997_v5 = vmul.f32 %v10948_v24, %v3209_v61  ;;  %v3142_v42 = vpop.f32.mrf.mxu1  ;;  %v13168_v53 = vmax.f32 %v10478_v59, 0.0  ;;  %v3968_v59 = vmul.f32 %v10946_v22, %v13172_v57  ;;  %v13175_v57 = vmax.f32 %v10665_v19, 0.0 }
 0x6d9   : > { %13165 = vst [vmem:[#allocation89_spill] sm:$0xff] %v10995_v16  ;;  %v3998_v2 = vmul.f32 %v10948_v24, %v12926_v48  ;;  %v3211_v52 = vmax.f32 %v3141_v63, 0.0  ;;  %v11008_v30 = vadd.f32 %v3142_v42, %v10943_v55 }
 0x6da   : > { %v3967_v60 = vmul.f32 %v10946_v22, %v13168_v53  ;;  %v11015_v50 = vadd.f32 %v3997_v5, %v3965_v58  ;;  %v3146_v46 = vpop.f32.mrf.mxu1 }
 0x6db   : > { %v11017_v15 = vadd.f32 %v3998_v2, %v3966_v62  ;;  %v11019_v0 = vpack.c.bf16 %v3211_v52, %v3209_v61  ;;  %v3999_v48 = vmul.f32 %v10948_v24, %v3211_v52  ;;  %v12928_v63 = vmax.f32 %v11008_v30, 0.0 }
 0x6dc   : > { %13169 = vst [vmem:[#allocation90_spill] sm:$0xff] %v11015_v50  ;;  %v11024_v42 = vadd.f32 %v3146_v46, %v10939_v21  ;;  %v3148_v10 = vpop.f32.mrf.mxu1 }
 0x6dd   : > { %13170 = vst [vmem:[#allocation91_spill] sm:$0xff] %v11017_v15  ;;  %13171 = vst [vmem:[#allocation92_spill] sm:$0xff] %v11019_v0  ;;  %v11029_v53 = vadd.f32 %v3999_v48, %v3967_v60  ;;  %v4000_v2 = vmul.f32 %v10948_v24, %v12928_v63  ;;  %v11035_v61 = vadd.f32 %v3148_v10, %v10943_v55  ;;  %v13176_v10 = vmax.f32 %v10637_v4, 0.0 }
 0x6de   : > { %v12929_v52 = vmax.f32 %v11024_v42, 0.0  ;;  %v3150_v58 = vpop.f32.mrf.mxu1  ;;  %v3969_v60 = vmul.f32 %v10946_v22, %v13175_v57 }
 0x6df   : > { %13173 = vst [vmem:[#allocation93_spill] sm:$0xff] %v11029_v53  ;;  %v12931_v5 = vmax.f32 %v11035_v61, 0.0  ;;  %v11042_v1 = vadd.f32 %v3150_v58, %v10939_v21  ;;  %v11044_v48 = vadd.f32 %v4000_v2, %v3968_v59  ;;  %v3970_v46 = vmul.f32 %v10946_v22, %v13176_v10 }
 0x6e0   : > { %v4001_v63 = vmul.f32 %v10948_v24, %v12929_v52  ;;  %v3152_v62 = vpop.f32.mrf.mxu1  ;;  %v13178_v10 = vmax.f32 %v10643_v18, 0.0 }
 0x6e1   : > { %13174 = vst [vmem:[#allocation94_spill] sm:$0xff] %v11044_v48  ;;  %v4002_v58 = vmul.f32 %v10948_v24, %v12931_v5  ;;  %v12934_v59 = vmax.f32 %v11042_v1, 0.0  ;;  %v11060_v2 = vadd.f32 %v3152_v62, %v10943_v55 }
 0x6e2   : > { %v11064_v4 = vadd.f32 %v4001_v63, %v3969_v60  ;;  %v3156_v57 = vpop.f32.mrf.mxu1  ;;  %v3971_v52 = vmul.f32 %v10946_v22, %v13178_v10  ;;  %v13180_v63 = vmax.f32 %v10620_v40, 0.0 }
 0x6e3   : > { %v11069_v50 = vadd.f32 %v4002_v58, %v3970_v46  ;;  %v4003_v5 = vmul.f32 %v10948_v24, %v12934_v59  ;;  %v12935_v53 = vmax.f32 %v11060_v2, 0.0  ;;  %v11076_v62 = vadd.f32 %v3156_v57, %v10939_v21 }
 0x6e4   : > { %13177 = vst [vmem:[#allocation95_spill] sm:$0xff] %v11064_v4  ;;  %v3158_v13 = vpop.f32.mrf.mxu1  ;;  %v3972_v60 = vmul.f32 %v10946_v22, %v13180_v63 }
 0x6e5   : > { %13179 = vst [vmem:[#allocation96_spill] sm:$0xff] %v11069_v50  ;;  %v11081_v19 = vadd.f32 %v4003_v5, %v3971_v52  ;;  %v4004_v18 = vmul.f32 %v10948_v24, %v12935_v53  ;;  %v11087_v46 = vadd.f32 %v3158_v13, %v10943_v55  ;;  %v12937_v58 = vmax.f32 %v11076_v62, 0.0 }
 0x6e6   : > { %v3160_v10 = vpop.f32.mrf.mxu1  ;;  %v13183_v5 = vmax.f32 %v10631_v36, 0.0  ;;  %v13184_v13 = vmax.f32 %v10604_v38, 0.0 }
 0x6e7   : > { %13181 = vst [vmem:[#allocation97_spill] sm:$0xff] %v11081_v19  ;;  %v12939_v59 = vmax.f32 %v11087_v46, 0.0  ;;  %v11094_v40 = vadd.f32 %v3160_v10, %v10939_v21  ;;  %v11096_v52 = vadd.f32 %v4004_v18, %v3972_v60  ;;  %v4005_v15 = vmul.f32 %v10948_v24, %v12937_v58 }
 0x6e8   : > { %v3973_v63 = vmul.f32 %v10946_v22, %v13183_v5  ;;  %v3974_v53 = vmul.f32 %v10946_v22, %v13184_v13  ;;  %v3162_v57 = vpop.f32.mrf.mxu1  ;;  %v13186_v13 = vmax.f32 %v10609_v34, 0.0 }
 0x6e9   : > { %13182 = vst [vmem:[#allocation98_spill] sm:$0xff] %v11096_v52  ;;  %v4006_v10 = vmul.f32 %v10948_v24, %v12939_v59  ;;  %v12942_v60 = vmax.f32 %v11094_v40, 0.0  ;;  %v11112_v18 = vadd.f32 %v3162_v57, %v10943_v55 }
 0x6ea   : > { %v11116_v38 = vadd.f32 %v4005_v15, %v3973_v63  ;;  %v3166_v5 = vpop.f32.mrf.mxu1  ;;  %v3975_v58 = vmul.f32 %v10946_v22, %v13186_v13  ;;  %v13188_v15 = vmax.f32 %v10589_v23, 0.0 }
 0x6eb   : > { %v11121_v4 = vadd.f32 %v4006_v10, %v3974_v53  ;;  %v4007_v59 = vmul.f32 %v10948_v24, %v12942_v60  ;;  %v12943_v19 = vmax.f32 %v11112_v18, 0.0  ;;  %v11128_v57 = vadd.f32 %v3166_v5, %v10939_v21 }
 0x6ec   : > { %13185 = vst [vmem:[#allocation99_spill] sm:$0xff] %v11116_v38  ;;  %v3168_v48 = vpop.f32.mrf.mxu1  ;;  %v3976_v63 = vmul.f32 %v10946_v22, %v13188_v15 }
 0x6ed   : > { %13187 = vst [vmem:[#allocation100_spill] sm:$0xff] %v11121_v4  ;;  %v11133_v36 = vadd.f32 %v4007_v59, %v3975_v58  ;;  %v4008_v34 = vmul.f32 %v10948_v24, %v12943_v19  ;;  %v11139_v53 = vadd.f32 %v3168_v48, %v10943_v55  ;;  %v12945_v10 = vmax.f32 %v11128_v57, 0.0 }
 0x6ee   : > { %v3170_v13 = vpop.f32.mrf.mxu1  ;;  %v13191_v58 = vmax.f32 %v10599_v11, 0.0  ;;  %v13192_v48 = vmax.f32 %v10574_v12, 0.0 }
 0x6ef   : > { %13189 = vst [vmem:[#allocation101_spill] sm:$0xff] %v11133_v36  ;;  %v12947_v60 = vmax.f32 %v11139_v53, 0.0  ;;  %v11146_v23 = vadd.f32 %v3170_v13, %v10939_v21  ;;  %v11148_v59 = vadd.f32 %v4008_v34, %v3976_v63  ;;  %v4009_v50 = vmul.f32 %v10948_v24, %v12945_v10 }
 0x6f0   : > { %v3977_v15 = vmul.f32 %v10946_v22, %v13191_v58  ;;  %v3978_v19 = vmul.f32 %v10946_v22, %v13192_v48  ;;  %v3172_v5 = vpop.f32.mrf.mxu1  ;;  %v13194_v48 = vmax.f32 %v10579_v20, 0.0 }
 0x6f1   : > { %13190 = vst [vmem:[#allocation102_spill] sm:$0xff] %v11148_v59  ;;  %v4010_v13 = vmul.f32 %v10948_v24, %v12947_v60  ;;  %v12950_v63 = vmax.f32 %v11146_v23, 0.0  ;;  %v11164_v34 = vadd.f32 %v3172_v5, %v10943_v55 }
 0x6f2   : > { %v11168_v12 = vadd.f32 %v4009_v50, %v3977_v15  ;;  %v3176_v58 = vpop.f32.mrf.mxu1  ;;  %v3979_v10 = vmul.f32 %v10946_v22, %v13194_v48  ;;  %v13196_v50 = vmax.f32 %v10558_v14, 0.0 }
 0x6f3   : > { %v11173_v38 = vadd.f32 %v4010_v13, %v3978_v19  ;;  %v4011_v60 = vmul.f32 %v10948_v24, %v12950_v63  ;;  %v12951_v36 = vmax.f32 %v11164_v34, 0.0  ;;  %v11180_v5 = vadd.f32 %v3176_v58, %v10939_v21 }
 0x6f4   : > { %13193 = vst [vmem:[#allocation103_spill] sm:$0xff] %v11168_v12  ;;  %v3178_v52 = vpop.f32.mrf.mxu1  ;;  %v3980_v15 = vmul.f32 %v10946_v22, %v13196_v50 }
 0x6f5   : > { %13195 = vst [vmem:[#allocation104_spill] sm:$0xff] %v11173_v38  ;;  %v11185_v11 = vadd.f32 %v4011_v60, %v3979_v10  ;;  %v4012_v20 = vmul.f32 %v10948_v24, %v12951_v36  ;;  %v11191_v19 = vadd.f32 %v3178_v52, %v10943_v55  ;;  %v12953_v13 = vmax.f32 %v11180_v5, 0.0 }
 0x6f6   : > { %v3180_v48 = vpop.f32.mrf.mxu1  ;;  %v13199_v10 = vmax.f32 %v10569_v17, 0.0  ;;  %v13200_v52 = vmax.f32 %v10538_v41, 0.0 }
 0x6f7   : > { %13197 = vst [vmem:[#allocation105_spill] sm:$0xff] %v11185_v11  ;;  %v12955_v63 = vmax.f32 %v11191_v19, 0.0  ;;  %v11198_v14 = vadd.f32 %v3180_v48, %v10939_v21  ;;  %v11200_v60 = vadd.f32 %v4012_v20, %v3980_v15  ;;  %v4013_v4 = vmul.f32 %v10948_v24, %v12953_v13 }
 0x6f8   : > { %v3981_v50 = vmul.f32 %v10946_v22, %v13199_v10  ;;  %v3982_v36 = vmul.f32 %v10946_v22, %v13200_v52  ;;  %v3182_v58 = vpop.f32.mrf.mxu1  ;;  %v13202_v52 = vmax.f32 %v10548_v49, 0.0 }
 0x6f9   : > { %13198 = vst [vmem:[#allocation106_spill] sm:$0xff] %v11200_v60  ;;  %v4014_v48 = vmul.f32 %v10948_v24, %v12955_v63  ;;  %v12958_v15 = vmax.f32 %v11198_v14, 0.0  ;;  %v11216_v20 = vadd.f32 %v3182_v58, %v10943_v55 }
 0x6fa   : > { %v11220_v41 = vadd.f32 %v4013_v4, %v3981_v50  ;;  %v3186_v10 = vpop.f32.mrf.mxu1  ;;  %v3983_v13 = vmul.f32 %v10946_v22, %v13202_v52  ;;  %v13204_v4 = vmax.f32 %v10528_v35, 0.0 }
 0x6fb   : > { %v11225_v12 = vadd.f32 %v4014_v48, %v3982_v36  ;;  %v4015_v63 = vmul.f32 %v10948_v24, %v12958_v15  ;;  %v12960_v11 = vmax.f32 %v11216_v20, 0.0  ;;  %v11232_v58 = vadd.f32 %v3186_v10, %v10939_v21 }
 0x6fc   : > { %13201 = vst [vmem:[#allocation107_spill] sm:$0xff] %v11220_v41  ;;  %v3188_v59 = vpop.f32.mrf.mxu1  ;;  %v3984_v50 = vmul.f32 %v10946_v22, %v13204_v4  ;;  %v13208_v4 = vmax.f32 %v10518_v31, 0.0 }
 0x6fd   : > { %13203 = vst [vmem:[#allocation108_spill] sm:$0xff] %v11225_v12  ;;  %v11237_v17 = vadd.f32 %v4015_v63, %v3983_v13  ;;  %v4016_v49 = vmul.f32 %v10948_v24, %v12960_v11  ;;  %v3189_v36 = vadd.f32 %v3188_v59, %v10943_v55  ;;  %v3229_v48 = vmax.f32 %v11232_v58, 0.0 }
 0x6fe   : > { %v3190_v52 = vpop.f32.mrf.mxu1  ;;  %v13207_v63 = vmax.f32 %v10534_v39, 0.0  ;;  %v3986_v11 = vmul.f32 %v10946_v22, %v13208_v4 }
 0x6ff   : > { %13205 = vst [vmem:[#allocation109_spill] sm:$0xff] %v11237_v17  ;;  %v3230_v15 = vmax.f32 %v3189_v36, 0.0  ;;  %v3191_v38 = vadd.f32 %v3190_v52, %v10939_v21  ;;  %v11247_v35 = vadd.f32 %v4016_v49, %v3984_v50  ;;  %v4017_v59 = vmul.f32 %v10948_v24, %v3229_v48 }
 0x700   : > { %v3985_v13 = vmul.f32 %v10946_v22, %v13207_v63  ;;  %v3192_v58 = vpop.f32.mrf.mxu1  ;;  %v13210_v52 = vmax.f32 %v10524_v33, 0.0 }
 0x701   : > { %13206 = vst [vmem:[#allocation110_spill] sm:$0xff] %v11247_v35  ;;  %v4018_v60 = vmul.f32 %v10948_v24, %v3230_v15  ;;  %v3231_v16 = vmax.f32 %v3191_v38, 0.0  ;;  %v3193_v36 = vadd.f32 %v3192_v58, %v10943_v55  ;;  %v13212_v58 = vmax.f32 %v10506_v26, 0.0 }
 0x702   : > { %v11260_v49 = vadd.f32 %v4017_v59, %v3985_v13  ;;  %v3196_v39 = vpop.f32.mrf.mxu1  ;;  %v3987_v31 = vmul.f32 %v10946_v22, %v13210_v52  ;;  %v13215_v26 = vmax.f32 %v10515_v29, 0.0  ;;  %v13218_v29 = vmax.f32 %v10512_v28, 0.0 }
 0x703   : > { %v11265_v63 = vadd.f32 %v4018_v60, %v3986_v11  ;;  %v4019_v4 = vmul.f32 %v10948_v24, %v3231_v16  ;;  %v3232_v10 = vmax.f32 %v3193_v36, 0.0  ;;  %v3197_v41 = vadd.f32 %v3196_v39, %v10939_v21 }
 0x704   : > { %13209 = vst [vmem:[#allocation111_spill] sm:$0xff] %v11260_v49  ;;  %v3198_v38 = vpop.f32.mrf.mxu1  ;;  %v3988_v17 = vmul.f32 %v10946_v22, %v13212_v58  ;;  %v3989_v58 = vmul.f32 %v10946_v22, %v13215_v26 }
 0x705   : > { %13211 = vst [vmem:[#allocation112_spill] sm:$0xff] %v11265_v63  ;;  %v11272_v50 = vadd.f32 %v4019_v4, %v3987_v31  ;;  %v4020_v13 = vmul.f32 %v10948_v24, %v3232_v10  ;;  %v3199_v33 = vadd.f32 %v3198_v38, %v10943_v55  ;;  %v3233_v59 = vmax.f32 %v3197_v41, 0.0 }
 0x706   : > { %v3200_v52 = vpop.f32.mrf.mxu1  ;;  %v13216_v31 = vmax.f32 %v10509_v27, 0.0 }
 0x707   : > { %13213 = vst [vmem:[#allocation113_spill] sm:$0xff] %v11272_v50  ;;  %v3234_v60 = vmax.f32 %v3199_v33, 0.0  ;;  %v3201_v36 = vadd.f32 %v3200_v52, %v10939_v21  ;;  %v11279_v39 = vadd.f32 %v4020_v13, %v3988_v17  ;;  %v4021_v38 = vmul.f32 %v10948_v24, %v3233_v59 }
 0x708   : > { %v3990_v4 = vmul.f32 %v10946_v22, %v13216_v31  ;;  %v3202_v41 = vpop.f32.mrf.mxu1  ;;  %v3991_v13 = vmul.f32 %v10946_v22, %v13218_v29  ;;  %v13220_v31 = vmax.f32 %v10521_v32, 0.0  ;;  %v13233_v29 = vmax.f32 %v11139_v53, 0.0 }
 0x709   : > { %13214 = vst [vmem:[#allocation114_spill] sm:$0xff] %v11279_v39  ;;  %v4022_v12 = vmul.f32 %v10948_v24, %v3234_v60  ;;  %v3235_v35 = vmax.f32 %v3201_v36, 0.0  ;;  %v3203_v33 = vadd.f32 %v3202_v41, %v10943_v55  ;;  %v11292_v17 = vadd.f32 %v4021_v38, %v3989_v58  ;;  %v11746_v39 = vld [vmem:[%s13304_s14 + $0x38] sm:$0xff]  }
 0x70a   : > { %v3992_v36 = vmul.f32 %v10946_v22, %v13220_v31  ;;  %v13251_v31 = vmax.f32 %v11042_v1, 0.0 }
 0x70b   : > { %13217 = vst [vmem:[#allocation115_spill] sm:$0xff] %v11292_v17  ;;  %v11297_v27 = vadd.f32 %v4022_v12, %v3990_v4  ;;  %v4023_v52 = vmul.f32 %v10948_v24, %v3235_v35  ;;  %v3236_v26 = vmax.f32 %v3203_v33, 0.0  ;;  %v11308_v58 = vpack.c.bf16 %v3235_v35, %v3233_v59 }
 0x70c   : > { %v11313_v12 = vpack.c.bf16 %v3232_v10, %v3230_v15  ;;  %v13227_v35 = vmax.f32 %v11191_v19, 0.0  ;;  %v13228_v59 = vmax.f32 %v11216_v20, 0.0  ;;  %v13230_v15 = vmax.f32 %v11180_v5, 0.0 }
 0x70d   : > { %13219 = vst [vmem:[#allocation116_spill] sm:$0xff] %v11297_v27  ;;  %v11303_v11 = vadd.f32 %v4023_v52, %v3991_v13  ;;  %v4024_v55 = vmul.f32 %v10948_v24, %v3236_v26  ;;  %v11306_v41 = vpack.c.bf16 %v3236_v26, %v3234_v60  ;;  %13223 = vst [vmem:[#allocation119_spill] sm:$0xff] %v11308_v58  ;;  %v13231_v10 = vmax.f32 %v11198_v14, 0.0 }
 0x70e   : > { %13224 = vst [vmem:[#allocation120_spill] sm:$0xff] %v11313_v12  ;;  %v11321_v60 = vpack.c.bf16 %v3231_v16, %v3229_v48  ;;  %v11327_v38 = vpack.c.bf16 %v13228_v59, %v13227_v35  ;;  %v13234_v16 = vmax.f32 %v11164_v34, 0.0  ;;  %v13236_v19 = vmax.f32 %v11128_v57, 0.0  ;;  %v9521_v35 = vld [vmem:[%s13238_s5 + $0x70] sm:$0xff]   ;;  %v9516_v59 = vld [vmem:[%s13242_s11 + $0x8] sm:$0xff]  }
 0x70f   : > { %13221 = vst [vmem:[#allocation117_spill] sm:$0xff] %v11303_v11  ;;  %13222 = vst [vmem:[#allocation118_spill] sm:$0xff] %v11306_v41  ;;  %3277 = vmatprep.subr.bf16.mxu0 %v11306_v41  ;;  %v11315_v4 = vadd.f32 %v4024_v55, %v3992_v36  ;;  %v11335_v33 = vpack.c.bf16 %v13231_v10, %v13230_v15  ;;  %v13237_v20 = vmax.f32 %v11146_v23, 0.0  ;;  %v13240_v14 = vmax.f32 %v11087_v46, 0.0  ;;  %v9520_v55 = vld [vmem:[%s13238_s5 + $0x38] sm:$0xff]   ;;  %v9524_v15 = vld [vmem:[%s13238_s5 + $0x28] sm:$0xff]  }
 0x710   : > { %3278 = vmatpush1.bf16.msra.mxu0 %v11308_v58  ;;  %13226 = vst [vmem:[#allocation122_spill] sm:$0xff] %v11321_v60  ;;  %13229 = vst [vmem:[#allocation123_spill] sm:$0xff] %v11327_v38  ;;  %v11341_v48 = vpack.c.bf16 %v13234_v16, %v13233_v29  ;;  %v13241_v13 = vmax.f32 %v11112_v18, 0.0  ;;  %v13244_v34 = vmax.f32 %v11076_v62, 0.0  ;;  %v13245_v57 = vmax.f32 %v11094_v40, 0.0  ;;  %v9525_v10 = vld [vmem:[%s13238_s5 + $0x60] sm:$0xff]  }
 0x711   : > { %13225 = vst [vmem:[#allocation121_spill] sm:$0xff] %v11315_v4  ;;  %3279 = vmatprep.subr.bf16.mxu0 %v11313_v12  ;;  %13232 = vst [vmem:[#allocation124_spill] sm:$0xff] %v11335_v33  ;;  %v11349_v5 = vpack.c.bf16 %v13237_v20, %v13236_v19  ;;  %v13247_v52 = vmax.f32 %v11035_v61, 0.0  ;;  %v13248_v46 = vmax.f32 %v11060_v2, 0.0  ;;  %v13250_v26 = vmax.f32 %v11024_v42, 0.0  ;;  %v9526_v29 = vld [vmem:[%s13238_s5 + $0x20] sm:$0xff]  }
 0x712   : > { %13235 = vst [vmem:[#allocation125_spill] sm:$0xff] %v11341_v48  ;;  %v11355_v53 = vpack.c.bf16 %v13241_v13, %v13240_v14  ;;  %v11363_v23 = vpack.c.bf16 %v13245_v57, %v13244_v34  ;;  %v13253_v40 = vmax.f32 %v10989_v43, 0.0  ;;  %v13254_v36 = vmax.f32 %v11008_v30, 0.0  ;;  %v9519_v43 = vld [vmem:[%s13238_s5 + $0x78] sm:$0xff]   ;;  %v9515_v30 = vld [vmem:[%s13242_s11] sm:$0xff]   ;;  %v9517_v19 = vld [vmem:[%s13242_s11 + $0x10] sm:$0xff]  }
 0x713   : > { %13239 = vst [vmem:[#allocation126_spill] sm:$0xff] %v11349_v5  ;;  %v11369_v18 = vpack.c.bf16 %v13248_v46, %v13247_v52  ;;  %v11377_v62 = vpack.c.bf16 %v13251_v31, %v13250_v26  ;;  %v13256_v2 = vmax.f32 %v10951_v9, 0.0  ;;  %v13257_v42 = vmax.f32 %v10968_v54, 0.0  ;;  %v9522_v9 = vld [vmem:[%s13238_s5 + $0x30] sm:$0xff]   ;;  %v9523_v54 = vld [vmem:[%s13238_s5 + $0x68] sm:$0xff]   ;;  %v9527_v16 = vld [vmem:[%s13238_s5 + $0x58] sm:$0xff]  }
 0x714   : > { %3280 = vmatpush1.bf16.msra.mxu0 %v11321_v60  ;;  %13243 = vst [vmem:[#allocation127_spill] sm:$0xff] %v11355_v53  ;;  %13246 = vst [vmem:[#allocation128_spill] sm:$0xff] %v11363_v23  ;;  %v11383_v61 = vpack.c.bf16 %v13254_v36, %v13253_v40  ;;  %v9528_v20 = vld [vmem:[%s13238_s5 + $0x18] sm:$0xff]   ;;  %v9529_v14 = vld [vmem:[%s13238_s5 + $0x50] sm:$0xff]  }
 0x715   : > { %3281 = vmatprep.subr.bf16.mxu0 %v11327_v38  ;;  %13249 = vst [vmem:[#allocation129_spill] sm:$0xff] %v11369_v18  ;;  %13252 = vst [vmem:[#allocation130_spill] sm:$0xff] %v11377_v62  ;;  %v11391_v1 = vpack.c.bf16 %v13257_v42, %v13256_v2  ;;  %v9530_v13 = vld [vmem:[%s13238_s5 + $0x10] sm:$0xff]   ;;  %v9518_v34 = vld [vmem:[%s13242_s11 + $0x18] sm:$0xff]   ;;  %s12981_s11 = scalar_lea.vmem [#allocation5], %s11421_s3 }
 0x716   : > { %13255 = vst [vmem:[#allocation131_spill] sm:$0xff] %v11383_v61  ;;  %v9531_v57 = vld [vmem:[%s13238_s5 + $0x48] sm:$0xff]   ;;  %v9533_v46 = vld [vmem:[%s13238_s5 + $0x40] sm:$0xff]  }
 0x717   : > { %13258 = vst [vmem:[#allocation132_spill] sm:$0xff] %v11391_v1  ;;  %v9532_v52 = vld [vmem:[%s13238_s5 + $0x8] sm:$0xff]   ;;  %v9534_v26 = vld [vmem:[%s13238_s5] sm:$0xff]   ;;  %s13261_s5 = sld [smem:[#allocation32_spill]] }
 0x718   : > { %3282 = vmatpush1.bf16.msra.mxu0 %v11335_v33  ;;  %v9621_v58 = vld [vmem:[%s13305_s19] sm:$0xff]   ;;  %v13326_v41 = vld [vmem:[#allocation62_spill] sm:$0xff] }
 0x719   : > { %3283 = vmatprep.subr.bf16.mxu0 %v11341_v48  ;;  %v13327_v60 = vld [vmem:[#allocation73_spill] sm:$0xff] }
 0x71c   : > { %3284 = vmatpush1.bf16.msra.mxu0 %v11349_v5 }
 0x71d   : > { %3285 = vmatprep.subr.bf16.mxu0 %v11355_v53 }
 0x720   : > { %3286 = vmatpush1.bf16.msra.mxu0 %v11363_v23 }
 0x721   : > { %3287 = vmatprep.subr.bf16.mxu0 %v11369_v18 }
 0x724   : > { %3288 = vmatpush1.bf16.msra.mxu0 %v11377_v62 }
 0x725   : > { %3289 = vmatprep.subr.bf16.mxu0 %v11383_v61 }
 0x728   : > { %3290 = vmatpush1.bf16.msra.mxu0 %v11019_v0 }
 0x729   : > { %3291 = vmatprep.subr.bf16.mxu0 %v11391_v1 }
 0x72c   : > { %3292 = vmatpush1.bf16.msra.mxu0 %v10975_v6 }
 0x72d   : > { %8153 = vmatprep.subr.bf16.mxu0 %v9519_v43 }
 0x72f   : > { %3310 = vmatmul.mubr.bf16.vlgmr.msra.gmra.mxu0 %v9515_v30 }
 0x730   : > { %3319 = vmatprep.mubr.bf16.mxu0 %v13150_v51  ;;  %8154 = vmatpush3.bf16.msra.mxu0 %v9520_v55 }
 0x731   : > { %8155 = vmatprep.subr.bf16.mxu0 %v9521_v35 }
 0x734   : > { %8156 = vmatpush3.bf16.msra.mxu0 %v9522_v9 }
 0x735   : > { %8157 = vmatprep.subr.bf16.mxu0 %v9523_v54 }
 0x737   : > { %3320 = vmatmul.mubr.bf16.gmra.mxu0 %v9516_v59 }
 0x738   : > { %3329 = vmatprep.mubr.bf16.mxu0 %v13150_v51  ;;  %8158 = vmatpush3.bf16.msra.mxu0 %v9524_v15 }
 0x739   : > { %8159 = vmatprep.subr.bf16.mxu0 %v9525_v10 }
 0x73c   : > { %8160 = vmatpush3.bf16.msra.mxu0 %v9526_v29 }
 0x73d   : > { %8161 = vmatprep.subr.bf16.mxu0 %v9527_v16 }
 0x73f   : > { %3330 = vmatmul.mubr.bf16.gmra.mxu0 %v9517_v19 }
 0x740   : > { %3339 = vmatprep.mubr.bf16.mxu0 %v13150_v51  ;;  %8162 = vmatpush3.bf16.msra.mxu0 %v9528_v20  ;;  %v1932_v51 = vld [vmem:[%s13259_s13] sm:$0x1] }
 0x741   : > { %8163 = vmatprep.subr.bf16.mxu0 %v9529_v14 }
 0x744   : > { %8164 = vmatpush3.bf16.msra.mxu0 %v9530_v13 }
 0x745   : > { %8165 = vmatprep.subr.bf16.mxu0 %v9531_v57 }
 0x747   : > { %3340 = vmatmul.mubr.bf16.gmra.mxu0 %v9518_v34 }
 0x748   : > { %8166 = vmatpush3.bf16.msra.mxu0 %v9532_v52 }
 0x749   : > { %8167 = vmatprep.subr.bf16.mxu0 %v9533_v46 }
 0x74c   : > { %8168 = vmatpush3.bf16.msra.mxu0 %v9534_v26 }
 0x74d   : > { %8746 = vmatprep.subr.bf16.mxu0 %v13141_v44 }
 0x780   : > { %v2859_v31 = vpop.f32.mrf.mxu0 }
 0x781   : > { %v2860_v40 = vadd.f32 %v2859_v31, %v1932_v51 }
 0x782   : > { %v8732_v36 = vpop.f32.mrf.mxu0 }
 0x783   : > { %3922 = vst.msk [vmem:[%s12967_s6] sm:$0x1] %vm3921_vm4, %v2860_v40  ;;  %s13260_s6 = sld [smem:[#allocation34_spill]] }
 0x784   : > { %v2862_v2 = vpop.f32.mrf.mxu0 }
 0x786   : > { %v8733_v42 = vpop.f32.mrf.mxu0 }
 0x789   : > { %v9536_v2 = vld [vmem:[%s13260_s6 + $0x38] sm:$0xff]   ;;  %v9537_v42 = vld [vmem:[%s13260_s6 + $0x30] sm:$0xff]  }
 0x7ef   : > { %v3311_v43 = vpop.f32.mrf.mxu0 }
 0x7f1   : > { %v3313_v30 = vpop.f32.mrf.mxu0 }
 0x7f3   : > { %v3315_v55 = vpop.f32.mrf.mxu0 }
 0x7f4   : > { %v3350_v54 = vpack.c.bf16 %v3315_v55, %v3311_v43  ;;  %v9538_v43 = vld [vmem:[%s13260_s6 + $0x28] sm:$0xff]   ;;  %v9540_v55 = vld [vmem:[%s13260_s6 + $0x18] sm:$0xff]  }
 0x7f5   : > { %v3317_v35 = vpop.f32.mrf.mxu0 }
 0x7f6   : > { %v3351_v9 = vpack.c.bf16 %v3317_v35, %v3313_v30  ;;  %v9539_v30 = vld [vmem:[%s13260_s6 + $0x20] sm:$0xff]   ;;  %v9541_v35 = vld [vmem:[%s13260_s6 + $0x10] sm:$0xff]  }
 0x7f7   : > { %v3321_v59 = vpop.f32.mrf.mxu0 }
 0x7f8   : > { %3492 = vmatprep.mubr.bf16.mxu0 %v3351_v9 }
 0x7f9   : > { %v3323_v15 = vpop.f32.mrf.mxu0  ;;  %3493 = vmatmul.mubr.bf16.vlgmr.msra.gmra.mxu0 %v3350_v54  ;;  %v7816_v54 = vld [vmem:[%s13261_s5] ss:$0 sm:$0xff]  ;;  %s13276_s5 = sld [smem:[#allocation33_spill]] }
 0x7fa   : > { %8747 = vmatpush3.bf16.msra.mxu0 %v9536_v2 }
 0x7fb   : > { %v3325_v10 = vpop.f32.mrf.mxu0  ;;  %8748 = vmatprep.subr.bf16.mxu0 %v13141_v44 }
 0x7fc   : > { %v3352_v19 = vpack.c.bf16 %v3325_v10, %v3321_v59 }
 0x7fd   : > { %v3327_v29 = vpop.f32.mrf.mxu0 }
 0x7fe   : > { %v3353_v16 = vpack.c.bf16 %v3327_v29, %v3323_v15  ;;  %8749 = vmatpush3.bf16.msra.mxu0 %v9537_v42 }
 0x7ff   : > { %v3331_v20 = vpop.f32.mrf.mxu0  ;;  %8750 = vmatprep.subr.bf16.mxu0 %v13141_v44 }
 0x800   : > { %3500 = vmatprep.mubr.bf16.mxu0 %v3353_v16 }
 0x801   : > { %v3333_v14 = vpop.f32.mrf.mxu0  ;;  %3501 = vmatmul.mubr.bf16.gmra.mxu0 %v3352_v19 }
 0x802   : > { %8751 = vmatpush3.bf16.msra.mxu0 %v9538_v43 }
 0x803   : > { %v3335_v13 = vpop.f32.mrf.mxu0  ;;  %8752 = vmatprep.subr.bf16.mxu0 %v13141_v44 }
 0x804   : > { %v3354_v52 = vpack.c.bf16 %v3335_v13, %v3331_v20  ;;  %v13262_v13 = vmax.f32 %v10801_v8, 0.0 }
 0x805   : > { %v3337_v34 = vpop.f32.mrf.mxu0 }
 0x806   : > { %v3355_v57 = vpack.c.bf16 %v3337_v34, %v3333_v14  ;;  %8753 = vmatpush3.bf16.msra.mxu0 %v9539_v30  ;;  %v3937_v34 = vmul.f32 %v10946_v22, %v13262_v13 }
 0x807   : > { %v3341_v46 = vpop.f32.mrf.mxu0  ;;  %8754 = vmatprep.subr.bf16.mxu0 %v13141_v44 }
 0x808   : > { %3508 = vmatprep.mubr.bf16.mxu0 %v3355_v57 }
 0x809   : > { %v3343_v26 = vpop.f32.mrf.mxu0  ;;  %3509 = vmatmul.mubr.bf16.gmra.mxu0 %v3354_v52 }
 0x80a   : > { %8755 = vmatpush3.bf16.msra.mxu0 %v9540_v55 }
 0x80b   : > { %v3345_v51 = vpop.f32.mrf.mxu0  ;;  %8756 = vmatprep.subr.bf16.mxu0 %v13141_v44 }
 0x80c   : > { %v3356_v36 = vpack.c.bf16 %v3345_v51, %v3341_v46 }
 0x80d   : > { %v3347_v31 = vpop.f32.mrf.mxu0 }
 0x80e   : > { %v3357_v40 = vpack.c.bf16 %v3347_v31, %v3343_v26  ;;  %8757 = vmatpush3.bf16.msra.mxu0 %v9541_v35 }
 0x80f   : > { %8758 = vmatprep.subr.bf16.mxu0 %v13141_v44 }
 0x810   : > { %3516 = vmatprep.mubr.bf16.mxu0 %v3357_v40 }
 0x811   : > { %3517 = vmatmul.mubr.bf16.gmra.mxu0 %v3356_v36  ;;  %v13264_v36 = vmax.f32 %v10792_v7, 0.0 }
 0x812   : > { %8762 = vmatprep.mubr.msk.bf16.mxu0 %vm10069_vm0, %v13141_v44 }
 0x813   : > { %v3938_v2 = vmul.f32 %v10946_v22, %v13264_v36 }
 0x8b9   : > { %v8169_v9 = vpop.f32.mrf.mxu0 }
 0x8bb   : > { %v8170_v59 = vpop.f32.mrf.mxu0 }
 0x8bc   : > { %v8171_v15 = vadd.f32 %v8170_v59, %v8169_v9  ;;  %v13266_v59 = vmax.f32 %v10787_v37, 0.0 }
 0x8bd   : > { %v8172_v10 = vpop.f32.mrf.mxu0 }
 0x8be   : > { %v11443_v29 = vadd.f32 %v8171_v15, %v7816_v54  ;;  %v3939_v15 = vmul.f32 %v10946_v22, %v13266_v59 }
 0x8bf   : > { %v8173_v16 = vpop.f32.mrf.mxu0 }
 0x8c0   : > { %v3525_v19 = vmax.f32 %v11443_v29, 0.0  ;;  %v8174_v20 = vadd.f32 %v8173_v16, %v8172_v10  ;;  %v9543_v29 = vld [vmem:[%s13260_s6] sm:$0xff]  }
 0x8c1   : > { %v8175_v14 = vpop.f32.mrf.mxu0 }
 0x8c2   : > { %v3945_v57 = vmul.f32 %v10948_v24, %v3525_v19  ;;  %v11452_v52 = vadd.f32 %v8174_v20, %v7816_v54 }
 0x8c3   : > { %v8176_v46 = vpop.f32.mrf.mxu0 }
 0x8c4   : > { %v3526_v26 = vmax.f32 %v11452_v52, 0.0  ;;  %v8177_v51 = vadd.f32 %v8176_v46, %v8175_v14  ;;  %v11455_v31 = vadd.f32 %v3945_v57, %v3937_v34  ;;  %v13268_v46 = vmax.f32 %v10778_v47, 0.0 }
 0x8c5   : > { %v8178_v40 = vpop.f32.mrf.mxu0 }
 0x8c6   : > { %13263 = vst [vmem:[#allocation133_spill] sm:$0xff] %v11455_v31  ;;  %v3946_v8 = vmul.f32 %v10948_v24, %v3526_v26  ;;  %v3503_v42 = vadd.f32 %v8177_v51, %v7816_v54  ;;  %v3940_v51 = vmul.f32 %v10946_v22, %v13268_v46  ;;  %v11854_v31 = vld [vmem:[%s13306_s20 + $0x40] sm:$0xff]  }
 0x8c7   : > { %v8179_v43 = vpop.f32.mrf.mxu0  ;;  %13322 = vst [vmem:[#allocation146_spill] sm:$0xff] %v11854_v31 }
 0x8c8   : > { %v3527_v30 = vmax.f32 %v3503_v42, 0.0  ;;  %v8180_v55 = vadd.f32 %v8179_v43, %v8178_v40  ;;  %v11463_v35 = vadd.f32 %v3946_v8, %v3938_v2 }
 0x8c9   : > { %v8181_v9 = vpop.f32.mrf.mxu0 }
 0x8ca   : > { %13265 = vst [vmem:[#allocation134_spill] sm:$0xff] %v11463_v35  ;;  %v3947_v10 = vmul.f32 %v10948_v24, %v3527_v30  ;;  %v3506_v7 = vadd.f32 %v8180_v55, %v7816_v54  ;;  %v13270_v55 = vmax.f32 %v10774_v56, 0.0  ;;  %v11858_v35 = vld [vmem:[%s13306_s20] sm:$0xff]  }
 0x8cb   : > { %v8182_v20 = vpop.f32.mrf.mxu0  ;;  %13323 = vst [vmem:[#allocation147_spill] sm:$0xff] %v11858_v35 }
 0x8cc   : > { %v11471_v14 = vadd.f32 %v3947_v10, %v3939_v15  ;;  %v3528_v13 = vmax.f32 %v3506_v7, 0.0  ;;  %v8183_v34 = vadd.f32 %v8182_v20, %v8181_v9  ;;  %v3941_v59 = vmul.f32 %v10946_v22, %v13270_v55 }
 0x8cd   : > { %v8184_v57 = vpop.f32.mrf.mxu0 }
 0x8ce   : > { %13267 = vst [vmem:[#allocation135_spill] sm:$0xff] %v11471_v14  ;;  %v3948_v37 = vmul.f32 %v10948_v24, %v3528_v13  ;;  %v3511_v40 = vadd.f32 %v8183_v34, %v7816_v54  ;;  %v11842_v14 = vld [vmem:[%s13306_s20 + $0x10] sm:$0xff]  }
 0x8cf   : > { %v8185_v36 = vpop.f32.mrf.mxu0  ;;  %13319 = vst [vmem:[#allocation143_spill] sm:$0xff] %v11842_v14 }
 0x8d0   : > { %v11477_v2 = vadd.f32 %v3948_v37, %v3940_v51  ;;  %v3529_v8 = vmax.f32 %v3511_v40, 0.0  ;;  %v8186_v42 = vadd.f32 %v8185_v36, %v8184_v57  ;;  %v13272_v51 = vmax.f32 %v10770_v45, 0.0 }
 0x8d1   : > { %v8187_v43 = vpop.f32.mrf.mxu0 }
 0x8d2   : > { %13269 = vst [vmem:[#allocation136_spill] sm:$0xff] %v11477_v2  ;;  %v3949_v47 = vmul.f32 %v10948_v24, %v3529_v8  ;;  %v3514_v15 = vadd.f32 %v8186_v42, %v7816_v54  ;;  %v3942_v57 = vmul.f32 %v10946_v22, %v13272_v51  ;;  %v13274_v42 = vmax.f32 %v10768_v25, 0.0  ;;  %v11850_v2 = vld [vmem:[%s13306_s20 + $0x8] sm:$0xff]  }
 0x8d3   : > { %v8188_v10 = vpop.f32.mrf.mxu0  ;;  %13321 = vst [vmem:[#allocation145_spill] sm:$0xff] %v11850_v2 }
 0x8d4   : > { %v3530_v7 = vmax.f32 %v3514_v15, 0.0  ;;  %v8189_v20 = vadd.f32 %v8188_v10, %v8187_v43  ;;  %v11485_v34 = vadd.f32 %v3949_v47, %v3941_v59  ;;  %v3943_v15 = vmul.f32 %v10946_v22, %v13274_v42 }
 0x8d5   : > { %v8190_v46 = vpop.f32.mrf.mxu0 }
 0x8d6   : > { %13271 = vst [vmem:[#allocation137_spill] sm:$0xff] %v11485_v34  ;;  %v3950_v56 = vmul.f32 %v10948_v24, %v3530_v7  ;;  %v3519_v37 = vadd.f32 %v8189_v20, %v7816_v54  ;;  %v13277_v20 = vmax.f32 %v10772_v3, 0.0  ;;  %v11517_v3 = vpack.c.bf16 %v3528_v13, %v3527_v30  ;;  %v9542_v30 = vld [vmem:[%s13260_s6 + $0x8] sm:$0xff]   ;;  %s11626_s6 = sshll.u32 %s10406_s22, 2  ;;  %s13297_s22 = sld [smem:[#allocation40_spill]]  ;;  %v11830_v34 = vld [vmem:[%s13306_s20 + $0x58] sm:$0xff]  }
 0x8d7   : > { %v8191_v40 = vpop.f32.mrf.mxu0  ;;  %8759 = vmatpush3.bf16.msra.mxu0 %v9542_v30  ;;  %s1648_s2 = scalar_lea.vmem %s13343_s30, %s11626_s6  ;;  %s12101_s30 = scalar_lea.vmem %s13345_s16, %s10411_s26 }
 0x8d8   : > { %v3531_v36 = vmax.f32 %v3519_v37, 0.0  ;;  %v8192_v55 = vadd.f32 %v8191_v40, %v8190_v46  ;;  %v11491_v28 = vadd.f32 %v3950_v56, %v3942_v57  ;;  %v3944_v46 = vmul.f32 %v10946_v22, %v13277_v20  ;;  %8760 = vmatprep.subr.bf16.mxu0 %v13141_v44  ;;  %v7835_v40 = vld [vmem:[%s13280_s8] ss:$0 sm:$0xff]  ;;  %s13289_s8 = sld [smem:[#allocation39_spill]] }
 0x8da   : > { %13273 = vst [vmem:[#allocation138_spill] sm:$0xff] %v11491_v28  ;;  %v3951_v43 = vmul.f32 %v10948_v24, %v3531_v36  ;;  %v3522_v59 = vadd.f32 %v8192_v55, %v7816_v54  ;;  %v11511_v54 = vpack.c.bf16 %v3530_v7, %v3529_v8  ;;  %v11525_v8 = vpack.c.bf16 %v3526_v26, %v3525_v19  ;;  %v9535_v7 = vld [vmem:[%s13276_s5] sm:$0xff]   ;;  %s13281_s5 = sld [smem:[#allocation36_spill]]  ;;  %v11834_v28 = vld [vmem:[%s13306_s20 + $0x18] sm:$0xff]  }
 0x8db   : > { %8761 = vmatpush3.bf16.msra.mxu0 %v9543_v29 }
 0x8dc   : > { %v11499_v47 = vadd.f32 %v3951_v43, %v3943_v15  ;;  %v3532_v10 = vmax.f32 %v3522_v59, 0.0  ;;  %8766 = vmatprep.subr.bf16.mxu0 %v13141_v44  ;;  %v13283_v59 = vld [vmem:[#allocation81_spill] sm:$0xff] }
 0x8de   : > { %13275 = vst [vmem:[#allocation139_spill] sm:$0xff] %v11499_v47  ;;  %v11504_v51 = vpack.c.bf16 %v3532_v10, %v3531_v36  ;;  %v3952_v25 = vmul.f32 %v10948_v24, %v3532_v10  ;;  %v13284_v10 = vmax.f32 %v13283_v59, 0.0  ;;  %v9547_v59 = vld [vmem:[%s13282_s9 + $0x20] sm:$0xff]  }
 0x8df   : > { %v13314_v47 = vld [vmem:[#allocation76_spill] sm:$0xff] }
 0x8e0   : > { %13278 = vst [vmem:[#allocation140_spill] sm:$0xff] %v11504_v51  ;;  %v11507_v57 = vadd.f32 %v3952_v25, %v3944_v46  ;;  %8735 = vmatpush3.bf16.msra.mxu1 %v11504_v51  ;;  %v3931_v20 = vmul.f32 %v10946_v22, %v13284_v10  ;;  %v9548_v10 = vld [vmem:[%s13282_s9 + $0x18] sm:$0xff]   ;;  %13317 = vst [vmem:[#allocation76_spill] sm:$0xff] %v11834_v28 }
 0x8e1   : > { %8736 = vmatprep.subr.bf16.mxu1 %v13141_v44 }
 0x8e2   : > { %13279 = vst [vmem:[#allocation141_spill] sm:$0xff] %v11507_v57  ;;  %v11826_v57 = vld [vmem:[%s13306_s20 + $0x20] sm:$0xff]  }
 0x8e4   : > { %8737 = vmatpush3.bf16.msra.mxu1 %v11511_v54 }
 0x8e5   : > { %8738 = vmatprep.subr.bf16.mxu1 %v13141_v44 }
 0x8e8   : > { %8739 = vmatpush3.bf16.msra.mxu1 %v11517_v3 }
 0x8e9   : > { %8740 = vmatprep.subr.bf16.mxu1 %v13141_v44 }
 0x8ec   : > { %8741 = vmatpush3.bf16.msra.mxu1 %v11525_v8 }
 0x8ed   : > { %8792 = vmatprep.subr.bf16.mxu1 %v13141_v44 }
 0x8ef   : > { %8743 = vmatmul.mubr.msk.bf16.vlgmr.msra.gmra.mxu1 %vm2482_vm1, %v9535_v7 }
 0x8f0   : > { %8808 = vmatprep.mubr.msk.bf16.mxu1 %vm10069_vm0, %v13141_v44 }
 0x9af   : > { %v3579_v19 = vpop.f32.mrf.mxu1 }
 0x9b1   : > { %v8744_v52 = vpop.f32.mrf.mxu1 }
 0x9b3   : > { %v3582_v26 = vpop.f32.mrf.mxu1 }
 0x9b4   : > { %v3586_v13 = vpack.c.bf16 %v3582_v26, %v3579_v19  ;;  %v13286_v19 = vld [vmem:[#allocation82_spill] sm:$0xff] }
 0x9b5   : > { %v8745_v37 = vpop.f32.mrf.mxu1  ;;  %v13287_v52 = vmax.f32 %v13286_v19, 0.0  ;;  %v9555_v19 = vld [vmem:[%s13289_s8 + $0x28] sm:$0xff]  }
 0x9b6   : > { %8763 = vmatmul.mubr.bf16.vlgmr.msra.gmra.mxu0 %v3586_v13 }
 0x9b7   : > { %8768 = vmatprep.mubr.msk.bf16.mxu0 %vm10069_vm0, %v13141_v44  ;;  %v3932_v26 = vmul.f32 %v10946_v22, %v13287_v52 }
 0xa76   : > { %v3675_v36 = vpop.f32.mrf.mxu0 }
 0xa77   : > { %v3676_v55 = vadd.f32 %v7835_v40, %v3675_v36 }
 0xa78   : > { %v8764_v42 = vpop.f32.mrf.mxu0 }
 0xa79   : > { %v3682_v15 = vmax.f32 %v3676_v55, 0.0  ;;  %v2958_v55 = vld [vmem:[%s13281_s5] sm:$0x3]  ;;  %s13290_s5 = sld [smem:[#allocation38_spill]] }
 0xa7a   : > { %v3678_v43 = vpop.f32.mrf.mxu0 }
 0xa7b   : > { %v3933_v46 = vmul.f32 %v10948_v24, %v3682_v15  ;;  %v3679_v25 = vadd.f32 %v7835_v40, %v3678_v43  ;;  %v9544_v40 = vld [vmem:[%s13282_s9 + $0x38] sm:$0xff]   ;;  %v9546_v43 = vld [vmem:[%s13282_s9 + $0x28] sm:$0xff]  }
 0xa7c   : > { %v8765_v7 = vpop.f32.mrf.mxu0 }
 0xa7d   : > { %v11544_v30 = vadd.f32 %v3933_v46, %v3931_v20  ;;  %v3683_v29 = vmax.f32 %v3679_v25, 0.0  ;;  %v9549_v20 = vld [vmem:[%s13282_s9 + $0x10] sm:$0xff]   ;;  %v9550_v46 = vld [vmem:[%s13282_s9 + $0x8] sm:$0xff]   ;;  %v9551_v25 = vld [vmem:[%s13282_s9] sm:$0xff]  }
 0xa7e   : > { %v9552_v7 = vld [vmem:[%s13289_s8 + $0x38] sm:$0xff]  }
 0xa7f   : > { %13285 = vst [vmem:[#allocation81_spill] sm:$0xff] %v11544_v30  ;;  %v11549_v13 = vpack.c.bf16 %v3683_v29, %v3682_v15  ;;  %v3934_v37 = vmul.f32 %v10948_v24, %v3683_v29  ;;  %v9545_v15 = vld [vmem:[%s13282_s9 + $0x30] sm:$0xff]   ;;  %8793 = vmatpush3.bf16.msra.mxu1 %v9552_v7  ;;  %v9562_v7 = vld [vmem:[%s13114_s4 + $0x18] sm:$0xff]   ;;  %v13324_v30 = vld [vmem:[#allocation61_spill] sm:$0xff] }
 0xa80   : > { %v9553_v29 = vld [vmem:[%s13289_s8 + $0x30] sm:$0xff]   ;;  %8794 = vmatprep.subr.bf16.mxu1 %v13141_v44 }
 0xa81   : > { %v11552_v36 = vadd.f32 %v3934_v37, %v3932_v26  ;;  %8767 = vmatpush3.bf16.msra.mxu0 %v11549_v13  ;;  %v9554_v26 = vld [vmem:[%s13114_s4 + $0x38] sm:$0xff]  }
 0xa82   : > { %8772 = vmatprep.subr.bf16.mxu0 %v13141_v44 }
 0xa83   : > { %13288 = vst [vmem:[#allocation82_spill] sm:$0xff] %v11552_v36  ;;  %8795 = vmatpush3.bf16.msra.mxu1 %v9553_v29  ;;  %v9563_v29 = vld [vmem:[%s13289_s8 + $0x8] sm:$0xff]  }
 0xa84   : > { %8769 = vmatmul.mubr.msk.bf16.vlgmr.msra.gmra.mxu0 %vm2626_vm2, %v2958_v55  ;;  %8796 = vmatprep.subr.bf16.mxu1 %v13141_v44  ;;  %v9620_v36 = vld [vmem:[%s13305_s19 + $0x8] sm:$0xff]  }
 0xa85   : > { %8773 = vmatpush3.bf16.msra.mxu0 %v9544_v40  ;;  %8788 = vmatprep.mubr.msk.bf16.mxu0 %vm10069_vm0, %v13141_v44 }
 0xa86   : > { %8774 = vmatprep.subr.bf16.mxu0 %v13141_v44 }
 0xa87   : > { %8797 = vmatpush3.bf16.msra.mxu1 %v9555_v19  ;;  %v9564_v19 = vld [vmem:[%s13114_s4 + $0x10] sm:$0xff]  }
 0xa88   : > { %8798 = vmatprep.subr.bf16.mxu1 %v13141_v44 }
 0xa89   : > { %8775 = vmatpush3.bf16.msra.mxu0 %v9545_v15  ;;  %v9556_v15 = vld [vmem:[%s13114_s4 + $0x30] sm:$0xff]  }
 0xa8a   : > { %8776 = vmatprep.subr.bf16.mxu0 %v13141_v44 }
 0xa8d   : > { %8777 = vmatpush3.bf16.msra.mxu0 %v9546_v43 }
 0xa8e   : > { %8778 = vmatprep.subr.bf16.mxu0 %v13141_v44 }
 0xa91   : > { %8779 = vmatpush3.bf16.msra.mxu0 %v9547_v59  ;;  %v9557_v59 = vld [vmem:[%s13289_s8 + $0x20] sm:$0xff]  }
 0xa92   : > { %8780 = vmatprep.subr.bf16.mxu0 %v13141_v44  ;;  %8799 = vmatpush3.bf16.msra.mxu1 %v9557_v59 }
 0xa93   : > { %8800 = vmatprep.subr.bf16.mxu1 %v13141_v44 }
 0xa95   : > { %8781 = vmatpush3.bf16.msra.mxu0 %v9548_v10  ;;  %v9558_v10 = vld [vmem:[%s13114_s4 + $0x28] sm:$0xff]  }
 0xa96   : > { %8782 = vmatprep.subr.bf16.mxu0 %v13141_v44 }
 0xa99   : > { %8783 = vmatpush3.bf16.msra.mxu0 %v9549_v20  ;;  %v9559_v20 = vld [vmem:[%s13289_s8 + $0x18] sm:$0xff]  }
 0xa9a   : > { %8784 = vmatprep.subr.bf16.mxu0 %v13141_v44  ;;  %8801 = vmatpush3.bf16.msra.mxu1 %v9559_v20  ;;  %v13291_v20 = vld [vmem:[#allocation84_spill] sm:$0xff] }
 0xa9b   : > { %8802 = vmatprep.subr.bf16.mxu1 %v13141_v44 }
 0xa9d   : > { %8785 = vmatpush3.bf16.msra.mxu0 %v9550_v46  ;;  %v9560_v46 = vld [vmem:[%s13114_s4 + $0x20] sm:$0xff]  }
 0xa9e   : > { %8786 = vmatprep.subr.bf16.mxu0 %v13141_v44 }
 0xaa1   : > { %8787 = vmatpush3.bf16.msra.mxu0 %v9551_v25  ;;  %v9561_v25 = vld [vmem:[%s13289_s8 + $0x10] sm:$0xff]  }
 0xaa2   : > { %8812 = vmatprep.subr.bf16.mxu0 %v13141_v44  ;;  %8803 = vmatpush3.bf16.msra.mxu1 %v9561_v25 }
 0xaa3   : > { %8804 = vmatprep.subr.bf16.mxu1 %v13141_v44 }
 0xaa6   : > { %8805 = vmatpush3.bf16.msra.mxu1 %v9563_v29 }
 0xaa7   : > { %8806 = vmatprep.subr.bf16.mxu1 %v13141_v44 }
 0xb44   : > { %v3722_v52 = vpop.f32.mrf.mxu0 }
 0xb45   : > { %v3728_v37 = vpack.c.bf16 %v3722_v52, %v3722_v52  ;;  %v9565_v52 = vld [vmem:[%s13289_s8] sm:$0xff]   ;;  %s13295_s8 = sld [smem:[#allocation41_spill]] }
 0xb46   : > { %v8770_v55 = vpop.f32.mrf.mxu0  ;;  %8807 = vmatpush3.bf16.msra.mxu1 %v9565_v52 }
 0xb47   : > { %8789 = vmatmul.mubr.bf16.vlgmr.msra.gmra.mxu0 %v3728_v37  ;;  %8832 = vmatprep.subr.bf16.mxu1 %v13141_v44  ;;  %v9567_v37 = vld [vmem:[%s13114_s4] sm:$0xff]  }
 0xb48   : > { %v3725_v40 = vpop.f32.mrf.mxu0  ;;  %8813 = vmatpush3.bf16.msra.mxu0 %v9554_v26  ;;  %8828 = vmatprep.mubr.msk.bf16.mxu0 %vm10069_vm0, %v13141_v44  ;;  %v9566_v26 = vld [vmem:[%s13114_s4 + $0x8] sm:$0xff]   ;;  %v7845_v55 = vld [vmem:[%s13290_s5] ss:$0 sm:$0xff]  ;;  %s13292_s4 = sld [smem:[#allocation42_spill]] }
 0xb49   : > { %8814 = vmatprep.subr.bf16.mxu0 %v13141_v44  ;;  %s13294_s5 = sld [smem:[#allocation12_spill]] }
 0xb4a   : > { %v8771_v43 = vpop.f32.mrf.mxu0 }
 0xb4c   : > { %8815 = vmatpush3.bf16.msra.mxu0 %v9556_v15 }
 0xb4d   : > { %8816 = vmatprep.subr.bf16.mxu0 %v13141_v44 }
 0xb4f   : > { %s1644_s9 = scalar_lea.vmem %s13294_s5, %s11626_s6  ;;  %s13298_s5 = sld [smem:[#allocation43_spill]] }
 0xb50   : > { %8817 = vmatpush3.bf16.msra.mxu0 %v9558_v10 }
 0xb51   : > { %8818 = vmatprep.subr.bf16.mxu0 %v13141_v44 }
 0xb54   : > { %8819 = vmatpush3.bf16.msra.mxu0 %v9560_v46  ;;  %v3926_v46 = vmul.f32 %v10946_v22, %v13291_v20 }
 0xb55   : > { %8820 = vmatprep.subr.bf16.mxu0 %v13141_v44  ;;  %v11707_v27 = vld [vmem:[%s13298_s5] ss:$0 sm:$0xff] }
 0xb58   : > { %8821 = vmatpush3.bf16.msra.mxu0 %v9562_v7 }
 0xb59   : > { %8822 = vmatprep.subr.bf16.mxu0 %v13141_v44 }
 0xb5c   : > { %8823 = vmatpush3.bf16.msra.mxu0 %v9564_v19 }
 0xb5d   : > { %8824 = vmatprep.subr.bf16.mxu0 %v13141_v44 }
 0xb60   : > { %8825 = vmatpush3.bf16.msra.mxu0 %v9566_v26 }
 0xb61   : > { %8826 = vmatprep.subr.bf16.mxu0 %v13141_v44 }
 0xb64   : > { %8827 = vmatpush3.bf16.msra.mxu0 %v9567_v37 }
 0xb65   : > { %8858 = vmatprep.subr.bf16.mxu0 %v13141_v44 }
 0xc07   : > { %v3817_v40 = vpop.f32.mrf.mxu0 }
 0xc08   : > { %v3818_v15 = vadd.f32 %v7845_v55, %v3817_v40 }
 0xc09   : > { %v8790_v43 = vpop.f32.mrf.mxu0 }
 0xc0a   : > { %v11613_v59 = vmax.f32 %v3818_v15, 0.0 }
 0xc0b   : > { %v3820_v10 = vpop.f32.mrf.mxu0 }
 0xc0c   : > { %v3824_v25 = vsel %vm2766_vm3, %v11613_v59, 0.0  ;;  %v3929_v7 = vmul.f32 %v10948_v24, %v11613_v59 }
 0xc0d   : > { %v3825_v29 = vrot.slane %v3824_v25, 4  ;;  %v8791_v19 = vpop.f32.mrf.mxu0 }
 0xc0e   : > { %v11621_v52 = vadd.f32 %v3929_v7, %v3926_v46  ;;  %v11629_v7 = vld [vmem:[%s13292_s4] sm:$0xff]  }
 0xc0f   : > { %v3826_v26 = vadd.f32 %v3825_v29, %v3824_v25 }
 0xc10   : > { %13293 = vst [vmem:[#allocation84_spill] sm:$0xff] %v11621_v52  ;;  %v4074_v37 = vsel %vm2766_vm3, %v11621_v52, 0.0  ;;  %v13325_v52 = vld [vmem:[#allocation75_spill] sm:$0xff] }
 0xc11   : > { %v3827_v55 = vrot.slane %v3826_v26, 2  ;;  %v4075_v40 = vrot.slane %v4074_v37, 4 }
 0xc13   : > { %v3828_v22 = vadd.f32 %v3827_v55, %v3826_v26  ;;  %v4076_v15 = vadd.f32 %v4075_v40, %v4074_v37  ;;  %v4172_v26 = vld [vmem:[%s1644_s9] sm:$0xf]  ;;  %v11638_v55 = vld [vmem:[%s13295_s8 + $0x38] sm:$0xff]   ;;  %v11652_v40 = vld [vmem:[%s13295_s8 + $0x28] sm:$0xff]   ;;  %s13296_s9 = sld [smem:[#allocation45_spill]] }
 0xc15   : > { %v3829_v43 = vrot.slane %v3828_v22, 1  ;;  %v4077_v10 = vrot.slane %v4076_v15, 2 }
 0xc17   : > { %v3830_v32 = vadd.f32 %v3829_v43, %v3828_v22  ;;  %v4078_v21 = vadd.f32 %v4077_v10, %v4076_v15  ;;  %v11657_v22 = vld [vmem:[%s13295_s8 + $0x20] sm:$0xff]   ;;  %v11662_v15 = vld [vmem:[%s13295_s8 + $0x18] sm:$0xff]   ;;  %v11667_v43 = vld [vmem:[%s13295_s8 + $0x10] sm:$0xff]  }
 0xc18   : > { %v11672_v10 = vld [vmem:[%s13295_s8 + $0x8] sm:$0xff]  }
 0xc19   : > { %v3831_v24 = vmul.f32 0.25, %v3830_v32  ;;  %v4079_v46 = vrot.slane %v4078_v21, 1  ;;  %v4174_v32 = vpack.c.bf16 %v4172_v26, %v4172_v26 }
 0xc1b   : > { %v3832_v25 = vpack.c.bf16 %v3831_v24, %v3831_v24  ;;  %v4080_v29 = vadd.f32 %v4079_v46, %v4078_v21  ;;  %v11645_v21 = vld [vmem:[%s13295_s8 + $0x30] sm:$0xff]   ;;  %v11677_v24 = vld [vmem:[%s13295_s8] sm:$0xff]   ;;  %v4173_v46 = vpack.c.bf16 %v13291_v20, %v13291_v20 }
 0xc1c   : > { %v2992_v20 = vld [vmem:[%s13297_s22] sm:$0x1]  ;;  %s13299_s22 = sld [smem:[#allocation44_spill]] }
 0xc1d   : > { %8809 = vmatmul.mubr.bf16.vlgmr.msra.gmra.mxu1 %v3832_v25  ;;  %v4081_v19 = vmul.f32 0.25, %v4080_v29  ;;  %v11687_v25 = vld [vmem:[%s13296_s9 + $0x18] sm:$0xff]   ;;  %v11691_v29 = vld [vmem:[%s13296_s9 + $0x10] sm:$0xff]  }
 0xc1e   : > { %8833 = vmatpush3.bf16.msra.mxu1 %v11629_v7  ;;  %8834 = vmatprep.mubr.msk.bf16.mxu1 %vm10069_vm0, %v13141_v44 }
 0xc1f   : > { %v4082_v37 = vpack.c.bf16 %v4081_v19, %v4081_v19  ;;  %8838 = vmatprep.subr.bf16.mxu1 %v13141_v44 }
 0xc21   : > { %8829 = vmatmul.mubr.bf16.vlgmr.msra.gmra.mxu0 %v4082_v37  ;;  %v4073_v37 = vld [vmem:[%s13259_s13] sm:$0x1]  ;;  %s13300_s13 = sld [smem:[#allocation46_spill]] }
 0xc22   : > { %8860 = vmatprep.mubr.msk.bf16.mxu0 %vm10069_vm0, %v13141_v44 }
 0xc25   : > { %8835 = vmatmul.mubr.msk.bf16.vlgmr.msra.gmra.mxu1 %vm2626_vm2, %v4174_v32 }
 0xc26   : > { %8839 = vmatpush3.bf16.msra.mxu1 %v11638_v55  ;;  %8854 = vmatprep.mubr.msk.bf16.mxu1 %vm10069_vm0, %v13141_v44 }
 0xc27   : > { %8840 = vmatprep.subr.bf16.mxu1 %v13141_v44 }
 0xc2a   : > { %8841 = vmatpush3.bf16.msra.mxu1 %v11645_v21 }
 0xc2b   : > { %8842 = vmatprep.subr.bf16.mxu1 %v13141_v44 }
 0xc2e   : > { %8843 = vmatpush3.bf16.msra.mxu1 %v11652_v40 }
 0xc2f   : > { %8844 = vmatprep.subr.bf16.mxu1 %v13141_v44 }
 0xc32   : > { %8845 = vmatpush3.bf16.msra.mxu1 %v11657_v22 }
 0xc33   : > { %8846 = vmatprep.subr.bf16.mxu1 %v13141_v44 }
 0xc36   : > { %8847 = vmatpush3.bf16.msra.mxu1 %v11662_v15 }
 0xc37   : > { %8848 = vmatprep.subr.bf16.mxu1 %v13141_v44 }
 0xc3a   : > { %8849 = vmatpush3.bf16.msra.mxu1 %v11667_v43 }
 0xc3b   : > { %8850 = vmatprep.subr.bf16.mxu1 %v13141_v44 }
 0xc3e   : > { %8851 = vmatpush3.bf16.msra.mxu1 %v11672_v10 }
 0xc3f   : > { %8852 = vmatprep.subr.bf16.mxu1 %v13141_v44 }
 0xc42   : > { %8853 = vmatpush3.bf16.msra.mxu1 %v11677_v24 }
 0xc43   : > { %8884 = vmatprep.subr.bf16.mxu1 %v13141_v44 }
 0xc45   : > { %8855 = vmatmul.mubr.bf16.vlgmr.msra.gmra.mxu1 %v4173_v46 }
 0xc46   : > { %8892 = vmatprep.mubr.msk.bf16.mxu1 %vm10069_vm0, %v13141_v44  ;;  %8885 = vmatpush3.bf16.msra.mxu1 %v11687_v25 }
 0xc47   : > { %8886 = vmatprep.subr.bf16.mxu1 %v13141_v44 }
 0xc4a   : > { %8887 = vmatpush3.bf16.msra.mxu1 %v11691_v29 }
 0xc4b   : > { %8888 = vmatprep.subr.bf16.mxu1 %v13141_v44 }
 0xcdd   : > { %v3915_v19 = vpop.f32.mrf.mxu1 }
 0xcde   : > { %v3916_v26 = vadd.f32 %v3915_v19, %v2992_v20 }
 0xcdf   : > { %v8810_v32 = vpop.f32.mrf.mxu1 }
 0xce0   : > { %3923 = vst.msk [vmem:[%s12981_s11] sm:$0x1] %vm3921_vm4, %v3916_v26  ;;  %s13303_s11 = sld [smem:[#allocation47_spill]] }
 0xce1   : > { %v4165_v46 = vpop.f32.mrf.mxu0  ;;  %v3918_v56 = vpop.f32.mrf.mxu1 }
 0xce2   : > { %v4166_v45 = vadd.f32 %v4165_v46, %v4073_v37 }
 0xce3   : > { %v8830_v9 = vpop.f32.mrf.mxu0  ;;  %v8811_v16 = vpop.f32.mrf.mxu1 }
 0xce4   : > { %4171 = vst.msk [vmem:[%s12980_s12] sm:$0x1] %vm3921_vm4, %v4166_v45  ;;  %s13302_s12 = sld [smem:[#allocation48_spill]] }
 0xce5   : > { %v4168_v42 = vpop.f32.mrf.mxu0  ;;  %v4218_v17 = vpop.f32.mrf.mxu1 }
 0xce6   : > { %v7896_v49 = vld [vmem:[%s13303_s11] ss:$0 sm:$0xff] }
 0xce7   : > { %v8831_v20 = vpop.f32.mrf.mxu0  ;;  %v8836_v19 = vpop.f32.mrf.mxu1 }
 0xce8   : > { %v9577_v20 = vld [vmem:[%s13299_s22] sm:$0xff]  }
 0xce9   : > { %v4221_v32 = vpop.f32.mrf.mxu1  ;;  %v9581_v19 = vld [vmem:[%s13300_s13 + $0x20] sm:$0xff]  }
 0xcea   : > { %v9582_v32 = vld [vmem:[%s13300_s13 + $0x18] sm:$0xff]  }
 0xceb   : > { %v8837_v11 = vpop.f32.mrf.mxu1 }
 0xcec   : > { %v9578_v11 = vld [vmem:[%s13300_s13 + $0x38] sm:$0xff]  }
 0xd05   : > { %v4306_v26 = vpop.f32.mrf.mxu1 }
 0xd06   : > { %v4307_v4 = vadd.f32 %v4306_v26, %v4218_v17  ;;  %v9579_v17 = vld [vmem:[%s13300_s13 + $0x30] sm:$0xff]  }
 0xd07   : > { %v8856_v56 = vpop.f32.mrf.mxu1  ;;  %v9583_v26 = vld [vmem:[%s13300_s13 + $0x10] sm:$0xff]  }
 0xd08   : > { %v4318_v16 = vadd.f32 %v11707_v27, %v4307_v4  ;;  %v9580_v4 = vld [vmem:[%s13300_s13 + $0x28] sm:$0xff]  }
 0xd09   : > { %v4309_v9 = vpop.f32.mrf.mxu1  ;;  %v9584_v56 = vld [vmem:[%s13300_s13 + $0x8] sm:$0xff]  }
 0xd0a   : > { %v4319_v37 = vmax.f32 %v4318_v16, 0.0  ;;  %v9585_v16 = vld [vmem:[%s13300_s13] sm:$0xff]   ;;  %v13301_v9 = vld [vmem:[#allocation83_spill] sm:$0xff] }
 0xd0b   : > { %v8857_v45 = vpop.f32.mrf.mxu1 }
 0xd0c   : > { %v4320_v42 = vpack.c.bf16 %v4319_v37, %v4319_v37  ;;  %v11733_v37 = vld [vmem:[%s13296_s9 + $0x8] sm:$0xff]   ;;  %v11738_v45 = vld [vmem:[%s13296_s9] sm:$0xff]  }
 0xd0d   : > { %8889 = vmatpush3.bf16.msra.mxu1 %v11733_v37 }
 0xd0e   : > { %v4332_v46 = vsel %vm4330_vm5, %v4320_v42, 0  ;;  %8890 = vmatprep.subr.bf16.mxu1 %v13141_v44 }
 0xd0f   : > { %8859 = vmatpush3.bf16.msra.mxu0 %v4332_v46 }
 0xd10   : > { %8864 = vmatprep.subr.bf16.mxu0 %v13141_v44 }
 0xd11   : > { %8891 = vmatpush3.bf16.msra.mxu1 %v11738_v45 }
 0xd12   : > { %8861 = vmatmul.mubr.msk.bf16.vlgmr.msra.gmra.mxu0 %vm4326_vm6, %v9577_v20 }
 0xd13   : > { %8865 = vmatpush3.bf16.msra.mxu0 %v9578_v11  ;;  %8880 = vmatprep.mubr.msk.bf16.mxu0 %vm10069_vm0, %v13141_v44 }
 0xd14   : > { %8866 = vmatprep.subr.bf16.mxu0 %v13141_v44 }
 0xd17   : > { %8867 = vmatpush3.bf16.msra.mxu0 %v9579_v17 }
 0xd18   : > { %8868 = vmatprep.subr.bf16.mxu0 %v13141_v44 }
 0xd1b   : > { %8869 = vmatpush3.bf16.msra.mxu0 %v9580_v4 }
 0xd1c   : > { %8870 = vmatprep.subr.bf16.mxu0 %v13141_v44 }
 0xd1f   : > { %8871 = vmatpush3.bf16.msra.mxu0 %v9581_v19 }
 0xd20   : > { %8872 = vmatprep.subr.bf16.mxu0 %v13141_v44 }
 0xd23   : > { %8873 = vmatpush3.bf16.msra.mxu0 %v9582_v32 }
 0xd24   : > { %8874 = vmatprep.subr.bf16.mxu0 %v13141_v44 }
 0xd27   : > { %8875 = vmatpush3.bf16.msra.mxu0 %v9583_v26 }
 0xd28   : > { %8876 = vmatprep.subr.bf16.mxu0 %v13141_v44 }
 0xd2b   : > { %8877 = vmatpush3.bf16.msra.mxu0 %v9584_v56  ;;  %v9590_v56 = vld [vmem:[%s13302_s12] sm:$0xff]  }
 0xd2c   : > { %8878 = vmatprep.subr.bf16.mxu0 %v13141_v44 }
 0xd2f   : > { %8879 = vmatpush3.bf16.msra.mxu0 %v9585_v16 }
 0xd32   : > { %8881 = vmatmul.mubr.bf16.vlgmr.msra.gmra.mxu0 %v13301_v9 }
 0xdd2   : > { %v4368_v42 = vpop.f32.mrf.mxu0 }
 0xdd4   : > { %v8862_v46 = vpop.f32.mrf.mxu0 }
 0xdd6   : > { %v4371_v20 = vpop.f32.mrf.mxu0 }
 0xdd7   : > { %v4375_v11 = vpack.c.bf16 %v4371_v20, %v4368_v42 }
 0xdd8   : > { %v8863_v17 = vpop.f32.mrf.mxu0 }
 0xdd9   : > { %8893 = vmatmul.mubr.msk.bf16.vlgmr.msra.gmra.mxu1 %vm2482_vm1, %v4375_v11 }
 0xdda   : > { %8898 = vmatprep.mubr.msk.bf16.mxu1 %vm2626_vm2, %v9590_v56  ;;  %v9591_v56 = vld [vmem:[%s13302_s12 + $0x8] sm:$0xff]  }
 0xdf2   : > { %v4458_v4 = vpop.f32.mrf.mxu0 }
 0xdf4   : > { %v8882_v19 = vpop.f32.mrf.mxu0 }
 0xdf6   : > { %v4461_v32 = vpop.f32.mrf.mxu0 }
 0xdf8   : > { %v8883_v26 = vpop.f32.mrf.mxu0 }
 0xe99   : > { %v4526_v16 = vpop.f32.mrf.mxu1 }
 0xe9a   : > { %v4527_v9 = vadd.f32 %v4526_v16, %v4458_v4  ;;  %v9594_v4 = vld [vmem:[%s13302_s12 + $0x10] sm:$0xff]  }
 0xe9b   : > { %v8894_v46 = vpop.f32.mrf.mxu1  ;;  %v11752_v16 = vld [vmem:[%s13304_s14 + $0x30] sm:$0xff]  }
 0xe9c   : > { %v4539_v42 = vadd.f32 %v7896_v49, %v4527_v9  ;;  %v11767_v9 = vld [vmem:[%s13304_s14 + $0x20] sm:$0xff]  }
 0xe9d   : > { %v4529_v50 = vpop.f32.mrf.mxu1  ;;  %v13307_v46 = vld [vmem:[#allocation80_spill] sm:$0xff] }
 0xe9e   : > { %v4530_v20 = vadd.f32 %v4529_v50, %v4461_v32  ;;  %v4541_v19 = vmax.f32 %v4539_v42, 0.0  ;;  %v9618_v50 = vld [vmem:[%s13305_s19 + $0x18] sm:$0xff]   ;;  %v11761_v32 = vld [vmem:[%s13304_s14 + $0x28] sm:$0xff]  }
 0xe9f   : > { %v8895_v11 = vpop.f32.mrf.mxu1  ;;  %8930 = vmatprep.subr.bf16.mxu0 %v9618_v50  ;;  %v11774_v42 = vld [vmem:[%s13304_s14 + $0x18] sm:$0xff]  }
 0xea0   : > { %v4540_v17 = vadd.f32 %v7896_v49, %v4530_v20  ;;  %v9619_v49 = vld [vmem:[%s13305_s19 + $0x10] sm:$0xff]   ;;  %8931 = vmatpush3.bf16.msra.mxu0 %v9618_v50  ;;  %v11784_v11 = vld [vmem:[%s13304_s14 + $0x8] sm:$0xff]  }
 0xea1   : > { %8932 = vmatprep.subr.bf16.mxu0 %v9619_v49  ;;  %v11779_v20 = vld [vmem:[%s13304_s14 + $0x10] sm:$0xff]  }
 0xea2   : > { %v4542_v26 = vmax.f32 %v4540_v17, 0.0  ;;  %v11789_v17 = vld [vmem:[%s13304_s14] sm:$0xff]   ;;  %v13309_v50 = vld [vmem:[#allocation78_spill] sm:$0xff] }
 0xea3   : > { %13315 = vst [vmem:[#allocation78_spill] sm:$0xff] %v11826_v57 }
 0xea4   : > { %v4543_v63 = vpack.c.bf16 %v4542_v26, %v4541_v19  ;;  %8933 = vmatpush3.bf16.msra.mxu0 %v9619_v49  ;;  %v11794_v19 = vld [vmem:[%s13306_s20 + $0x78] sm:$0xff]   ;;  %v11808_v49 = vld [vmem:[%s13306_s20 + $0x30] sm:$0xff]  }
 0xea5   : > { %v11798_v26 = vld [vmem:[%s13306_s20 + $0x38] sm:$0xff]   ;;  %8934 = vmatprep.subr.bf16.mxu0 %v9620_v36 }
 0xea6   : > { %8896 = vmatprep.subr.bf16.mxu1 %v4543_v63 }
 0xea7   : > { %8897 = vmatpush3.bf16.msra.mxu1 %v4543_v63  ;;  %v9595_v63 = vld [vmem:[%s13302_s12 + $0x18] sm:$0xff]  }
 0xea8   : > { %8906 = vmatprep.subr.bf16.mxu1 %v11746_v39  ;;  %8935 = vmatpush3.bf16.msra.mxu0 %v9620_v36  ;;  %v13329_v36 = vld [vmem:[#allocation71_spill] sm:$0xff] }
 0xea9   : > { %8936 = vmatprep.subr.bf16.mxu0 %v9621_v58 }
 0xeaa   : > { %8899 = vmatmul.mubr.msk.bf16.vlgmr.msra.gmra.mxu1 %vm2626_vm2, %v9591_v56  ;;  %v11802_v56 = vld [vmem:[%s13306_s20 + $0x70] sm:$0xff]  }
 0xeab   : > { %8907 = vmatpush3.bf16.msra.mxu1 %v11746_v39  ;;  %8902 = vmatprep.mubr.msk.bf16.mxu1 %vm2626_vm2, %v9594_v4  ;;  %v13308_v4 = vld [vmem:[#allocation79_spill] sm:$0xff] }
 0xeac   : > { %8908 = vmatprep.subr.bf16.mxu1 %v11752_v16  ;;  %8937 = vmatpush3.bf16.msra.mxu0 %v9621_v58  ;;  %v13331_v58 = vld [vmem:[#allocation69_spill] sm:$0xff] }
 0xeaf   : > { %8909 = vmatpush3.bf16.msra.mxu1 %v11752_v16 }
 0xeb0   : > { %8910 = vmatprep.subr.bf16.mxu1 %v11761_v32 }
 0xeb2   : > { %8903 = vmatmul.mubr.msk.bf16.gmra.mxu1 %vm2626_vm2, %v9595_v63  ;;  %v11812_v63 = vld [vmem:[%s13306_s20 + $0x68] sm:$0xff]  }
 0xeb3   : > { %8911 = vmatpush3.bf16.msra.mxu1 %v11761_v32  ;;  %8922 = vmatprep.mubr.bf16.mxu1 %v13307_v46  ;;  %13310 = vst [vmem:[#allocation83_spill] sm:$0xff] %v11812_v63  ;;  %v11816_v46 = vld [vmem:[%s13306_s20 + $0x28] sm:$0xff]  }
 0xeb4   : > { %8912 = vmatprep.subr.bf16.mxu1 %v11767_v9  ;;  %13311 = vst [vmem:[#allocation80_spill] sm:$0xff] %v11816_v46 }
 0xeb7   : > { %8913 = vmatpush3.bf16.msra.mxu1 %v11767_v9 }
 0xeb8   : > { %8914 = vmatprep.subr.bf16.mxu1 %v11774_v42 }
 0xebb   : > { %8915 = vmatpush3.bf16.msra.mxu1 %v11774_v42 }
 0xebc   : > { %8916 = vmatprep.subr.bf16.mxu1 %v11779_v20 }
 0xebf   : > { %8917 = vmatpush3.bf16.msra.mxu1 %v11779_v20 }
 0xec0   : > { %8918 = vmatprep.subr.bf16.mxu1 %v11784_v11 }
 0xec3   : > { %8919 = vmatpush3.bf16.msra.mxu1 %v11784_v11 }
 0xec4   : > { %8920 = vmatprep.subr.bf16.mxu1 %v11789_v17 }
 0xec7   : > { %8921 = vmatpush3.bf16.msra.mxu1 %v11789_v17 }
 0xec8   : > { %8300 = vmatprep.subr.bf16.mxu1 %v11794_v19 }
 0xeca   : > { %8923 = vmatmul.mubr.bf16.vlgmr.msra.gmra.mxu1 %v13308_v4  ;;  %v11820_v4 = vld [vmem:[%s13306_s20 + $0x60] sm:$0xff]  }
 0xecb   : > { %8926 = vmatprep.mubr.bf16.mxu1 %v13309_v50  ;;  %8301 = vmatpush3.bf16.msra.mxu1 %v11798_v26  ;;  %13312 = vst [vmem:[#allocation79_spill] sm:$0xff] %v11820_v4  ;;  %v13313_v50 = vld [vmem:[#allocation77_spill] sm:$0xff] }
 0xecc   : > { %8302 = vmatprep.subr.bf16.mxu1 %v11802_v56  ;;  %13316 = vst [vmem:[#allocation77_spill] sm:$0xff] %v11830_v34 }
 0xecf   : > { %8303 = vmatpush3.bf16.msra.mxu1 %v11808_v49 }
 0xed0   : > { %8304 = vmatprep.subr.bf16.mxu1 %v11812_v63 }
 0xed2   : > { %8927 = vmatmul.mubr.bf16.gmra.mxu1 %v13313_v50  ;;  %v11838_v50 = vld [vmem:[%s13306_s20 + $0x50] sm:$0xff]  }
 0xed3   : > { %8305 = vmatpush3.bf16.msra.mxu1 %v11816_v46  ;;  %5182 = vmatprep.mubr.bf16.mxu1 %v13314_v47  ;;  %13318 = vst [vmem:[#allocation142_spill] sm:$0xff] %v11838_v50  ;;  %v11846_v47 = vld [vmem:[%s13306_s20 + $0x48] sm:$0xff]  }
 0xed4   : > { %8306 = vmatprep.subr.bf16.mxu1 %v11820_v4  ;;  %13320 = vst [vmem:[#allocation144_spill] sm:$0xff] %v11846_v47 }
 0xed7   : > { %8307 = vmatpush3.bf16.msra.mxu1 %v11826_v57 }
 0xed8   : > { %8308 = vmatprep.subr.bf16.mxu1 %v11830_v34 }
 0xedb   : > { %8309 = vmatpush3.bf16.msra.mxu1 %v11834_v28 }
 0xedc   : > { %8310 = vmatprep.subr.bf16.mxu1 %v11838_v50 }
 0xedf   : > { %8311 = vmatpush3.bf16.msra.mxu1 %v11842_v14 }
 0xee0   : > { %8312 = vmatprep.subr.bf16.mxu1 %v11846_v47 }
 0xee3   : > { %8313 = vmatpush3.bf16.msra.mxu1 %v11850_v2 }
 0xee4   : > { %8314 = vmatprep.subr.bf16.mxu1 %v11854_v31 }
 0xee7   : > { %8315 = vmatpush3.bf16.msra.mxu1 %v11858_v35  ;;  %v9622_v35 = vld [vmem:[%s13339_s21] sm:$0xff]  }
 0xee8   : > { %9000 = vmatprep.subr.bf16.mxu1 %v13141_v44 }
 0xeea   : > { %5183 = vmatmul.mubr.bf16.vlgmr.msra.gmra.mxu1 %v13324_v30  ;;  %v13328_v30 = vld [vmem:[#allocation74_spill] sm:$0xff] }
 0xeeb   : > { %5190 = vmatprep.mubr.bf16.mxu1 %v13325_v52  ;;  %9001 = vmatpush3.bf16.msra.mxu1 %v11638_v55  ;;  %v13333_v52 = vld [vmem:[#allocation67_spill] sm:$0xff]  ;;  %v13334_v55 = vld [vmem:[#allocation68_spill] sm:$0xff] }
 0xeec   : > { %9002 = vmatprep.subr.bf16.mxu1 %v13141_v44 }
 0xeef   : > { %9003 = vmatpush3.bf16.msra.mxu1 %v11645_v21  ;;  %v13335_v21 = vld [vmem:[#allocation65_spill] sm:$0xff] }
 0xef0   : > { %9004 = vmatprep.subr.bf16.mxu1 %v13141_v44 }
 0xef2   : > { %5191 = vmatmul.mubr.bf16.gmra.mxu1 %v13326_v41  ;;  %v13330_v41 = vld [vmem:[#allocation72_spill] sm:$0xff] }
 0xef3   : > { %5198 = vmatprep.mubr.bf16.mxu1 %v13327_v60  ;;  %9005 = vmatpush3.bf16.msra.mxu1 %v11652_v40  ;;  %v13332_v60 = vld [vmem:[#allocation70_spill] sm:$0xff] }
 0xef4   : > { %9006 = vmatprep.subr.bf16.mxu1 %v13141_v44  ;;  %v13336_v40 = vld [vmem:[#allocation66_spill] sm:$0xff] }
 0xef7   : > { %9007 = vmatpush3.bf16.msra.mxu1 %v11657_v22  ;;  %v13337_v22 = vld [vmem:[#allocation63_spill] sm:$0xff] }
 0xef8   : > { %9008 = vmatprep.subr.bf16.mxu1 %v13141_v44 }
 0xefa   : > { %5199 = vmatmul.mubr.bf16.gmra.mxu1 %v13328_v30 }
 0xefb   : > { %5206 = vmatprep.mubr.bf16.mxu1 %v13329_v36  ;;  %9009 = vmatpush3.bf16.msra.mxu1 %v11662_v15  ;;  %v13338_v15 = vld [vmem:[#allocation64_spill] sm:$0xff] }
 0xefc   : > { %9010 = vmatprep.subr.bf16.mxu1 %v13141_v44 }
 0xeff   : > { %9011 = vmatpush3.bf16.msra.mxu1 %v11667_v43  ;;  %v5527_v43 = vpack.c.bf16 %v11613_v59, %v11613_v59 }
 0xf00   : > { %9012 = vmatprep.subr.bf16.mxu1 %v13141_v44 }
 0xf02   : > { %5207 = vmatmul.mubr.bf16.gmra.mxu1 %v13330_v41 }
 0xf03   : > { %5214 = vmatprep.mubr.bf16.mxu1 %v13331_v58  ;;  %9013 = vmatpush3.bf16.msra.mxu1 %v11672_v10 }
 0xf04   : > { %9014 = vmatprep.subr.bf16.mxu1 %v13141_v44 }
 0xf07   : > { %9015 = vmatpush3.bf16.msra.mxu1 %v11677_v24 }
 0xf08   : > { %9046 = vmatprep.subr.bf16.mxu1 %v13141_v44 }
 0xf0a   : > { %5215 = vmatmul.mubr.bf16.gmra.mxu1 %v13332_v60 }
 0xf0b   : > { %5222 = vmatprep.mubr.bf16.mxu1 %v13333_v52 }
 0xf12   : > { %5223 = vmatmul.mubr.bf16.gmra.mxu1 %v13334_v55 }
 0xf13   : > { %5230 = vmatprep.mubr.bf16.mxu1 %v13335_v21 }
 0xf1a   : > { %5231 = vmatmul.mubr.bf16.gmra.mxu1 %v13336_v40 }
 0xf1b   : > { %5238 = vmatprep.mubr.bf16.mxu1 %v13337_v22 }
 0xf22   : > { %5239 = vmatmul.mubr.bf16.gmra.mxu1 %v13338_v15 }
 0xf23   : > { %9016 = vmatprep.mubr.msk.bf16.mxu1 %vm10069_vm0, %v13141_v44 }
 0xf2a   : > { %9017 = vmatmul.mubr.bf16.vlgmr.msra.gmra.mxu1 %v5527_v43 }
 0xf2b   : > { %9047 = vmatpush3.bf16.msra.mxu1 %v11687_v25  ;;  %9054 = vmatprep.mubr.msk.bf16.mxu1 %vm10069_vm0, %v13141_v44 }
 0xf2c   : > { %9048 = vmatprep.subr.bf16.mxu1 %v13141_v44 }
 0xf2f   : > { %9049 = vmatpush3.bf16.msra.mxu1 %v11691_v29 }
 0xf30   : > { %9050 = vmatprep.subr.bf16.mxu1 %v13141_v44 }
 0xf33   : > { %9051 = vmatpush3.bf16.msra.mxu1 %v11733_v37 }
 0xf34   : > { %9052 = vmatprep.subr.bf16.mxu1 %v13141_v44 }
 0xf37   : > { %9053 = vmatpush3.bf16.msra.mxu1 %v11738_v45 }
 0xf38   : > { %9068 = vmatprep.subr.bf16.mxu1 %v11746_v39 }
 0xf6a   : > { %v8900_v59 = vpop.f32.mrf.mxu1 }
 0xf6c   : > { %v4610_v10 = vpop.f32.mrf.mxu1 }
 0xf6e   : > { %v8901_v24 = vpop.f32.mrf.mxu1 }
 0xf6f   : > { %v4642_v36 = vpack.c.bf16 %v8901_v24, %v8900_v59 }
 0xf70   : > { %v4613_v25 = vpop.f32.mrf.mxu1 }
 0xf71   : > { %v4641_v30 = vpack.c.bf16 %v4613_v25, %v4610_v10 }
 0xf72   : > { %v8904_v41 = vpop.f32.mrf.mxu1 }
 0xf73   : > { %8938 = vmatprep.mubr.msk.bf16.mxu0 %vm2482_vm1, %v4641_v30 }
 0xf74   : > { %v4626_v29 = vpop.f32.mrf.mxu1  ;;  %8939 = vmatmul.mubr.msk.bf16.vlgmr.msra.gmra.mxu0 %vm2482_vm1, %v4642_v36 }
 0xf76   : > { %v8905_v58 = vpop.f32.mrf.mxu1 }
 0xf77   : > { %v4644_v52 = vpack.c.bf16 %v8905_v58, %v8904_v41 }
 0xf78   : > { %v4629_v37 = vpop.f32.mrf.mxu1 }
 0xf79   : > { %v4643_v60 = vpack.c.bf16 %v4629_v37, %v4626_v29 }
 0xf7b   : > { %8942 = vmatprep.mubr.msk.bf16.mxu0 %vm2482_vm1, %v4643_v60 }
 0xf7c   : > { %8943 = vmatmul.mubr.msk.bf16.gmra.mxu0 %vm2482_vm1, %v4644_v52 }
 0xf7d   : > { %8954 = vmatprep.mubr.msk.bf16.mxu0 %vm2482_vm1, %v9622_v35 }
 0xf8a   : > { %v11914_v39 = vpop.f32.mrf.mxu1 }
 0xf8c   : > { %v11916_v45 = vpop.f32.mrf.mxu1 }
 0xf8e   : > { %v11918_v55 = vpop.f32.mrf.mxu1 }
 0xf90   : > { %v11920_v21 = vpop.f32.mrf.mxu1 }
 0xf92   : > { %v8928_v40 = vpop.f32.mrf.mxu1 }
 0xf94   : > { %v4743_v22 = vpop.f32.mrf.mxu1 }
 0xf96   : > { %v11922_v15 = vpop.f32.mrf.mxu1 }
 0xf98   : > { %v11924_v43 = vpop.f32.mrf.mxu1 }
 0xfaa   : > { %v8316_v59 = vpop.f32.mrf.mxu1 }
 0xfac   : > { %v8317_v10 = vpop.f32.mrf.mxu1 }
 0xfad   : > { %v11926_v24 = vadd.f32 %v8317_v10, %v8316_v59 }
 0xfae   : > { %v11928_v25 = vpop.f32.mrf.mxu1 }
 0xfb0   : > { %v11930_v30 = vpop.f32.mrf.mxu1 }
 0xfb2   : > { %v8322_v36 = vpop.f32.mrf.mxu1 }
 0xfb4   : > { %v8323_v41 = vpop.f32.mrf.mxu1 }
 0xfb5   : > { %v11932_v29 = vadd.f32 %v8323_v41, %v8322_v36 }
 0xfb6   : > { %v11934_v58 = vpop.f32.mrf.mxu1 }
 0xfb8   : > { %v11936_v37 = vpop.f32.mrf.mxu1 }
 0xfba   : > { %v8328_v60 = vpop.f32.mrf.mxu1 }
 0xfbc   : > { %v8329_v52 = vpop.f32.mrf.mxu1 }
 0xfbd   : > { %v11938_v12 = vadd.f32 %v8329_v52, %v8328_v60 }
 0xfbe   : > { %v11940_v33 = vpop.f32.mrf.mxu1 }
 0xfc0   : > { %v11942_v59 = vpop.f32.mrf.mxu1 }
 0xfc2   : > { %v8334_v10 = vpop.f32.mrf.mxu1 }
 0xfc4   : > { %v8335_v38 = vpop.f32.mrf.mxu1 }
 0xfc5   : > { %v11944_v5 = vadd.f32 %v8335_v38, %v8334_v10 }
 0xfc6   : > { %v11946_v48 = vpop.f32.mrf.mxu1 }
 0xfc8   : > { %v11948_v36 = vpop.f32.mrf.mxu1 }
 0xfca   : > { %v8340_v41 = vpop.f32.mrf.mxu1 }
 0xfcc   : > { %v8341_v23 = vpop.f32.mrf.mxu1 }
 0xfcd   : > { %v11950_v53 = vadd.f32 %v8341_v23, %v8340_v41 }
 0xfce   : > { %v8343_v62 = vpop.f32.mrf.mxu1 }
 0xfd0   : > { %v8344_v60 = vpop.f32.mrf.mxu1 }
 0xfd1   : > { %v11952_v52 = vadd.f32 %v8344_v60, %v8343_v62 }
 0xfd2   : > { %v8346_v18 = vpop.f32.mrf.mxu1 }
 0xfd4   : > { %v8347_v0 = vpop.f32.mrf.mxu1 }
 0xfd5   : > { %v11954_v61 = vadd.f32 %v8347_v0, %v8346_v18 }
 0xfd6   : > { %v8349_v6 = vpop.f32.mrf.mxu1 }
 0xfd8   : > { %v8350_v38 = vpop.f32.mrf.mxu1 }
 0xfd9   : > { %v11958_v10 = vadd.f32 %v8350_v38, %v8349_v6 }
 0xfda   : > { %v8352_v31 = vpop.f32.mrf.mxu1 }
 0xfdc   : > { %v8353_v2 = vpop.f32.mrf.mxu1 }
 0xfdd   : > { %v11960_v47 = vadd.f32 %v8353_v2, %v8352_v31 }
 0xfde   : > { %v8355_v23 = vpop.f32.mrf.mxu1 }
 0xfe0   : > { %v8356_v41 = vpop.f32.mrf.mxu1 }
 0xfe1   : > { %v11962_v14 = vadd.f32 %v8356_v41, %v8355_v23 }
 0xfe2   : > { %v8358_v62 = vpop.f32.mrf.mxu1 }
 0xfe4   : > { %v8359_v60 = vpop.f32.mrf.mxu1 }
 0xfe5   : > { %v11964_v50 = vadd.f32 %v8359_v60, %v8358_v62  ;;  %v11971_v62 = vld [vmem:[%s13340_s24] ss:$0 sm:$0xff] }
 0xfe6   : > { %v8361_v0 = vpop.f32.mrf.mxu1 }
 0xfe8   : > { %v8362_v18 = vpop.f32.mrf.mxu1 }
 0xfe9   : > { %v11966_v28 = vadd.f32 %v8362_v18, %v8361_v0 }
 0xfea   : > { %v11968_v35 = vpop.f32.mrf.mxu1 }
 0xfec   : > { %v9018_v6 = vpop.f32.mrf.mxu1 }
 0xfee   : > { %v5609_v38 = vpop.f32.mrf.mxu1 }
 0xff0   : > { %v9019_v34 = vpop.f32.mrf.mxu1 }
0x1034   : > { %v8940_v31 = vpop.f32.mrf.mxu0 }
0x1035   : > { %v4837_v6 = vadd.f32 %v8940_v31, %v11914_v39 }
0x1036   : > { %v4828_v2 = vpop.f32.mrf.mxu0 }
0x1038   : > { %v8941_v57 = vpop.f32.mrf.mxu0 }
0x1039   : > { %v4840_v60 = vadd.f32 %v8941_v57, %v11918_v55 }
0x103a   : > { %v4831_v4 = vpop.f32.mrf.mxu0 }
0x103c   : > { %v8944_v23 = vpop.f32.mrf.mxu0 }
0x103d   : > { %v4853_v41 = vadd.f32 %v8944_v23, %v8928_v40 }
0x103e   : > { %v4844_v1 = vpop.f32.mrf.mxu0 }
0x103f   : > { %v4845_v46 = vadd.f32 %v4844_v1, %v4743_v22  ;;  %v4871_v0 = vadd.f32 %v11971_v62, %v4853_v41  ;;  %v4868_v1 = vadd.f32 %v11971_v62, %v4840_v60  ;;  %v4832_v22 = vadd.f32 %v4831_v4, %v11920_v21 }
0x1040   : > { %v8945_v51 = vpop.f32.mrf.mxu0  ;;  %v4867_v41 = vadd.f32 %v11971_v62, %v4837_v6  ;;  %v11991_v6 = vld [vmem:[%s13339_s21 + $0x8] sm:$0xff]  }
0x1041   : > { %v4856_v18 = vadd.f32 %v8945_v51, %v11922_v15  ;;  %v4869_v38 = vadd.f32 %v11971_v62, %v4845_v46  ;;  %v4879_v23 = vmax.f32 %v4871_v0, 0.0  ;;  %v4829_v51 = vadd.f32 %v4828_v2, %v11916_v45  ;;  %v11988_v0 = vld [vmem:[%s13341_s29 + $0x18] sm:$0xff]  }
0x1042   : > { %v4847_v34 = vpop.f32.mrf.mxu0  ;;  %v4876_v46 = vmax.f32 %v4868_v1, 0.0  ;;  %v4875_v4 = vmax.f32 %v4867_v41, 0.0  ;;  %v12010_v1 = vld [vmem:[%s13339_s21 + $0x20] sm:$0xff]  }
0x1043   : > { %v4872_v63 = vadd.f32 %v11971_v62, %v4856_v18  ;;  %v4848_v40 = vadd.f32 %v4847_v34, %v11924_v43  ;;  %v4877_v39 = vmax.f32 %v4869_v38, 0.0  ;;  %v4866_v18 = vadd.f32 %v11971_v62, %v4832_v22  ;;  %v11994_v34 = vld [vmem:[%s13339_s21 + $0x10] sm:$0xff]   ;;  %v12018_v22 = vld [vmem:[%s13339_s21 + $0x28] sm:$0xff]   ;;  %v12038_v41 = vld [vmem:[%s13341_s29] sm:$0xff]  }
0x1044   : > { %v4882_v60 = vpack.c.bf16 %v4876_v46, %v4875_v4  ;;  %v11998_v38 = vld [vmem:[%s13341_s29 + $0x10] sm:$0xff]  }
0x1045   : > { %v4880_v57 = vmax.f32 %v4872_v63, 0.0  ;;  %v4870_v55 = vadd.f32 %v11971_v62, %v4848_v40  ;;  %v4865_v63 = vadd.f32 %v11971_v62, %v4829_v51  ;;  %v4874_v21 = vmax.f32 %v4866_v18, 0.0  ;;  %v12007_v40 = vld [vmem:[%s13339_s21 + $0x18] sm:$0xff]  }
0x1047   : > { %v4878_v15 = vmax.f32 %v4870_v55, 0.0  ;;  %v4884_v31 = vpack.c.bf16 %v4880_v57, %v4879_v23  ;;  %v4873_v45 = vmax.f32 %v4865_v63, 0.0  ;;  %v12021_v23 = vld [vmem:[%s13339_s21 + $0x30] sm:$0xff]   ;;  %v12028_v57 = vld [vmem:[%s13339_s21 + $0x38] sm:$0xff]   ;;  %v12033_v55 = vld [vmem:[%s13341_s29 + $0x8] sm:$0xff]  }
0x1048   : > { %13342 = vst [vmem:[#allocation61_spill] sm:$0xff] %v12028_v57 }
0x1049   : > { %8946 = vmatprep.subr.bf16.mxu0 %v4884_v31  ;;  %v4883_v43 = vpack.c.bf16 %v4878_v15, %v4877_v39  ;;  %v4881_v2 = vpack.c.bf16 %v4874_v21, %v4873_v45 }
0x104a   : > { %8947 = vmatpush3.bf16.msra.mxu0 %v4884_v31 }
0x104b   : > { %8948 = vmatprep.subr.bf16.mxu0 %v4883_v43 }
0x104e   : > { %8949 = vmatpush3.bf16.msra.mxu0 %v4883_v43 }
0x104f   : > { %8950 = vmatprep.subr.bf16.mxu0 %v4882_v60 }
0x1052   : > { %8951 = vmatpush3.bf16.msra.mxu0 %v4882_v60 }
0x1053   : > { %8952 = vmatprep.subr.bf16.mxu0 %v4881_v2 }
0x1056   : > { %8953 = vmatpush3.bf16.msra.mxu0 %v4881_v2 }
0x1057   : > { %8970 = vmatprep.subr.bf16.mxu0 %v11988_v0 }
0x1059   : > { %8955 = vmatmul.mubr.msk.bf16.vlgmr.msra.gmra.mxu0 %vm2482_vm1, %v11991_v6 }
0x105a   : > { %8958 = vmatprep.mubr.msk.bf16.mxu0 %vm2482_vm1, %v11994_v34  ;;  %8971 = vmatpush3.bf16.msra.mxu0 %v11988_v0 }
0x105b   : > { %8972 = vmatprep.subr.bf16.mxu0 %v11998_v38 }
0x105e   : > { %8973 = vmatpush3.bf16.msra.mxu0 %v11998_v38 }
0x105f   : > { %8974 = vmatprep.subr.bf16.mxu0 %v12033_v55 }
0x1061   : > { %8959 = vmatmul.mubr.msk.bf16.gmra.mxu0 %vm2482_vm1, %v12007_v40 }
0x1062   : > { %8962 = vmatprep.mubr.msk.bf16.mxu0 %vm2482_vm1, %v12010_v1  ;;  %8975 = vmatpush3.bf16.msra.mxu0 %v12033_v55 }
0x1063   : > { %8976 = vmatprep.subr.bf16.mxu0 %v12038_v41 }
0x1066   : > { %8977 = vmatpush3.bf16.msra.mxu0 %v12038_v41 }
0x1067   : > { %8994 = vmatprep.subr.bf16.mxu0 %v13141_v44 }
0x1069   : > { %8963 = vmatmul.mubr.msk.bf16.gmra.mxu0 %vm2482_vm1, %v12018_v22 }
0x106a   : > { %8966 = vmatprep.mubr.msk.bf16.mxu0 %vm2482_vm1, %v12021_v23 }
0x1071   : > { %8967 = vmatmul.mubr.msk.bf16.gmra.mxu0 %vm2482_vm1, %v12028_v57 }
0x1119   : > { %v8956_v51 = vpop.f32.mrf.mxu0 }
0x111b   : > { %v4983_v39 = vpop.f32.mrf.mxu0 }
0x111d   : > { %v8957_v15 = vpop.f32.mrf.mxu0 }
0x111e   : > { %v5047_v18 = vpack.c.bf16 %v8957_v15, %v8956_v51 }
0x111f   : > { %v4986_v31 = vpop.f32.mrf.mxu0 }
0x1120   : > { %v5046_v46 = vpack.c.bf16 %v4986_v31, %v4983_v39 }
0x1121   : > { %v8960_v43 = vpop.f32.mrf.mxu0 }
0x1122   : > { %8978 = vmatprep.mubr.msk.bf16.mxu0 %vm2482_vm1, %v5046_v46 }
0x1123   : > { %v4999_v4 = vpop.f32.mrf.mxu0  ;;  %8979 = vmatmul.mubr.msk.bf16.vlgmr.msra.gmra.mxu0 %vm2482_vm1, %v5047_v18 }
0x1124   : > { %8995 = vmatpush3.bf16.msra.mxu0 %v11629_v7 }
0x1125   : > { %v8961_v63 = vpop.f32.mrf.mxu0  ;;  %9020 = vmatprep.subr.bf16.mxu0 %v13141_v44 }
0x1126   : > { %v5049_v45 = vpack.c.bf16 %v8961_v63, %v8960_v43 }
0x1127   : > { %v5002_v21 = vpop.f32.mrf.mxu0 }
0x1128   : > { %v5048_v60 = vpack.c.bf16 %v5002_v21, %v4999_v4 }
0x1129   : > { %v8964_v2 = vpop.f32.mrf.mxu0 }
0x112a   : > { %8982 = vmatprep.mubr.msk.bf16.mxu0 %vm2482_vm1, %v5048_v60  ;;  %v5526_v60 = vld [vmem:[%s1648_s2] sm:$0xf]  ;;  %s13387_s2 = sld [smem:[#allocation14_spill]] }
0x112b   : > { %v5015_v51 = vpop.f32.mrf.mxu0  ;;  %8983 = vmatmul.mubr.msk.bf16.gmra.mxu0 %vm2482_vm1, %v5049_v45  ;;  %v5528_v45 = vpack.c.bf16 %v5526_v60, %v5526_v60 }
0x112d   : > { %v8965_v39 = vpop.f32.mrf.mxu0 }
0x112e   : > { %v5051_v46 = vpack.c.bf16 %v8965_v39, %v8964_v2  ;;  %v12061_v2 = vld [vmem:[%s13344_s15] ss:$0 sm:$0xff] }
0x112f   : > { %v5018_v15 = vpop.f32.mrf.mxu0 }
0x1130   : > { %v5050_v31 = vpack.c.bf16 %v5018_v15, %v5015_v51 }
0x1131   : > { %v8968_v18 = vpop.f32.mrf.mxu0 }
0x1132   : > { %8986 = vmatprep.mubr.msk.bf16.mxu0 %vm2482_vm1, %v5050_v31  ;;  %v8327_v31 = vadd.f32 %v11936_v37, %v11934_v58 }
0x1133   : > { %v5031_v7 = vpop.f32.mrf.mxu0  ;;  %8987 = vmatmul.mubr.msk.bf16.gmra.mxu0 %vm2482_vm1, %v5051_v46 }
0x1135   : > { %v8969_v43 = vpop.f32.mrf.mxu0 }
0x1136   : > { %v5053_v21 = vpack.c.bf16 %v8969_v43, %v8968_v18  ;;  %v8321_v43 = vadd.f32 %v11930_v30, %v11928_v25  ;;  %v8339_v25 = vadd.f32 %v11948_v36, %v11946_v48 }
0x1137   : > { %v5034_v4 = vpop.f32.mrf.mxu0 }
0x1138   : > { %v5052_v63 = vpack.c.bf16 %v5034_v4, %v5031_v7 }
0x113a   : > { %8990 = vmatprep.mubr.msk.bf16.mxu0 %vm2482_vm1, %v5052_v63 }
0x113b   : > { %8991 = vmatmul.mubr.msk.bf16.gmra.mxu0 %vm2482_vm1, %v5053_v21 }
0x113c   : > { %8996 = vmatprep.mubr.msk.bf16.mxu0 %vm10069_vm0, %v13141_v44 }
0x1143   : > { %8997 = vmatmul.mubr.msk.bf16.vlgmr.msra.gmra.mxu0 %vm2626_vm2, %v5528_v45 }
0x1144   : > { %9022 = vmatprep.mubr.msk.bf16.mxu0 %vm10069_vm0, %v13141_v44 }
0x11e3   : > { %v8980_v51 = vpop.f32.mrf.mxu0 }
0x11e4   : > { %v5338_v39 = vadd.f32 %v8980_v51, %v11932_v29 }
0x11e5   : > { %v5329_v15 = vpop.f32.mrf.mxu0 }
0x11e6   : > { %v5400_v46 = vadd.f32 %v12061_v2, %v5338_v39  ;;  %v5330_v18 = vadd.f32 %v11926_v24, %v5329_v15 }
0x11e7   : > { %v8981_v7 = vpop.f32.mrf.mxu0 }
0x11e8   : > { %v7969_v4 = vmul.f32 -1.442695, %v5400_v46  ;;  %v5398_v63 = vadd.f32 %v12061_v2, %v5330_v18  ;;  %v5341_v21 = vadd.f32 %v8981_v7, %v8327_v31  ;;  %v8333_v46 = vadd.f32 %v11942_v59, %v11940_v33 }
0x11e9   : > { %v5332_v60 = vpop.f32.mrf.mxu0 }
0x11ea   : > { %9634 = vpow2.f32 %v7969_v4  ;;  %v7967_v45 = vmul.f32 -1.442695, %v5398_v63  ;;  %v5401_v29 = vadd.f32 %v12061_v2, %v5341_v21  ;;  %v5333_v51 = vadd.f32 %v8321_v43, %v5332_v60 }
0x11eb   : > { %v8984_v57 = vpop.f32.mrf.mxu0 }
0x11ec   : > { %9636 = vpow2.f32 %v7967_v45  ;;  %v7970_v58 = vmul.f32 -1.442695, %v5401_v29  ;;  %v5399_v37 = vadd.f32 %v12061_v2, %v5333_v51  ;;  %v5354_v24 = vadd.f32 %v8984_v57, %v11944_v5 }
0x11ed   : > { %v5345_v30 = vpop.f32.mrf.mxu0 }
0x11ee   : > { %9638 = vpow2.f32 %v7970_v58  ;;  %v7968_v39 = vmul.f32 -1.442695, %v5399_v37  ;;  %v5404_v15 = vadd.f32 %v12061_v2, %v5354_v24  ;;  %v5346_v31 = vadd.f32 %v11938_v12, %v5345_v30 }
0x11ef   : > { %v8985_v18 = vpop.f32.mrf.mxu0 }
0x11f0   : > { %9640 = vpow2.f32 %v7968_v39  ;;  %v7973_v7 = vmul.f32 -1.442695, %v5404_v15  ;;  %v5402_v43 = vadd.f32 %v12061_v2, %v5346_v31  ;;  %v5357_v4 = vadd.f32 %v8985_v18, %v8339_v25 }
0x11f1   : > { %v5348_v5 = vpop.f32.mrf.mxu0 }
0x11f2   : > { %9642 = vpow2.f32 %v7973_v7  ;;  %v7971_v57 = vmul.f32 -1.442695, %v5402_v43  ;;  %v5405_v48 = vadd.f32 %v12061_v2, %v5357_v4  ;;  %v5349_v36 = vadd.f32 %v8333_v46, %v5348_v5 }
0x11f3   : > { %v8988_v63 = vpop.f32.mrf.mxu0 }
0x11f4   : > { %9644 = vpow2.f32 %v7971_v57  ;;  %v7974_v21 = vmul.f32 -1.442695, %v5405_v48  ;;  %v5403_v12 = vadd.f32 %v12061_v2, %v5349_v36  ;;  %v5370_v60 = vadd.f32 %v8988_v63, %v11954_v61 }
0x11f5   : > { %v5361_v33 = vpop.f32.mrf.mxu0 }
0x11f6   : > { %9646 = vpow2.f32 %v7974_v21  ;;  %v7972_v59 = vmul.f32 -1.442695, %v5403_v12  ;;  %v5408_v45 = vadd.f32 %v12061_v2, %v5370_v60  ;;  %v5362_v29 = vadd.f32 %v11950_v53, %v5361_v33 }
0x11f7   : > { %v9635_v51 = vpop.eup %9634  ;;  %v8989_v58 = vpop.f32.mrf.mxu0 }
0x11f8   : > { %v5464_v37 = vadd.f32 1.0, %v9635_v51  ;;  %9648 = vpow2.f32 %v7972_v59  ;;  %v7977_v24 = vmul.f32 -1.442695, %v5408_v45  ;;  %v5406_v25 = vadd.f32 %v12061_v2, %v5362_v29 }
0x11f9   : > { %v9637_v30 = vpop.eup %9636  ;;  %v5373_v39 = vadd.f32 %v8989_v58, %v11958_v10  ;;  %v5364_v15 = vpop.f32.mrf.mxu0 }
0x11fa   : > { %9650 = vrcp.f32 %v5464_v37  ;;  %v5462_v61 = vadd.f32 1.0, %v9637_v30  ;;  %v7975_v31 = vmul.f32 -1.442695, %v5406_v25  ;;  %v5365_v46 = vadd.f32 %v11952_v52, %v5364_v15 }
0x11fb   : > { %v9639_v18 = vpop.eup %9638  ;;  %9652 = vpow2.f32 %v7977_v24  ;;  %v5409_v53 = vadd.f32 %v12061_v2, %v5373_v39  ;;  %v8992_v7 = vpop.f32.mrf.mxu0 }
0x11fc   : > { %9654 = vrcp.f32 %v5462_v61  ;;  %v5465_v43 = vadd.f32 1.0, %v9639_v18  ;;  %v5407_v4 = vadd.f32 %v12061_v2, %v5365_v46  ;;  %v5386_v5 = vadd.f32 %v8992_v7, %v11964_v50 }
0x11fd   : > { %v9641_v57 = vpop.eup %9640  ;;  %9656 = vpow2.f32 %v7975_v31  ;;  %v7978_v10 = vmul.f32 -1.442695, %v5409_v53  ;;  %v5377_v48 = vpop.f32.mrf.mxu0 }
0x11fe   : > { %9658 = vrcp.f32 %v5465_v43  ;;  %v5463_v36 = vadd.f32 1.0, %v9641_v57  ;;  %v7976_v63 = vmul.f32 -1.442695, %v5407_v4  ;;  %v5412_v52 = vadd.f32 %v12061_v2, %v5386_v5 }
0x11ff   : > { %v9643_v21 = vpop.eup %9642  ;;  %9660 = vpow2.f32 %v7978_v10  ;;  %v5378_v12 = vadd.f32 %v11960_v47, %v5377_v48  ;;  %v8993_v60 = vpop.f32.mrf.mxu0 }
0x1200   : > { %9662 = vrcp.f32 %v5463_v36  ;;  %v5468_v33 = vadd.f32 1.0, %v9643_v21  ;;  %v7981_v59 = vmul.f32 -1.442695, %v5412_v52  ;;  %v5389_v45 = vadd.f32 %v8993_v60, %v11966_v28 }
0x1201   : > { %v9645_v50 = vpop.eup %9644  ;;  %9664 = vpow2.f32 %v7976_v63  ;;  %v5410_v29 = vadd.f32 %v12061_v2, %v5378_v12  ;;  %v5380_v51 = vpop.f32.mrf.mxu0 }
0x1202   : > { %9666 = vrcp.f32 %v5468_v33  ;;  %v5466_v58 = vadd.f32 1.0, %v9645_v50  ;;  %v5413_v37 = vadd.f32 %v12061_v2, %v5389_v45  ;;  %v5381_v24 = vadd.f32 %v11962_v14, %v5380_v51 }
0x1203   : > { %v9647_v47 = vpop.eup %9646  ;;  %9668 = vpow2.f32 %v7981_v59  ;;  %v7979_v25 = vmul.f32 -1.442695, %v5410_v29  ;;  %v5566_v30 = vpop.f32.mrf.mxu0 }
0x1204   : > { %9670 = vrcp.f32 %v5466_v58  ;;  %v5469_v39 = vadd.f32 1.0, %v9647_v47  ;;  %v7982_v28 = vmul.f32 -1.442695, %v5413_v37  ;;  %v5411_v15 = vadd.f32 %v12061_v2, %v5381_v24  ;;  %v12113_v58 = vld [vmem:[%s13299_s22] sm:$0xff]   ;;  %v12119_v24 = vld [vmem:[%s13300_s13 + $0x38] sm:$0xff]  }
0x1205   : > { %v9649_v61 = vpop.eup %9648  ;;  %9672 = vpow2.f32 %v7979_v25  ;;  %v5607_v31 = vadd.f32 %v11968_v35, %v5566_v30  ;;  %v8998_v46 = vpop.f32.mrf.mxu0 }
0x1206   : > { %9674 = vrcp.f32 %v5469_v39  ;;  %v5467_v14 = vadd.f32 1.0, %v9649_v61  ;;  %v7980_v18 = vmul.f32 -1.442695, %v5411_v15  ;;  %v12128_v61 = vld [vmem:[%s13300_s13 + $0x30] sm:$0xff]  }
0x1207   : > { %v9651_v53 = vpop.eup %9650  ;;  %9676 = vpow2.f32 %v7982_v28  ;;  %v5612_v7 = vadd.f32 %v11707_v27, %v5607_v31  ;;  %v5569_v43 = vpop.f32.mrf.mxu0 }
0x1208   : > { %v9653_v4 = vpop.eup %9652  ;;  %5512 = vst [vmem:[%s12101_s30 + $0x10] sm:$0xff] %v9651_v53  ;;  %9678 = vrcp.f32 %v5467_v14  ;;  %v12141_v43 = vld [vmem:[%s13300_s13 + $0x20] sm:$0xff]  }
0x1209   : > { %v9655_v5 = vpop.eup %9654  ;;  %v5472_v57 = vadd.f32 1.0, %v9653_v4  ;;  %9680 = vpow2.f32 %v7980_v18  ;;  %v5613_v10 = vmax.f32 %v5612_v7, 0.0  ;;  %v8999_v35 = vpop.f32.mrf.mxu0  ;;  %v12134_v18 = vld [vmem:[%s13300_s13 + $0x28] sm:$0xff]  }
0x120a   : > { %v9657_v48 = vpop.eup %9656  ;;  %5510 = vst [vmem:[%s12101_s30] sm:$0xff] %v9655_v5 }
0x120b   : > { %v9659_v36 = vpop.eup %9658  ;;  %9682 = vrcp.f32 %v5472_v57  ;;  %v5470_v63 = vadd.f32 1.0, %v9657_v48  ;;  %v5614_v52 = vpack.c.bf16 %v5613_v10, %v5613_v10  ;;  %v12148_v57 = vld [vmem:[%s13300_s13 + $0x18] sm:$0xff]   ;;  %v12155_v48 = vld [vmem:[%s13300_s13 + $0x10] sm:$0xff]  }
0x120c   : > { %v9661_v21 = vpop.eup %9660  ;;  %5513 = vst [vmem:[%s12101_s30 + $0x18] sm:$0xff] %v9659_v36  ;;  %v12161_v36 = vld [vmem:[%s13300_s13 + $0x8] sm:$0xff]  }
0x120d   : > { %v9663_v27 = vpop.eup %9662  ;;  %9684 = vrcp.f32 %v5470_v63  ;;  %v5473_v12 = vadd.f32 1.0, %v9661_v21  ;;  %v5616_v60 = vsel %vm4330_vm5, %v5614_v52, 0  ;;  %v12166_v63 = vld [vmem:[%s13300_s13] sm:$0xff]  }
0x120e   : > { %v9665_v33 = vpop.eup %9664  ;;  %5511 = vst [vmem:[%s12101_s30 + $0x8] sm:$0xff] %v9663_v27  ;;  %9021 = vmatpush3.bf16.msra.mxu0 %v5616_v60  ;;  %v12171_v52 = vld [vmem:[%s13302_s12] sm:$0xff]  }
0x120f   : > { %v9667_v59 = vpop.eup %9666  ;;  %9686 = vrcp.f32 %v5473_v12  ;;  %v5471_v45 = vadd.f32 1.0, %v9665_v33  ;;  %9026 = vmatprep.subr.bf16.mxu0 %v13141_v44 }
0x1210   : > { %v9669_v50 = vpop.eup %9668  ;;  %5516 = vst [vmem:[%s12101_s30 + $0x30] sm:$0xff] %v9667_v59  ;;  %v12177_v59 = vld [vmem:[%s13304_s14 + $0x38] sm:$0xff]  }
0x1211   : > { %v9671_v29 = vpop.eup %9670  ;;  %9688 = vrcp.f32 %v5471_v45  ;;  %v5476_v51 = vadd.f32 1.0, %v9669_v50  ;;  %9023 = vmatmul.mubr.msk.bf16.vlgmr.msra.gmra.mxu0 %vm4326_vm6, %v12113_v58  ;;  %13346 = vst [vmem:[#allocation75_spill] sm:$0xff] %v12177_v59  ;;  %v13358_v45 = vld [vmem:[#allocation145_spill] sm:$0xff]  ;;  %v13359_v50 = vld [vmem:[#allocation146_spill] sm:$0xff] }
0x1212   : > { %v9673_v37 = vpop.eup %9672  ;;  %5514 = vst [vmem:[%s12101_s30 + $0x20] sm:$0xff] %v9671_v29  ;;  %9027 = vmatpush3.bf16.msra.mxu0 %v12119_v24  ;;  %9042 = vmatprep.mubr.msk.bf16.mxu0 %vm10069_vm0, %v13141_v44  ;;  %v13360_v29 = vld [vmem:[#allocation147_spill] sm:$0xff] }
0x1213   : > { %v9675_v47 = vpop.eup %9674  ;;  %9690 = vrcp.f32 %v5476_v51  ;;  %v5474_v25 = vadd.f32 1.0, %v9673_v37  ;;  %9028 = vmatprep.subr.bf16.mxu0 %v13141_v44  ;;  %v13361_v51 = vld [vmem:[#allocation87_spill] sm:$0xff] }
0x1214   : > { %v9677_v30 = vpop.eup %9676  ;;  %5517 = vst [vmem:[%s12101_s30 + $0x38] sm:$0xff] %v9675_v47  ;;  %v13362_v37 = vld [vmem:[#allocation131_spill] sm:$0xff] }
0x1215   : > { %v9679_v39 = vpop.eup %9678  ;;  %9692 = vrcp.f32 %v5474_v25  ;;  %v5477_v28 = vadd.f32 1.0, %v9677_v30  ;;  %v9837_v47 = vld [vmem:[%s13295_s8 + $0x38] sm:$0xff]   ;;  %v9838_v25 = vld [vmem:[%s13295_s8 + $0x30] sm:$0xff]  }
0x1216   : > { %v9681_v15 = vpop.eup %9680  ;;  %5515 = vst [vmem:[%s12101_s30 + $0x28] sm:$0xff] %v9679_v39  ;;  %9029 = vmatpush3.bf16.msra.mxu0 %v12128_v61  ;;  %v13363_v30 = vld [vmem:[#allocation92_spill] sm:$0xff]  ;;  %v13364_v39 = vld [vmem:[#allocation129_spill] sm:$0xff] }
0x1217   : > { %9694 = vrcp.f32 %v5477_v28  ;;  %v5475_v31 = vadd.f32 1.0, %v9681_v15  ;;  %9030 = vmatprep.subr.bf16.mxu0 %v13141_v44  ;;  %v9839_v28 = vld [vmem:[%s13295_s8 + $0x28] sm:$0xff]   ;;  %v9840_v15 = vld [vmem:[%s13295_s8 + $0x20] sm:$0xff]  }
0x1218   : > { %v9683_v46 = vpop.eup %9682 }
0x1219   : > { %5520 = vst [vmem:[%s12101_s30 + $0x50] sm:$0xff] %v9683_v46  ;;  %9696 = vrcp.f32 %v5475_v31  ;;  %v13365_v31 = vld [vmem:[#allocation130_spill] sm:$0xff]  ;;  %v13366_v46 = vld [vmem:[#allocation127_spill] sm:$0xff] }
0x121a   : > { %v9685_v14 = vpop.eup %9684  ;;  %9031 = vmatpush3.bf16.msra.mxu0 %v12134_v18 }
0x121b   : > { %5518 = vst [vmem:[%s12101_s30 + $0x40] sm:$0xff] %v9685_v14  ;;  %9032 = vmatprep.subr.bf16.mxu0 %v13141_v44  ;;  %v9841_v14 = vld [vmem:[%s13295_s8 + $0x18] sm:$0xff]  }
0x121c   : > { %v9687_v53 = vpop.eup %9686 }
0x121d   : > { %5521 = vst [vmem:[%s12101_s30 + $0x58] sm:$0xff] %v9687_v53  ;;  %v9842_v53 = vld [vmem:[%s13295_s8 + $0x10] sm:$0xff]  }
0x121e   : > { %v9689_v7 = vpop.eup %9688  ;;  %9033 = vmatpush3.bf16.msra.mxu0 %v12141_v43 }
0x121f   : > { %5519 = vst [vmem:[%s12101_s30 + $0x48] sm:$0xff] %v9689_v7  ;;  %9034 = vmatprep.subr.bf16.mxu0 %v13141_v44  ;;  %v13367_v7 = vld [vmem:[#allocation128_spill] sm:$0xff] }
0x1220   : > { %v9691_v4 = vpop.eup %9690 }
0x1221   : > { %5524 = vst [vmem:[%s12101_s30 + $0x70] sm:$0xff] %v9691_v4  ;;  %v13368_v4 = vld [vmem:[#allocation125_spill] sm:$0xff] }
0x1222   : > { %v9693_v5 = vpop.eup %9692  ;;  %9035 = vmatpush3.bf16.msra.mxu0 %v12148_v57 }
0x1223   : > { %5522 = vst [vmem:[%s12101_s30 + $0x60] sm:$0xff] %v9693_v5  ;;  %9036 = vmatprep.subr.bf16.mxu0 %v13141_v44  ;;  %v9843_v5 = vld [vmem:[%s13295_s8 + $0x8] sm:$0xff]  }
0x1224   : > { %v9695_v10 = vpop.eup %9694 }
0x1225   : > { %5525 = vst [vmem:[%s12101_s30 + $0x78] sm:$0xff] %v9695_v10  ;;  %v9844_v10 = vld [vmem:[%s13295_s8] sm:$0xff]  }
0x1226   : > { %v9697_v35 = vpop.eup %9696  ;;  %9037 = vmatpush3.bf16.msra.mxu0 %v12155_v48 }
0x1227   : > { %5523 = vst [vmem:[%s12101_s30 + $0x68] sm:$0xff] %v9697_v35  ;;  %9038 = vmatprep.subr.bf16.mxu0 %v13141_v44  ;;  %v13369_v35 = vld [vmem:[#allocation126_spill] sm:$0xff]  ;;  %s1652_s30 = scalar_lea.vmem %s13387_s2, %s11626_s6  ;;  %s12462_s6 = scalar_lea.vmem %s10336_s23, %s10411_s26 }
0x1228   : > { %s13461_s2 = sld [smem:[#allocation57_spill]] }
0x122a   : > { %9039 = vmatpush3.bf16.msra.mxu0 %v12161_v36 }
0x122b   : > { %9040 = vmatprep.subr.bf16.mxu0 %v13141_v44 }
0x122e   : > { %9041 = vmatpush3.bf16.msra.mxu0 %v12166_v63 }
0x1231   : > { %9043 = vmatmul.mubr.bf16.vlgmr.msra.gmra.mxu0 %v11549_v13 }
0x1232   : > { %9060 = vmatprep.mubr.msk.bf16.mxu0 %vm2626_vm2, %v12171_v52 }
0x12d1   : > { %v5652_v21 = vpop.f32.mrf.mxu0 }
0x12d3   : > { %v9024_v27 = vpop.f32.mrf.mxu0 }
0x12d4   : > { %v13371_v27 = vld [vmem:[#allocation124_spill] sm:$0xff] }
0x12d5   : > { %v5655_v12 = vpop.f32.mrf.mxu0 }
0x12d6   : > { %v5659_v60 = vpack.c.bf16 %v5655_v12, %v5652_v21  ;;  %v13370_v21 = vld [vmem:[#allocation123_spill] sm:$0xff]  ;;  %v13372_v12 = vld [vmem:[#allocation120_spill] sm:$0xff] }
0x12d7   : > { %v9025_v33 = vpop.f32.mrf.mxu0 }
0x12d8   : > { %9055 = vmatmul.mubr.msk.bf16.vlgmr.msra.gmra.mxu1 %vm2482_vm1, %v5659_v60  ;;  %v13373_v60 = vld [vmem:[#allocation122_spill] sm:$0xff] }
0x12d9   : > { %9069 = vmatpush3.bf16.msra.mxu1 %v12177_v59  ;;  %9084 = vmatprep.mubr.bf16.mxu1 %v11525_v8  ;;  %v13374_v33 = vld [vmem:[#allocation118_spill] sm:$0xff] }
0x12da   : > { %9070 = vmatprep.subr.bf16.mxu1 %v11752_v16 }
0x12dd   : > { %9071 = vmatpush3.bf16.msra.mxu1 %v11752_v16 }
0x12de   : > { %9072 = vmatprep.subr.bf16.mxu1 %v11761_v32 }
0x12e1   : > { %9073 = vmatpush3.bf16.msra.mxu1 %v11761_v32 }
0x12e2   : > { %9074 = vmatprep.subr.bf16.mxu1 %v11767_v9 }
0x12e5   : > { %9075 = vmatpush3.bf16.msra.mxu1 %v11767_v9  ;;  %v13347_v9 = vld [vmem:[#allocation83_spill] sm:$0xff] }
0x12e6   : > { %9076 = vmatprep.subr.bf16.mxu1 %v11774_v42 }
0x12e9   : > { %9077 = vmatpush3.bf16.msra.mxu1 %v11774_v42  ;;  %v13348_v42 = vld [vmem:[#allocation140_spill] sm:$0xff] }
0x12ea   : > { %9078 = vmatprep.subr.bf16.mxu1 %v11779_v20 }
0x12ed   : > { %9079 = vmatpush3.bf16.msra.mxu1 %v11779_v20  ;;  %v13349_v20 = vld [vmem:[#allocation80_spill] sm:$0xff] }
0x12ee   : > { %9080 = vmatprep.subr.bf16.mxu1 %v11784_v11 }
0x12f1   : > { %9081 = vmatpush3.bf16.msra.mxu1 %v11784_v11  ;;  %v12193_v8 = vpop.f32.mrf.mxu0  ;;  %v13350_v11 = vld [vmem:[#allocation132_spill] sm:$0xff] }
0x12f2   : > { %9082 = vmatprep.subr.bf16.mxu1 %v11789_v17 }
0x12f3   : > { %v9044_v13 = vpop.f32.mrf.mxu0 }
0x12f4   : > { %v13375_v13 = vld [vmem:[#allocation119_spill] sm:$0xff] }
0x12f5   : > { %9083 = vmatpush3.bf16.msra.mxu1 %v11789_v17  ;;  %v12197_v16 = vpop.f32.mrf.mxu0  ;;  %v13351_v17 = vld [vmem:[#allocation79_spill] sm:$0xff] }
0x12f6   : > { %8440 = vmatprep.subr.bf16.mxu1 %v11794_v19  ;;  %v13354_v19 = vld [vmem:[#allocation76_spill] sm:$0xff] }
0x12f7   : > { %v9045_v32 = vpop.f32.mrf.mxu0 }
0x12f8   : > { %9085 = vmatmul.mubr.bf16.vlgmr.msra.gmra.mxu1 %v11517_v3  ;;  %v13352_v3 = vld [vmem:[#allocation78_spill] sm:$0xff]  ;;  %v13376_v32 = vld [vmem:[#allocation84_spill] sm:$0xff] }
0x12f9   : > { %9088 = vmatprep.mubr.bf16.mxu1 %v11511_v54  ;;  %8441 = vmatpush3.bf16.msra.mxu1 %v11798_v26  ;;  %v13353_v54 = vld [vmem:[#allocation77_spill] sm:$0xff]  ;;  %v13355_v26 = vld [vmem:[#allocation142_spill] sm:$0xff] }
0x12fa   : > { %8442 = vmatprep.subr.bf16.mxu1 %v11802_v56  ;;  %v13356_v56 = vld [vmem:[#allocation143_spill] sm:$0xff] }
0x12fd   : > { %8443 = vmatpush3.bf16.msra.mxu1 %v11808_v49  ;;  %v13357_v49 = vld [vmem:[#allocation144_spill] sm:$0xff] }
0x12fe   : > { %8444 = vmatprep.subr.bf16.mxu1 %v13347_v9  ;;  %v6433_v9 = vpack.c.bf16 %v13376_v32, %v13376_v32 }
0x1300   : > { %9089 = vmatmul.mubr.bf16.gmra.mxu1 %v13348_v42  ;;  %v9845_v42 = vld [vmem:[%s13296_s9 + $0x18] sm:$0xff]  }
0x1301   : > { %8445 = vmatpush3.bf16.msra.mxu1 %v13349_v20  ;;  %6118 = vmatprep.mubr.bf16.mxu1 %v13350_v11  ;;  %v9846_v20 = vld [vmem:[%s13296_s9 + $0x10] sm:$0xff]   ;;  %v9847_v11 = vld [vmem:[%s13296_s9 + $0x8] sm:$0xff]  }
0x1302   : > { %8446 = vmatprep.subr.bf16.mxu1 %v13351_v17  ;;  %v9848_v17 = vld [vmem:[%s13296_s9] sm:$0xff]   ;;  %s13464_s9 = scalar_lea.vmem [#allocation5], %s11421_s3 }
0x1305   : > { %8447 = vmatpush3.bf16.msra.mxu1 %v13352_v3 }
0x1306   : > { %8448 = vmatprep.subr.bf16.mxu1 %v13353_v54 }
0x1309   : > { %8449 = vmatpush3.bf16.msra.mxu1 %v13354_v19 }
0x130a   : > { %8450 = vmatprep.subr.bf16.mxu1 %v13355_v26 }
0x130d   : > { %8451 = vmatpush3.bf16.msra.mxu1 %v13356_v56  ;;  %v12267_v56 = vld [vmem:[%s13303_s11] ss:$0 sm:$0xff]  ;;  %s7408_s11 = sshll.u32 %s13464_s9, 4  ;;  %s7409_s11 = int_to_ptr.vmem [resolvable:$true] %s7408_s11 }
0x130e   : > { %8452 = vmatprep.subr.bf16.mxu1 %v13357_v49  ;;  %13377 = vst [vmem:[#allocation62_spill] sm:$0xff] %v12267_v56 }
0x1311   : > { %8453 = vmatpush3.bf16.msra.mxu1 %v13358_v45 }
0x1312   : > { %8454 = vmatprep.subr.bf16.mxu1 %v13359_v50 }
0x1315   : > { %8455 = vmatpush3.bf16.msra.mxu1 %v13360_v29 }
0x1316   : > { %9162 = vmatprep.subr.bf16.mxu1 %v13141_v44 }
0x1318   : > { %6119 = vmatmul.mubr.bf16.vlgmr.msra.gmra.mxu1 %v13361_v51 }
0x1319   : > { %6126 = vmatprep.mubr.bf16.mxu1 %v13362_v37  ;;  %9163 = vmatpush3.bf16.msra.mxu1 %v9837_v47 }
0x131a   : > { %9164 = vmatprep.subr.bf16.mxu1 %v13141_v44 }
0x131d   : > { %9165 = vmatpush3.bf16.msra.mxu1 %v9838_v25  ;;  %v12277_v25 = vld [vmem:[%s13302_s12 + $0x8] sm:$0xff]  }
0x131e   : > { %9166 = vmatprep.subr.bf16.mxu1 %v13141_v44  ;;  %13379 = vst [vmem:[#allocation74_spill] sm:$0xff] %v12277_v25 }
0x1320   : > { %6127 = vmatmul.mubr.bf16.gmra.mxu1 %v13363_v30  ;;  %v12288_v30 = vld [vmem:[%s13305_s19 + $0x10] sm:$0xff]  }
0x1321   : > { %6134 = vmatprep.mubr.bf16.mxu1 %v13364_v39  ;;  %9167 = vmatpush3.bf16.msra.mxu1 %v9839_v28  ;;  %13381 = vst [vmem:[#allocation72_spill] sm:$0xff] %v12288_v30  ;;  %v12293_v39 = vld [vmem:[%s13305_s19 + $0x8] sm:$0xff]   ;;  %v12297_v28 = vld [vmem:[%s13302_s12 + $0x18] sm:$0xff]  }
0x1322   : > { %9168 = vmatprep.subr.bf16.mxu1 %v13141_v44  ;;  %13382 = vst [vmem:[#allocation69_spill] sm:$0xff] %v12293_v39  ;;  %13383 = vst [vmem:[#allocation70_spill] sm:$0xff] %v12297_v28 }
0x1325   : > { %9169 = vmatpush3.bf16.msra.mxu1 %v9840_v15  ;;  %v12303_v15 = vld [vmem:[%s13305_s19] sm:$0xff]  }
0x1326   : > { %9170 = vmatprep.subr.bf16.mxu1 %v13141_v44  ;;  %13384 = vst [vmem:[#allocation67_spill] sm:$0xff] %v12303_v15 }
0x1328   : > { %6135 = vmatmul.mubr.bf16.gmra.mxu1 %v13365_v31 }
0x1329   : > { %6142 = vmatprep.mubr.bf16.mxu1 %v13366_v46  ;;  %9171 = vmatpush3.bf16.msra.mxu1 %v9841_v14 }
0x132a   : > { %9172 = vmatprep.subr.bf16.mxu1 %v13141_v44 }
0x132d   : > { %9173 = vmatpush3.bf16.msra.mxu1 %v9842_v53 }
0x132e   : > { %9174 = vmatprep.subr.bf16.mxu1 %v13141_v44 }
0x1330   : > { %6143 = vmatmul.mubr.bf16.gmra.mxu1 %v13367_v7 }
0x1331   : > { %6150 = vmatprep.mubr.bf16.mxu1 %v13368_v4  ;;  %9175 = vmatpush3.bf16.msra.mxu1 %v9843_v5 }
0x1332   : > { %9176 = vmatprep.subr.bf16.mxu1 %v13141_v44 }
0x1335   : > { %9177 = vmatpush3.bf16.msra.mxu1 %v9844_v10 }
0x1336   : > { %9208 = vmatprep.subr.bf16.mxu1 %v13141_v44 }
0x1338   : > { %6151 = vmatmul.mubr.bf16.gmra.mxu1 %v13369_v35 }
0x1339   : > { %6158 = vmatprep.mubr.bf16.mxu1 %v13370_v21 }
0x1340   : > { %6159 = vmatmul.mubr.bf16.gmra.mxu1 %v13371_v27 }
0x1341   : > { %6166 = vmatprep.mubr.bf16.mxu1 %v13372_v12 }
0x1348   : > { %6167 = vmatmul.mubr.bf16.gmra.mxu1 %v13373_v60 }
0x1349   : > { %6174 = vmatprep.mubr.bf16.mxu1 %v13374_v33 }
0x1350   : > { %6175 = vmatmul.mubr.bf16.gmra.mxu1 %v13375_v13 }
0x1351   : > { %9178 = vmatprep.mubr.msk.bf16.mxu1 %vm10069_vm0, %v13141_v44 }
0x1358   : > { %9179 = vmatmul.mubr.bf16.vlgmr.msra.gmra.mxu1 %v6433_v9 }
0x1359   : > { %9209 = vmatpush3.bf16.msra.mxu1 %v9845_v42  ;;  %9216 = vmatprep.mubr.msk.bf16.mxu1 %vm10069_vm0, %v13141_v44 }
0x135a   : > { %9210 = vmatprep.subr.bf16.mxu1 %v13141_v44 }
0x135d   : > { %9211 = vmatpush3.bf16.msra.mxu1 %v9846_v20 }
0x135e   : > { %9212 = vmatprep.subr.bf16.mxu1 %v13141_v44 }
0x1361   : > { %9213 = vmatpush3.bf16.msra.mxu1 %v9847_v11 }
0x1362   : > { %9214 = vmatprep.subr.bf16.mxu1 %v13141_v44 }
0x1365   : > { %9215 = vmatpush3.bf16.msra.mxu1 %v9848_v17 }
0x1366   : > { %9230 = vmatprep.subr.bf16.mxu1 %v12177_v59 }
0x1398   : > { %v5738_v3 = vpop.f32.mrf.mxu1 }
0x1399   : > { %v5739_v54 = vadd.f32 %v5738_v3, %v12193_v8  ;;  %v12273_v8 = vld [vmem:[%s13305_s19 + $0x18] sm:$0xff]  }
0x139a   : > { %v9056_v19 = vpop.f32.mrf.mxu1  ;;  %13378 = vst [vmem:[#allocation73_spill] sm:$0xff] %v12273_v8 }
0x139b   : > { %v5745_v49 = vadd.f32 %v12267_v56, %v5739_v54 }
0x139c   : > { %v5741_v26 = vpop.f32.mrf.mxu1 }
0x139d   : > { %v5742_v45 = vadd.f32 %v5741_v26, %v12197_v16  ;;  %v5747_v51 = vmax.f32 %v5745_v49, 0.0  ;;  %v12282_v16 = vld [vmem:[%s13302_s12 + $0x10] sm:$0xff]  }
0x139e   : > { %v9057_v50 = vpop.f32.mrf.mxu1  ;;  %13380 = vst [vmem:[#allocation71_spill] sm:$0xff] %v12282_v16 }
0x139f   : > { %v5746_v29 = vadd.f32 %v12267_v56, %v5742_v45 }
0x13a1   : > { %v5748_v37 = vmax.f32 %v5746_v29, 0.0 }
0x13a3   : > { %v5749_v47 = vpack.c.bf16 %v5748_v37, %v5747_v51 }
0x13a5   : > { %9058 = vmatprep.subr.bf16.mxu0 %v5749_v47 }
0x13a6   : > { %9059 = vmatpush3.bf16.msra.mxu0 %v5749_v47 }
0x13a7   : > { %9092 = vmatprep.subr.bf16.mxu0 %v12273_v8 }
0x13a9   : > { %9061 = vmatmul.mubr.msk.bf16.vlgmr.msra.gmra.mxu0 %vm2626_vm2, %v12277_v25 }
0x13aa   : > { %9064 = vmatprep.mubr.msk.bf16.mxu0 %vm2626_vm2, %v12282_v16  ;;  %9093 = vmatpush3.bf16.msra.mxu0 %v12273_v8 }
0x13ab   : > { %9094 = vmatprep.subr.bf16.mxu0 %v12288_v30 }
0x13ae   : > { %9095 = vmatpush3.bf16.msra.mxu0 %v12288_v30 }
0x13af   : > { %9096 = vmatprep.subr.bf16.mxu0 %v12293_v39 }
0x13b1   : > { %9065 = vmatmul.mubr.msk.bf16.gmra.mxu0 %vm2626_vm2, %v12297_v28 }
0x13b2   : > { %9097 = vmatpush3.bf16.msra.mxu0 %v12293_v39 }
0x13b3   : > { %9098 = vmatprep.subr.bf16.mxu0 %v12303_v15 }
0x13b6   : > { %9099 = vmatpush3.bf16.msra.mxu0 %v12303_v15 }
0x13b8   : > { %v12307_v31 = vpop.f32.mrf.mxu1 }
0x13ba   : > { %v12309_v46 = vpop.f32.mrf.mxu1 }
0x13bc   : > { %v12311_v14 = vpop.f32.mrf.mxu1 }
0x13be   : > { %v12313_v53 = vpop.f32.mrf.mxu1 }
0x13c0   : > { %v12315_v7 = vpop.f32.mrf.mxu1 }
0x13c2   : > { %v12317_v4 = vpop.f32.mrf.mxu1 }
0x13c4   : > { %v12319_v5 = vpop.f32.mrf.mxu1 }
0x13c6   : > { %v12321_v10 = vpop.f32.mrf.mxu1 }
0x13d8   : > { %v8456_v35 = vpop.f32.mrf.mxu1 }
0x13da   : > { %v8457_v21 = vpop.f32.mrf.mxu1 }
0x13db   : > { %v12323_v27 = vadd.f32 %v8457_v21, %v8456_v35 }
0x13dc   : > { %v8459_v12 = vpop.f32.mrf.mxu1 }
0x13de   : > { %v8460_v60 = vpop.f32.mrf.mxu1 }
0x13df   : > { %v12325_v33 = vadd.f32 %v8460_v60, %v8459_v12 }
0x13e0   : > { %v8462_v13 = vpop.f32.mrf.mxu1 }
0x13e2   : > { %v8463_v32 = vpop.f32.mrf.mxu1 }
0x13e3   : > { %v12327_v9 = vadd.f32 %v8463_v32, %v8462_v13 }
0x13e4   : > { %v8465_v42 = vpop.f32.mrf.mxu1 }
0x13e6   : > { %v8466_v20 = vpop.f32.mrf.mxu1 }
0x13e7   : > { %v12329_v11 = vadd.f32 %v8466_v20, %v8465_v42 }
0x13e8   : > { %v8468_v17 = vpop.f32.mrf.mxu1 }
0x13ea   : > { %v8469_v3 = vpop.f32.mrf.mxu1 }
0x13eb   : > { %v12331_v54 = vadd.f32 %v8469_v3, %v8468_v17 }
0x13ec   : > { %v8471_v19 = vpop.f32.mrf.mxu1 }
0x13ee   : > { %v8472_v26 = vpop.f32.mrf.mxu1 }
0x13ef   : > { %v12333_v49 = vadd.f32 %v8472_v26, %v8471_v19 }
0x13f0   : > { %v8474_v45 = vpop.f32.mrf.mxu1 }
0x13f2   : > { %v8475_v50 = vpop.f32.mrf.mxu1 }
0x13f3   : > { %v12335_v29 = vadd.f32 %v8475_v50, %v8474_v45 }
0x13f4   : > { %v8477_v51 = vpop.f32.mrf.mxu1 }
0x13f6   : > { %v8478_v37 = vpop.f32.mrf.mxu1 }
0x13f7   : > { %v12337_v47 = vadd.f32 %v8478_v37, %v8477_v51 }
0x13f8   : > { %v8480_v35 = vpop.f32.mrf.mxu1 }
0x13fa   : > { %v8481_v21 = vpop.f32.mrf.mxu1 }
0x13fb   : > { %v12339_v12 = vadd.f32 %v8481_v21, %v8480_v35 }
0x13fc   : > { %v8483_v60 = vpop.f32.mrf.mxu1 }
0x13fe   : > { %v8484_v13 = vpop.f32.mrf.mxu1 }
0x13ff   : > { %v12341_v32 = vadd.f32 %v8484_v13, %v8483_v60 }
0x1400   : > { %v8486_v42 = vpop.f32.mrf.mxu1 }
0x1402   : > { %v8487_v20 = vpop.f32.mrf.mxu1 }
0x1403   : > { %v12343_v17 = vadd.f32 %v8487_v20, %v8486_v42 }
0x1404   : > { %v8489_v3 = vpop.f32.mrf.mxu1 }
0x1406   : > { %v8490_v19 = vpop.f32.mrf.mxu1 }
0x1407   : > { %v12345_v26 = vadd.f32 %v8490_v19, %v8489_v3 }
0x1408   : > { %v8492_v45 = vpop.f32.mrf.mxu1 }
0x140a   : > { %v8493_v50 = vpop.f32.mrf.mxu1 }
0x140b   : > { %v12347_v51 = vadd.f32 %v8493_v50, %v8492_v45 }
0x140c   : > { %v8495_v37 = vpop.f32.mrf.mxu1 }
0x140e   : > { %v8496_v15 = vpop.f32.mrf.mxu1 }
0x140f   : > { %v12349_v35 = vadd.f32 %v8496_v15, %v8495_v37 }
0x1410   : > { %v8498_v21 = vpop.f32.mrf.mxu1 }
0x1412   : > { %v8499_v28 = vpop.f32.mrf.mxu1 }
0x1413   : > { %v12351_v60 = vadd.f32 %v8499_v28, %v8498_v21 }
0x1414   : > { %v8501_v13 = vpop.f32.mrf.mxu1 }
0x1416   : > { %v8502_v39 = vpop.f32.mrf.mxu1 }
0x1417   : > { %v12353_v42 = vadd.f32 %v8502_v39, %v8501_v13 }
0x1418   : > { %v12355_v20 = vpop.f32.mrf.mxu1 }
0x141a   : > { %v9180_v3 = vpop.f32.mrf.mxu1 }
0x141c   : > { %v6515_v19 = vpop.f32.mrf.mxu1 }
0x141e   : > { %v9181_v30 = vpop.f32.mrf.mxu1 }
0x141f   : > { %v12362_v30 = vld [vmem:[%s13339_s21] sm:$0xff]  }
0x1420   : > { %13385 = vst [vmem:[#allocation68_spill] sm:$0xff] %v12362_v30 }
0x1469   : > { %v9062_v16 = vpop.f32.mrf.mxu0 }
0x146b   : > { %v5784_v45 = vpop.f32.mrf.mxu0 }
0x146d   : > { %v9063_v50 = vpop.f32.mrf.mxu0 }
0x146e   : > { %v5816_v37 = vpack.c.bf16 %v9063_v50, %v9062_v16 }
0x146f   : > { %v5787_v25 = vpop.f32.mrf.mxu0 }
0x1470   : > { %v5815_v15 = vpack.c.bf16 %v5787_v25, %v5784_v45 }
0x1471   : > { %v9066_v8 = vpop.f32.mrf.mxu0 }
0x1472   : > { %9100 = vmatprep.mubr.msk.bf16.mxu0 %vm2482_vm1, %v5815_v15 }
0x1473   : > { %v5800_v28 = vpop.f32.mrf.mxu0  ;;  %9101 = vmatmul.mubr.msk.bf16.vlgmr.msra.gmra.mxu0 %vm2482_vm1, %v5816_v37 }
0x1475   : > { %v9067_v39 = vpop.f32.mrf.mxu0 }
0x1476   : > { %v5818_v56 = vpack.c.bf16 %v9067_v39, %v9066_v8 }
0x1477   : > { %v5803_v21 = vpop.f32.mrf.mxu0 }
0x1478   : > { %v5817_v13 = vpack.c.bf16 %v5803_v21, %v5800_v28 }
0x147a   : > { %9104 = vmatprep.mubr.msk.bf16.mxu0 %vm2482_vm1, %v5817_v13 }
0x147b   : > { %9105 = vmatmul.mubr.msk.bf16.gmra.mxu0 %vm2482_vm1, %v5818_v56 }
0x147c   : > { %9116 = vmatprep.mubr.msk.bf16.mxu0 %vm2482_vm1, %v12362_v30 }
0x1533   : > { %v9102_v25 = vpop.f32.mrf.mxu0 }
0x1534   : > { %v5939_v21 = vadd.f32 %v9102_v25, %v12307_v31 }
0x1535   : > { %v5930_v16 = vpop.f32.mrf.mxu0 }
0x1536   : > { %v5931_v31 = vadd.f32 %v5930_v16, %v12309_v46 }
0x1537   : > { %v9103_v3 = vpop.f32.mrf.mxu0 }
0x1538   : > { %v5942_v37 = vadd.f32 %v9103_v3, %v12311_v14  ;;  %v12378_v3 = vld [vmem:[%s13340_s24] ss:$0 sm:$0xff] }
0x1539   : > { %v5933_v19 = vpop.f32.mrf.mxu0 }
0x153b   : > { %v9106_v45 = vpop.f32.mrf.mxu0 }
0x153c   : > { %v5955_v50 = vadd.f32 %v9106_v45, %v12315_v7  ;;  %v5964_v45 = vadd.f32 %v11971_v62, %v5942_v37 }
0x153d   : > { %v5946_v15 = vpop.f32.mrf.mxu0 }
0x153e   : > { %v5947_v8 = vadd.f32 %v5946_v15, %v12317_v4  ;;  %v5967_v56 = vadd.f32 %v11971_v62, %v5955_v50  ;;  %v5934_v4 = vadd.f32 %v5933_v19, %v12313_v53 }
0x153f   : > { %v9107_v28 = vpop.f32.mrf.mxu0 }
0x1540   : > { %v5958_v39 = vadd.f32 %v9107_v28, %v12319_v5  ;;  %v5965_v30 = vadd.f32 %v11971_v62, %v5947_v8  ;;  %v5975_v15 = vmax.f32 %v5967_v56, 0.0  ;;  %v5963_v5 = vadd.f32 %v12378_v3, %v5939_v21 }
0x1541   : > { %v5949_v13 = vpop.f32.mrf.mxu0 }
0x1542   : > { %v5968_v59 = vadd.f32 %v11971_v62, %v5958_v39  ;;  %v5950_v7 = vadd.f32 %v5949_v13, %v12321_v10  ;;  %v5973_v25 = vmax.f32 %v5965_v30, 0.0  ;;  %v5972_v39 = vmax.f32 %v5964_v45, 0.0  ;;  %v9859_v30 = vld [vmem:[%s13292_s4] sm:$0xff]   ;;  %s7363_s4 = sand.u32 1, %s10365_s0  }
0x1543   : > { %v5962_v10 = vadd.f32 %v12378_v3, %v5934_v4  ;;  %v5971_v53 = vmax.f32 %v5963_v5, 0.0  ;;  %s12685_s13 = scalar_lea.sflag [#allocation6], %s7363_s4 }
0x1544   : > { %v5976_v14 = vmax.f32 %v5968_v59, 0.0  ;;  %v5966_v50 = vadd.f32 %v12378_v3, %v5950_v7  ;;  %v5961_v59 = vadd.f32 %v12378_v3, %v5931_v31 }
0x1545   : > { %v5970_v19 = vmax.f32 %v5962_v10, 0.0  ;;  %v5978_v37 = vpack.c.bf16 %v5972_v39, %v5971_v53  ;;  %v6432_v10 = vld [vmem:[%s1652_s30] sm:$0xf]  ;;  %s13462_s30 = smov %s13461_s2 }
0x1546   : > { %v5974_v8 = vmax.f32 %v5966_v50, 0.0  ;;  %v5980_v28 = vpack.c.bf16 %v5976_v14, %v5975_v15  ;;  %v5969_v56 = vmax.f32 %v5961_v59, 0.0 }
0x1548   : > { %9108 = vmatprep.subr.bf16.mxu0 %v5980_v28  ;;  %v5979_v62 = vpack.c.bf16 %v5974_v8, %v5973_v25  ;;  %v5977_v21 = vpack.c.bf16 %v5970_v19, %v5969_v56 }
0x1549   : > { %9109 = vmatpush3.bf16.msra.mxu0 %v5980_v28 }
0x154a   : > { %9110 = vmatprep.subr.bf16.mxu0 %v5979_v62 }
0x154d   : > { %9111 = vmatpush3.bf16.msra.mxu0 %v5979_v62  ;;  %v6434_v62 = vpack.c.bf16 %v6432_v10, %v6432_v10 }
0x154e   : > { %9112 = vmatprep.subr.bf16.mxu0 %v5978_v37 }
0x1551   : > { %9113 = vmatpush3.bf16.msra.mxu0 %v5978_v37 }
0x1552   : > { %9114 = vmatprep.subr.bf16.mxu0 %v5977_v21 }
0x1555   : > { %9115 = vmatpush3.bf16.msra.mxu0 %v5977_v21 }
0x1556   : > { %9132 = vmatprep.subr.bf16.mxu0 %v11988_v0 }
0x1558   : > { %9117 = vmatmul.mubr.msk.bf16.vlgmr.msra.gmra.mxu0 %vm2482_vm1, %v11991_v6 }
0x1559   : > { %9120 = vmatprep.mubr.msk.bf16.mxu0 %vm2482_vm1, %v11994_v34  ;;  %9133 = vmatpush3.bf16.msra.mxu0 %v11988_v0  ;;  %v13386_v0 = vld [vmem:[#allocation61_spill] sm:$0xff] }
0x155a   : > { %9134 = vmatprep.subr.bf16.mxu0 %v11998_v38 }
0x155d   : > { %9135 = vmatpush3.bf16.msra.mxu0 %v11998_v38 }
0x155e   : > { %9136 = vmatprep.subr.bf16.mxu0 %v12033_v55 }
0x1560   : > { %9121 = vmatmul.mubr.msk.bf16.gmra.mxu0 %vm2482_vm1, %v12007_v40 }
0x1561   : > { %9124 = vmatprep.mubr.msk.bf16.mxu0 %vm2482_vm1, %v12010_v1  ;;  %9137 = vmatpush3.bf16.msra.mxu0 %v12033_v55 }
0x1562   : > { %9138 = vmatprep.subr.bf16.mxu0 %v12038_v41 }
0x1565   : > { %9139 = vmatpush3.bf16.msra.mxu0 %v12038_v41 }
0x1566   : > { %9156 = vmatprep.subr.bf16.mxu0 %v13141_v44 }
0x1568   : > { %9125 = vmatmul.mubr.msk.bf16.gmra.mxu0 %vm2482_vm1, %v12018_v22 }
0x1569   : > { %9128 = vmatprep.mubr.msk.bf16.mxu0 %vm2482_vm1, %v12021_v23 }
0x1570   : > { %9129 = vmatmul.mubr.msk.bf16.gmra.mxu0 %vm2482_vm1, %v13386_v0 }
0x1618   : > { %v9118_v6 = vpop.f32.mrf.mxu0 }
0x161a   : > { %v6015_v34 = vpop.f32.mrf.mxu0 }
0x161c   : > { %v9119_v38 = vpop.f32.mrf.mxu0 }
0x161d   : > { %v6079_v55 = vpack.c.bf16 %v9119_v38, %v9118_v6 }
0x161e   : > { %v6018_v40 = vpop.f32.mrf.mxu0 }
0x161f   : > { %v6078_v1 = vpack.c.bf16 %v6018_v40, %v6015_v34 }
0x1620   : > { %v9122_v46 = vpop.f32.mrf.mxu0 }
0x1621   : > { %9140 = vmatprep.mubr.msk.bf16.mxu0 %vm2482_vm1, %v6078_v1 }
0x1622   : > { %v6031_v41 = vpop.f32.mrf.mxu0  ;;  %9141 = vmatmul.mubr.msk.bf16.vlgmr.msra.gmra.mxu0 %vm2482_vm1, %v6079_v55 }
0x1623   : > { %9157 = vmatpush3.bf16.msra.mxu0 %v9859_v30 }
0x1624   : > { %v9123_v22 = vpop.f32.mrf.mxu0  ;;  %9182 = vmatprep.subr.bf16.mxu0 %v13141_v44 }
0x1625   : > { %v6081_v13 = vpack.c.bf16 %v9123_v22, %v9122_v46 }
0x1626   : > { %v6034_v23 = vpop.f32.mrf.mxu0 }
0x1627   : > { %v6080_v16 = vpack.c.bf16 %v6034_v23, %v6031_v41 }
0x1628   : > { %v9126_v7 = vpop.f32.mrf.mxu0 }
0x1629   : > { %9144 = vmatprep.mubr.msk.bf16.mxu0 %vm2482_vm1, %v6080_v16 }
0x162a   : > { %v6047_v45 = vpop.f32.mrf.mxu0  ;;  %9145 = vmatmul.mubr.msk.bf16.gmra.mxu0 %vm2482_vm1, %v6081_v13 }
0x162c   : > { %v9127_v4 = vpop.f32.mrf.mxu0 }
0x162d   : > { %v6083_v50 = vpack.c.bf16 %v9127_v4, %v9126_v7  ;;  %v12437_v7 = vld [vmem:[%s13344_s15] ss:$0 sm:$0xff] }
0x162e   : > { %v6050_v15 = vpop.f32.mrf.mxu0 }
0x162f   : > { %v6082_v14 = vpack.c.bf16 %v6050_v15, %v6047_v45 }
0x1630   : > { %v9130_v5 = vpop.f32.mrf.mxu0 }
0x1631   : > { %9148 = vmatprep.mubr.msk.bf16.mxu0 %vm2482_vm1, %v6082_v14 }
0x1632   : > { %v6063_v31 = vpop.f32.mrf.mxu0  ;;  %9149 = vmatmul.mubr.msk.bf16.gmra.mxu0 %vm2482_vm1, %v6083_v50 }
0x1634   : > { %v9131_v25 = vpop.f32.mrf.mxu0 }
0x1635   : > { %v6085_v39 = vpack.c.bf16 %v9131_v25, %v9130_v5 }
0x1636   : > { %v6066_v8 = vpop.f32.mrf.mxu0 }
0x1637   : > { %v6084_v28 = vpack.c.bf16 %v6066_v8, %v6063_v31 }
0x1639   : > { %9152 = vmatprep.mubr.msk.bf16.mxu0 %vm2482_vm1, %v6084_v28 }
0x163a   : > { %9153 = vmatmul.mubr.msk.bf16.gmra.mxu0 %vm2482_vm1, %v6085_v39 }
0x163b   : > { %9158 = vmatprep.mubr.msk.bf16.mxu0 %vm10069_vm0, %v13141_v44 }
0x1642   : > { %9159 = vmatmul.mubr.msk.bf16.vlgmr.msra.gmra.mxu0 %vm2626_vm2, %v6434_v62 }
0x1643   : > { %9184 = vmatprep.mubr.msk.bf16.mxu0 %vm10069_vm0, %v13141_v44 }
0x16e2   : > { %v9142_v53 = vpop.f32.mrf.mxu0 }
0x16e3   : > { %v6250_v59 = vadd.f32 %v9142_v53, %v12327_v9 }
0x16e4   : > { %v6241_v19 = vpop.f32.mrf.mxu0 }
0x16e5   : > { %v6306_v37 = vadd.f32 %v12061_v2, %v6250_v59  ;;  %v6242_v56 = vadd.f32 %v12323_v27, %v6241_v19 }
0x16e6   : > { %v9143_v21 = vpop.f32.mrf.mxu0 }
0x16e7   : > { %v8012_v0 = vmul.f32 -1.442695, %v6306_v37  ;;  %v6304_v6 = vadd.f32 %v12061_v2, %v6242_v56  ;;  %v6253_v34 = vadd.f32 %v9143_v21, %v12329_v11 }
0x16e8   : > { %v6244_v38 = vpop.f32.mrf.mxu0 }
0x16e9   : > { %9698 = vpow2.f32 %v8012_v0  ;;  %v8010_v40 = vmul.f32 -1.442695, %v6304_v6  ;;  %v6307_v1 = vadd.f32 %v12061_v2, %v6253_v34  ;;  %v6245_v55 = vadd.f32 %v12325_v33, %v6244_v38 }
0x16ea   : > { %v9146_v9 = vpop.f32.mrf.mxu0 }
0x16eb   : > { %9700 = vpow2.f32 %v8010_v40  ;;  %v8013_v46 = vmul.f32 -1.442695, %v6307_v1  ;;  %v6305_v41 = vadd.f32 %v12061_v2, %v6245_v55  ;;  %v6266_v27 = vadd.f32 %v9146_v9, %v12335_v29 }
0x16ec   : > { %v6257_v30 = vpop.f32.mrf.mxu0 }
0x16ed   : > { %9702 = vpow2.f32 %v8013_v46  ;;  %v8011_v22 = vmul.f32 -1.442695, %v6305_v41  ;;  %v6310_v11 = vadd.f32 %v12061_v2, %v6266_v27  ;;  %v6258_v23 = vadd.f32 %v12331_v54, %v6257_v30 }
0x16ee   : > { %v9147_v16 = vpop.f32.mrf.mxu0 }
0x16ef   : > { %9704 = vpow2.f32 %v8011_v22  ;;  %v8016_v13 = vmul.f32 -1.442695, %v6310_v11  ;;  %v6308_v33 = vadd.f32 %v12437_v7, %v6258_v23  ;;  %v6269_v45 = vadd.f32 %v9147_v16, %v12337_v47 }
0x16f0   : > { %v6260_v4 = vpop.f32.mrf.mxu0 }
0x16f1   : > { %9706 = vpow2.f32 %v8016_v13  ;;  %v8014_v15 = vmul.f32 -1.442695, %v6308_v33  ;;  %v6311_v29 = vadd.f32 %v12437_v7, %v6269_v45  ;;  %v6261_v14 = vadd.f32 %v12333_v49, %v6260_v4 }
0x16f2   : > { %v9150_v50 = vpop.f32.mrf.mxu0 }
0x16f3   : > { %9708 = vpow2.f32 %v8014_v15  ;;  %v8017_v2 = vmul.f32 -1.442695, %v6311_v29  ;;  %v6309_v54 = vadd.f32 %v12437_v7, %v6261_v14  ;;  %v6282_v5 = vadd.f32 %v9150_v50, %v12343_v17 }
0x16f4   : > { %v6273_v31 = vpop.f32.mrf.mxu0 }
0x16f5   : > { %9710 = vpow2.f32 %v8017_v2  ;;  %v8015_v25 = vmul.f32 -1.442695, %v6309_v54  ;;  %v6314_v8 = vadd.f32 %v12437_v7, %v6282_v5  ;;  %v6274_v47 = vadd.f32 %v12339_v12, %v6273_v31 }
0x16f6   : > { %v9699_v28 = vpop.eup %9698  ;;  %v9151_v39 = vpop.f32.mrf.mxu0 }
0x16f7   : > { %v6370_v10 = vadd.f32 1.0, %v9699_v28  ;;  %9712 = vpow2.f32 %v8015_v25  ;;  %v8020_v62 = vmul.f32 -1.442695, %v6314_v8  ;;  %v6312_v49 = vadd.f32 %v12437_v7, %v6274_v47  ;;  %v9861_v25 = vld [vmem:[%s13298_s5] ss:$0 sm:$0xff]  ;;  %s12671_s5 = sshll.u32 %s10365_s0, 4 }
0x16f8   : > { %v9701_v53 = vpop.eup %9700  ;;  %v6285_v59 = vadd.f32 %v9151_v39, %v12345_v26  ;;  %v6276_v19 = vpop.f32.mrf.mxu0  ;;  %s12675_s8 = scalar_lea.hbm %s13461_s2, %s12671_s5  ;;  %s10070_s0 = smov [#allocation5]  }
0x16f9   : > { %9714 = vrcp.f32 %v6370_v10  ;;  %v6368_v17 = vadd.f32 1.0, %v9701_v53  ;;  %v8018_v37 = vmul.f32 -1.442695, %v6312_v49  ;;  %v6277_v56 = vadd.f32 %v12341_v32, %v6276_v19  ;;  %s9901_s16 = sshll.u32 %s10070_s0, 4  ;;  %s9902_s16 = int_to_ptr.vmem [resolvable:$false] %s9901_s16 }
0x16fa   : > { %v9703_v21 = vpop.eup %9702  ;;  %9716 = vpow2.f32 %v8020_v62  ;;  %v6315_v12 = vadd.f32 %v12437_v7, %v6285_v59  ;;  %v9154_v0 = vpop.f32.mrf.mxu0  ;;  %s9903_s19 = scalar_lea.vmem %s9902_s16, 32  ;;  %p9904_p0 = scmp.lt.s32.totalorder %s7409_s11, %s9902_s16 }
0x16fb   : > { %9718 = vrcp.f32 %v6368_v17  ;;  %v6371_v6 = vadd.f32 1.0, %v9703_v21  ;;  %v6313_v34 = vadd.f32 %v12437_v7, %v6277_v56  ;;  %v6298_v38 = vadd.f32 %v9154_v0, %v12351_v60 }
0x16fc   : > { %v9705_v40 = vpop.eup %9704  ;;  %9720 = vpow2.f32 %v8018_v37  ;;  %v8021_v26 = vmul.f32 -1.442695, %v6315_v12  ;;  %v6289_v1 = vpop.f32.mrf.mxu0 }
0x16fd   : > { %9722 = vrcp.f32 %v6371_v6  ;;  %v6369_v55 = vadd.f32 1.0, %v9705_v40  ;;  %v8019_v9 = vmul.f32 -1.442695, %v6313_v34  ;;  %v6318_v32 = vadd.f32 %v12437_v7, %v6298_v38 }
0x16fe   : > { %v9707_v46 = vpop.eup %9706  ;;  %9724 = vpow2.f32 %v8021_v26  ;;  %v6290_v41 = vadd.f32 %v12347_v51, %v6289_v1  ;;  %v9155_v27 = vpop.f32.mrf.mxu0 }
0x16ff   : > { %9726 = vrcp.f32 %v6369_v55  ;;  %v6374_v30 = vadd.f32 1.0, %v9707_v46  ;;  %v8024_v22 = vmul.f32 -1.442695, %v6318_v32  ;;  %v6301_v11 = vadd.f32 %v9155_v27, %v12353_v42 }
0x1700   : > { %v9709_v60 = vpop.eup %9708  ;;  %9728 = vpow2.f32 %v8019_v9  ;;  %v6316_v23 = vadd.f32 %v12437_v7, %v6290_v41  ;;  %v6292_v16 = vpop.f32.mrf.mxu0 }
0x1701   : > { %9730 = vrcp.f32 %v6374_v30  ;;  %v6372_v13 = vadd.f32 1.0, %v9709_v60  ;;  %v6319_v33 = vadd.f32 %v12437_v7, %v6301_v11  ;;  %v6293_v45 = vadd.f32 %v12349_v35, %v6292_v16 }
0x1702   : > { %v9711_v51 = vpop.eup %9710  ;;  %9732 = vpow2.f32 %v8024_v22  ;;  %v8022_v4 = vmul.f32 -1.442695, %v6316_v23  ;;  %v6472_v15 = vpop.f32.mrf.mxu0 }
0x1703   : > { %9734 = vrcp.f32 %v6372_v13  ;;  %v6375_v42 = vadd.f32 1.0, %v9711_v51  ;;  %v8025_v29 = vmul.f32 -1.442695, %v6319_v33  ;;  %v6317_v14 = vadd.f32 %v12437_v7, %v6293_v45 }
0x1704   : > { %v9713_v50 = vpop.eup %9712  ;;  %9736 = vpow2.f32 %v8022_v4  ;;  %v6513_v2 = vadd.f32 %v12355_v20, %v6472_v15  ;;  %v9160_v54 = vpop.f32.mrf.mxu0  ;;  %v9862_v4 = vld [vmem:[%s13304_s14 + $0x30] sm:$0xff]   ;;  %v9864_v15 = vld [vmem:[%s13304_s14 + $0x20] sm:$0xff]  }
0x1705   : > { %9738 = vrcp.f32 %v6375_v42  ;;  %v6373_v35 = vadd.f32 1.0, %v9713_v50  ;;  %v8023_v5 = vmul.f32 -1.442695, %v6317_v14  ;;  %v9865_v42 = vld [vmem:[%s13304_s14 + $0x18] sm:$0xff]   ;;  %v9867_v14 = vld [vmem:[%s13304_s14 + $0x8] sm:$0xff]  }
0x1706   : > { %v9715_v31 = vpop.eup %9714  ;;  %9740 = vpow2.f32 %v8025_v29  ;;  %v6518_v8 = vadd.f32 %v9861_v25, %v6513_v2  ;;  %v6475_v47 = vpop.f32.mrf.mxu0  ;;  %v9866_v29 = vld [vmem:[%s13304_s14 + $0x10] sm:$0xff]   ;;  %v9868_v2 = vld [vmem:[%s13304_s14] sm:$0xff]  }
0x1707   : > { %v9717_v28 = vpop.eup %9716  ;;  %6418 = vst [vmem:[%s12462_s6 + $0x10] sm:$0xff] %v9715_v31  ;;  %9742 = vrcp.f32 %v6373_v35  ;;  %v13395_v25 = vld [vmem:[#allocation136_spill] sm:$0xff] }
0x1708   : > { %v9719_v39 = vpop.eup %9718  ;;  %v6378_v10 = vadd.f32 1.0, %v9717_v28  ;;  %9744 = vpow2.f32 %v8023_v5  ;;  %v6519_v62 = vmax.f32 %v6518_v8, 0.0  ;;  %v9161_v20 = vpop.f32.mrf.mxu0  ;;  %v9869_v5 = vld [vmem:[%s13306_s20 + $0x78] sm:$0xff]   ;;  %v13398_v28 = vld [vmem:[#allocation138_spill] sm:$0xff] }
0x1709   : > { %v9721_v49 = vpop.eup %9720  ;;  %6416 = vst [vmem:[%s12462_s6] sm:$0xff] %v9719_v39  ;;  %v13396_v8 = vld [vmem:[#allocation135_spill] sm:$0xff]  ;;  %v13399_v39 = vld [vmem:[#allocation137_spill] sm:$0xff] }
0x170a   : > { %v9723_v53 = vpop.eup %9722  ;;  %9746 = vrcp.f32 %v6378_v10  ;;  %v6376_v59 = vadd.f32 1.0, %v9721_v49  ;;  %v6520_v19 = vpack.c.bf16 %v6519_v62, %v6519_v62  ;;  %v13397_v47 = vpack.c.bf16 %v13395_v25, %v13396_v8  ;;  %v9870_v62 = vld [vmem:[%s13306_s20 + $0x38] sm:$0xff]   ;;  %v9871_v20 = vld [vmem:[%s13306_s20 + $0x70] sm:$0xff]  }
0x170b   : > { %v9725_v17 = vpop.eup %9724  ;;  %6419 = vst [vmem:[%s12462_s6 + $0x18] sm:$0xff] %v9723_v53  ;;  %v13400_v10 = vpack.c.bf16 %v13398_v28, %v13399_v39  ;;  %v9872_v49 = vld [vmem:[%s13306_s20 + $0x30] sm:$0xff]   ;;  %v9873_v53 = vld [vmem:[%s13306_s20 + $0x68] sm:$0xff]   ;;  %v13441_v8 = vld [vmem:[#allocation112_spill] sm:$0xff] }
0x170c   : > { %v9727_v37 = vpop.eup %9726  ;;  %9748 = vrcp.f32 %v6376_v59  ;;  %v6379_v56 = vadd.f32 1.0, %v9725_v17  ;;  %v6522_v21 = vsel %vm4330_vm5, %v6520_v19, 0  ;;  %v13401_v59 = vld [vmem:[#allocation141_spill] sm:$0xff]  ;;  %v13402_v19 = vld [vmem:[#allocation139_spill] sm:$0xff]  ;;  %v13440_v25 = vld [vmem:[#allocation114_spill] sm:$0xff] }
0x170d   : > { %v9729_v12 = vpop.eup %9728  ;;  %6417 = vst [vmem:[%s12462_s6 + $0x8] sm:$0xff] %v9727_v37  ;;  %9183 = vmatpush3.bf16.msra.mxu0 %v6522_v21  ;;  %v13403_v17 = vpack.c.bf16 %v13401_v59, %v13402_v19  ;;  %v9874_v37 = vld [vmem:[%s13306_s20 + $0x28] sm:$0xff]   ;;  %v13444_v39 = vld [vmem:[#allocation111_spill] sm:$0xff] }
0x170e   : > { %v9731_v0 = vpop.eup %9730  ;;  %9750 = vrcp.f32 %v6379_v56  ;;  %v6377_v6 = vadd.f32 1.0, %v9729_v12  ;;  %9188 = vmatprep.subr.bf16.mxu0 %v13141_v44  ;;  %v13404_v56 = vld [vmem:[#allocation89_spill] sm:$0xff]  ;;  %v13405_v21 = vld [vmem:[#allocation86_spill] sm:$0xff]  ;;  %v13450_v59 = vld [vmem:[#allocation115_spill] sm:$0xff] }
0x170f   : > { %v9733_v34 = vpop.eup %9732  ;;  %6422 = vst [vmem:[%s12462_s6 + $0x30] sm:$0xff] %v9731_v0  ;;  %v13406_v12 = vpack.c.bf16 %v13404_v56, %v13405_v21  ;;  %v9875_v0 = vld [vmem:[%s13306_s20 + $0x60] sm:$0xff]  }
0x1710   : > { %v9735_v38 = vpop.eup %9734  ;;  %9752 = vrcp.f32 %v6377_v6  ;;  %v6382_v40 = vadd.f32 1.0, %v9733_v34  ;;  %9185 = vmatmul.mubr.msk.bf16.vlgmr.msra.gmra.mxu0 %vm4326_vm6, %v12113_v58  ;;  %v9876_v6 = vld [vmem:[%s13306_s20 + $0x20] sm:$0xff]   ;;  %v9877_v34 = vld [vmem:[%s13306_s20 + $0x58] sm:$0xff]  }
0x1711   : > { %v9737_v26 = vpop.eup %9736  ;;  %6420 = vst [vmem:[%s12462_s6 + $0x20] sm:$0xff] %v9735_v38  ;;  %9189 = vmatpush3.bf16.msra.mxu0 %v12119_v24  ;;  %9204 = vmatprep.mubr.msk.bf16.mxu0 %vm10069_vm0, %v13141_v44  ;;  %v9878_v38 = vld [vmem:[%s13306_s20 + $0x18] sm:$0xff]   ;;  %v13443_v28 = vld [vmem:[#allocation113_spill] sm:$0xff] }
0x1712   : > { %v9739_v1 = vpop.eup %9738  ;;  %9754 = vrcp.f32 %v6382_v40  ;;  %v6380_v55 = vadd.f32 1.0, %v9737_v26  ;;  %9190 = vmatprep.subr.bf16.mxu0 %v13141_v44  ;;  %v9879_v40 = vld [vmem:[%s13306_s20 + $0x50] sm:$0xff]  }
0x1713   : > { %v9741_v9 = vpop.eup %9740  ;;  %6423 = vst [vmem:[%s12462_s6 + $0x38] sm:$0xff] %v9739_v1  ;;  %v9880_v26 = vld [vmem:[%s13306_s20 + $0x10] sm:$0xff]   ;;  %v9881_v1 = vld [vmem:[%s13306_s20 + $0x48] sm:$0xff]  }
0x1714   : > { %v9743_v32 = vpop.eup %9742  ;;  %9756 = vrcp.f32 %v6380_v55  ;;  %v6383_v58 = vadd.f32 1.0, %v9741_v9  ;;  %v9882_v55 = vld [vmem:[%s13306_s20 + $0x8] sm:$0xff]   ;;  %v9883_v9 = vld [vmem:[%s13306_s20 + $0x40] sm:$0xff]  }
0x1715   : > { %v9745_v46 = vpop.eup %9744  ;;  %6421 = vst [vmem:[%s12462_s6 + $0x28] sm:$0xff] %v9743_v32  ;;  %9191 = vmatpush3.bf16.msra.mxu0 %v12128_v61  ;;  %v9884_v32 = vld [vmem:[%s13306_s20] sm:$0xff]  }
0x1716   : > { %9758 = vrcp.f32 %v6383_v58  ;;  %v6381_v24 = vadd.f32 1.0, %v9745_v46  ;;  %9192 = vmatprep.subr.bf16.mxu0 %v13141_v44  ;;  %v13407_v58 = vld [vmem:[#allocation88_spill] sm:$0xff]  ;;  %v13408_v46 = vld [vmem:[#allocation85_spill] sm:$0xff] }
0x1717   : > { %v9747_v41 = vpop.eup %9746 }
0x1718   : > { %6426 = vst [vmem:[%s12462_s6 + $0x50] sm:$0xff] %v9747_v41  ;;  %9760 = vrcp.f32 %v6381_v24  ;;  %v13409_v24 = vpack.c.bf16 %v13407_v58, %v13408_v46  ;;  %v13410_v41 = vld [vmem:[#allocation94_spill] sm:$0xff]  ;;  %v13459_v46 = vld [vmem:[#allocation67_spill] sm:$0xff] }
0x1719   : > { %v9749_v27 = vpop.eup %9748  ;;  %9193 = vmatpush3.bf16.msra.mxu0 %v12134_v18  ;;  %v13458_v58 = vld [vmem:[#allocation70_spill] sm:$0xff] }
0x171a   : > { %6424 = vst [vmem:[%s12462_s6 + $0x40] sm:$0xff] %v9749_v27  ;;  %9194 = vmatprep.subr.bf16.mxu0 %v13141_v44  ;;  %v13411_v27 = vld [vmem:[#allocation91_spill] sm:$0xff] }
0x171b   : > { %v9751_v30 = vpop.eup %9750 }
0x171c   : > { %6427 = vst [vmem:[%s12462_s6 + $0x58] sm:$0xff] %v9751_v30  ;;  %v13412_v30 = vpack.c.bf16 %v13410_v41, %v13411_v27 }
0x171d   : > { %v9753_v61 = vpop.eup %9752  ;;  %9195 = vmatpush3.bf16.msra.mxu0 %v12141_v43  ;;  %v13388_v43 = vld [vmem:[#allocation82_spill] sm:$0xff] }
0x171e   : > { %6425 = vst [vmem:[%s12462_s6 + $0x48] sm:$0xff] %v9753_v61  ;;  %9196 = vmatprep.subr.bf16.mxu0 %v13141_v44  ;;  %v13413_v61 = vld [vmem:[#allocation93_spill] sm:$0xff] }
0x171f   : > { %v9755_v22 = vpop.eup %9754 }
0x1720   : > { %6430 = vst [vmem:[%s12462_s6 + $0x70] sm:$0xff] %v9755_v22  ;;  %v13414_v22 = vld [vmem:[#allocation90_spill] sm:$0xff] }
0x1721   : > { %v9757_v11 = vpop.eup %9756  ;;  %9197 = vmatpush3.bf16.msra.mxu0 %v12148_v57  ;;  %v13389_v57 = vld [vmem:[#allocation81_spill] sm:$0xff] }
0x1722   : > { %6428 = vst [vmem:[%s12462_s6 + $0x60] sm:$0xff] %v9757_v11  ;;  %9198 = vmatprep.subr.bf16.mxu0 %v13141_v44  ;;  %v13390_v23 = vpack.c.bf16 %v13388_v43, %v13389_v57  ;;  %v13415_v11 = vpack.c.bf16 %v13413_v61, %v13414_v22  ;;  %v13419_v57 = vld [vmem:[#allocation97_spill] sm:$0xff] }
0x1723   : > { %v9759_v18 = vpop.eup %9758 }
0x1724   : > { %6431 = vst [vmem:[%s12462_s6 + $0x78] sm:$0xff] %v9759_v18  ;;  %v13416_v18 = vld [vmem:[#allocation98_spill] sm:$0xff] }
0x1725   : > { %v9761_v60 = vpop.eup %9760  ;;  %9199 = vmatpush3.bf16.msra.mxu0 %v12155_v48 }
0x1726   : > { %6429 = vst [vmem:[%s12462_s6 + $0x68] sm:$0xff] %v9761_v60  ;;  %9200 = vmatprep.subr.bf16.mxu0 %v13141_v44  ;;  %v13417_v60 = vld [vmem:[#allocation96_spill] sm:$0xff]  ;;  %s13463_s6 = sld [smem:[#allocation56_spill]] }
0x1727   : > { %v13418_v43 = vpack.c.bf16 %v13416_v18, %v13417_v60 }
0x1729   : > { %9201 = vmatpush3.bf16.msra.mxu0 %v12161_v36  ;;  %v13392_v36 = vld [vmem:[#allocation134_spill] sm:$0xff] }
0x172a   : > { %9202 = vmatprep.subr.bf16.mxu0 %v13141_v44  ;;  %v13391_v44 = vld [vmem:[#allocation75_spill] sm:$0xff] }
0x172c   : > { %s12683_s12 = scalar_lea.hbm %s13463_s6, %s12671_s5 }
0x172d   : > { %9203 = vmatpush3.bf16.msra.mxu0 %v12166_v63  ;;  %v13393_v63 = vld [vmem:[#allocation133_spill] sm:$0xff] }
0x172e   : > { %v13394_v51 = vpack.c.bf16 %v13392_v36, %v13393_v63  ;;  %v13428_v63 = vld [vmem:[#allocation106_spill] sm:$0xff] }
0x1730   : > { %9205 = vmatmul.mubr.bf16.vlgmr.msra.gmra.mxu0 %v13390_v23  ;;  %v13420_v23 = vld [vmem:[#allocation95_spill] sm:$0xff] }
0x1731   : > { %9222 = vmatprep.mubr.msk.bf16.mxu0 %vm2626_vm2, %v12171_v52  ;;  %v9863_v52 = vld [vmem:[%s13304_s14 + $0x28] sm:$0xff]   ;;  %s9897_s14 = scalar_lea.vmem %s7409_s11, 16 }
0x1732   : > { %p9898_p11 = scmp.ne.s32.totalorder %s7409_s11, %s9897_s14  ;;  %p9905_p1 = scmp.lt.s32.totalorder %s9903_s19, %s9897_s14 }
0x1734   : > { %p9899_p12 = pnand %p9898_p11, %p10384_p5  ;;  %p9906_p2 = por %p9905_p1, %p9904_p0 }
0x1736   : > { %p9900_p13 = pneg %p9899_p12 }
0x1738   : > { %p9907_p3 = pnand %p9906_p2, %p9900_p13 }
0x17d0   : > { %v6558_v48 = vpop.f32.mrf.mxu0 }
0x17d2   : > { %v9186_v16 = vpop.f32.mrf.mxu0 }
0x17d3   : > { %v13422_v16 = vld [vmem:[#allocation102_spill] sm:$0xff] }
0x17d4   : > { %v6561_v13 = vpop.f32.mrf.mxu0 }
0x17d5   : > { %v6565_v33 = vpack.c.bf16 %v6561_v13, %v6558_v48  ;;  %v13421_v48 = vpack.c.bf16 %v13419_v57, %v13420_v23  ;;  %v13423_v13 = vld [vmem:[#allocation100_spill] sm:$0xff] }
0x17d6   : > { %v9187_v45 = vpop.f32.mrf.mxu0 }
0x17d7   : > { %9217 = vmatmul.mubr.msk.bf16.vlgmr.msra.gmra.mxu1 %vm2482_vm1, %v6565_v33  ;;  %v13424_v33 = vpack.c.bf16 %v13422_v16, %v13423_v13  ;;  %v13425_v45 = vld [vmem:[#allocation101_spill] sm:$0xff] }
0x17d8   : > { %9231 = vmatpush3.bf16.msra.mxu1 %v13391_v44  ;;  %9246 = vmatprep.mubr.bf16.mxu1 %v13394_v51  ;;  %v13426_v44 = vld [vmem:[#allocation99_spill] sm:$0xff]  ;;  %v13429_v51 = vld [vmem:[#allocation104_spill] sm:$0xff] }
0x17d9   : > { %9232 = vmatprep.subr.bf16.mxu1 %v9862_v4  ;;  %v13427_v36 = vpack.c.bf16 %v13425_v45, %v13426_v44 }
0x17dc   : > { %9233 = vmatpush3.bf16.msra.mxu1 %v9862_v4  ;;  %v13430_v4 = vpack.c.bf16 %v13428_v63, %v13429_v51 }
0x17dd   : > { %9234 = vmatprep.subr.bf16.mxu1 %v9863_v52 }
0x17e0   : > { %9235 = vmatpush3.bf16.msra.mxu1 %v9863_v52  ;;  %v13431_v52 = vld [vmem:[#allocation105_spill] sm:$0xff] }
0x17e1   : > { %9236 = vmatprep.subr.bf16.mxu1 %v9864_v15 }
0x17e4   : > { %9237 = vmatpush3.bf16.msra.mxu1 %v9864_v15  ;;  %v13432_v15 = vld [vmem:[#allocation103_spill] sm:$0xff] }
0x17e5   : > { %9238 = vmatprep.subr.bf16.mxu1 %v9865_v42 }
0x17e8   : > { %9239 = vmatpush3.bf16.msra.mxu1 %v9865_v42  ;;  %v13433_v42 = vpack.c.bf16 %v13431_v52, %v13432_v15 }
0x17e9   : > { %9240 = vmatprep.subr.bf16.mxu1 %v9866_v29 }
0x17ec   : > { %9241 = vmatpush3.bf16.msra.mxu1 %v9866_v29  ;;  %v13434_v29 = vld [vmem:[#allocation110_spill] sm:$0xff] }
0x17ed   : > { %9242 = vmatprep.subr.bf16.mxu1 %v9867_v14 }
0x17f0   : > { %9243 = vmatpush3.bf16.msra.mxu1 %v9867_v14  ;;  %v6601_v50 = vpop.f32.mrf.mxu0  ;;  %v13435_v14 = vld [vmem:[#allocation108_spill] sm:$0xff] }
0x17f1   : > { %9244 = vmatprep.subr.bf16.mxu1 %v9868_v2 }
0x17f2   : > { %v9206_v54 = vpop.f32.mrf.mxu0 }
0x17f3   : > { %v13437_v54 = vld [vmem:[#allocation109_spill] sm:$0xff] }
0x17f4   : > { %9245 = vmatpush3.bf16.msra.mxu1 %v9868_v2  ;;  %v6604_v35 = vpop.f32.mrf.mxu0  ;;  %v13436_v2 = vpack.c.bf16 %v13434_v29, %v13435_v14 }
0x17f5   : > { %8580 = vmatprep.subr.bf16.mxu1 %v9869_v5  ;;  %v13438_v5 = vld [vmem:[#allocation107_spill] sm:$0xff] }
0x17f6   : > { %v9207_v31 = vpop.f32.mrf.mxu0 }
0x17f7   : > { %9247 = vmatmul.mubr.bf16.vlgmr.msra.gmra.mxu1 %v13397_v47  ;;  %v13439_v31 = vpack.c.bf16 %v13437_v54, %v13438_v5  ;;  %v13442_v47 = vpack.c.bf16 %v13440_v25, %v13441_v8 }
0x17f8   : > { %9250 = vmatprep.mubr.bf16.mxu1 %v13400_v10  ;;  %8581 = vmatpush3.bf16.msra.mxu1 %v9870_v62  ;;  %v13445_v10 = vpack.c.bf16 %v13443_v28, %v13444_v39  ;;  %v13446_v62 = vld [vmem:[#allocation121_spill] sm:$0xff] }
0x17f9   : > { %8582 = vmatprep.subr.bf16.mxu1 %v9871_v20  ;;  %v13447_v20 = vld [vmem:[#allocation116_spill] sm:$0xff] }
0x17fc   : > { %8583 = vmatpush3.bf16.msra.mxu1 %v9872_v49  ;;  %v13448_v49 = vpack.c.bf16 %v13446_v62, %v13447_v20 }
0x17fd   : > { %8584 = vmatprep.subr.bf16.mxu1 %v9873_v53  ;;  %v13449_v53 = vld [vmem:[#allocation117_spill] sm:$0xff] }
0x17fe   : > { %v13451_v19 = vpack.c.bf16 %v13449_v53, %v13450_v59 }
0x17ff   : > { %9251 = vmatmul.mubr.bf16.gmra.mxu1 %v13403_v17 }
0x1800   : > { %8585 = vmatpush3.bf16.msra.mxu1 %v9874_v37  ;;  %7045 = vmatprep.mubr.bf16.mxu1 %v13406_v12  ;;  %v13452_v12 = vld [vmem:[#allocation62_spill] sm:$0xff] }
0x1801   : > { %8586 = vmatprep.subr.bf16.mxu1 %v9875_v0 }
0x1804   : > { %8587 = vmatpush3.bf16.msra.mxu1 %v9876_v6 }
0x1805   : > { %8588 = vmatprep.subr.bf16.mxu1 %v9877_v34 }
0x1808   : > { %8589 = vmatpush3.bf16.msra.mxu1 %v9878_v38 }
0x1809   : > { %8590 = vmatprep.subr.bf16.mxu1 %v9879_v40 }
0x180c   : > { %8591 = vmatpush3.bf16.msra.mxu1 %v9880_v26 }
0x180d   : > { %8592 = vmatprep.subr.bf16.mxu1 %v9881_v1 }
0x1810   : > { %8593 = vmatpush3.bf16.msra.mxu1 %v9882_v55  ;;  %v13453_v55 = vld [vmem:[#allocation73_spill] sm:$0xff] }
0x1811   : > { %8594 = vmatprep.subr.bf16.mxu1 %v9883_v9  ;;  %v13454_v9 = vld [vmem:[#allocation74_spill] sm:$0xff] }
0x1814   : > { %8595 = vmatpush3.bf16.msra.mxu1 %v9884_v32  ;;  %v13455_v32 = vld [vmem:[#allocation71_spill] sm:$0xff] }
0x1817   : > { %7046 = vmatmul.mubr.bf16.vlgmr.msra.gmra.mxu1 %v13409_v24 }
0x1818   : > { %7053 = vmatprep.mubr.bf16.mxu1 %v13412_v30 }
0x181f   : > { %7054 = vmatmul.mubr.bf16.gmra.mxu1 %v13415_v11 }
0x1820   : > { %7061 = vmatprep.mubr.bf16.mxu1 %v13418_v43 }
0x1827   : > { %7062 = vmatmul.mubr.bf16.gmra.mxu1 %v13421_v48  ;;  %v13460_v48 = vld [vmem:[#allocation68_spill] sm:$0xff] }
0x1828   : > { %7069 = vmatprep.mubr.bf16.mxu1 %v13424_v33 }
0x182f   : > { %7070 = vmatmul.mubr.bf16.gmra.mxu1 %v13427_v36 }
0x1830   : > { %7077 = vmatprep.mubr.bf16.mxu1 %v13430_v4 }
0x1837   : > { %7078 = vmatmul.mubr.bf16.gmra.mxu1 %v13433_v42 }
0x1838   : > { %7085 = vmatprep.mubr.bf16.mxu1 %v13436_v2 }
0x183f   : > { %7086 = vmatmul.mubr.bf16.gmra.mxu1 %v13439_v31 }
0x1840   : > { %7093 = vmatprep.mubr.bf16.mxu1 %v13442_v47 }
0x1847   : > { %7094 = vmatmul.mubr.bf16.gmra.mxu1 %v13445_v10 }
0x1848   : > { %7101 = vmatprep.mubr.bf16.mxu1 %v13448_v49 }
0x184f   : > { %7102 = vmatmul.mubr.bf16.gmra.mxu1 %v13451_v19 }
0x1897   : > { %v6645_v17 = vpop.f32.mrf.mxu1 }
0x1898   : > { %v6646_v37 = vadd.f32 %v6645_v17, %v6601_v50  ;;  %v13456_v50 = vld [vmem:[#allocation72_spill] sm:$0xff] }
0x1899   : > { %v9218_v56 = vpop.f32.mrf.mxu1 }
0x189a   : > { %v6652_v0 = vadd.f32 %v13452_v12, %v6646_v37 }
0x189b   : > { %v6648_v21 = vpop.f32.mrf.mxu1 }
0x189c   : > { %v6649_v6 = vadd.f32 %v6648_v21, %v6604_v35  ;;  %v6654_v40 = vmax.f32 %v6652_v0, 0.0  ;;  %v13457_v35 = vld [vmem:[#allocation69_spill] sm:$0xff] }
0x189d   : > { %v9219_v34 = vpop.f32.mrf.mxu1 }
0x189e   : > { %v6653_v38 = vadd.f32 %v13452_v12, %v6649_v6 }
0x18a0   : > { %v6655_v26 = vmax.f32 %v6653_v38, 0.0 }
0x18a2   : > { %v6656_v1 = vpack.c.bf16 %v6655_v26, %v6654_v40 }
0x18a4   : > { %9220 = vmatprep.subr.bf16.mxu0 %v6656_v1 }
0x18a5   : > { %9221 = vmatpush3.bf16.msra.mxu0 %v6656_v1 }
0x18a6   : > { %9254 = vmatprep.subr.bf16.mxu0 %v13453_v55 }
0x18a8   : > { %9223 = vmatmul.mubr.msk.bf16.vlgmr.msra.gmra.mxu0 %vm2626_vm2, %v13454_v9 }
0x18a9   : > { %9226 = vmatprep.mubr.msk.bf16.mxu0 %vm2626_vm2, %v13455_v32  ;;  %9255 = vmatpush3.bf16.msra.mxu0 %v13453_v55  ;;  %v9885_v32 = vld [vmem:[%s13341_s29 + $0x18] sm:$0xff]  }
0x18aa   : > { %9256 = vmatprep.subr.bf16.mxu0 %v13456_v50 }
0x18ad   : > { %9257 = vmatpush3.bf16.msra.mxu0 %v13456_v50  ;;  %v9886_v50 = vld [vmem:[%s13339_s21 + $0x8] sm:$0xff]  }
0x18ae   : > { %9258 = vmatprep.subr.bf16.mxu0 %v13457_v35 }
0x18b0   : > { %9227 = vmatmul.mubr.msk.bf16.gmra.mxu0 %vm2626_vm2, %v13458_v58  ;;  %v9889_v58 = vld [vmem:[%s13341_s29 + $0x8] sm:$0xff]  }
0x18b1   : > { %9259 = vmatpush3.bf16.msra.mxu0 %v13457_v35  ;;  %v9888_v35 = vld [vmem:[%s13341_s29 + $0x10] sm:$0xff]  }
0x18b2   : > { %9260 = vmatprep.subr.bf16.mxu0 %v13459_v46 }
0x18b5   : > { %9261 = vmatpush3.bf16.msra.mxu0 %v13459_v46  ;;  %v9890_v46 = vld [vmem:[%s13339_s21 + $0x18] sm:$0xff]  }
0x18b7   : > { %v9248_v16 = vpop.f32.mrf.mxu1 }
0x18b9   : > { %v6764_v13 = vpop.f32.mrf.mxu1 }
0x18bb   : > { %v9249_v33 = vpop.f32.mrf.mxu1 }
0x18bd   : > { %v6767_v45 = vpop.f32.mrf.mxu1 }
0x18bf   : > { %v9252_v36 = vpop.f32.mrf.mxu1 }
0x18c1   : > { %v6780_v4 = vpop.f32.mrf.mxu1 }
0x18c3   : > { %v9253_v29 = vpop.f32.mrf.mxu1 }
0x18c5   : > { %v6783_v8 = vpop.f32.mrf.mxu1 }
0x1968   : > { %v9224_v24 = vpop.f32.mrf.mxu0 }
0x196a   : > { %v6691_v41 = vpop.f32.mrf.mxu0 }
0x196c   : > { %v9225_v27 = vpop.f32.mrf.mxu0 }
0x196d   : > { %v6723_v22 = vpack.c.bf16 %v9225_v27, %v9224_v24  ;;  %v9891_v24 = vld [vmem:[%s13339_s21 + $0x20] sm:$0xff]   ;;  %v9893_v27 = vld [vmem:[%s13339_s21 + $0x28] sm:$0xff]  }
0x196e   : > { %v6694_v30 = vpop.f32.mrf.mxu0 }
0x196f   : > { %v6722_v61 = vpack.c.bf16 %v6694_v30, %v6691_v41  ;;  %v9892_v41 = vld [vmem:[%s13341_s29] sm:$0xff]   ;;  %v9894_v30 = vld [vmem:[%s13339_s21 + $0x30] sm:$0xff]  }
0x1970   : > { %v9228_v11 = vpop.f32.mrf.mxu0 }
0x1971   : > { %9262 = vmatprep.mubr.msk.bf16.mxu0 %vm2482_vm1, %v6722_v61  ;;  %v9895_v61 = vld [vmem:[%s13339_s21 + $0x38] sm:$0xff]  }
0x1972   : > { %v6707_v18 = vpop.f32.mrf.mxu0  ;;  %9263 = vmatmul.mubr.msk.bf16.vlgmr.msra.gmra.mxu0 %vm2482_vm1, %v6723_v22 }
0x1974   : > { %v9229_v60 = vpop.f32.mrf.mxu0 }
0x1975   : > { %v6725_v23 = vpack.c.bf16 %v9229_v60, %v9228_v11 }
0x1976   : > { %v6710_v43 = vpop.f32.mrf.mxu0 }
0x1977   : > { %v6724_v57 = vpack.c.bf16 %v6710_v43, %v6707_v18 }
0x1979   : > { %9266 = vmatprep.mubr.msk.bf16.mxu0 %vm2482_vm1, %v6724_v57 }
0x197a   : > { %9267 = vmatmul.mubr.msk.bf16.gmra.mxu0 %vm2482_vm1, %v6725_v23 }
0x197b   : > { %9278 = vmatprep.mubr.msk.bf16.mxu0 %vm2482_vm1, %v13460_v48 }
0x1a32   : > { %v9264_v44 = vpop.f32.mrf.mxu0 }
0x1a33   : > { %v6850_v47 = vadd.f32 %v9264_v44, %v9248_v16 }
0x1a34   : > { %v6841_v63 = vpop.f32.mrf.mxu0 }
0x1a35   : > { %v6874_v17 = vadd.f32 %v12378_v3, %v6850_v47  ;;  %v6842_v37 = vadd.f32 %v6841_v63, %v6764_v13 }
0x1a36   : > { %v9265_v51 = vpop.f32.mrf.mxu0 }
0x1a37   : > { %v6853_v54 = vadd.f32 %v9265_v51, %v9249_v33  ;;  %v6882_v38 = vmax.f32 %v6874_v17, 0.0  ;;  %v6872_v40 = vadd.f32 %v12378_v3, %v6842_v37 }
0x1a38   : > { %v6844_v52 = vpop.f32.mrf.mxu0 }
0x1a39   : > { %v6875_v20 = vadd.f32 %v12378_v3, %v6853_v54  ;;  %v6845_v49 = vadd.f32 %v6844_v52, %v6767_v45  ;;  %v6880_v55 = vmax.f32 %v6872_v40, 0.0 }
0x1a3a   : > { %v9268_v15 = vpop.f32.mrf.mxu0 }
0x1a3b   : > { %v6866_v42 = vadd.f32 %v9268_v15, %v9252_v36  ;;  %v6883_v0 = vmax.f32 %v6875_v20, 0.0  ;;  %v6873_v6 = vadd.f32 %v12378_v3, %v6845_v49 }
0x1a3c   : > { %v6857_v14 = vpop.f32.mrf.mxu0 }
0x1a3d   : > { %v6858_v2 = vadd.f32 %v6857_v14, %v6780_v4  ;;  %v6878_v31 = vadd.f32 %v12378_v3, %v6866_v42  ;;  %v6881_v26 = vmax.f32 %v6873_v6, 0.0  ;;  %v6889_v1 = vpack.c.bf16 %v6883_v0, %v6882_v38 }
0x1a3e   : > { %v9269_v5 = vpop.f32.mrf.mxu0 }
0x1a3f   : > { %v6869_v25 = vadd.f32 %v9269_v5, %v9253_v29  ;;  %v6876_v39 = vadd.f32 %v12378_v3, %v6858_v2  ;;  %v6886_v53 = vmax.f32 %v6878_v31, 0.0  ;;  %v6888_v9 = vpack.c.bf16 %v6881_v26, %v6880_v55  ;;  %v12649_v5 = vpop.f32.mrf.mxu1 }
0x1a40   : > { %v6860_v28 = vpop.f32.mrf.mxu0 }
0x1a41   : > { %v6879_v10 = vadd.f32 %v12378_v3, %v6869_v25  ;;  %v6861_v62 = vadd.f32 %v6860_v28, %v6783_v8  ;;  %v6884_v56 = vmax.f32 %v6876_v39, 0.0  ;;  %v12651_v31 = vpop.f32.mrf.mxu1 }
0x1a43   : > { %v6887_v59 = vmax.f32 %v6879_v10, 0.0  ;;  %v6877_v19 = vadd.f32 %v12378_v3, %v6861_v62  ;;  %v9887_v3 = vld [vmem:[%s13339_s21 + $0x10] sm:$0xff]   ;;  %v12653_v25 = vpop.f32.mrf.mxu1 }
0x1a45   : > { %v6885_v21 = vmax.f32 %v6877_v19, 0.0  ;;  %v6891_v12 = vpack.c.bf16 %v6887_v59, %v6886_v53  ;;  %v12655_v8 = vpop.f32.mrf.mxu1 }
0x1a47   : > { %9270 = vmatprep.subr.bf16.mxu0 %v6891_v12  ;;  %v6890_v34 = vpack.c.bf16 %v6885_v21, %v6884_v56  ;;  %v12657_v47 = vpop.f32.mrf.mxu1 }
0x1a48   : > { %9271 = vmatpush3.bf16.msra.mxu0 %v6891_v12 }
0x1a49   : > { %9272 = vmatprep.subr.bf16.mxu0 %v6890_v34  ;;  %v12659_v28 = vpop.f32.mrf.mxu1 }
0x1a4b   : > { %v12661_v39 = vpop.f32.mrf.mxu1 }
0x1a4c   : > { %9273 = vmatpush3.bf16.msra.mxu0 %v6890_v34 }
0x1a4d   : > { %9274 = vmatprep.subr.bf16.mxu0 %v6889_v1  ;;  %v12663_v10 = vpop.f32.mrf.mxu1 }
0x1a4f   : > { %v12665_v62 = vpop.f32.mrf.mxu1 }
0x1a50   : > { %9275 = vmatpush3.bf16.msra.mxu0 %v6889_v1 }
0x1a51   : > { %9276 = vmatprep.subr.bf16.mxu0 %v6888_v9  ;;  %v12667_v20 = vpop.f32.mrf.mxu1 }
0x1a53   : > { %v12677_v49 = vpop.f32.mrf.mxu1 }
0x1a54   : > { %9277 = vmatpush3.bf16.msra.mxu0 %v6888_v9 }
0x1a55   : > { %9294 = vmatprep.subr.bf16.mxu0 %v9885_v32 }
0x1a57   : > { %9279 = vmatmul.mubr.msk.bf16.vlgmr.msra.gmra.mxu0 %vm2482_vm1, %v9886_v50 }
0x1a58   : > { %9282 = vmatprep.mubr.msk.bf16.mxu0 %vm2482_vm1, %v9887_v3  ;;  %9295 = vmatpush3.bf16.msra.mxu0 %v9885_v32 }
0x1a59   : > { %9296 = vmatprep.subr.bf16.mxu0 %v9888_v35 }
0x1a5c   : > { %9297 = vmatpush3.bf16.msra.mxu0 %v9888_v35 }
0x1a5d   : > { %9298 = vmatprep.subr.bf16.mxu0 %v9889_v58 }
0x1a5f   : > { %9283 = vmatmul.mubr.msk.bf16.gmra.mxu0 %vm2482_vm1, %v9890_v46 }
0x1a60   : > { %9286 = vmatprep.mubr.msk.bf16.mxu0 %vm2482_vm1, %v9891_v24  ;;  %9299 = vmatpush3.bf16.msra.mxu0 %v9889_v58 }
0x1a61   : > { %9300 = vmatprep.subr.bf16.mxu0 %v9892_v41 }
0x1a64   : > { %9301 = vmatpush3.bf16.msra.mxu0 %v9892_v41 }
0x1a67   : > { %9287 = vmatmul.mubr.msk.bf16.gmra.mxu0 %vm2482_vm1, %v9893_v27 }
0x1a68   : > { %9290 = vmatprep.mubr.msk.bf16.mxu0 %vm2482_vm1, %v9894_v30 }
0x1a6f   : > { %9291 = vmatmul.mubr.msk.bf16.gmra.mxu0 %vm2482_vm1, %v9895_v61 }
0x1b17   : > { %v9280_v22 = vpop.f32.mrf.mxu0 }
0x1b19   : > { %v6926_v11 = vpop.f32.mrf.mxu0 }
0x1b1b   : > { %v9281_v18 = vpop.f32.mrf.mxu0 }
0x1b1c   : > { %v6990_v57 = vpack.c.bf16 %v9281_v18, %v9280_v22 }
0x1b1d   : > { %v6929_v60 = vpop.f32.mrf.mxu0 }
0x1b1e   : > { %v6989_v43 = vpack.c.bf16 %v6929_v60, %v6926_v11 }
0x1b1f   : > { %v9284_v23 = vpop.f32.mrf.mxu0 }
0x1b20   : > { %9302 = vmatprep.mubr.msk.bf16.mxu0 %vm2482_vm1, %v6989_v43 }
0x1b21   : > { %v6942_v48 = vpop.f32.mrf.mxu0  ;;  %9303 = vmatmul.mubr.msk.bf16.vlgmr.msra.gmra.mxu0 %vm2482_vm1, %v6990_v57 }
0x1b23   : > { %v9285_v16 = vpop.f32.mrf.mxu0 }
0x1b24   : > { %v6992_v45 = vpack.c.bf16 %v9285_v16, %v9284_v23 }
0x1b25   : > { %v6945_v13 = vpop.f32.mrf.mxu0 }
0x1b26   : > { %v6991_v33 = vpack.c.bf16 %v6945_v13, %v6942_v48 }
0x1b27   : > { %v9288_v44 = vpop.f32.mrf.mxu0 }
0x1b28   : > { %9306 = vmatprep.mubr.msk.bf16.mxu0 %vm2482_vm1, %v6991_v33 }
0x1b29   : > { %v6958_v36 = vpop.f32.mrf.mxu0  ;;  %9307 = vmatmul.mubr.msk.bf16.gmra.mxu0 %vm2482_vm1, %v6992_v45 }
0x1b2b   : > { %v9289_v63 = vpop.f32.mrf.mxu0 }
0x1b2c   : > { %v6994_v52 = vpack.c.bf16 %v9289_v63, %v9288_v44 }
0x1b2d   : > { %v6961_v51 = vpop.f32.mrf.mxu0 }
0x1b2e   : > { %v6993_v4 = vpack.c.bf16 %v6961_v51, %v6958_v36 }
0x1b2f   : > { %v9292_v15 = vpop.f32.mrf.mxu0 }
0x1b30   : > { %9310 = vmatprep.mubr.msk.bf16.mxu0 %vm2482_vm1, %v6993_v4 }
0x1b31   : > { %v6974_v42 = vpop.f32.mrf.mxu0  ;;  %9311 = vmatmul.mubr.msk.bf16.gmra.mxu0 %vm2482_vm1, %v6994_v52 }
0x1b33   : > { %v9293_v29 = vpop.f32.mrf.mxu0 }
0x1b34   : > { %v6996_v54 = vpack.c.bf16 %v9293_v29, %v9292_v15 }
0x1b35   : > { %v6977_v14 = vpop.f32.mrf.mxu0 }
0x1b36   : > { %v6995_v2 = vpack.c.bf16 %v6977_v14, %v6974_v42 }
0x1b38   : > { %9314 = vmatprep.mubr.msk.bf16.mxu0 %vm2482_vm1, %v6995_v2 }
0x1b39   : > { %9315 = vmatmul.mubr.msk.bf16.gmra.mxu0 %vm2482_vm1, %v6996_v54 }
0x1b3a   : > { %9910 = shalt.err (!%p9907_p3)
}
0x1b3b   : > { %s9911_s4 = scalar_lea.hbm %s12675_s8, 16  ;;  %s9915_s9 = scalar_lea.hbm %s13462_s30, 32 }
0x1b3c   : > { %p9912_p4 = scmp.ne.s32.totalorder %s12675_s8, %s9911_s4  ;;  %p9916_p9 = scmp.lt.s32.totalorder %s12675_s8, %s13462_s30 }
0x1b3d   : > { %p9917_p10 = scmp.lt.s32.totalorder %s9915_s9, %s9911_s4 }
0x1b3e   : > { %p9913_p7 = pnand %p9912_p4, %p10384_p5 }
0x1b3f   : > { %p9918_p11 = por %p9917_p10, %p9916_p9 }
0x1b40   : > { %p9914_p8 = pneg %p9913_p7 }
0x1b42   : > { %p9919_p12 = pnand %p9918_p11, %p9914_p8 }
0x1b44   : > { %9922 = shalt.err (!%p9919_p12)
}
0x1b45   : > { %9319 = dma.vmem_to_hbm [thread:$0]  (%p10384_p5), %s7409_s11, 16, %s12675_s8, %s12685_s13   ;;  %v12706_v53 = vpop.f32.mrf.mxu1 }
0x1b46   : > { %s13465_s14 = scalar_lea.vmem [#allocation3], %s11421_s3  ;;  %s12704_s16 = scalar_lea.hbm %s10326_s27, %s12671_s5 }
0x1b47   : > { %s7395_s19 = sshll.u32 %s13465_s14, 4  ;;  %s13466_s2 = scalar_lea.vmem [#allocation7], %s11421_s3  ;;  %s7396_s19 = int_to_ptr.vmem [resolvable:$true] %s7395_s19 }
0x1b48   : > { %s7421_s0 = sshll.u32 %s13466_s2, 4  ;;  %s7360_s4 = scalar_lea.sflag [#allocation4], %s11421_s3  ;;  %s7422_s0 = int_to_ptr.vmem [resolvable:$true] %s7421_s0 }
0x1b49   : > { %s9923_s9 = scalar_lea.vmem %s7396_s19, 16  ;;  %s10071_s20 = smov [#allocation3]  }
0x1b4a   : > { %p9924_p13 = scmp.ne.s32.totalorder %s7396_s19, %s9923_s9  ;;  %s9927_s21 = sshll.u32 %s10071_s20, 4  ;;  %s9928_s21 = int_to_ptr.vmem [resolvable:$false] %s9927_s21 }
0x1b4b   : > { %s9929_s22 = scalar_lea.vmem %s9928_s21, 32  ;;  %p9930_p2 = scmp.lt.s32.totalorder %s7396_s19, %s9928_s21 }
0x1b4c   : > { %p9925_p0 = pnand %p9924_p13, %p10384_p5  ;;  %p9931_p3 = scmp.lt.s32.totalorder %s9929_s22, %s9923_s9 }
0x1b4e   : > { %p9926_p1 = pneg %p9925_p0  ;;  %p9932_p4 = por %p9931_p3, %p9930_p2 }
0x1b50   : > { %p9933_p7 = pnand %p9932_p4, %p9926_p1 }
0x1b52   : > { %9936 = shalt.err (!%p9933_p7)
}
0x1b53   : > { %s9937_s3 = scalar_lea.hbm %s12683_s12, 16  ;;  %s9941_s11 = scalar_lea.hbm %s13463_s6, 32 }
0x1b54   : > { %p9938_p8 = scmp.ne.s32.totalorder %s12683_s12, %s9937_s3  ;;  %p9942_p11 = scmp.lt.s32.totalorder %s12683_s12, %s13463_s6 }
0x1b55   : > { %p9943_p12 = scmp.lt.s32.totalorder %s9941_s11, %s9937_s3 }
0x1b56   : > { %p9939_p9 = pnand %p9938_p8, %p10384_p5 }
0x1b57   : > { %p9944_p13 = por %p9943_p12, %p9942_p11 }
0x1b58   : > { %p9940_p10 = pneg %p9939_p9 }
0x1b5a   : > { %p9945_p0 = pnand %p9944_p13, %p9940_p10 }
0x1b5c   : > { %9948 = shalt.err (!%p9945_p0)
}
0x1b5d   : > { %9318 = dma.vmem_to_hbm [thread:$0]  (%p10384_p5), %s7396_s19, 16, %s12683_s12, %s7360_s4  }
0x1b5e   : > { %s9949_s21 = scalar_lea.vmem %s7422_s0, 16  ;;  %s10072_s20 = smov [#allocation7]  }
0x1b5f   : > { %p9950_p1 = scmp.ne.s32.totalorder %s7422_s0, %s9949_s21  ;;  %s9953_s8 = sshll.u32 %s10072_s20, 4  ;;  %s9954_s8 = int_to_ptr.vmem [resolvable:$false] %s9953_s8 }
0x1b60   : > { %s9955_s5 = scalar_lea.vmem %s9954_s8, 32  ;;  %p9956_p4 = scmp.lt.s32.totalorder %s7422_s0, %s9954_s8 }
0x1b61   : > { %p9951_p2 = pnand %p9950_p1, %p10384_p5  ;;  %p9957_p7 = scmp.lt.s32.totalorder %s9955_s5, %s9949_s21 }
0x1b63   : > { %p9952_p3 = pneg %p9951_p2  ;;  %p9958_p8 = por %p9957_p7, %p9956_p4 }
0x1b65   : > { %p9959_p9 = pnand %p9958_p8, %p9952_p3 }
0x1b67   : > { %9962 = shalt.err (!%p9959_p9)
}
0x1b68   : > { %s9963_s12 = scalar_lea.hbm %s12704_s16, 16  ;;  %s9967_s22 = scalar_lea.hbm %s10326_s27, 32 }
0x1b69   : > { %p9964_p10 = scmp.ne.s32.totalorder %s12704_s16, %s9963_s12  ;;  %p9968_p13 = scmp.lt.s32.totalorder %s12704_s16, %s10326_s27 }
0x1b6a   : > { %p9969_p0 = scmp.lt.s32.totalorder %s9967_s22, %s9963_s12 }
0x1b6b   : > { %p9965_p11 = pnand %p9964_p10, %p10384_p5 }
0x1b6c   : > { %p9970_p1 = por %p9969_p0, %p9968_p13 }
0x1b6d   : > { %p9966_p12 = pneg %p9965_p11 }
0x1b6f   : > { %p9971_p2 = pnand %p9970_p1, %p9966_p12 }
0x1b71   : > { %9974 = shalt.err (!%p9971_p2)
}
0x1b72   : > { %9320 = dma.vmem_to_hbm [thread:$0]  (%p10384_p5), %s7422_s0, 16, %s12704_s16, %s12685_s13   ;;  %v8614_v59 = vpop.f32.mrf.mxu1  ;;  %v8604_v1 = vadd.f32 %v12659_v28, %v12657_v47  ;;  %v8598_v32 = vadd.f32 %v12651_v31, %v12649_v5  ;;  %v8607_v35 = vadd.f32 %v12663_v10, %v12661_v39  ;;  %v8601_v27 = vadd.f32 %v12655_v8, %v12653_v25 }
0x1b73   : > { %v8610_v48 = vadd.f32 %v12667_v20, %v12665_v62  ;;  %v8613_v15 = vadd.f32 %v12706_v53, %v12677_v49  ;;  %s12788_s18 = scalar_lea.vmem %s10341_s1, %s10411_s26 }
0x1b74   : > { %v8615_v19 = vpop.f32.mrf.mxu1 }
0x1b75   : > { %v8616_v11 = vadd.f32 %v8615_v19, %v8614_v59 }
0x1b76   : > { %v8617_v17 = vpop.f32.mrf.mxu1 }
0x1b78   : > { %v8618_v37 = vpop.f32.mrf.mxu1 }
0x1b79   : > { %v8619_v44 = vadd.f32 %v8618_v37, %v8617_v17 }
0x1b7a   : > { %v8620_v56 = vpop.f32.mrf.mxu1 }
0x1b7c   : > { %v8621_v21 = vpop.f32.mrf.mxu1 }
0x1b7d   : > { %v8622_v28 = vadd.f32 %v8621_v21, %v8620_v56 }
0x1b7e   : > { %v12736_v12 = vpop.f32.mrf.mxu1 }
0x1b80   : > { %v12738_v0 = vpop.f32.mrf.mxu1 }
0x1b82   : > { %v8626_v6 = vpop.f32.mrf.mxu1 }
0x1b84   : > { %v8627_v34 = vpop.f32.mrf.mxu1 }
0x1b85   : > { %v8628_v54 = vadd.f32 %v8627_v34, %v8626_v6  ;;  %v8625_v6 = vadd.f32 %v12738_v0, %v12736_v12 }
0x1b86   : > { %v12740_v38 = vpop.f32.mrf.mxu1 }
0x1b88   : > { %v12742_v40 = vpop.f32.mrf.mxu1 }
0x1b89   : > { %v8631_v56 = vadd.f32 %v12742_v40, %v12740_v38 }
0x1b8a   : > { %v12744_v26 = vpop.f32.mrf.mxu1 }
0x1b8c   : > { %v12748_v55 = vpop.f32.mrf.mxu1 }
0x1b8e   : > { %v12754_v58 = vpop.f32.mrf.mxu1 }
0x1b90   : > { %v12760_v60 = vpop.f32.mrf.mxu1 }
0x1b92   : > { %v8638_v63 = vpop.f32.mrf.mxu1 }
0x1b94   : > { %v8639_v31 = vpop.f32.mrf.mxu1 }
0x1b96   : > { %v8641_v53 = vpop.f32.mrf.mxu1 }
0x1be1   : > { %v9304_v9 = vpop.f32.mrf.mxu0 }
0x1be2   : > { %v7177_v50 = vadd.f32 %v9304_v9, %v8604_v1 }
0x1be3   : > { %v7168_v3 = vpop.f32.mrf.mxu0 }
0x1be4   : > { %v7233_v46 = vadd.f32 %v12437_v7, %v7177_v50  ;;  %v7169_v24 = vadd.f32 %v8598_v32, %v7168_v3  ;;  %v8640_v50 = vadd.f32 %v8639_v31, %v8638_v63 }
0x1be5   : > { %v9305_v41 = vpop.f32.mrf.mxu0 }
0x1be6   : > { %v8055_v30 = vmul.f32 -1.442695, %v7233_v46  ;;  %v7231_v61 = vadd.f32 %v12437_v7, %v7169_v24  ;;  %v7180_v22 = vadd.f32 %v9305_v41, %v8607_v35  ;;  %v8642_v46 = vpop.f32.mrf.mxu1 }
0x1be7   : > { %v7171_v18 = vpop.f32.mrf.mxu0 }
0x1be8   : > { %9762 = vpow2.f32 %v8055_v30  ;;  %v8053_v43 = vmul.f32 -1.442695, %v7231_v61  ;;  %v7234_v57 = vadd.f32 %v12437_v7, %v7180_v22  ;;  %v7172_v23 = vadd.f32 %v8601_v27, %v7171_v18 }
0x1be9   : > { %v9308_v16 = vpop.f32.mrf.mxu0  ;;  %v8643_v18 = vadd.f32 %v8642_v46, %v8641_v53 }
0x1bea   : > { %9764 = vpow2.f32 %v8053_v43  ;;  %v8056_v13 = vmul.f32 -1.442695, %v7234_v57  ;;  %v7232_v33 = vadd.f32 %v12437_v7, %v7172_v23  ;;  %v7193_v45 = vadd.f32 %v9308_v16, %v8616_v11 }
0x1beb   : > { %v7184_v36 = vpop.f32.mrf.mxu0  ;;  %v8634_v11 = vadd.f32 %v12748_v55, %v12744_v26 }
0x1bec   : > { %9766 = vpow2.f32 %v8056_v13  ;;  %v8054_v51 = vmul.f32 -1.442695, %v7232_v33  ;;  %v7237_v4 = vadd.f32 %v12437_v7, %v7193_v45  ;;  %v7185_v52 = vadd.f32 %v8610_v48, %v7184_v36 }
0x1bed   : > { %v9309_v42 = vpop.f32.mrf.mxu0  ;;  %v8637_v33 = vadd.f32 %v12760_v60, %v12754_v58 }
0x1bee   : > { %9768 = vpow2.f32 %v8054_v51  ;;  %v8059_v29 = vmul.f32 -1.442695, %v7237_v4  ;;  %v7235_v14 = vadd.f32 %v12437_v7, %v7185_v52  ;;  %v7196_v2 = vadd.f32 %v9309_v42, %v8619_v44  ;;  %v9896_v51 = vld [vmem:[%s13344_s15] ss:$0 sm:$0xff] }
0x1bef   : > { %v7187_v5 = vpop.f32.mrf.mxu0 }
0x1bf0   : > { %9770 = vpow2.f32 %v8059_v29  ;;  %v8057_v25 = vmul.f32 -1.442695, %v7235_v14  ;;  %v7238_v8 = vadd.f32 %v12437_v7, %v7196_v2  ;;  %v7188_v47 = vadd.f32 %v8613_v15, %v7187_v5 }
0x1bf1   : > { %v9312_v39 = vpop.f32.mrf.mxu0 }
0x1bf2   : > { %9772 = vpow2.f32 %v8057_v25  ;;  %v8060_v10 = vmul.f32 -1.442695, %v7238_v8  ;;  %v7236_v62 = vadd.f32 %v12437_v7, %v7188_v47  ;;  %v7209_v20 = vadd.f32 %v9312_v39, %v8628_v54 }
0x1bf3   : > { %v7200_v49 = vpop.f32.mrf.mxu0 }
0x1bf4   : > { %9774 = vpow2.f32 %v8060_v10  ;;  %v8058_v59 = vmul.f32 -1.442695, %v7236_v62  ;;  %v7241_v19 = vadd.f32 %v12437_v7, %v7209_v20  ;;  %v7201_v17 = vadd.f32 %v8622_v28, %v7200_v49 }
0x1bf5   : > { %v9763_v37 = vpop.eup %9762  ;;  %v9313_v21 = vpop.f32.mrf.mxu0 }
0x1bf6   : > { %v7297_v34 = vadd.f32 1.0, %v9763_v37  ;;  %9776 = vpow2.f32 %v8058_v59  ;;  %v8063_v1 = vmul.f32 -1.442695, %v7241_v19  ;;  %v7239_v9 = vadd.f32 %v12437_v7, %v7201_v17 }
0x1bf7   : > { %v9765_v32 = vpop.eup %9764  ;;  %v7212_v3 = vadd.f32 %v9313_v21, %v8631_v56  ;;  %v7203_v35 = vpop.f32.mrf.mxu0 }
0x1bf8   : > { %9778 = vrcp.f32 %v7297_v34  ;;  %v7295_v24 = vadd.f32 1.0, %v9765_v32  ;;  %v8061_v41 = vmul.f32 -1.442695, %v7239_v9  ;;  %v7204_v27 = vadd.f32 %v8625_v6, %v7203_v35 }
0x1bf9   : > { %v9767_v30 = vpop.eup %9766  ;;  %9780 = vpow2.f32 %v8063_v1  ;;  %v7242_v12 = vadd.f32 %v12437_v7, %v7212_v3  ;;  %v9316_v0 = vpop.f32.mrf.mxu0 }
0x1bfa   : > { %9782 = vrcp.f32 %v7295_v24  ;;  %v7298_v38 = vadd.f32 1.0, %v9767_v30  ;;  %v7240_v40 = vadd.f32 %v12437_v7, %v7204_v27  ;;  %v7225_v61 = vadd.f32 %v9316_v0, %v8640_v50 }
0x1bfb   : > { %v9769_v22 = vpop.eup %9768  ;;  %9784 = vpow2.f32 %v8061_v41  ;;  %v8064_v43 = vmul.f32 -1.442695, %v7242_v12  ;;  %v7216_v57 = vpop.f32.mrf.mxu0 }
0x1bfc   : > { %9786 = vrcp.f32 %v7298_v38  ;;  %v7296_v23 = vadd.f32 1.0, %v9769_v22  ;;  %v8062_v48 = vmul.f32 -1.442695, %v7240_v40  ;;  %v7245_v16 = vadd.f32 %v12437_v7, %v7225_v61 }
0x1bfd   : > { %v9771_v13 = vpop.eup %9770  ;;  %9788 = vpow2.f32 %v8064_v43  ;;  %v7217_v45 = vadd.f32 %v8634_v11, %v7216_v57  ;;  %v9317_v44 = vpop.f32.mrf.mxu0 }
0x1bfe   : > { %9790 = vrcp.f32 %v7296_v23  ;;  %v7301_v36 = vadd.f32 1.0, %v9771_v13  ;;  %v8067_v26 = vmul.f32 -1.442695, %v7245_v16  ;;  %v7228_v55 = vadd.f32 %v9317_v44, %v8643_v18 }
0x1bff   : > { %v9773_v63 = vpop.eup %9772  ;;  %9792 = vpow2.f32 %v8062_v48  ;;  %v7243_v4 = vadd.f32 %v9896_v51, %v7217_v45  ;;  %v7219_v52 = vpop.f32.mrf.mxu0 }
0x1c00   : > { %9794 = vrcp.f32 %v7301_v36  ;;  %v7299_v7 = vadd.f32 1.0, %v9773_v63  ;;  %v7246_v15 = vadd.f32 %v9896_v51, %v7228_v55  ;;  %v7220_v42 = vadd.f32 %v8637_v33, %v7219_v52 }
0x1c01   : > { %v9775_v29 = vpop.eup %9774  ;;  %9796 = vpow2.f32 %v8067_v26  ;;  %v8065_v58 = vmul.f32 -1.442695, %v7243_v4 }
0x1c02   : > { %9798 = vrcp.f32 %v7299_v7  ;;  %v7302_v60 = vadd.f32 1.0, %v9775_v29  ;;  %v8068_v14 = vmul.f32 -1.442695, %v7246_v15  ;;  %v7244_v2 = vadd.f32 %v9896_v51, %v7220_v42 }
0x1c03   : > { %v9777_v54 = vpop.eup %9776  ;;  %9800 = vpow2.f32 %v8065_v58 }
0x1c04   : > { %9802 = vrcp.f32 %v7302_v60  ;;  %v7300_v5 = vadd.f32 1.0, %v9777_v54  ;;  %v8066_v31 = vmul.f32 -1.442695, %v7244_v2 }
0x1c05   : > { %v9779_v25 = vpop.eup %9778  ;;  %9804 = vpow2.f32 %v8068_v14 }
0x1c06   : > { %v9781_v8 = vpop.eup %9780  ;;  %7345 = vst [vmem:[%s12788_s18 + $0x10] sm:$0xff] %v9779_v25  ;;  %9806 = vrcp.f32 %v7300_v5 }
0x1c07   : > { %v9783_v47 = vpop.eup %9782  ;;  %v7305_v28 = vadd.f32 1.0, %v9781_v8  ;;  %9808 = vpow2.f32 %v8066_v31 }
0x1c08   : > { %v9785_v39 = vpop.eup %9784  ;;  %7343 = vst [vmem:[%s12788_s18] sm:$0xff] %v9783_v47 }
0x1c09   : > { %v9787_v10 = vpop.eup %9786  ;;  %9810 = vrcp.f32 %v7305_v28  ;;  %v7303_v62 = vadd.f32 1.0, %v9785_v39 }
0x1c0a   : > { %v9789_v20 = vpop.eup %9788  ;;  %7346 = vst [vmem:[%s12788_s18 + $0x18] sm:$0xff] %v9787_v10 }
0x1c0b   : > { %v9791_v49 = vpop.eup %9790  ;;  %9812 = vrcp.f32 %v7303_v62  ;;  %v7306_v53 = vadd.f32 1.0, %v9789_v20 }
0x1c0c   : > { %v9793_v59 = vpop.eup %9792  ;;  %7344 = vst [vmem:[%s12788_s18 + $0x8] sm:$0xff] %v9791_v49 }
0x1c0d   : > { %v9795_v19 = vpop.eup %9794  ;;  %9814 = vrcp.f32 %v7306_v53  ;;  %v7304_v17 = vadd.f32 1.0, %v9793_v59 }
0x1c0e   : > { %v9797_v37 = vpop.eup %9796  ;;  %7349 = vst [vmem:[%s12788_s18 + $0x30] sm:$0xff] %v9795_v19 }
0x1c0f   : > { %v9799_v6 = vpop.eup %9798  ;;  %9816 = vrcp.f32 %v7304_v17  ;;  %v7309_v56 = vadd.f32 1.0, %v9797_v37 }
0x1c10   : > { %v9801_v21 = vpop.eup %9800  ;;  %7347 = vst [vmem:[%s12788_s18 + $0x20] sm:$0xff] %v9799_v6 }
0x1c11   : > { %v9803_v34 = vpop.eup %9802  ;;  %9818 = vrcp.f32 %v7309_v56  ;;  %v7307_v1 = vadd.f32 1.0, %v9801_v21 }
0x1c12   : > { %v9805_v9 = vpop.eup %9804  ;;  %7350 = vst [vmem:[%s12788_s18 + $0x38] sm:$0xff] %v9803_v34 }
0x1c13   : > { %v9807_v32 = vpop.eup %9806  ;;  %9820 = vrcp.f32 %v7307_v1  ;;  %v7310_v50 = vadd.f32 1.0, %v9805_v9 }
0x1c14   : > { %v9809_v3 = vpop.eup %9808  ;;  %7348 = vst [vmem:[%s12788_s18 + $0x28] sm:$0xff] %v9807_v32 }
0x1c15   : > { %9822 = vrcp.f32 %v7310_v50  ;;  %v7308_v35 = vadd.f32 1.0, %v9809_v3 }
0x1c16   : > { %v9811_v46 = vpop.eup %9810 }
0x1c17   : > { %7353 = vst [vmem:[%s12788_s18 + $0x50] sm:$0xff] %v9811_v46  ;;  %9824 = vrcp.f32 %v7308_v35 }
0x1c18   : > { %v9813_v24 = vpop.eup %9812 }
0x1c19   : > { %7351 = vst [vmem:[%s12788_s18 + $0x40] sm:$0xff] %v9813_v24 }
0x1c1a   : > { %v9815_v41 = vpop.eup %9814 }
0x1c1b   : > { %7354 = vst [vmem:[%s12788_s18 + $0x58] sm:$0xff] %v9815_v41 }
0x1c1c   : > { %v9817_v27 = vpop.eup %9816 }
0x1c1d   : > { %7352 = vst [vmem:[%s12788_s18 + $0x48] sm:$0xff] %v9817_v27 }
0x1c1e   : > { %v9819_v30 = vpop.eup %9818 }
0x1c1f   : > { %7357 = vst [vmem:[%s12788_s18 + $0x70] sm:$0xff] %v9819_v30 }
0x1c20   : > { %v9821_v12 = vpop.eup %9820 }
0x1c21   : > { %7355 = vst [vmem:[%s12788_s18 + $0x60] sm:$0xff] %v9821_v12 }
0x1c22   : > { %v9823_v0 = vpop.eup %9822 }
0x1c23   : > { %7358 = vst [vmem:[%s12788_s18 + $0x78] sm:$0xff] %v9823_v0 }
0x1c24   : > { %v9825_v38 = vpop.eup %9824 }
0x1c25   : > { %7356 = vst [vmem:[%s12788_s18 + $0x68] sm:$0xff] %v9825_v38 }
0x1c26 PF: > { %p9334_p5 = scmp.ge.s32.totalorder %s10013_s25, 2  ;;  %s7442_s26 = sand.u32 1, %s10001_s10  }
0x1c27   : > { %s7443_s13 = scalar_lea.sflag [#allocation4], %s7442_s26 }
0x1c28   : > { %p9325_p3 = pnand %p9334_p5, %p10388_p6 }
0x1c2a   : > { %p9326_p4 = pneg %p9325_p3 }
0x1c2c   : > { %9992 = dma.done.wait (%p9326_p4), %s7443_s13, 16  }
0x1c2d   : > { %9994 = vsyncadd (%p9326_p4), %s7443_s13, 4294967280  ;;  %s13467_s14 = sadd.s32 4294967294, %s10013_s25  }
0x1c2e   : > { %s7450_s19 = sand.u32 1, %s13467_s14  }
0x1c2f   : > { %s7451_s16 = scalar_lea.sflag [#allocation6], %s7450_s19 }
0x1c30   : > { %9996 = dma.done.wait (%p9326_p4), %s7451_s16, 32  }
0x1c31   : > { %9998 = vsyncadd (%p9326_p4), %s7451_s16, 4294967264  ;;  %s13468_s2 = sld [smem:[#allocation59_spill]]  ;;  %p120_p7 = scmp.ge.s32.totalorder %s10369_s7, 4  }
0x1c32   : > { %s13469_s0 = sld [smem:[#allocation60_spill]]  ;;  %s13470_s10 = smov %s10005_s28 }
0x1c33   : > { %s13473_s25 = smov %s10369_s7 }
0x1c34   :  { %122 = sbr.rel (!%p120_p7) target bundleno = 118 (0x76), region = 375 }
0x1c37   : > { %s13471_s28 = smov %s13468_s2 }
0x1c38   : > { %s13472_s2 = smov %s13469_s0 }
0x1c39   :  { %7487 = vsyncpa [#allocation4], 1 }
0x1c3a   :  { %7489 = vsyncpa [#allocation4 + $0x1], 1 }
0x1c3b   :  { %7490 = vsyncpa [#allocation6], 1 }
0x1c3c   :  { %7492 = vsyncpa [#allocation6 + $0x1], 1 }

</bundles_post_ra>
